<compile_context>
chip_gen: v7x
topology: tpu7x:2x2x1
jax: 0.10.0
libtpu: 0.0.40
codegen_flags: <defaults>
</compile_context>

<pallas_src>
import functools

import numpy as np
import jax
import jax.numpy as jnp
from jax import lax
from jax.experimental import pallas as pl
from jax.experimental.pallas import tpu as pltpu

F32 = jnp.float32
BF16 = jnp.bfloat16
_VMEM_LIMIT = 32 * 1024 * 1024   # fits the default scoped VMEM on v5e/v6e/v7x


# ---------------------------------------------------------------------------
# Pallas kernels
# ---------------------------------------------------------------------------

def _dmdc_branch_kernel(xs_ref, xf_ref,
                        w1_ref, b1_ref, w2_ref, b2_ref, w3_ref, b3_ref,
                        p_ref, wp1_ref, bp1_ref, wp2_ref, bp2_ref,
                        y_ref, s_ref, *, d, Wc, R):
    """Fused DMDC branch for one batch element (grid=(B,), "parallel").

    Computes, without leaving VMEM:
      y = conv1x1(conv1x1(conv3x3(x, stride=2, dilation=d, padding=d)))   # DMDConv
      s = conv_dxd(conv1x1(adaptive_avg_pool(x, (d, d))))                 # DMDCPool
    The dilated/strided 3x3 conv is evaluated as 9 accumulated MXU dots over
    a stride-phase split of the zero-padded input (no 9x im2col in HBM).
    `xs_ref[phase]` holds the flattened phase plane x_pad[2i+p, 2j+q] with row
    pitch Wc; the tap for (ki,kj) is a contiguous row window at a static offset.
    Rows r with (r % Wc) >= Wo are padding rows; they carry through every
    per-row op and are sliced away after the final kernel (their fraction
    vanishes for realistic image sizes).  MXU operands bf16, accumulators f32.
    """
    oc1 = w1_ref.shape[2]

    # ---- DMDConv chain: 9 accumulated taps, then two chained 1x1 convs ----
    acc = jnp.zeros((R, oc1), F32)
    for ki in range(3):
        for kj in range(3):
            oh, ow = ki * d, kj * d
            phase = (oh % 2) * 2 + (ow % 2)
            shift = (oh // 2) * Wc + (ow // 2)
            tap = xs_ref[phase, shift:shift + R, :]              # (R, Cin) bf16
            acc = acc + jnp.dot(tap, w1_ref[ki * 3 + kj],
                                preferred_element_type=F32)
    y = acc + b1_ref[...]
    y = jnp.dot(y.astype(BF16), w2_ref[...],
                preferred_element_type=F32) + b2_ref[...]
    y = jnp.dot(y.astype(BF16), w3_ref[...],
                preferred_element_type=F32) + b3_ref[...]
    y_ref[0] = y

    # ---- DMDCPool chain: pool-as-matmul -> 1x1 -> dxd spatial collapse ----
    pooled = jnp.dot(p_ref[...], xf_ref[0], preferred_element_type=F32)   # (d*d, Cin)
    q = jnp.dot(pooled.astype(BF16), wp1_ref[...],
                preferred_element_type=F32) + bp1_ref[...]                # (d*d, mid)
    s = bp2_ref[...]                                                      # (1, mid)
    for t in range(d * d):
        s = s + jnp.dot(q[t:t + 1].astype(BF16), wp2_ref[t],
                        preferred_element_type=F32)
    s_ref[0] = s


def _fuse_up_kernel(y1_ref, s1_ref, y2_ref, s2_ref, y3_ref, s3_ref,
                    wo1_ref, bo1_ref, wo2_ref, bo2_ref, wo3_ref, bo3_ref,
                    wu1_ref, wu2_ref, wu3_ref, bu_ref, o_ref):
    """x1*x2 scale + per-branch Out_conv + upChannel 1x1 + folded BN + ReLU.

    The concat([o1,o2,o3]) @ W_up matmul is replaced by three K-sliced dots
    accumulated into one f32 tile; BatchNorm is already folded into wu*/bu.
    All element-wise math is f32 (v5e guidance); dots are tiny (K=mid / out_c).
    """
    acc = jnp.zeros(o_ref.shape[1:], F32) + bu_ref[...]
    branches = ((y1_ref, s1_ref, wo1_ref, bo1_ref, wu1_ref),
                (y2_ref, s2_ref, wo2_ref, bo2_ref, wu2_ref),
                (y3_ref, s3_ref, wo3_ref, bo3_ref, wu3_ref))
    for y_ref, s_ref, wo_ref, bo_ref, wu_ref in branches:
        xs = y_ref[0] * s_ref[0]                                  # (TM, mid) f32
        o = jnp.dot(xs, wo_ref[...], preferred_element_type=F32) + bo_ref[...]
        acc = acc + jnp.dot(o, wu_ref[...], preferred_element_type=F32)
    o_ref[0] = jnp.maximum(acc, 0.0)


# ---------------------------------------------------------------------------
# Layout glue + parameter prep (plain JAX / numpy, outside the hot kernels)
# ---------------------------------------------------------------------------

def _phase_split(x_nhwc, d, Hc, Wc):
    """Zero-pad by `d` (conv padding) and split into the 4 stride-2 phases.

    Returns (B*4, Hc*Wc, C); plane p*2+q holds x_pad[2i+p, 2j+q] flattened with
    row pitch Wc.  Total bytes == 1x the (padded) input — no 9x im2col.
    """
    B, H, W, C = x_nhwc.shape
    xp = jnp.pad(x_nhwc, ((0, 0),
                          (d, 2 * Hc - H - d),
                          (d, 2 * Wc - W - d),
                          (0, 0)))
    xs = xp.reshape(B, Hc, 2, Wc, 2, C).transpose(0, 2, 4, 1, 3, 5)
    return xs.reshape(B * 4, Hc * Wc, C)


def _adaptive_pool_matrix(H, W, oh, ow):
    """P such that pooled = P @ x_flat reproduces PyTorch AdaptiveAvgPool2d bins."""
    P = np.zeros((oh * ow, H * W), dtype=np.float32)
    for i in range(oh):
        hs = (i * H) // oh
        he = -(-((i + 1) * H) // oh)
        for j in range(ow):
            ws = (j * W) // ow
            we = -(-((j + 1) * W) // ow)
            cnt = float((he - hs) * (we - ws))
            for h in range(hs, he):
                for w_ in range(ws, we):
                    P[i * ow + j, h * W + w_] = 1.0 / cnt
    return P


def _prep_branch(p, d, H, W):
    """Reshape one DMDC branch's weights for the fused kernel (one-time, static)."""
    cin = p["c1_w"].shape[0]
    mid = p["c2_w"].shape[0]
    outc = p["out_w"].shape[0]
    return dict(
        w1=jnp.transpose(p["c1_w"], (2, 3, 1, 0)).reshape(9, cin, cin).astype(BF16),
        b1=p["c1_b"].reshape(1, cin).astype(F32),
        w2=p["c2_w"][:, :, 0, 0].T.astype(BF16),
        b2=p["c2_b"].reshape(1, mid).astype(F32),
        w3=p["c3_w"][:, :, 0, 0].T.astype(BF16),
        b3=p["c3_b"].reshape(1, mid).astype(F32),
        P=jnp.asarray(_adaptive_pool_matrix(H, W, d, d)).astype(BF16),
        wp1=p["p1_w"][:, :, 0, 0].T.astype(BF16),
        bp1=p["p1_b"].reshape(1, mid).astype(F32),
        wp2=jnp.transpose(p["p2_w"], (2, 3, 1, 0)).reshape(d * d, mid, mid).astype(BF16),
        bp2=p["p2_b"].reshape(1, mid).astype(F32),
        wo=p["out_w"][:, :, 0, 0].T.astype(F32),
        bo=p["out_b"].reshape(1, outc).astype(F32),
    )


# ---------------------------------------------------------------------------
# pallas_call drivers
# ---------------------------------------------------------------------------

def _run_dmdc_branch(xs, xf, bp, d, Wc, R):
    B = xf.shape[0]
    L, C = xs.shape[1], xs.shape[2]
    HW = xf.shape[1]
    mid = bp["w2"].shape[1]
    kernel = functools.partial(_dmdc_branch_kernel, d=d, Wc=Wc, R=R)
    return pl.pallas_call(
        kernel,
        out_shape=(jax.ShapeDtypeStruct((B, R, mid), F32),
                   jax.ShapeDtypeStruct((B, 1, mid), F32)),
        grid=(B,),
        in_specs=[
            pl.BlockSpec((4, L, C), lambda b: (b, 0, 0)),
            pl.BlockSpec((1, HW, C), lambda b: (b, 0, 0)),
            pl.BlockSpec(bp["w1"].shape, lambda b: (0, 0, 0)),
            pl.BlockSpec(bp["b1"].shape, lambda b: (0, 0)),
            pl.BlockSpec(bp["w2"].shape, lambda b: (0, 0)),
            pl.BlockSpec(bp["b2"].shape, lambda b: (0, 0)),
            pl.BlockSpec(bp["w3"].shape, lambda b: (0, 0)),
            pl.BlockSpec(bp["b3"].shape, lambda b: (0, 0)),
            pl.BlockSpec(bp["P"].shape, lambda b: (0, 0)),
            pl.BlockSpec(bp["wp1"].shape, lambda b: (0, 0)),
            pl.BlockSpec(bp["bp1"].shape, lambda b: (0, 0)),
            pl.BlockSpec(bp["wp2"].shape, lambda b: (0, 0, 0)),
            pl.BlockSpec(bp["bp2"].shape, lambda b: (0, 0)),
        ],
        out_specs=(pl.BlockSpec((1, R, mid), lambda b: (b, 0, 0)),
                   pl.BlockSpec((1, 1, mid), lambda b: (b, 0, 0))),
        compiler_params=pltpu.CompilerParams(
            dimension_semantics=("parallel",),
            vmem_limit_bytes=_VMEM_LIMIT),
    )(xs, xf, bp["w1"], bp["b1"], bp["w2"], bp["b2"], bp["w3"], bp["b3"],
      bp["P"], bp["wp1"], bp["bp1"], bp["wp2"], bp["bp2"])


def _run_fuse_up(ys, ss, wos, bos, wus, bu, out_c):
    B, R, mid = ys[0].shape
    # M-tile: one full block at this test size; row-tiled (multiple of 8) for
    # large images so the auto pipeline keeps the per-step VMEM footprint bounded.
    TM = R if R <= 1024 else 512
    num_m = -(-R // TM)
    y_spec = pl.BlockSpec((1, TM, mid), lambda b, m: (b, m, 0))
    s_spec = pl.BlockSpec((1, 1, mid), lambda b, m: (b, 0, 0))
    wo_spec = pl.BlockSpec((mid, out_c), lambda b, m: (0, 0))
    v_spec = pl.BlockSpec((1, out_c), lambda b, m: (0, 0))
    wu_spec = pl.BlockSpec((out_c, out_c), lambda b, m: (0, 0))
    # NOTE: output last dim is out_c (module semantics); it is not padded to a
    # lane-dense 128 multiple to keep the exact PyTorch output shape.
    return pl.pallas_call(
        _fuse_up_kernel,
        out_shape=jax.ShapeDtypeStruct((B, R, out_c), F32),
        grid=(B, num_m),
        in_specs=[y_spec, s_spec, y_spec, s_spec, y_spec, s_spec,
                  wo_spec, v_spec, wo_spec, v_spec, wo_spec, v_spec,
                  wu_spec, wu_spec, wu_spec, v_spec],
        out_specs=pl.BlockSpec((1, TM, out_c), lambda b, m: (b, m, 0)),
        compiler_params=pltpu.CompilerParams(
            dimension_semantics=("parallel", "parallel"),
            vmem_limit_bytes=_VMEM_LIMIT),
    )(ys[0], ss[0], ys[1], ss[1], ys[2], ss[2],
      wos[0], bos[0], wos[1], bos[1], wos[2], bos[2],
      wus[0], wus[1], wus[2], bu)


# ---------------------------------------------------------------------------
# DMDConv forward (NCHW in / NCHW out)
# ---------------------------------------------------------------------------

def dmdconv_forward(x_nchw, params):
    x = jnp.transpose(x_nchw, (0, 2, 3, 1)).astype(F32)          # NCHW -> NHWC
    B, H, W, C = x.shape
    out_c = params["up_w"].shape[0]

    dilations = (1, 3, 5)
    names = ("dmdc1", "dmdc2", "dmdc3")
    dmax = max(dilations)
    Ho = (H - 1) // 2 + 1
    Wo = (W - 1) // 2 + 1
    Hc, Wc = Ho + dmax + 1, Wo + dmax    # common phase-plane geometry for all branches
    R = Ho * Wc                          # rows carried per branch (cols >= Wo are padding)

    preps = [_prep_branch(params[n], d, H, W) for n, d in zip(names, dilations)]

    # Fold BatchNorm into the upChannel 1x1 weights/bias (one-time, static).
    eps = 1e-5
    scale = params["bn_gamma"] / jnp.sqrt(params["bn_var"] + eps)
    shift = params["bn_beta"] - params["bn_mean"] * scale
    wup = params["up_w"][:, :, 0, 0].T * scale[None, :]          # (3*out_c, out_c)
    bup = (params["up_b"] * scale + shift).reshape(1, out_c).astype(F32)
    wu_slices = [wup[i * out_c:(i + 1) * out_c].astype(F32) for i in range(3)]

    xf = x.reshape(B, H * W, C).astype(BF16)

    ys, ss = [], []
    for prep, d in zip(preps, dilations):
        xs = _phase_split(x, d, Hc, Wc).astype(BF16)
        y, s = _run_dmdc_branch(xs, xf, prep, d, Wc, R)
        ys.append(y)
        ss.append(s)

    out = _run_fuse_up(ys, ss,
                       [p["wo"] for p in preps], [p["bo"] for p in preps],
                       wu_slices, bup, out_c)
    out = out.reshape(B, Ho, Wc, out_c)[:, :, :Wo, :]            # drop padding cols
    return jnp.transpose(out, (0, 3, 1, 2))                      # back to NCHW


# ---------------------------------------------------------------------------
# Deterministic parameter init (matches PyTorch module shapes)
# ---------------------------------------------------------------------------

def init_dmdc_params(key, in_c, out_c, dilation):
    mid = in_c // 2
    ks = jax.random.split(key, 12)
    r = lambda k, s: 0.1 * jax.random.normal(k, s, F32)
    return dict(
        c1_w=r(ks[0], (in_c, in_c, 3, 3)),         c1_b=r(ks[1], (in_c,)),
        c2_w=r(ks[2], (mid, in_c, 1, 1)),          c2_b=r(ks[3], (mid,)),
        c3_w=r(ks[4], (mid, mid, 1, 1)),           c3_b=r(ks[5], (mid,)),
        p1_w=r(ks[6], (mid, in_c, 1, 1)),          p1_b=r(ks[7], (mid,)),
        p2_w=r(ks[8], (mid, mid, dilation, dilation)), p2_b=r(ks[9], (mid,)),
        out_w=r(ks[10], (out_c, mid, 1, 1)),       out_b=r(ks[11], (out_c,)),
    )


def init_params(key, in_c, out_c):
    k1, k2, k3, k4, k5, k6, k7, k8 = jax.random.split(key, 8)
    return dict(
        dmdc1=init_dmdc_params(k1, in_c, out_c, 1),
        dmdc2=init_dmdc_params(k2, in_c, out_c, 3),
        dmdc3=init_dmdc_params(k3, in_c, out_c, 5),
        up_w=0.1 * jax.random.normal(k4, (out_c, 3 * out_c, 1, 1), F32),
        up_b=0.1 * jax.random.normal(k5, (out_c,), F32),
        bn_gamma=1.0 + 0.1 * jax.random.normal(k6, (out_c,), F32),
        bn_beta=0.1 * jax.random.normal(k7, (out_c,), F32),
        bn_mean=0.1 * jax.random.normal(k8, (out_c,), F32),
        bn_var=jnp.ones((out_c,), F32),
    )


# ---------------------------------------------------------------------------
# Pure-JAX reference (for correctness check)
# ---------------------------------------------------------------------------

def ref_conv(x, w, b, stride=1, padding=0, dilation=1):
    out = lax.conv_general_dilated(
        x, w, window_strides=(stride, stride),
        padding=[(padding, padding), (padding, padding)],
        rhs_dilation=(dilation, dilation),
        dimension_numbers=("NCHW", "OIHW", "NCHW"))
    return out + b.reshape(1, -1, 1, 1)


def ref_adaptive_avg_pool(x, oh, ow):
    B, C, H, W = x.shape
    rows = []
    for i in range(oh):
        hs = (i * H) // oh
        he = -(-((i + 1) * H) // oh)
        cols = []
        for j in range(ow):
            ws = (j * W) // ow
            we = -(-((j + 1) * W) // ow)
            cols.append(jnp.mean(x[:, :, hs:he, ws:we], axis=(2, 3)))
        rows.append(jnp.stack(cols, axis=-1))
    return jnp.stack(rows, axis=-2)


def ref_dmdc(x, p, d):
    y = ref_conv(x, p["c1_w"], p["c1_b"], stride=2, padding=d, dilation=d)
    y = ref_conv(y, p["c2_w"], p["c2_b"])
    y = ref_conv(y, p["c3_w"], p["c3_b"])
    z = ref_adaptive_avg_pool(x, d, d)
    z = ref_conv(z, p["p1_w"], p["p1_b"])
    z = ref_conv(z, p["p2_w"], p["p2_b"])
    return ref_conv(y * z, p["out_w"], p["out_b"])


def ref_forward(x, params):
    x1 = ref_dmdc(x, params["dmdc1"], 1)
    x2 = ref_dmdc(x, params["dmdc2"], 3)
    x3 = ref_dmdc(x, params["dmdc3"], 5)
    cat = jnp.concatenate([x1, x2, x3], axis=1)
    o = ref_conv(cat, params["up_w"], params["up_b"])
    eps = 1e-5
    inv_std = 1.0 / jnp.sqrt(params["bn_var"] + eps)
    scale = (params["bn_gamma"] * inv_std).reshape(1, -1, 1, 1)
    shift = (params["bn_beta"] - params["bn_mean"] * params["bn_gamma"] * inv_std).reshape(1, -1, 1, 1)
    return jnp.maximum(o * scale + shift, 0.0)


# ---------------------------------------------------------------------------

if __name__ == "__main__":
    key = jax.random.PRNGKey(0)
    kx, kp = jax.random.split(key)

    B, C_in, H, W = 2, 4, 16, 16
    C_out = 4
    x = jax.random.normal(kx, (B, C_in, H, W), F32)
    params = init_params(kp, C_in, C_out)

    fwd = jax.jit(dmdconv_forward)
    out = jax.block_until_ready(fwd(x, params))
    assert out.shape == (B, C_out, H // 2, W // 2), out.shape

    ref = jax.block_until_ready(ref_forward(x, params))
    if not np.allclose(np.asarray(out), np.asarray(ref), rtol=1e-2, atol=1e-2):
        err = float(np.max(np.abs(np.asarray(out) - np.asarray(ref))))
        raise AssertionError(
            f"Pallas DMDConv output mismatch vs JAX reference (max abs err {err})")

    print("KERNEL_OK")
</pallas_src>

<mosaic_0001>
module attributes {stable_mosaic.version = 11 : i64} {
  func.func @_dmdc_branch_kernel(%arg0: i32, %arg1: memref<4x182x4xbf16, #tpu.memory_space<vmem>>, %arg2: memref<1x256x4xbf16, #tpu.memory_space<vmem>>, %arg3: memref<9x4x4xbf16, #tpu.memory_space<vmem>>, %arg4: memref<1x4xf32, #tpu.memory_space<vmem>>, %arg5: memref<4x2xbf16, #tpu.memory_space<vmem>>, %arg6: memref<1x2xf32, #tpu.memory_space<vmem>>, %arg7: memref<2x2xbf16, #tpu.memory_space<vmem>>, %arg8: memref<1x2xf32, #tpu.memory_space<vmem>>, %arg9: memref<1x256xbf16, #tpu.memory_space<vmem>>, %arg10: memref<4x2xbf16, #tpu.memory_space<vmem>>, %arg11: memref<1x2xf32, #tpu.memory_space<vmem>>, %arg12: memref<1x2x2xbf16, #tpu.memory_space<vmem>>, %arg13: memref<1x2xf32, #tpu.memory_space<vmem>>, %arg14: memref<1x104x2xf32, #tpu.memory_space<vmem>>, %arg15: memref<1x1x2xf32, #tpu.memory_space<vmem>>) attributes {dimension_semantics = [#tpu.dimension_semantics<parallel>], iteration_bounds = array<i64: 2>, scalar_prefetch = 0 : i64, scratch_operands = 0 : i64, tpu.core_type = #tpu.core_type<tc>, window_params = [{transform_indices = @transform_0, window_bounds = array<i64: 4, 182, 4>}, {transform_indices = @transform_1, window_bounds = array<i64: 1, 256, 4>}, {pipeline_mode = #tpu.pipeline_mode<synchronous>, transform_indices = @transform_2, window_bounds = array<i64: 9, 4, 4>}, {pipeline_mode = #tpu.pipeline_mode<synchronous>, transform_indices = @transform_3, window_bounds = array<i64: 1, 4>}, {pipeline_mode = #tpu.pipeline_mode<synchronous>, transform_indices = @transform_4, window_bounds = array<i64: 4, 2>}, {pipeline_mode = #tpu.pipeline_mode<synchronous>, transform_indices = @transform_5, window_bounds = array<i64: 1, 2>}, {pipeline_mode = #tpu.pipeline_mode<synchronous>, transform_indices = @transform_6, window_bounds = array<i64: 2, 2>}, {pipeline_mode = #tpu.pipeline_mode<synchronous>, transform_indices = @transform_7, window_bounds = array<i64: 1, 2>}, {pipeline_mode = #tpu.pipeline_mode<synchronous>, transform_indices = @transform_8, window_bounds = array<i64: 1, 256>}, {pipeline_mode = #tpu.pipeline_mode<synchronous>, transform_indices = @transform_9, window_bounds = array<i64: 4, 2>}, {pipeline_mode = #tpu.pipeline_mode<synchronous>, transform_indices = @transform_10, window_bounds = array<i64: 1, 2>}, {pipeline_mode = #tpu.pipeline_mode<synchronous>, transform_indices = @transform_11, window_bounds = array<i64: 1, 2, 2>}, {pipeline_mode = #tpu.pipeline_mode<synchronous>, transform_indices = @transform_12, window_bounds = array<i64: 1, 2>}, {transform_indices = @transform_13, window_bounds = array<i64: 1, 104, 2>}, {transform_indices = @transform_14, window_bounds = array<i64: 1, 1, 2>}]} {
    %cst = arith.constant 0.000000e+00 : f32
    %0 = vector.broadcast %cst : f32 to vector<104x4xf32>
    %c0 = arith.constant 0 : index
    %c0_0 = arith.constant 0 : index
    %c0_1 = arith.constant 0 : index
    %1 = vector.load %arg1[%c0, %c0_0, %c0_1] : memref<4x182x4xbf16, #tpu.memory_space<vmem>>, vector<1x104x4xbf16>
    %2 = vector.shape_cast %1 : vector<1x104x4xbf16> to vector<104x4xbf16>
    %c0_2 = arith.constant 0 : index
    %c0_3 = arith.constant 0 : index
    %c0_4 = arith.constant 0 : index
    %3 = vector.load %arg3[%c0_2, %c0_3, %c0_4] : memref<9x4x4xbf16, #tpu.memory_space<vmem>>, vector<1x4x4xbf16>
    %4 = vector.shape_cast %3 : vector<1x4x4xbf16> to vector<4x4xbf16>
    %cst_5 = arith.constant dense<0.000000e+00> : vector<104x4xf32>
    %5 = tpu.matmul %2, %4, %cst_5 {dimension_numbers = #tpu.dot_dimension_numbers<[1], [0], [0], [1], [0, 0, 1, 1], [], []>} : vector<104x4xbf16>, vector<4x4xbf16>, vector<104x4xf32> -> vector<104x4xf32>
    %6 = arith.addf %0, %5 : vector<104x4xf32>
    %c1 = arith.constant 1 : index
    %c0_6 = arith.constant 0 : index
    %c0_7 = arith.constant 0 : index
    %7 = vector.load %arg1[%c1, %c0_6, %c0_7] : memref<4x182x4xbf16, #tpu.memory_space<vmem>>, vector<1x104x4xbf16>
    %8 = vector.shape_cast %7 : vector<1x104x4xbf16> to vector<104x4xbf16>
    %c1_8 = arith.constant 1 : index
    %c0_9 = arith.constant 0 : index
    %c0_10 = arith.constant 0 : index
    %9 = vector.load %arg3[%c1_8, %c0_9, %c0_10] : memref<9x4x4xbf16, #tpu.memory_space<vmem>>, vector<1x4x4xbf16>
    %10 = vector.shape_cast %9 : vector<1x4x4xbf16> to vector<4x4xbf16>
    %cst_11 = arith.constant dense<0.000000e+00> : vector<104x4xf32>
    %11 = tpu.matmul %8, %10, %cst_11 {dimension_numbers = #tpu.dot_dimension_numbers<[1], [0], [0], [1], [0, 0, 1, 1], [], []>} : vector<104x4xbf16>, vector<4x4xbf16>, vector<104x4xf32> -> vector<104x4xf32>
    %12 = arith.addf %6, %11 : vector<104x4xf32>
    %c0_12 = arith.constant 0 : index
    %c1_13 = arith.constant 1 : index
    %c0_14 = arith.constant 0 : index
    %13 = vector.load %arg1[%c0_12, %c1_13, %c0_14] : memref<4x182x4xbf16, #tpu.memory_space<vmem>>, vector<1x104x4xbf16>
    %14 = vector.shape_cast %13 : vector<1x104x4xbf16> to vector<104x4xbf16>
    %c2 = arith.constant 2 : index
    %c0_15 = arith.constant 0 : index
    %c0_16 = arith.constant 0 : index
    %15 = vector.load %arg3[%c2, %c0_15, %c0_16] : memref<9x4x4xbf16, #tpu.memory_space<vmem>>, vector<1x4x4xbf16>
    %16 = vector.shape_cast %15 : vector<1x4x4xbf16> to vector<4x4xbf16>
    %cst_17 = arith.constant dense<0.000000e+00> : vector<104x4xf32>
    %17 = tpu.matmul %14, %16, %cst_17 {dimension_numbers = #tpu.dot_dimension_numbers<[1], [0], [0], [1], [0, 0, 1, 1], [], []>} : vector<104x4xbf16>, vector<4x4xbf16>, vector<104x4xf32> -> vector<104x4xf32>
    %18 = arith.addf %12, %17 : vector<104x4xf32>
    %c2_18 = arith.constant 2 : index
    %c0_19 = arith.constant 0 : index
    %c0_20 = arith.constant 0 : index
    %19 = vector.load %arg1[%c2_18, %c0_19, %c0_20] : memref<4x182x4xbf16, #tpu.memory_space<vmem>>, vector<1x104x4xbf16>
    %20 = vector.shape_cast %19 : vector<1x104x4xbf16> to vector<104x4xbf16>
    %c3 = arith.constant 3 : index
    %c0_21 = arith.constant 0 : index
    %c0_22 = arith.constant 0 : index
    %21 = vector.load %arg3[%c3, %c0_21, %c0_22] : memref<9x4x4xbf16, #tpu.memory_space<vmem>>, vector<1x4x4xbf16>
    %22 = vector.shape_cast %21 : vector<1x4x4xbf16> to vector<4x4xbf16>
    %cst_23 = arith.constant dense<0.000000e+00> : vector<104x4xf32>
    %23 = tpu.matmul %20, %22, %cst_23 {dimension_numbers = #tpu.dot_dimension_numbers<[1], [0], [0], [1], [0, 0, 1, 1], [], []>} : vector<104x4xbf16>, vector<4x4xbf16>, vector<104x4xf32> -> vector<104x4xf32>
    %24 = arith.addf %18, %23 : vector<104x4xf32>
    %c3_24 = arith.constant 3 : index
    %c0_25 = arith.constant 0 : index
    %c0_26 = arith.constant 0 : index
    %25 = vector.load %arg1[%c3_24, %c0_25, %c0_26] : memref<4x182x4xbf16, #tpu.memory_space<vmem>>, vector<1x104x4xbf16>
    %26 = vector.shape_cast %25 : vector<1x104x4xbf16> to vector<104x4xbf16>
    %c4 = arith.constant 4 : index
    %c0_27 = arith.constant 0 : index
    %c0_28 = arith.constant 0 : index
    %27 = vector.load %arg3[%c4, %c0_27, %c0_28] : memref<9x4x4xbf16, #tpu.memory_space<vmem>>, vector<1x4x4xbf16>
    %28 = vector.shape_cast %27 : vector<1x4x4xbf16> to vector<4x4xbf16>
    %cst_29 = arith.constant dense<0.000000e+00> : vector<104x4xf32>
    %29 = tpu.matmul %26, %28, %cst_29 {dimension_numbers = #tpu.dot_dimension_numbers<[1], [0], [0], [1], [0, 0, 1, 1], [], []>} : vector<104x4xbf16>, vector<4x4xbf16>, vector<104x4xf32> -> vector<104x4xf32>
    %30 = arith.addf %24, %29 : vector<104x4xf32>
    %c2_30 = arith.constant 2 : index
    %c1_31 = arith.constant 1 : index
    %c0_32 = arith.constant 0 : index
    %31 = vector.load %arg1[%c2_30, %c1_31, %c0_32] : memref<4x182x4xbf16, #tpu.memory_space<vmem>>, vector<1x104x4xbf16>
    %32 = vector.shape_cast %31 : vector<1x104x4xbf16> to vector<104x4xbf16>
    %c5 = arith.constant 5 : index
    %c0_33 = arith.constant 0 : index
    %c0_34 = arith.constant 0 : index
    %33 = vector.load %arg3[%c5, %c0_33, %c0_34] : memref<9x4x4xbf16, #tpu.memory_space<vmem>>, vector<1x4x4xbf16>
    %34 = vector.shape_cast %33 : vector<1x4x4xbf16> to vector<4x4xbf16>
    %cst_35 = arith.constant dense<0.000000e+00> : vector<104x4xf32>
    %35 = tpu.matmul %32, %34, %cst_35 {dimension_numbers = #tpu.dot_dimension_numbers<[1], [0], [0], [1], [0, 0, 1, 1], [], []>} : vector<104x4xbf16>, vector<4x4xbf16>, vector<104x4xf32> -> vector<104x4xf32>
    %36 = arith.addf %30, %35 : vector<104x4xf32>
    %c0_36 = arith.constant 0 : index
    %c13 = arith.constant 13 : index
    %c0_37 = arith.constant 0 : index
    %37 = vector.load %arg1[%c0_36, %c13, %c0_37] : memref<4x182x4xbf16, #tpu.memory_space<vmem>>, vector<1x104x4xbf16>
    %38 = vector.shape_cast %37 : vector<1x104x4xbf16> to vector<104x4xbf16>
    %c6 = arith.constant 6 : index
    %c0_38 = arith.constant 0 : index
    %c0_39 = arith.constant 0 : index
    %39 = vector.load %arg3[%c6, %c0_38, %c0_39] : memref<9x4x4xbf16, #tpu.memory_space<vmem>>, vector<1x4x4xbf16>
    %40 = vector.shape_cast %39 : vector<1x4x4xbf16> to vector<4x4xbf16>
    %cst_40 = arith.constant dense<0.000000e+00> : vector<104x4xf32>
    %41 = tpu.matmul %38, %40, %cst_40 {dimension_numbers = #tpu.dot_dimension_numbers<[1], [0], [0], [1], [0, 0, 1, 1], [], []>} : vector<104x4xbf16>, vector<4x4xbf16>, vector<104x4xf32> -> vector<104x4xf32>
    %42 = arith.addf %36, %41 : vector<104x4xf32>
    %c1_41 = arith.constant 1 : index
    %c13_42 = arith.constant 13 : index
    %c0_43 = arith.constant 0 : index
    %43 = vector.load %arg1[%c1_41, %c13_42, %c0_43] : memref<4x182x4xbf16, #tpu.memory_space<vmem>>, vector<1x104x4xbf16>
    %44 = vector.shape_cast %43 : vector<1x104x4xbf16> to vector<104x4xbf16>
    %c7 = arith.constant 7 : index
    %c0_44 = arith.constant 0 : index
    %c0_45 = arith.constant 0 : index
    %45 = vector.load %arg3[%c7, %c0_44, %c0_45] : memref<9x4x4xbf16, #tpu.memory_space<vmem>>, vector<1x4x4xbf16>
    %46 = vector.shape_cast %45 : vector<1x4x4xbf16> to vector<4x4xbf16>
    %cst_46 = arith.constant dense<0.000000e+00> : vector<104x4xf32>
    %47 = tpu.matmul %44, %46, %cst_46 {dimension_numbers = #tpu.dot_dimension_numbers<[1], [0], [0], [1], [0, 0, 1, 1], [], []>} : vector<104x4xbf16>, vector<4x4xbf16>, vector<104x4xf32> -> vector<104x4xf32>
    %48 = arith.addf %42, %47 : vector<104x4xf32>
    %c0_47 = arith.constant 0 : index
    %c14 = arith.constant 14 : index
    %c0_48 = arith.constant 0 : index
    %49 = vector.load %arg1[%c0_47, %c14, %c0_48] : memref<4x182x4xbf16, #tpu.memory_space<vmem>>, vector<1x104x4xbf16>
    %50 = vector.shape_cast %49 : vector<1x104x4xbf16> to vector<104x4xbf16>
    %c8 = arith.constant 8 : index
    %c0_49 = arith.constant 0 : index
    %c0_50 = arith.constant 0 : index
    %51 = vector.load %arg3[%c8, %c0_49, %c0_50] : memref<9x4x4xbf16, #tpu.memory_space<vmem>>, vector<1x4x4xbf16>
    %52 = vector.shape_cast %51 : vector<1x4x4xbf16> to vector<4x4xbf16>
    %cst_51 = arith.constant dense<0.000000e+00> : vector<104x4xf32>
    %53 = tpu.matmul %50, %52, %cst_51 {dimension_numbers = #tpu.dot_dimension_numbers<[1], [0], [0], [1], [0, 0, 1, 1], [], []>} : vector<104x4xbf16>, vector<4x4xbf16>, vector<104x4xf32> -> vector<104x4xf32>
    %54 = arith.addf %48, %53 : vector<104x4xf32>
    %c0_52 = arith.constant 0 : index
    %c0_53 = arith.constant 0 : index
    %55 = vector.load %arg4[%c0_52, %c0_53] : memref<1x4xf32, #tpu.memory_space<vmem>>, vector<1x4xf32>
    %56 = vector.broadcast %55 : vector<1x4xf32> to vector<104x4xf32>
    %57 = arith.addf %54, %56 : vector<104x4xf32>
    %58 = arith.truncf %57 : vector<104x4xf32> to vector<104x4xbf16>
    %c0_54 = arith.constant 0 : index
    %c0_55 = arith.constant 0 : index
    %59 = vector.load %arg5[%c0_54, %c0_55] : memref<4x2xbf16, #tpu.memory_space<vmem>>, vector<4x2xbf16>
    %cst_56 = arith.constant dense<0.000000e+00> : vector<104x2xf32>
    %60 = tpu.matmul %58, %59, %cst_56 {dimension_numbers = #tpu.dot_dimension_numbers<[1], [0], [0], [1], [0, 0, 1, 1], [], []>} : vector<104x4xbf16>, vector<4x2xbf16>, vector<104x2xf32> -> vector<104x2xf32>
    %c0_57 = arith.constant 0 : index
    %c0_58 = arith.constant 0 : index
    %61 = vector.load %arg6[%c0_57, %c0_58] : memref<1x2xf32, #tpu.memory_space<vmem>>, vector<1x2xf32>
    %62 = vector.broadcast %61 : vector<1x2xf32> to vector<104x2xf32>
    %63 = arith.addf %60, %62 : vector<104x2xf32>
    %64 = arith.truncf %63 : vector<104x2xf32> to vector<104x2xbf16>
    %c0_59 = arith.constant 0 : index
    %c0_60 = arith.constant 0 : index
    %65 = vector.load %arg7[%c0_59, %c0_60] : memref<2x2xbf16, #tpu.memory_space<vmem>>, vector<2x2xbf16>
    %cst_61 = arith.constant dense<0.000000e+00> : vector<104x2xf32>
    %66 = tpu.matmul %64, %65, %cst_61 {dimension_numbers = #tpu.dot_dimension_numbers<[1], [0], [0], [1], [0, 0, 1, 1], [], []>} : vector<104x2xbf16>, vector<2x2xbf16>, vector<104x2xf32> -> vector<104x2xf32>
    %c0_62 = arith.constant 0 : index
    %c0_63 = arith.constant 0 : index
    %67 = vector.load %arg8[%c0_62, %c0_63] : memref<1x2xf32, #tpu.memory_space<vmem>>, vector<1x2xf32>
    %68 = vector.broadcast %67 : vector<1x2xf32> to vector<104x2xf32>
    %69 = arith.addf %66, %68 : vector<104x2xf32>
    %c0_64 = arith.constant 0 : index
    %c0_65 = arith.constant 0 : index
    %c0_66 = arith.constant 0 : index
    %70 = vector.load %arg14[%c0_64, %c0_65, %c0_66] : memref<1x104x2xf32, #tpu.memory_space<vmem>>, vector<1x104x2xf32>
    %71 = vector.shape_cast %70 : vector<1x104x2xf32> to vector<104x2xf32>
    %72 = vector.shape_cast %69 : vector<104x2xf32> to vector<1x104x2xf32>
    tpu.vector_store %arg14[%c0_64, %c0_65, %c0_66], %72 {strides = array<i32>} : memref<1x104x2xf32, #tpu.memory_space<vmem>>, vector<1x104x2xf32>,
    %c0_67 = arith.constant 0 : index
    %c0_68 = arith.constant 0 : index
    %73 = vector.load %arg9[%c0_67, %c0_68] : memref<1x256xbf16, #tpu.memory_space<vmem>>, vector<1x256xbf16>
    %c0_69 = arith.constant 0 : index
    %c0_70 = arith.constant 0 : index
    %c0_71 = arith.constant 0 : index
    %74 = vector.load %arg2[%c0_69, %c0_70, %c0_71] : memref<1x256x4xbf16, #tpu.memory_space<vmem>>, vector<1x256x4xbf16>
    %75 = vector.shape_cast %74 : vector<1x256x4xbf16> to vector<256x4xbf16>
    %cst_72 = arith.constant dense<0.000000e+00> : vector<1x4xf32>
    %76 = tpu.matmul %73, %75, %cst_72 {dimension_numbers = #tpu.dot_dimension_numbers<[1], [0], [0], [1], [0, 0, 1, 1], [], []>} : vector<1x256xbf16>, vector<256x4xbf16>, vector<1x4xf32> -> vector<1x4xf32>
    %77 = arith.truncf %76 : vector<1x4xf32> to vector<1x4xbf16>
    %c0_73 = arith.constant 0 : index
    %c0_74 = arith.constant 0 : index
    %78 = vector.load %arg10[%c0_73, %c0_74] : memref<4x2xbf16, #tpu.memory_space<vmem>>, vector<4x2xbf16>
    %cst_75 = arith.constant dense<0.000000e+00> : vector<1x2xf32>
    %79 = tpu.matmul %77, %78, %cst_75 {dimension_numbers = #tpu.dot_dimension_numbers<[1], [0], [0], [1], [0, 0, 1, 1], [], []>} : vector<1x4xbf16>, vector<4x2xbf16>, vector<1x2xf32> -> vector<1x2xf32>
    %c0_76 = arith.constant 0 : index
    %c0_77 = arith.constant 0 : index
    %80 = vector.load %arg11[%c0_76, %c0_77] : memref<1x2xf32, #tpu.memory_space<vmem>>, vector<1x2xf32>
    %81 = arith.addf %79, %80 : vector<1x2xf32>
    %c0_78 = arith.constant 0 : index
    %c0_79 = arith.constant 0 : index
    %82 = vector.load %arg13[%c0_78, %c0_79] : memref<1x2xf32, #tpu.memory_space<vmem>>, vector<1x2xf32>
    %83 = arith.truncf %81 : vector<1x2xf32> to vector<1x2xbf16>
    %c0_80 = arith.constant 0 : index
    %c0_81 = arith.constant 0 : index
    %c0_82 = arith.constant 0 : index
    %84 = vector.load %arg12[%c0_80, %c0_81, %c0_82] : memref<1x2x2xbf16, #tpu.memory_space<vmem>>, vector<1x2x2xbf16>
    %85 = vector.shape_cast %84 : vector<1x2x2xbf16> to vector<2x2xbf16>
    %cst_83 = arith.constant dense<0.000000e+00> : vector<1x2xf32>
    %86 = tpu.matmul %83, %85, %cst_83 {dimension_numbers = #tpu.dot_dimension_numbers<[1], [0], [0], [1], [0, 0, 1, 1], [], []>} : vector<1x2xbf16>, vector<2x2xbf16>, vector<1x2xf32> -> vector<1x2xf32>
    %87 = arith.addf %82, %86 : vector<1x2xf32>
    %c0_84 = arith.constant 0 : index
    %c0_85 = arith.constant 0 : index
    %c0_86 = arith.constant 0 : index
    %88 = vector.load %arg15[%c0_84, %c0_85, %c0_86] : memref<1x1x2xf32, #tpu.memory_space<vmem>>, vector<1x1x2xf32>
    %89 = vector.shape_cast %88 : vector<1x1x2xf32> to vector<1x2xf32>
    %90 = vector.shape_cast %87 : vector<1x2xf32> to vector<1x1x2xf32>
    tpu.vector_store %arg15[%c0_84, %c0_85, %c0_86], %90 {strides = array<i32>} : memref<1x1x2xf32, #tpu.memory_space<vmem>>, vector<1x1x2xf32>,
    return
  }
  func.func @transform_0(%arg0: i32) -> (i32, i32, i32) {
    %c0_i32 = arith.constant 0 : i32
    %c0_i32_0 = arith.constant 0 : i32
    %c0_i32_1 = arith.constant 0 : i32
    return %arg0, %c0_i32, %c0_i32_0 : i32, i32, i32
  }
  func.func @transform_1(%arg0: i32) -> (i32, i32, i32) {
    %c0_i32 = arith.constant 0 : i32
    %c0_i32_0 = arith.constant 0 : i32
    %c0_i32_1 = arith.constant 0 : i32
    return %arg0, %c0_i32, %c0_i32_0 : i32, i32, i32
  }
  func.func @transform_2(%arg0: i32) -> (i32, i32, i32) {
    %c0_i32 = arith.constant 0 : i32
    %c0_i32_0 = arith.constant 0 : i32
    %c0_i32_1 = arith.constant 0 : i32
    %c0_i32_2 = arith.constant 0 : i32
    return %c0_i32, %c0_i32_0, %c0_i32_1 : i32, i32, i32
  }
  func.func @transform_3(%arg0: i32) -> (i32, i32) {
    %c0_i32 = arith.constant 0 : i32
    %c0_i32_0 = arith.constant 0 : i32
    %c0_i32_1 = arith.constant 0 : i32
    return %c0_i32, %c0_i32_0 : i32, i32
  }
  func.func @transform_4(%arg0: i32) -> (i32, i32) {
    %c0_i32 = arith.constant 0 : i32
    %c0_i32_0 = arith.constant 0 : i32
    %c0_i32_1 = arith.constant 0 : i32
    return %c0_i32, %c0_i32_0 : i32, i32
  }
  func.func @transform_5(%arg0: i32) -> (i32, i32) {
    %c0_i32 = arith.constant 0 : i32
    %c0_i32_0 = arith.constant 0 : i32
    %c0_i32_1 = arith.constant 0 : i32
    return %c0_i32, %c0_i32_0 : i32, i32
  }
  func.func @transform_6(%arg0: i32) -> (i32, i32) {
    %c0_i32 = arith.constant 0 : i32
    %c0_i32_0 = arith.constant 0 : i32
    %c0_i32_1 = arith.constant 0 : i32
    return %c0_i32, %c0_i32_0 : i32, i32
  }
  func.func @transform_7(%arg0: i32) -> (i32, i32) {
    %c0_i32 = arith.constant 0 : i32
    %c0_i32_0 = arith.constant 0 : i32
    %c0_i32_1 = arith.constant 0 : i32
    return %c0_i32, %c0_i32_0 : i32, i32
  }
  func.func @transform_8(%arg0: i32) -> (i32, i32) {
    %c0_i32 = arith.constant 0 : i32
    %c0_i32_0 = arith.constant 0 : i32
    %c0_i32_1 = arith.constant 0 : i32
    return %c0_i32, %c0_i32_0 : i32, i32
  }
  func.func @transform_9(%arg0: i32) -> (i32, i32) {
    %c0_i32 = arith.constant 0 : i32
    %c0_i32_0 = arith.constant 0 : i32
    %c0_i32_1 = arith.constant 0 : i32
    return %c0_i32, %c0_i32_0 : i32, i32
  }
  func.func @transform_10(%arg0: i32) -> (i32, i32) {
    %c0_i32 = arith.constant 0 : i32
    %c0_i32_0 = arith.constant 0 : i32
    %c0_i32_1 = arith.constant 0 : i32
    return %c0_i32, %c0_i32_0 : i32, i32
  }
  func.func @transform_11(%arg0: i32) -> (i32, i32, i32) {
    %c0_i32 = arith.constant 0 : i32
    %c0_i32_0 = arith.constant 0 : i32
    %c0_i32_1 = arith.constant 0 : i32
    %c0_i32_2 = arith.constant 0 : i32
    return %c0_i32, %c0_i32_0, %c0_i32_1 : i32, i32, i32
  }
  func.func @transform_12(%arg0: i32) -> (i32, i32) {
    %c0_i32 = arith.constant 0 : i32
    %c0_i32_0 = arith.constant 0 : i32
    %c0_i32_1 = arith.constant 0 : i32
    return %c0_i32, %c0_i32_0 : i32, i32
  }
  func.func @transform_13(%arg0: i32) -> (i32, i32, i32) {
    %c0_i32 = arith.constant 0 : i32
    %c0_i32_0 = arith.constant 0 : i32
    %c0_i32_1 = arith.constant 0 : i32
    return %arg0, %c0_i32, %c0_i32_0 : i32, i32, i32
  }
  func.func @transform_14(%arg0: i32) -> (i32, i32, i32) {
    %c0_i32 = arith.constant 0 : i32
    %c0_i32_0 = arith.constant 0 : i32
    %c0_i32_1 = arith.constant 0 : i32
    return %arg0, %c0_i32, %c0_i32_0 : i32, i32, i32
  }
}

module attributes {stable_mosaic.version = 11 : i64} {
  func.func @_dmdc_branch_kernel(%arg0: i32, %arg1: memref<4x182x4xbf16, #tpu.memory_space<vmem>>, %arg2: memref<1x256x4xbf16, #tpu.memory_space<vmem>>, %arg3: memref<9x4x4xbf16, #tpu.memory_space<vmem>>, %arg4: memref<1x4xf32, #tpu.memory_space<vmem>>, %arg5: memref<4x2xbf16, #tpu.memory_space<vmem>>, %arg6: memref<1x2xf32, #tpu.memory_space<vmem>>, %arg7: memref<2x2xbf16, #tpu.memory_space<vmem>>, %arg8: memref<1x2xf32, #tpu.memory_space<vmem>>, %arg9: memref<9x256xbf16, #tpu.memory_space<vmem>>, %arg10: memref<4x2xbf16, #tpu.memory_space<vmem>>, %arg11: memref<1x2xf32, #tpu.memory_space<vmem>>, %arg12: memref<9x2x2xbf16, #tpu.memory_space<vmem>>, %arg13: memref<1x2xf32, #tpu.memory_space<vmem>>, %arg14: memref<1x104x2xf32, #tpu.memory_space<vmem>>, %arg15: memref<1x1x2xf32, #tpu.memory_space<vmem>>) attributes {dimension_semantics = [#tpu.dimension_semantics<parallel>], iteration_bounds = array<i64: 2>, scalar_prefetch = 0 : i64, scratch_operands = 0 : i64, tpu.core_type = #tpu.core_type<tc>, window_params = [{transform_indices = @transform_0, window_bounds = array<i64: 4, 182, 4>}, {transform_indices = @transform_1, window_bounds = array<i64: 1, 256, 4>}, {pipeline_mode = #tpu.pipeline_mode<synchronous>, transform_indices = @transform_2, window_bounds = array<i64: 9, 4, 4>}, {pipeline_mode = #tpu.pipeline_mode<synchronous>, transform_indices = @transform_3, window_bounds = array<i64: 1, 4>}, {pipeline_mode = #tpu.pipeline_mode<synchronous>, transform_indices = @transform_4, window_bounds = array<i64: 4, 2>}, {pipeline_mode = #tpu.pipeline_mode<synchronous>, transform_indices = @transform_5, window_bounds = array<i64: 1, 2>}, {pipeline_mode = #tpu.pipeline_mode<synchronous>, transform_indices = @transform_6, window_bounds = array<i64: 2, 2>}, {pipeline_mode = #tpu.pipeline_mode<synchronous>, transform_indices = @transform_7, window_bounds = array<i64: 1, 2>}, {pipeline_mode = #tpu.pipeline_mode<synchronous>, transform_indices = @transform_8, window_bounds = array<i64: 9, 256>}, {pipeline_mode = #tpu.pipeline_mode<synchronous>, transform_indices = @transform_9, window_bounds = array<i64: 4, 2>}, {pipeline_mode = #tpu.pipeline_mode<synchronous>, transform_indices = @transform_10, window_bounds = array<i64: 1, 2>}, {pipeline_mode = #tpu.pipeline_mode<synchronous>, transform_indices = @transform_11, window_bounds = array<i64: 9, 2, 2>}, {pipeline_mode = #tpu.pipeline_mode<synchronous>, transform_indices = @transform_12, window_bounds = array<i64: 1, 2>}, {transform_indices = @transform_13, window_bounds = array<i64: 1, 104, 2>}, {transform_indices = @transform_14, window_bounds = array<i64: 1, 1, 2>}]} {
    %cst = arith.constant 0.000000e+00 : f32
    %0 = vector.broadcast %cst : f32 to vector<104x4xf32>
    %c0 = arith.constant 0 : index
    %c0_0 = arith.constant 0 : index
    %c0_1 = arith.constant 0 : index
    %1 = vector.load %arg1[%c0, %c0_0, %c0_1] : memref<4x182x4xbf16, #tpu.memory_space<vmem>>, vector<1x104x4xbf16>
    %2 = vector.shape_cast %1 : vector<1x104x4xbf16> to vector<104x4xbf16>
    %c0_2 = arith.constant 0 : index
    %c0_3 = arith.constant 0 : index
    %c0_4 = arith.constant 0 : index
    %3 = vector.load %arg3[%c0_2, %c0_3, %c0_4] : memref<9x4x4xbf16, #tpu.memory_space<vmem>>, vector<1x4x4xbf16>
    %4 = vector.shape_cast %3 : vector<1x4x4xbf16> to vector<4x4xbf16>
    %cst_5 = arith.constant dense<0.000000e+00> : vector<104x4xf32>
    %5 = tpu.matmul %2, %4, %cst_5 {dimension_numbers = #tpu.dot_dimension_numbers<[1], [0], [0], [1], [0, 0, 1, 1], [], []>} : vector<104x4xbf16>, vector<4x4xbf16>, vector<104x4xf32> -> vector<104x4xf32>
    %6 = arith.addf %0, %5 : vector<104x4xf32>
    %c1 = arith.constant 1 : index
    %c1_6 = arith.constant 1 : index
    %c0_7 = arith.constant 0 : index
    %7 = vector.load %arg1[%c1, %c1_6, %c0_7] : memref<4x182x4xbf16, #tpu.memory_space<vmem>>, vector<1x104x4xbf16>
    %8 = vector.shape_cast %7 : vector<1x104x4xbf16> to vector<104x4xbf16>
    %c1_8 = arith.constant 1 : index
    %c0_9 = arith.constant 0 : index
    %c0_10 = arith.constant 0 : index
    %9 = vector.load %arg3[%c1_8, %c0_9, %c0_10] : memref<9x4x4xbf16, #tpu.memory_space<vmem>>, vector<1x4x4xbf16>
    %10 = vector.shape_cast %9 : vector<1x4x4xbf16> to vector<4x4xbf16>
    %cst_11 = arith.constant dense<0.000000e+00> : vector<104x4xf32>
    %11 = tpu.matmul %8, %10, %cst_11 {dimension_numbers = #tpu.dot_dimension_numbers<[1], [0], [0], [1], [0, 0, 1, 1], [], []>} : vector<104x4xbf16>, vector<4x4xbf16>, vector<104x4xf32> -> vector<104x4xf32>
    %12 = arith.addf %6, %11 : vector<104x4xf32>
    %c0_12 = arith.constant 0 : index
    %c3 = arith.constant 3 : index
    %c0_13 = arith.constant 0 : index
    %13 = vector.load %arg1[%c0_12, %c3, %c0_13] : memref<4x182x4xbf16, #tpu.memory_space<vmem>>, vector<1x104x4xbf16>
    %14 = vector.shape_cast %13 : vector<1x104x4xbf16> to vector<104x4xbf16>
    %c2 = arith.constant 2 : index
    %c0_14 = arith.constant 0 : index
    %c0_15 = arith.constant 0 : index
    %15 = vector.load %arg3[%c2, %c0_14, %c0_15] : memref<9x4x4xbf16, #tpu.memory_space<vmem>>, vector<1x4x4xbf16>
    %16 = vector.shape_cast %15 : vector<1x4x4xbf16> to vector<4x4xbf16>
    %cst_16 = arith.constant dense<0.000000e+00> : vector<104x4xf32>
    %17 = tpu.matmul %14, %16, %cst_16 {dimension_numbers = #tpu.dot_dimension_numbers<[1], [0], [0], [1], [0, 0, 1, 1], [], []>} : vector<104x4xbf16>, vector<4x4xbf16>, vector<104x4xf32> -> vector<104x4xf32>
    %18 = arith.addf %12, %17 : vector<104x4xf32>
    %c2_17 = arith.constant 2 : index
    %c13 = arith.constant 13 : index
    %c0_18 = arith.constant 0 : index
    %19 = vector.load %arg1[%c2_17, %c13, %c0_18] : memref<4x182x4xbf16, #tpu.memory_space<vmem>>, vector<1x104x4xbf16>
    %20 = vector.shape_cast %19 : vector<1x104x4xbf16> to vector<104x4xbf16>
    %c3_19 = arith.constant 3 : index
    %c0_20 = arith.constant 0 : index
    %c0_21 = arith.constant 0 : index
    %21 = vector.load %arg3[%c3_19, %c0_20, %c0_21] : memref<9x4x4xbf16, #tpu.memory_space<vmem>>, vector<1x4x4xbf16>
    %22 = vector.shape_cast %21 : vector<1x4x4xbf16> to vector<4x4xbf16>
    %cst_22 = arith.constant dense<0.000000e+00> : vector<104x4xf32>
    %23 = tpu.matmul %20, %22, %cst_22 {dimension_numbers = #tpu.dot_dimension_numbers<[1], [0], [0], [1], [0, 0, 1, 1], [], []>} : vector<104x4xbf16>, vector<4x4xbf16>, vector<104x4xf32> -> vector<104x4xf32>
    %24 = arith.addf %18, %23 : vector<104x4xf32>
    %c3_23 = arith.constant 3 : index
    %c14 = arith.constant 14 : index
    %c0_24 = arith.constant 0 : index
    %25 = vector.load %arg1[%c3_23, %c14, %c0_24] : memref<4x182x4xbf16, #tpu.memory_space<vmem>>, vector<1x104x4xbf16>
    %26 = vector.shape_cast %25 : vector<1x104x4xbf16> to vector<104x4xbf16>
    %c4 = arith.constant 4 : index
    %c0_25 = arith.constant 0 : index
    %c0_26 = arith.constant 0 : index
    %27 = vector.load %arg3[%c4, %c0_25, %c0_26] : memref<9x4x4xbf16, #tpu.memory_space<vmem>>, vector<1x4x4xbf16>
    %28 = vector.shape_cast %27 : vector<1x4x4xbf16> to vector<4x4xbf16>
    %cst_27 = arith.constant dense<0.000000e+00> : vector<104x4xf32>
    %29 = tpu.matmul %26, %28, %cst_27 {dimension_numbers = #tpu.dot_dimension_numbers<[1], [0], [0], [1], [0, 0, 1, 1], [], []>} : vector<104x4xbf16>, vector<4x4xbf16>, vector<104x4xf32> -> vector<104x4xf32>
    %30 = arith.addf %24, %29 : vector<104x4xf32>
    %c2_28 = arith.constant 2 : index
    %c16 = arith.constant 16 : index
    %c0_29 = arith.constant 0 : index
    %31 = vector.load %arg1[%c2_28, %c16, %c0_29] : memref<4x182x4xbf16, #tpu.memory_space<vmem>>, vector<1x104x4xbf16>
    %32 = vector.shape_cast %31 : vector<1x104x4xbf16> to vector<104x4xbf16>
    %c5 = arith.constant 5 : index
    %c0_30 = arith.constant 0 : index
    %c0_31 = arith.constant 0 : index
    %33 = vector.load %arg3[%c5, %c0_30, %c0_31] : memref<9x4x4xbf16, #tpu.memory_space<vmem>>, vector<1x4x4xbf16>
    %34 = vector.shape_cast %33 : vector<1x4x4xbf16> to vector<4x4xbf16>
    %cst_32 = arith.constant dense<0.000000e+00> : vector<104x4xf32>
    %35 = tpu.matmul %32, %34, %cst_32 {dimension_numbers = #tpu.dot_dimension_numbers<[1], [0], [0], [1], [0, 0, 1, 1], [], []>} : vector<104x4xbf16>, vector<4x4xbf16>, vector<104x4xf32> -> vector<104x4xf32>
    %36 = arith.addf %30, %35 : vector<104x4xf32>
    %c0_33 = arith.constant 0 : index
    %c39 = arith.constant 39 : index
    %c0_34 = arith.constant 0 : index
    %37 = vector.load %arg1[%c0_33, %c39, %c0_34] : memref<4x182x4xbf16, #tpu.memory_space<vmem>>, vector<1x104x4xbf16>
    %38 = vector.shape_cast %37 : vector<1x104x4xbf16> to vector<104x4xbf16>
    %c6 = arith.constant 6 : index
    %c0_35 = arith.constant 0 : index
    %c0_36 = arith.constant 0 : index
    %39 = vector.load %arg3[%c6, %c0_35, %c0_36] : memref<9x4x4xbf16, #tpu.memory_space<vmem>>, vector<1x4x4xbf16>
    %40 = vector.shape_cast %39 : vector<1x4x4xbf16> to vector<4x4xbf16>
    %cst_37 = arith.constant dense<0.000000e+00> : vector<104x4xf32>
    %41 = tpu.matmul %38, %40, %cst_37 {dimension_numbers = #tpu.dot_dimension_numbers<[1], [0], [0], [1], [0, 0, 1, 1], [], []>} : vector<104x4xbf16>, vector<4x4xbf16>, vector<104x4xf32> -> vector<104x4xf32>
    %42 = arith.addf %36, %41 : vector<104x4xf32>
    %c1_38 = arith.constant 1 : index
    %c40 = arith.constant 40 : index
    %c0_39 = arith.constant 0 : index
    %43 = vector.load %arg1[%c1_38, %c40, %c0_39] : memref<4x182x4xbf16, #tpu.memory_space<vmem>>, vector<1x104x4xbf16>
    %44 = vector.shape_cast %43 : vector<1x104x4xbf16> to vector<104x4xbf16>
    %c7 = arith.constant 7 : index
    %c0_40 = arith.constant 0 : index
    %c0_41 = arith.constant 0 : index
    %45 = vector.load %arg3[%c7, %c0_40, %c0_41] : memref<9x4x4xbf16, #tpu.memory_space<vmem>>, vector<1x4x4xbf16>
    %46 = vector.shape_cast %45 : vector<1x4x4xbf16> to vector<4x4xbf16>
    %cst_42 = arith.constant dense<0.000000e+00> : vector<104x4xf32>
    %47 = tpu.matmul %44, %46, %cst_42 {dimension_numbers = #tpu.dot_dimension_numbers<[1], [0], [0], [1], [0, 0, 1, 1], [], []>} : vector<104x4xbf16>, vector<4x4xbf16>, vector<104x4xf32> -> vector<104x4xf32>
    %48 = arith.addf %42, %47 : vector<104x4xf32>
    %c0_43 = arith.constant 0 : index
    %c42 = arith.constant 42 : index
    %c0_44 = arith.constant 0 : index
    %49 = vector.load %arg1[%c0_43, %c42, %c0_44] : memref<4x182x4xbf16, #tpu.memory_space<vmem>>, vector<1x104x4xbf16>
    %50 = vector.shape_cast %49 : vector<1x104x4xbf16> to vector<104x4xbf16>
    %c8 = arith.constant 8 : index
    %c0_45 = arith.constant 0 : index
    %c0_46 = arith.constant 0 : index
    %51 = vector.load %arg3[%c8, %c0_45, %c0_46] : memref<9x4x4xbf16, #tpu.memory_space<vmem>>, vector<1x4x4xbf16>
    %52 = vector.shape_cast %51 : vector<1x4x4xbf16> to vector<4x4xbf16>
    %cst_47 = arith.constant dense<0.000000e+00> : vector<104x4xf32>
    %53 = tpu.matmul %50, %52, %cst_47 {dimension_numbers = #tpu.dot_dimension_numbers<[1], [0], [0], [1], [0, 0, 1, 1], [], []>} : vector<104x4xbf16>, vector<4x4xbf16>, vector<104x4xf32> -> vector<104x4xf32>
    %54 = arith.addf %48, %53 : vector<104x4xf32>
    %c0_48 = arith.constant 0 : index
    %c0_49 = arith.constant 0 : index
    %55 = vector.load %arg4[%c0_48, %c0_49] : memref<1x4xf32, #tpu.memory_space<vmem>>, vector<1x4xf32>
    %56 = vector.broadcast %55 : vector<1x4xf32> to vector<104x4xf32>
    %57 = arith.addf %54, %56 : vector<104x4xf32>
    %58 = arith.truncf %57 : vector<104x4xf32> to vector<104x4xbf16>
    %c0_50 = arith.constant 0 : index
    %c0_51 = arith.constant 0 : index
    %59 = vector.load %arg5[%c0_50, %c0_51] : memref<4x2xbf16, #tpu.memory_space<vmem>>, vector<4x2xbf16>
    %cst_52 = arith.constant dense<0.000000e+00> : vector<104x2xf32>
    %60 = tpu.matmul %58, %59, %cst_52 {dimension_numbers = #tpu.dot_dimension_numbers<[1], [0], [0], [1], [0, 0, 1, 1], [], []>} : vector<104x4xbf16>, vector<4x2xbf16>, vector<104x2xf32> -> vector<104x2xf32>
    %c0_53 = arith.constant 0 : index
    %c0_54 = arith.constant 0 : index
    %61 = vector.load %arg6[%c0_53, %c0_54] : memref<1x2xf32, #tpu.memory_space<vmem>>, vector<1x2xf32>
    %62 = vector.broadcast %61 : vector<1x2xf32> to vector<104x2xf32>
    %63 = arith.addf %60, %62 : vector<104x2xf32>
    %64 = arith.truncf %63 : vector<104x2xf32> to vector<104x2xbf16>
    %c0_55 = arith.constant 0 : index
    %c0_56 = arith.constant 0 : index
    %65 = vector.load %arg7[%c0_55, %c0_56] : memref<2x2xbf16, #tpu.memory_space<vmem>>, vector<2x2xbf16>
    %cst_57 = arith.constant dense<0.000000e+00> : vector<104x2xf32>
    %66 = tpu.matmul %64, %65, %cst_57 {dimension_numbers = #tpu.dot_dimension_numbers<[1], [0], [0], [1], [0, 0, 1, 1], [], []>} : vector<104x2xbf16>, vector<2x2xbf16>, vector<104x2xf32> -> vector<104x2xf32>
    %c0_58 = arith.constant 0 : index
    %c0_59 = arith.constant 0 : index
    %67 = vector.load %arg8[%c0_58, %c0_59] : memref<1x2xf32, #tpu.memory_space<vmem>>, vector<1x2xf32>
    %68 = vector.broadcast %67 : vector<1x2xf32> to vector<104x2xf32>
    %69 = arith.addf %66, %68 : vector<104x2xf32>
    %c0_60 = arith.constant 0 : index
    %c0_61 = arith.constant 0 : index
    %c0_62 = arith.constant 0 : index
    %70 = vector.load %arg14[%c0_60, %c0_61, %c0_62] : memref<1x104x2xf32, #tpu.memory_space<vmem>>, vector<1x104x2xf32>
    %71 = vector.shape_cast %70 : vector<1x104x2xf32> to vector<104x2xf32>
    %72 = vector.shape_cast %69 : vector<104x2xf32> to vector<1x104x2xf32>
    tpu.vector_store %arg14[%c0_60, %c0_61, %c0_62], %72 {strides = array<i32>} : memref<1x104x2xf32, #tpu.memory_space<vmem>>, vector<1x104x2xf32>,
    %c0_63 = arith.constant 0 : index
    %c0_64 = arith.constant 0 : index
    %73 = vector.load %arg9[%c0_63, %c0_64] : memref<9x256xbf16, #tpu.memory_space<vmem>>, vector<9x256xbf16>
    %c0_65 = arith.constant 0 : index
    %c0_66 = arith.constant 0 : index
    %c0_67 = arith.constant 0 : index
    %74 = vector.load %arg2[%c0_65, %c0_66, %c0_67] : memref<1x256x4xbf16, #tpu.memory_space<vmem>>, vector<1x256x4xbf16>
    %75 = vector.shape_cast %74 : vector<1x256x4xbf16> to vector<256x4xbf16>
    %cst_68 = arith.constant dense<0.000000e+00> : vector<9x4xf32>
    %76 = tpu.matmul %73, %75, %cst_68 {dimension_numbers = #tpu.dot_dimension_numbers<[1], [0], [0], [1], [0, 0, 1, 1], [], []>} : vector<9x256xbf16>, vector<256x4xbf16>, vector<9x4xf32> -> vector<9x4xf32>
    %77 = arith.truncf %76 : vector<9x4xf32> to vector<9x4xbf16>
    %c0_69 = arith.constant 0 : index
    %c0_70 = arith.constant 0 : index
    %78 = vector.load %arg10[%c0_69, %c0_70] : memref<4x2xbf16, #tpu.memory_space<vmem>>, vector<4x2xbf16>
    %cst_71 = arith.constant dense<0.000000e+00> : vector<9x2xf32>
    %79 = tpu.matmul %77, %78, %cst_71 {dimension_numbers = #tpu.dot_dimension_numbers<[1], [0], [0], [1], [0, 0, 1, 1], [], []>} : vector<9x4xbf16>, vector<4x2xbf16>, vector<9x2xf32> -> vector<9x2xf32>
    %c0_72 = arith.constant 0 : index
    %c0_73 = arith.constant 0 : index
    %80 = vector.load %arg11[%c0_72, %c0_73] : memref<1x2xf32, #tpu.memory_space<vmem>>, vector<1x2xf32>
    %81 = vector.broadcast %80 : vector<1x2xf32> to vector<9x2xf32>
    %82 = arith.addf %79, %81 : vector<9x2xf32>
    %c0_74 = arith.constant 0 : index
    %c0_75 = arith.constant 0 : index
    %83 = vector.load %arg13[%c0_74, %c0_75] : memref<1x2xf32, #tpu.memory_space<vmem>>, vector<1x2xf32>
    %84 = vector.extract_strided_slice %82 {offsets = [0, 0], sizes = [1, 2], strides = [1, 1]} : vector<9x2xf32> to vector<1x2xf32>
    %85 = arith.truncf %84 : vector<1x2xf32> to vector<1x2xbf16>
    %c0_76 = arith.constant 0 : index
    %c0_77 = arith.constant 0 : index
    %c0_78 = arith.constant 0 : index
    %86 = vector.load %arg12[%c0_76, %c0_77, %c0_78] : memref<9x2x2xbf16, #tpu.memory_space<vmem>>, vector<1x2x2xbf16>
    %87 = vector.shape_cast %86 : vector<1x2x2xbf16> to vector<2x2xbf16>
    %cst_79 = arith.constant dense<0.000000e+00> : vector<1x2xf32>
    %88 = tpu.matmul %85, %87, %cst_79 {dimension_numbers = #tpu.dot_dimension_numbers<[1], [0], [0], [1], [0, 0, 1, 1], [], []>} : vector<1x2xbf16>, vector<2x2xbf16>, vector<1x2xf32> -> vector<1x2xf32>
    %89 = arith.addf %83, %88 : vector<1x2xf32>
    %90 = vector.extract_strided_slice %82 {offsets = [1, 0], sizes = [1, 2], strides = [1, 1]} : vector<9x2xf32> to vector<1x2xf32>
    %91 = arith.truncf %90 : vector<1x2xf32> to vector<1x2xbf16>
    %c1_80 = arith.constant 1 : index
    %c0_81 = arith.constant 0 : index
    %c0_82 = arith.constant 0 : index
    %92 = vector.load %arg12[%c1_80, %c0_81, %c0_82] : memref<9x2x2xbf16, #tpu.memory_space<vmem>>, vector<1x2x2xbf16>
    %93 = vector.shape_cast %92 : vector<1x2x2xbf16> to vector<2x2xbf16>
    %cst_83 = arith.constant dense<0.000000e+00> : vector<1x2xf32>
    %94 = tpu.matmul %91, %93, %cst_83 {dimension_numbers = #tpu.dot_dimension_numbers<[1], [0], [0], [1], [0, 0, 1, 1], [], []>} : vector<1x2xbf16>, vector<2x2xbf16>, vector<1x2xf32> -> vector<1x2xf32>
    %95 = arith.addf %89, %94 : vector<1x2xf32>
    %96 = vector.extract_strided_slice %82 {offsets = [2, 0], sizes = [1, 2], strides = [1, 1]} : vector<9x2xf32> to vector<1x2xf32>
    %97 = arith.truncf %96 : vector<1x2xf32> to vector<1x2xbf16>
    %c2_84 = arith.constant 2 : index
    %c0_85 = arith.constant 0 : index
    %c0_86 = arith.constant 0 : index
    %98 = vector.load %arg12[%c2_84, %c0_85, %c0_86] : memref<9x2x2xbf16, #tpu.memory_space<vmem>>, vector<1x2x2xbf16>
    %99 = vector.shape_cast %98 : vector<1x2x2xbf16> to vector<2x2xbf16>
    %cst_87 = arith.constant dense<0.000000e+00> : vector<1x2xf32>
    %100 = tpu.matmul %97, %99, %cst_87 {dimension_numbers = #tpu.dot_dimension_numbers<[1], [0], [0], [1], [0, 0, 1, 1], [], []>} : vector<1x2xbf16>, vector<2x2xbf16>, vector<1x2xf32> -> vector<1x2xf32>
    %101 = arith.addf %95, %100 : vector<1x2xf32>
    %102 = vector.extract_strided_slice %82 {offsets = [3, 0], sizes = [1, 2], strides = [1, 1]} : vector<9x2xf32> to vector<1x2xf32>
    %103 = arith.truncf %102 : vector<1x2xf32> to vector<1x2xbf16>
    %c3_88 = arith.constant 3 : index
    %c0_89 = arith.constant 0 : index
    %c0_90 = arith.constant 0 : index
    %104 = vector.load %arg12[%c3_88, %c0_89, %c0_90] : memref<9x2x2xbf16, #tpu.memory_space<vmem>>, vector<1x2x2xbf16>
    %105 = vector.shape_cast %104 : vector<1x2x2xbf16> to vector<2x2xbf16>
    %cst_91 = arith.constant dense<0.000000e+00> : vector<1x2xf32>
    %106 = tpu.matmul %103, %105, %cst_91 {dimension_numbers = #tpu.dot_dimension_numbers<[1], [0], [0], [1], [0, 0, 1, 1], [], []>} : vector<1x2xbf16>, vector<2x2xbf16>, vector<1x2xf32> -> vector<1x2xf32>
    %107 = arith.addf %101, %106 : vector<1x2xf32>
    %108 = vector.extract_strided_slice %82 {offsets = [4, 0], sizes = [1, 2], strides = [1, 1]} : vector<9x2xf32> to vector<1x2xf32>
    %109 = arith.truncf %108 : vector<1x2xf32> to vector<1x2xbf16>
    %c4_92 = arith.constant 4 : index
    %c0_93 = arith.constant 0 : index
    %c0_94 = arith.constant 0 : index
    %110 = vector.load %arg12[%c4_92, %c0_93, %c0_94] : memref<9x2x2xbf16, #tpu.memory_space<vmem>>, vector<1x2x2xbf16>
    %111 = vector.shape_cast %110 : vector<1x2x2xbf16> to vector<2x2xbf16>
    %cst_95 = arith.constant dense<0.000000e+00> : vector<1x2xf32>
    %112 = tpu.matmul %109, %111, %cst_95 {dimension_numbers = #tpu.dot_dimension_numbers<[1], [0], [0], [1], [0, 0, 1, 1], [], []>} : vector<1x2xbf16>, vector<2x2xbf16>, vector<1x2xf32> -> vector<1x2xf32>
    %113 = arith.addf %107, %112 : vector<1x2xf32>
    %114 = vector.extract_strided_slice %82 {offsets = [5, 0], sizes = [1, 2], strides = [1, 1]} : vector<9x2xf32> to vector<1x2xf32>
    %115 = arith.truncf %114 : vector<1x2xf32> to vector<1x2xbf16>
    %c5_96 = arith.constant 5 : index
    %c0_97 = arith.constant 0 : index
    %c0_98 = arith.constant 0 : index
    %116 = vector.load %arg12[%c5_96, %c0_97, %c0_98] : memref<9x2x2xbf16, #tpu.memory_space<vmem>>, vector<1x2x2xbf16>
    %117 = vector.shape_cast %116 : vector<1x2x2xbf16> to vector<2x2xbf16>
    %cst_99 = arith.constant dense<0.000000e+00> : vector<1x2xf32>
    %118 = tpu.matmul %115, %117, %cst_99 {dimension_numbers = #tpu.dot_dimension_numbers<[1], [0], [0], [1], [0, 0, 1, 1], [], []>} : vector<1x2xbf16>, vector<2x2xbf16>, vector<1x2xf32> -> vector<1x2xf32>
    %119 = arith.addf %113, %118 : vector<1x2xf32>
    %120 = vector.extract_strided_slice %82 {offsets = [6, 0], sizes = [1, 2], strides = [1, 1]} : vector<9x2xf32> to vector<1x2xf32>
    %121 = arith.truncf %120 : vector<1x2xf32> to vector<1x2xbf16>
    %c6_100 = arith.constant 6 : index
    %c0_101 = arith.constant 0 : index
    %c0_102 = arith.constant 0 : index
    %122 = vector.load %arg12[%c6_100, %c0_101, %c0_102] : memref<9x2x2xbf16, #tpu.memory_space<vmem>>, vector<1x2x2xbf16>
    %123 = vector.shape_cast %122 : vector<1x2x2xbf16> to vector<2x2xbf16>
    %cst_103 = arith.constant dense<0.000000e+00> : vector<1x2xf32>
    %124 = tpu.matmul %121, %123, %cst_103 {dimension_numbers = #tpu.dot_dimension_numbers<[1], [0], [0], [1], [0, 0, 1, 1], [], []>} : vector<1x2xbf16>, vector<2x2xbf16>, vector<1x2xf32> -> vector<1x2xf32>
    %125 = arith.addf %119, %124 : vector<1x2xf32>
    %126 = vector.extract_strided_slice %82 {offsets = [7, 0], sizes = [1, 2], strides = [1, 1]} : vector<9x2xf32> to vector<1x2xf32>
    %127 = arith.truncf %126 : vector<1x2xf32> to vector<1x2xbf16>
    %c7_104 = arith.constant 7 : index
    %c0_105 = arith.constant 0 : index
    %c0_106 = arith.constant 0 : index
    %128 = vector.load %arg12[%c7_104, %c0_105, %c0_106] : memref<9x2x2xbf16, #tpu.memory_space<vmem>>, vector<1x2x2xbf16>
    %129 = vector.shape_cast %128 : vector<1x2x2xbf16> to vector<2x2xbf16>
    %cst_107 = arith.constant dense<0.000000e+00> : vector<1x2xf32>
    %130 = tpu.matmul %127, %129, %cst_107 {dimension_numbers = #tpu.dot_dimension_numbers<[1], [0], [0], [1], [0, 0, 1, 1], [], []>} : vector<1x2xbf16>, vector<2x2xbf16>, vector<1x2xf32> -> vector<1x2xf32>
    %131 = arith.addf %125, %130 : vector<1x2xf32>
    %132 = vector.extract_strided_slice %82 {offsets = [8, 0], sizes = [1, 2], strides = [1, 1]} : vector<9x2xf32> to vector<1x2xf32>
    %133 = arith.truncf %132 : vector<1x2xf32> to vector<1x2xbf16>
    %c8_108 = arith.constant 8 : index
    %c0_109 = arith.constant 0 : index
    %c0_110 = arith.constant 0 : index
    %134 = vector.load %arg12[%c8_108, %c0_109, %c0_110] : memref<9x2x2xbf16, #tpu.memory_space<vmem>>, vector<1x2x2xbf16>
    %135 = vector.shape_cast %134 : vector<1x2x2xbf16> to vector<2x2xbf16>
    %cst_111 = arith.constant dense<0.000000e+00> : vector<1x2xf32>
    %136 = tpu.matmul %133, %135, %cst_111 {dimension_numbers = #tpu.dot_dimension_numbers<[1], [0], [0], [1], [0, 0, 1, 1], [], []>} : vector<1x2xbf16>, vector<2x2xbf16>, vector<1x2xf32> -> vector<1x2xf32>
    %137 = arith.addf %131, %136 : vector<1x2xf32>
    %c0_112 = arith.constant 0 : index
    %c0_113 = arith.constant 0 : index
    %c0_114 = arith.constant 0 : index
    %138 = vector.load %arg15[%c0_112, %c0_113, %c0_114] : memref<1x1x2xf32, #tpu.memory_space<vmem>>, vector<1x1x2xf32>
    %139 = vector.shape_cast %138 : vector<1x1x2xf32> to vector<1x2xf32>
    %140 = vector.shape_cast %137 : vector<1x2xf32> to vector<1x1x2xf32>
    tpu.vector_store %arg15[%c0_112, %c0_113, %c0_114], %140 {strides = array<i32>} : memref<1x1x2xf32, #tpu.memory_space<vmem>>, vector<1x1x2xf32>,
    return
  }
  func.func @transform_0(%arg0: i32) -> (i32, i32, i32) {
    %c0_i32 = arith.constant 0 : i32
    %c0_i32_0 = arith.constant 0 : i32
    %c0_i32_1 = arith.constant 0 : i32
    return %arg0, %c0_i32, %c0_i32_0 : i32, i32, i32
  }
  func.func @transform_1(%arg0: i32) -> (i32, i32, i32) {
    %c0_i32 = arith.constant 0 : i32
    %c0_i32_0 = arith.constant 0 : i32
    %c0_i32_1 = arith.constant 0 : i32
    return %arg0, %c0_i32, %c0_i32_0 : i32, i32, i32
  }
  func.func @transform_2(%arg0: i32) -> (i32, i32, i32) {
    %c0_i32 = arith.constant 0 : i32
    %c0_i32_0 = arith.constant 0 : i32
    %c0_i32_1 = arith.constant 0 : i32
    %c0_i32_2 = arith.constant 0 : i32
    return %c0_i32, %c0_i32_0, %c0_i32_1 : i32, i32, i32
  }
  func.func @transform_3(%arg0: i32) -> (i32, i32) {
    %c0_i32 = arith.constant 0 : i32
    %c0_i32_0 = arith.constant 0 : i32
    %c0_i32_1 = arith.constant 0 : i32
    return %c0_i32, %c0_i32_0 : i32, i32
  }
  func.func @transform_4(%arg0: i32) -> (i32, i32) {
    %c0_i32 = arith.constant 0 : i32
    %c0_i32_0 = arith.constant 0 : i32
    %c0_i32_1 = arith.constant 0 : i32
    return %c0_i32, %c0_i32_0 : i32, i32
  }
  func.func @transform_5(%arg0: i32) -> (i32, i32) {
    %c0_i32 = arith.constant 0 : i32
    %c0_i32_0 = arith.constant 0 : i32
    %c0_i32_1 = arith.constant 0 : i32
    return %c0_i32, %c0_i32_0 : i32, i32
  }
  func.func @transform_6(%arg0: i32) -> (i32, i32) {
    %c0_i32 = arith.constant 0 : i32
    %c0_i32_0 = arith.constant 0 : i32
    %c0_i32_1 = arith.constant 0 : i32
    return %c0_i32, %c0_i32_0 : i32, i32
  }
  func.func @transform_7(%arg0: i32) -> (i32, i32) {
    %c0_i32 = arith.constant 0 : i32
    %c0_i32_0 = arith.constant 0 : i32
    %c0_i32_1 = arith.constant 0 : i32
    return %c0_i32, %c0_i32_0 : i32, i32
  }
  func.func @transform_8(%arg0: i32) -> (i32, i32) {
    %c0_i32 = arith.constant 0 : i32
    %c0_i32_0 = arith.constant 0 : i32
    %c0_i32_1 = arith.constant 0 : i32
    return %c0_i32, %c0_i32_0 : i32, i32
  }
  func.func @transform_9(%arg0: i32) -> (i32, i32) {
    %c0_i32 = arith.constant 0 : i32
    %c0_i32_0 = arith.constant 0 : i32
    %c0_i32_1 = arith.constant 0 : i32
    return %c0_i32, %c0_i32_0 : i32, i32
  }
  func.func @transform_10(%arg0: i32) -> (i32, i32) {
    %c0_i32 = arith.constant 0 : i32
    %c0_i32_0 = arith.constant 0 : i32
    %c0_i32_1 = arith.constant 0 : i32
    return %c0_i32, %c0_i32_0 : i32, i32
  }
  func.func @transform_11(%arg0: i32) -> (i32, i32, i32) {
    %c0_i32 = arith.constant 0 : i32
    %c0_i32_0 = arith.constant 0 : i32
    %c0_i32_1 = arith.constant 0 : i32
    %c0_i32_2 = arith.constant 0 : i32
    return %c0_i32, %c0_i32_0, %c0_i32_1 : i32, i32, i32
  }
  func.func @transform_12(%arg0: i32) -> (i32, i32) {
    %c0_i32 = arith.constant 0 : i32
    %c0_i32_0 = arith.constant 0 : i32
    %c0_i32_1 = arith.constant 0 : i32
    return %c0_i32, %c0_i32_0 : i32, i32
  }
  func.func @transform_13(%arg0: i32) -> (i32, i32, i32) {
    %c0_i32 = arith.constant 0 : i32
    %c0_i32_0 = arith.constant 0 : i32
    %c0_i32_1 = arith.constant 0 : i32
    return %arg0, %c0_i32, %c0_i32_0 : i32, i32, i32
  }
  func.func @transform_14(%arg0: i32) -> (i32, i32, i32) {
    %c0_i32 = arith.constant 0 : i32
    %c0_i32_0 = arith.constant 0 : i32
    %c0_i32_1 = arith.constant 0 : i32
    return %arg0, %c0_i32, %c0_i32_0 : i32, i32, i32
  }
}

module attributes {stable_mosaic.version = 11 : i64} {
  func.func @_dmdc_branch_kernel(%arg0: i32, %arg1: memref<4x182x4xbf16, #tpu.memory_space<vmem>>, %arg2: memref<1x256x4xbf16, #tpu.memory_space<vmem>>, %arg3: memref<9x4x4xbf16, #tpu.memory_space<vmem>>, %arg4: memref<1x4xf32, #tpu.memory_space<vmem>>, %arg5: memref<4x2xbf16, #tpu.memory_space<vmem>>, %arg6: memref<1x2xf32, #tpu.memory_space<vmem>>, %arg7: memref<2x2xbf16, #tpu.memory_space<vmem>>, %arg8: memref<1x2xf32, #tpu.memory_space<vmem>>, %arg9: memref<25x256xbf16, #tpu.memory_space<vmem>>, %arg10: memref<4x2xbf16, #tpu.memory_space<vmem>>, %arg11: memref<1x2xf32, #tpu.memory_space<vmem>>, %arg12: memref<25x2x2xbf16, #tpu.memory_space<vmem>>, %arg13: memref<1x2xf32, #tpu.memory_space<vmem>>, %arg14: memref<1x104x2xf32, #tpu.memory_space<vmem>>, %arg15: memref<1x1x2xf32, #tpu.memory_space<vmem>>) attributes {dimension_semantics = [#tpu.dimension_semantics<parallel>], iteration_bounds = array<i64: 2>, scalar_prefetch = 0 : i64, scratch_operands = 0 : i64, tpu.core_type = #tpu.core_type<tc>, window_params = [{transform_indices = @transform_0, window_bounds = array<i64: 4, 182, 4>}, {transform_indices = @transform_1, window_bounds = array<i64: 1, 256, 4>}, {pipeline_mode = #tpu.pipeline_mode<synchronous>, transform_indices = @transform_2, window_bounds = array<i64: 9, 4, 4>}, {pipeline_mode = #tpu.pipeline_mode<synchronous>, transform_indices = @transform_3, window_bounds = array<i64: 1, 4>}, {pipeline_mode = #tpu.pipeline_mode<synchronous>, transform_indices = @transform_4, window_bounds = array<i64: 4, 2>}, {pipeline_mode = #tpu.pipeline_mode<synchronous>, transform_indices = @transform_5, window_bounds = array<i64: 1, 2>}, {pipeline_mode = #tpu.pipeline_mode<synchronous>, transform_indices = @transform_6, window_bounds = array<i64: 2, 2>}, {pipeline_mode = #tpu.pipeline_mode<synchronous>, transform_indices = @transform_7, window_bounds = array<i64: 1, 2>}, {pipeline_mode = #tpu.pipeline_mode<synchronous>, transform_indices = @transform_8, window_bounds = array<i64: 25, 256>}, {pipeline_mode = #tpu.pipeline_mode<synchronous>, transform_indices = @transform_9, window_bounds = array<i64: 4, 2>}, {pipeline_mode = #tpu.pipeline_mode<synchronous>, transform_indices = @transform_10, window_bounds = array<i64: 1, 2>}, {pipeline_mode = #tpu.pipeline_mode<synchronous>, transform_indices = @transform_11, window_bounds = array<i64: 25, 2, 2>}, {pipeline_mode = #tpu.pipeline_mode<synchronous>, transform_indices = @transform_12, window_bounds = array<i64: 1, 2>}, {transform_indices = @transform_13, window_bounds = array<i64: 1, 104, 2>}, {transform_indices = @transform_14, window_bounds = array<i64: 1, 1, 2>}]} {
    %cst = arith.constant 0.000000e+00 : f32
    %0 = vector.broadcast %cst : f32 to vector<104x4xf32>
    %c0 = arith.constant 0 : index
    %c0_0 = arith.constant 0 : index
    %c0_1 = arith.constant 0 : index
    %1 = vector.load %arg1[%c0, %c0_0, %c0_1] : memref<4x182x4xbf16, #tpu.memory_space<vmem>>, vector<1x104x4xbf16>
    %2 = vector.shape_cast %1 : vector<1x104x4xbf16> to vector<104x4xbf16>
    %c0_2 = arith.constant 0 : index
    %c0_3 = arith.constant 0 : index
    %c0_4 = arith.constant 0 : index
    %3 = vector.load %arg3[%c0_2, %c0_3, %c0_4] : memref<9x4x4xbf16, #tpu.memory_space<vmem>>, vector<1x4x4xbf16>
    %4 = vector.shape_cast %3 : vector<1x4x4xbf16> to vector<4x4xbf16>
    %cst_5 = arith.constant dense<0.000000e+00> : vector<104x4xf32>
    %5 = tpu.matmul %2, %4, %cst_5 {dimension_numbers = #tpu.dot_dimension_numbers<[1], [0], [0], [1], [0, 0, 1, 1], [], []>} : vector<104x4xbf16>, vector<4x4xbf16>, vector<104x4xf32> -> vector<104x4xf32>
    %6 = arith.addf %0, %5 : vector<104x4xf32>
    %c1 = arith.constant 1 : index
    %c2 = arith.constant 2 : index
    %c0_6 = arith.constant 0 : index
    %7 = vector.load %arg1[%c1, %c2, %c0_6] : memref<4x182x4xbf16, #tpu.memory_space<vmem>>, vector<1x104x4xbf16>
    %8 = vector.shape_cast %7 : vector<1x104x4xbf16> to vector<104x4xbf16>
    %c1_7 = arith.constant 1 : index
    %c0_8 = arith.constant 0 : index
    %c0_9 = arith.constant 0 : index
    %9 = vector.load %arg3[%c1_7, %c0_8, %c0_9] : memref<9x4x4xbf16, #tpu.memory_space<vmem>>, vector<1x4x4xbf16>
    %10 = vector.shape_cast %9 : vector<1x4x4xbf16> to vector<4x4xbf16>
    %cst_10 = arith.constant dense<0.000000e+00> : vector<104x4xf32>
    %11 = tpu.matmul %8, %10, %cst_10 {dimension_numbers = #tpu.dot_dimension_numbers<[1], [0], [0], [1], [0, 0, 1, 1], [], []>} : vector<104x4xbf16>, vector<4x4xbf16>, vector<104x4xf32> -> vector<104x4xf32>
    %12 = arith.addf %6, %11 : vector<104x4xf32>
    %c0_11 = arith.constant 0 : index
    %c5 = arith.constant 5 : index
    %c0_12 = arith.constant 0 : index
    %13 = vector.load %arg1[%c0_11, %c5, %c0_12] : memref<4x182x4xbf16, #tpu.memory_space<vmem>>, vector<1x104x4xbf16>
    %14 = vector.shape_cast %13 : vector<1x104x4xbf16> to vector<104x4xbf16>
    %c2_13 = arith.constant 2 : index
    %c0_14 = arith.constant 0 : index
    %c0_15 = arith.constant 0 : index
    %15 = vector.load %arg3[%c2_13, %c0_14, %c0_15] : memref<9x4x4xbf16, #tpu.memory_space<vmem>>, vector<1x4x4xbf16>
    %16 = vector.shape_cast %15 : vector<1x4x4xbf16> to vector<4x4xbf16>
    %cst_16 = arith.constant dense<0.000000e+00> : vector<104x4xf32>
    %17 = tpu.matmul %14, %16, %cst_16 {dimension_numbers = #tpu.dot_dimension_numbers<[1], [0], [0], [1], [0, 0, 1, 1], [], []>} : vector<104x4xbf16>, vector<4x4xbf16>, vector<104x4xf32> -> vector<104x4xf32>
    %18 = arith.addf %12, %17 : vector<104x4xf32>
    %c2_17 = arith.constant 2 : index
    %c26 = arith.constant 26 : index
    %c0_18 = arith.constant 0 : index
    %19 = vector.load %arg1[%c2_17, %c26, %c0_18] : memref<4x182x4xbf16, #tpu.memory_space<vmem>>, vector<1x104x4xbf16>
    %20 = vector.shape_cast %19 : vector<1x104x4xbf16> to vector<104x4xbf16>
    %c3 = arith.constant 3 : index
    %c0_19 = arith.constant 0 : index
    %c0_20 = arith.constant 0 : index
    %21 = vector.load %arg3[%c3, %c0_19, %c0_20] : memref<9x4x4xbf16, #tpu.memory_space<vmem>>, vector<1x4x4xbf16>
    %22 = vector.shape_cast %21 : vector<1x4x4xbf16> to vector<4x4xbf16>
    %cst_21 = arith.constant dense<0.000000e+00> : vector<104x4xf32>
    %23 = tpu.matmul %20, %22, %cst_21 {dimension_numbers = #tpu.dot_dimension_numbers<[1], [0], [0], [1], [0, 0, 1, 1], [], []>} : vector<104x4xbf16>, vector<4x4xbf16>, vector<104x4xf32> -> vector<104x4xf32>
    %24 = arith.addf %18, %23 : vector<104x4xf32>
    %c3_22 = arith.constant 3 : index
    %c28 = arith.constant 28 : index
    %c0_23 = arith.constant 0 : index
    %25 = vector.load %arg1[%c3_22, %c28, %c0_23] : memref<4x182x4xbf16, #tpu.memory_space<vmem>>, vector<1x104x4xbf16>
    %26 = vector.shape_cast %25 : vector<1x104x4xbf16> to vector<104x4xbf16>
    %c4 = arith.constant 4 : index
    %c0_24 = arith.constant 0 : index
    %c0_25 = arith.constant 0 : index
    %27 = vector.load %arg3[%c4, %c0_24, %c0_25] : memref<9x4x4xbf16, #tpu.memory_space<vmem>>, vector<1x4x4xbf16>
    %28 = vector.shape_cast %27 : vector<1x4x4xbf16> to vector<4x4xbf16>
    %cst_26 = arith.constant dense<0.000000e+00> : vector<104x4xf32>
    %29 = tpu.matmul %26, %28, %cst_26 {dimension_numbers = #tpu.dot_dimension_numbers<[1], [0], [0], [1], [0, 0, 1, 1], [], []>} : vector<104x4xbf16>, vector<4x4xbf16>, vector<104x4xf32> -> vector<104x4xf32>
    %30 = arith.addf %24, %29 : vector<104x4xf32>
    %c2_27 = arith.constant 2 : index
    %c31 = arith.constant 31 : index
    %c0_28 = arith.constant 0 : index
    %31 = vector.load %arg1[%c2_27, %c31, %c0_28] : memref<4x182x4xbf16, #tpu.memory_space<vmem>>, vector<1x104x4xbf16>
    %32 = vector.shape_cast %31 : vector<1x104x4xbf16> to vector<104x4xbf16>
    %c5_29 = arith.constant 5 : index
    %c0_30 = arith.constant 0 : index
    %c0_31 = arith.constant 0 : index
    %33 = vector.load %arg3[%c5_29, %c0_30, %c0_31] : memref<9x4x4xbf16, #tpu.memory_space<vmem>>, vector<1x4x4xbf16>
    %34 = vector.shape_cast %33 : vector<1x4x4xbf16> to vector<4x4xbf16>
    %cst_32 = arith.constant dense<0.000000e+00> : vector<104x4xf32>
    %35 = tpu.matmul %32, %34, %cst_32 {dimension_numbers = #tpu.dot_dimension_numbers<[1], [0], [0], [1], [0, 0, 1, 1], [], []>} : vector<104x4xbf16>, vector<4x4xbf16>, vector<104x4xf32> -> vector<104x4xf32>
    %36 = arith.addf %30, %35 : vector<104x4xf32>
    %c0_33 = arith.constant 0 : index
    %c65 = arith.constant 65 : index
    %c0_34 = arith.constant 0 : index
    %37 = vector.load %arg1[%c0_33, %c65, %c0_34] : memref<4x182x4xbf16, #tpu.memory_space<vmem>>, vector<1x104x4xbf16>
    %38 = vector.shape_cast %37 : vector<1x104x4xbf16> to vector<104x4xbf16>
    %c6 = arith.constant 6 : index
    %c0_35 = arith.constant 0 : index
    %c0_36 = arith.constant 0 : index
    %39 = vector.load %arg3[%c6, %c0_35, %c0_36] : memref<9x4x4xbf16, #tpu.memory_space<vmem>>, vector<1x4x4xbf16>
    %40 = vector.shape_cast %39 : vector<1x4x4xbf16> to vector<4x4xbf16>
    %cst_37 = arith.constant dense<0.000000e+00> : vector<104x4xf32>
    %41 = tpu.matmul %38, %40, %cst_37 {dimension_numbers = #tpu.dot_dimension_numbers<[1], [0], [0], [1], [0, 0, 1, 1], [], []>} : vector<104x4xbf16>, vector<4x4xbf16>, vector<104x4xf32> -> vector<104x4xf32>
    %42 = arith.addf %36, %41 : vector<104x4xf32>
    %c1_38 = arith.constant 1 : index
    %c67 = arith.constant 67 : index
    %c0_39 = arith.constant 0 : index
    %43 = vector.load %arg1[%c1_38, %c67, %c0_39] : memref<4x182x4xbf16, #tpu.memory_space<vmem>>, vector<1x104x4xbf16>
    %44 = vector.shape_cast %43 : vector<1x104x4xbf16> to vector<104x4xbf16>
    %c7 = arith.constant 7 : index
    %c0_40 = arith.constant 0 : index
    %c0_41 = arith.constant 0 : index
    %45 = vector.load %arg3[%c7, %c0_40, %c0_41] : memref<9x4x4xbf16, #tpu.memory_space<vmem>>, vector<1x4x4xbf16>
    %46 = vector.shape_cast %45 : vector<1x4x4xbf16> to vector<4x4xbf16>
    %cst_42 = arith.constant dense<0.000000e+00> : vector<104x4xf32>
    %47 = tpu.matmul %44, %46, %cst_42 {dimension_numbers = #tpu.dot_dimension_numbers<[1], [0], [0], [1], [0, 0, 1, 1], [], []>} : vector<104x4xbf16>, vector<4x4xbf16>, vector<104x4xf32> -> vector<104x4xf32>
    %48 = arith.addf %42, %47 : vector<104x4xf32>
    %c0_43 = arith.constant 0 : index
    %c70 = arith.constant 70 : index
    %c0_44 = arith.constant 0 : index
    %49 = vector.load %arg1[%c0_43, %c70, %c0_44] : memref<4x182x4xbf16, #tpu.memory_space<vmem>>, vector<1x104x4xbf16>
    %50 = vector.shape_cast %49 : vector<1x104x4xbf16> to vector<104x4xbf16>
    %c8 = arith.constant 8 : index
    %c0_45 = arith.constant 0 : index
    %c0_46 = arith.constant 0 : index
    %51 = vector.load %arg3[%c8, %c0_45, %c0_46] : memref<9x4x4xbf16, #tpu.memory_space<vmem>>, vector<1x4x4xbf16>
    %52 = vector.shape_cast %51 : vector<1x4x4xbf16> to vector<4x4xbf16>
    %cst_47 = arith.constant dense<0.000000e+00> : vector<104x4xf32>
    %53 = tpu.matmul %50, %52, %cst_47 {dimension_numbers = #tpu.dot_dimension_numbers<[1], [0], [0], [1], [0, 0, 1, 1], [], []>} : vector<104x4xbf16>, vector<4x4xbf16>, vector<104x4xf32> -> vector<104x4xf32>
    %54 = arith.addf %48, %53 : vector<104x4xf32>
    %c0_48 = arith.constant 0 : index
    %c0_49 = arith.constant 0 : index
    %55 = vector.load %arg4[%c0_48, %c0_49] : memref<1x4xf32, #tpu.memory_space<vmem>>, vector<1x4xf32>
    %56 = vector.broadcast %55 : vector<1x4xf32> to vector<104x4xf32>
    %57 = arith.addf %54, %56 : vector<104x4xf32>
    %58 = arith.truncf %57 : vector<104x4xf32> to vector<104x4xbf16>
    %c0_50 = arith.constant 0 : index
    %c0_51 = arith.constant 0 : index
    %59 = vector.load %arg5[%c0_50, %c0_51] : memref<4x2xbf16, #tpu.memory_space<vmem>>, vector<4x2xbf16>
    %cst_52 = arith.constant dense<0.000000e+00> : vector<104x2xf32>
    %60 = tpu.matmul %58, %59, %cst_52 {dimension_numbers = #tpu.dot_dimension_numbers<[1], [0], [0], [1], [0, 0, 1, 1], [], []>} : vector<104x4xbf16>, vector<4x2xbf16>, vector<104x2xf32> -> vector<104x2xf32>
    %c0_53 = arith.constant 0 : index
    %c0_54 = arith.constant 0 : index
    %61 = vector.load %arg6[%c0_53, %c0_54] : memref<1x2xf32, #tpu.memory_space<vmem>>, vector<1x2xf32>
    %62 = vector.broadcast %61 : vector<1x2xf32> to vector<104x2xf32>
    %63 = arith.addf %60, %62 : vector<104x2xf32>
    %64 = arith.truncf %63 : vector<104x2xf32> to vector<104x2xbf16>
    %c0_55 = arith.constant 0 : index
    %c0_56 = arith.constant 0 : index
    %65 = vector.load %arg7[%c0_55, %c0_56] : memref<2x2xbf16, #tpu.memory_space<vmem>>, vector<2x2xbf16>
    %cst_57 = arith.constant dense<0.000000e+00> : vector<104x2xf32>
    %66 = tpu.matmul %64, %65, %cst_57 {dimension_numbers = #tpu.dot_dimension_numbers<[1], [0], [0], [1], [0, 0, 1, 1], [], []>} : vector<104x2xbf16>, vector<2x2xbf16>, vector<104x2xf32> -> vector<104x2xf32>
    %c0_58 = arith.constant 0 : index
    %c0_59 = arith.constant 0 : index
    %67 = vector.load %arg8[%c0_58, %c0_59] : memref<1x2xf32, #tpu.memory_space<vmem>>, vector<1x2xf32>
    %68 = vector.broadcast %67 : vector<1x2xf32> to vector<104x2xf32>
    %69 = arith.addf %66, %68 : vector<104x2xf32>
    %c0_60 = arith.constant 0 : index
    %c0_61 = arith.constant 0 : index
    %c0_62 = arith.constant 0 : index
    %70 = vector.load %arg14[%c0_60, %c0_61, %c0_62] : memref<1x104x2xf32, #tpu.memory_space<vmem>>, vector<1x104x2xf32>
    %71 = vector.shape_cast %70 : vector<1x104x2xf32> to vector<104x2xf32>
    %72 = vector.shape_cast %69 : vector<104x2xf32> to vector<1x104x2xf32>
    tpu.vector_store %arg14[%c0_60, %c0_61, %c0_62], %72 {strides = array<i32>} : memref<1x104x2xf32, #tpu.memory_space<vmem>>, vector<1x104x2xf32>,
    %c0_63 = arith.constant 0 : index
    %c0_64 = arith.constant 0 : index
    %73 = vector.load %arg9[%c0_63, %c0_64] : memref<25x256xbf16, #tpu.memory_space<vmem>>, vector<25x256xbf16>
    %c0_65 = arith.constant 0 : index
    %c0_66 = arith.constant 0 : index
    %c0_67 = arith.constant 0 : index
    %74 = vector.load %arg2[%c0_65, %c0_66, %c0_67] : memref<1x256x4xbf16, #tpu.memory_space<vmem>>, vector<1x256x4xbf16>
    %75 = vector.shape_cast %74 : vector<1x256x4xbf16> to vector<256x4xbf16>
    %cst_68 = arith.constant dense<0.000000e+00> : vector<25x4xf32>
    %76 = tpu.matmul %73, %75, %cst_68 {dimension_numbers = #tpu.dot_dimension_numbers<[1], [0], [0], [1], [0, 0, 1, 1], [], []>} : vector<25x256xbf16>, vector<256x4xbf16>, vector<25x4xf32> -> vector<25x4xf32>
    %77 = arith.truncf %76 : vector<25x4xf32> to vector<25x4xbf16>
    %c0_69 = arith.constant 0 : index
    %c0_70 = arith.constant 0 : index
    %78 = vector.load %arg10[%c0_69, %c0_70] : memref<4x2xbf16, #tpu.memory_space<vmem>>, vector<4x2xbf16>
    %cst_71 = arith.constant dense<0.000000e+00> : vector<25x2xf32>
    %79 = tpu.matmul %77, %78, %cst_71 {dimension_numbers = #tpu.dot_dimension_numbers<[1], [0], [0], [1], [0, 0, 1, 1], [], []>} : vector<25x4xbf16>, vector<4x2xbf16>, vector<25x2xf32> -> vector<25x2xf32>
    %c0_72 = arith.constant 0 : index
    %c0_73 = arith.constant 0 : index
    %80 = vector.load %arg11[%c0_72, %c0_73] : memref<1x2xf32, #tpu.memory_space<vmem>>, vector<1x2xf32>
    %81 = vector.broadcast %80 : vector<1x2xf32> to vector<25x2xf32>
    %82 = arith.addf %79, %81 : vector<25x2xf32>
    %c0_74 = arith.constant 0 : index
    %c0_75 = arith.constant 0 : index
    %83 = vector.load %arg13[%c0_74, %c0_75] : memref<1x2xf32, #tpu.memory_space<vmem>>, vector<1x2xf32>
    %84 = vector.extract_strided_slice %82 {offsets = [0, 0], sizes = [1, 2], strides = [1, 1]} : vector<25x2xf32> to vector<1x2xf32>
    %85 = arith.truncf %84 : vector<1x2xf32> to vector<1x2xbf16>
    %c0_76 = arith.constant 0 : index
    %c0_77 = arith.constant 0 : index
    %c0_78 = arith.constant 0 : index
    %86 = vector.load %arg12[%c0_76, %c0_77, %c0_78] : memref<25x2x2xbf16, #tpu.memory_space<vmem>>, vector<1x2x2xbf16>
    %87 = vector.shape_cast %86 : vector<1x2x2xbf16> to vector<2x2xbf16>
    %cst_79 = arith.constant dense<0.000000e+00> : vector<1x2xf32>
    %88 = tpu.matmul %85, %87, %cst_79 {dimension_numbers = #tpu.dot_dimension_numbers<[1], [0], [0], [1], [0, 0, 1, 1], [], []>} : vector<1x2xbf16>, vector<2x2xbf16>, vector<1x2xf32> -> vector<1x2xf32>
    %89 = arith.addf %83, %88 : vector<1x2xf32>
    %90 = vector.extract_strided_slice %82 {offsets = [1, 0], sizes = [1, 2], strides = [1, 1]} : vector<25x2xf32> to vector<1x2xf32>
    %91 = arith.truncf %90 : vector<1x2xf32> to vector<1x2xbf16>
    %c1_80 = arith.constant 1 : index
    %c0_81 = arith.constant 0 : index
    %c0_82 = arith.constant 0 : index
    %92 = vector.load %arg12[%c1_80, %c0_81, %c0_82] : memref<25x2x2xbf16, #tpu.memory_space<vmem>>, vector<1x2x2xbf16>
    %93 = vector.shape_cast %92 : vector<1x2x2xbf16> to vector<2x2xbf16>
    %cst_83 = arith.constant dense<0.000000e+00> : vector<1x2xf32>
    %94 = tpu.matmul %91, %93, %cst_83 {dimension_numbers = #tpu.dot_dimension_numbers<[1], [0], [0], [1], [0, 0, 1, 1], [], []>} : vector<1x2xbf16>, vector<2x2xbf16>, vector<1x2xf32> -> vector<1x2xf32>
    %95 = arith.addf %89, %94 : vector<1x2xf32>
    %96 = vector.extract_strided_slice %82 {offsets = [2, 0], sizes = [1, 2], strides = [1, 1]} : vector<25x2xf32> to vector<1x2xf32>
    %97 = arith.truncf %96 : vector<1x2xf32> to vector<1x2xbf16>
    %c2_84 = arith.constant 2 : index
    %c0_85 = arith.constant 0 : index
    %c0_86 = arith.constant 0 : index
    %98 = vector.load %arg12[%c2_84, %c0_85, %c0_86] : memref<25x2x2xbf16, #tpu.memory_space<vmem>>, vector<1x2x2xbf16>
    %99 = vector.shape_cast %98 : vector<1x2x2xbf16> to vector<2x2xbf16>
    %cst_87 = arith.constant dense<0.000000e+00> : vector<1x2xf32>
    %100 = tpu.matmul %97, %99, %cst_87 {dimension_numbers = #tpu.dot_dimension_numbers<[1], [0], [0], [1], [0, 0, 1, 1], [], []>} : vector<1x2xbf16>, vector<2x2xbf16>, vector<1x2xf32> -> vector<1x2xf32>
    %101 = arith.addf %95, %100 : vector<1x2xf32>
    %102 = vector.extract_strided_slice %82 {offsets = [3, 0], sizes = [1, 2], strides = [1, 1]} : vector<25x2xf32> to vector<1x2xf32>
    %103 = arith.truncf %102 : vector<1x2xf32> to vector<1x2xbf16>
    %c3_88 = arith.constant 3 : index
    %c0_89 = arith.constant 0 : index
    %c0_90 = arith.constant 0 : index
    %104 = vector.load %arg12[%c3_88, %c0_89, %c0_90] : memref<25x2x2xbf16, #tpu.memory_space<vmem>>, vector<1x2x2xbf16>
    %105 = vector.shape_cast %104 : vector<1x2x2xbf16> to vector<2x2xbf16>
    %cst_91 = arith.constant dense<0.000000e+00> : vector<1x2xf32>
    %106 = tpu.matmul %103, %105, %cst_91 {dimension_numbers = #tpu.dot_dimension_numbers<[1], [0], [0], [1], [0, 0, 1, 1], [], []>} : vector<1x2xbf16>, vector<2x2xbf16>, vector<1x2xf32> -> vector<1x2xf32>
    %107 = arith.addf %101, %106 : vector<1x2xf32>
    %108 = vector.extract_strided_slice %82 {offsets = [4, 0], sizes = [1, 2], strides = [1, 1]} : vector<25x2xf32> to vector<1x2xf32>
    %109 = arith.truncf %108 : vector<1x2xf32> to vector<1x2xbf16>
    %c4_92 = arith.constant 4 : index
    %c0_93 = arith.constant 0 : index
    %c0_94 = arith.constant 0 : index
    %110 = vector.load %arg12[%c4_92, %c0_93, %c0_94] : memref<25x2x2xbf16, #tpu.memory_space<vmem>>, vector<1x2x2xbf16>
    %111 = vector.shape_cast %110 : vector<1x2x2xbf16> to vector<2x2xbf16>
    %cst_95 = arith.constant dense<0.000000e+00> : vector<1x2xf32>
    %112 = tpu.matmul %109, %111, %cst_95 {dimension_numbers = #tpu.dot_dimension_numbers<[1], [0], [0], [1], [0, 0, 1, 1], [], []>} : vector<1x2xbf16>, vector<2x2xbf16>, vector<1x2xf32> -> vector<1x2xf32>
    %113 = arith.addf %107, %112 : vector<1x2xf32>
    %114 = vector.extract_strided_slice %82 {offsets = [5, 0], sizes = [1, 2], strides = [1, 1]} : vector<25x2xf32> to vector<1x2xf32>
    %115 = arith.truncf %114 : vector<1x2xf32> to vector<1x2xbf16>
    %c5_96 = arith.constant 5 : index
    %c0_97 = arith.constant 0 : index
    %c0_98 = arith.constant 0 : index
    %116 = vector.load %arg12[%c5_96, %c0_97, %c0_98] : memref<25x2x2xbf16, #tpu.memory_space<vmem>>, vector<1x2x2xbf16>
    %117 = vector.shape_cast %116 : vector<1x2x2xbf16> to vector<2x2xbf16>
    %cst_99 = arith.constant dense<0.000000e+00> : vector<1x2xf32>
    %118 = tpu.matmul %115, %117, %cst_99 {dimension_numbers = #tpu.dot_dimension_numbers<[1], [0], [0], [1], [0, 0, 1, 1], [], []>} : vector<1x2xbf16>, vector<2x2xbf16>, vector<1x2xf32> -> vector<1x2xf32>
    %119 = arith.addf %113, %118 : vector<1x2xf32>
    %120 = vector.extract_strided_slice %82 {offsets = [6, 0], sizes = [1, 2], strides = [1, 1]} : vector<25x2xf32> to vector<1x2xf32>
    %121 = arith.truncf %120 : vector<1x2xf32> to vector<1x2xbf16>
    %c6_100 = arith.constant 6 : index
    %c0_101 = arith.constant 0 : index
    %c0_102 = arith.constant 0 : index
    %122 = vector.load %arg12[%c6_100, %c0_101, %c0_102] : memref<25x2x2xbf16, #tpu.memory_space<vmem>>, vector<1x2x2xbf16>
    %123 = vector.shape_cast %122 : vector<1x2x2xbf16> to vector<2x2xbf16>
    %cst_103 = arith.constant dense<0.000000e+00> : vector<1x2xf32>
    %124 = tpu.matmul %121, %123, %cst_103 {dimension_numbers = #tpu.dot_dimension_numbers<[1], [0], [0], [1], [0, 0, 1, 1], [], []>} : vector<1x2xbf16>, vector<2x2xbf16>, vector<1x2xf32> -> vector<1x2xf32>
    %125 = arith.addf %119, %124 : vector<1x2xf32>
    %126 = vector.extract_strided_slice %82 {offsets = [7, 0], sizes = [1, 2], strides = [1, 1]} : vector<25x2xf32> to vector<1x2xf32>
    %127 = arith.truncf %126 : vector<1x2xf32> to vector<1x2xbf16>
    %c7_104 = arith.constant 7 : index
    %c0_105 = arith.constant 0 : index
    %c0_106 = arith.constant 0 : index
    %128 = vector.load %arg12[%c7_104, %c0_105, %c0_106] : memref<25x2x2xbf16, #tpu.memory_space<vmem>>, vector<1x2x2xbf16>
    %129 = vector.shape_cast %128 : vector<1x2x2xbf16> to vector<2x2xbf16>
    %cst_107 = arith.constant dense<0.000000e+00> : vector<1x2xf32>
    %130 = tpu.matmul %127, %129, %cst_107 {dimension_numbers = #tpu.dot_dimension_numbers<[1], [0], [0], [1], [0, 0, 1, 1], [], []>} : vector<1x2xbf16>, vector<2x2xbf16>, vector<1x2xf32> -> vector<1x2xf32>
    %131 = arith.addf %125, %130 : vector<1x2xf32>
    %132 = vector.extract_strided_slice %82 {offsets = [8, 0], sizes = [1, 2], strides = [1, 1]} : vector<25x2xf32> to vector<1x2xf32>
    %133 = arith.truncf %132 : vector<1x2xf32> to vector<1x2xbf16>
    %c8_108 = arith.constant 8 : index
    %c0_109 = arith.constant 0 : index
    %c0_110 = arith.constant 0 : index
    %134 = vector.load %arg12[%c8_108, %c0_109, %c0_110] : memref<25x2x2xbf16, #tpu.memory_space<vmem>>, vector<1x2x2xbf16>
    %135 = vector.shape_cast %134 : vector<1x2x2xbf16> to vector<2x2xbf16>
    %cst_111 = arith.constant dense<0.000000e+00> : vector<1x2xf32>
    %136 = tpu.matmul %133, %135, %cst_111 {dimension_numbers = #tpu.dot_dimension_numbers<[1], [0], [0], [1], [0, 0, 1, 1], [], []>} : vector<1x2xbf16>, vector<2x2xbf16>, vector<1x2xf32> -> vector<1x2xf32>
    %137 = arith.addf %131, %136 : vector<1x2xf32>
    %138 = vector.extract_strided_slice %82 {offsets = [9, 0], sizes = [1, 2], strides = [1, 1]} : vector<25x2xf32> to vector<1x2xf32>
    %139 = arith.truncf %138 : vector<1x2xf32> to vector<1x2xbf16>
    %c9 = arith.constant 9 : index
    %c0_112 = arith.constant 0 : index
    %c0_113 = arith.constant 0 : index
    %140 = vector.load %arg12[%c9, %c0_112, %c0_113] : memref<25x2x2xbf16, #tpu.memory_space<vmem>>, vector<1x2x2xbf16>
    %141 = vector.shape_cast %140 : vector<1x2x2xbf16> to vector<2x2xbf16>
    %cst_114 = arith.constant dense<0.000000e+00> : vector<1x2xf32>
    %142 = tpu.matmul %139, %141, %cst_114 {dimension_numbers = #tpu.dot_dimension_numbers<[1], [0], [0], [1], [0, 0, 1, 1], [], []>} : vector<1x2xbf16>, vector<2x2xbf16>, vector<1x2xf32> -> vector<1x2xf32>
    %143 = arith.addf %137, %142 : vector<1x2xf32>
    %144 = vector.extract_strided_slice %82 {offsets = [10, 0], sizes = [1, 2], strides = [1, 1]} : vector<25x2xf32> to vector<1x2xf32>
    %145 = arith.truncf %144 : vector<1x2xf32> to vector<1x2xbf16>
    %c10 = arith.constant 10 : index
    %c0_115 = arith.constant 0 : index
    %c0_116 = arith.constant 0 : index
    %146 = vector.load %arg12[%c10, %c0_115, %c0_116] : memref<25x2x2xbf16, #tpu.memory_space<vmem>>, vector<1x2x2xbf16>
    %147 = vector.shape_cast %146 : vector<1x2x2xbf16> to vector<2x2xbf16>
    %cst_117 = arith.constant dense<0.000000e+00> : vector<1x2xf32>
    %148 = tpu.matmul %145, %147, %cst_117 {dimension_numbers = #tpu.dot_dimension_numbers<[1], [0], [0], [1], [0, 0, 1, 1], [], []>} : vector<1x2xbf16>, vector<2x2xbf16>, vector<1x2xf32> -> vector<1x2xf32>
    %149 = arith.addf %143, %148 : vector<1x2xf32>
    %150 = vector.extract_strided_slice %82 {offsets = [11, 0], sizes = [1, 2], strides = [1, 1]} : vector<25x2xf32> to vector<1x2xf32>
    %151 = arith.truncf %150 : vector<1x2xf32> to vector<1x2xbf16>
    %c11 = arith.constant 11 : index
    %c0_118 = arith.constant 0 : index
    %c0_119 = arith.constant 0 : index
    %152 = vector.load %arg12[%c11, %c0_118, %c0_119] : memref<25x2x2xbf16, #tpu.memory_space<vmem>>, vector<1x2x2xbf16>
    %153 = vector.shape_cast %152 : vector<1x2x2xbf16> to vector<2x2xbf16>
    %cst_120 = arith.constant dense<0.000000e+00> : vector<1x2xf32>
    %154 = tpu.matmul %151, %153, %cst_120 {dimension_numbers = #tpu.dot_dimension_numbers<[1], [0], [0], [1], [0, 0, 1, 1], [], []>} : vector<1x2xbf16>, vector<2x2xbf16>, vector<1x2xf32> -> vector<1x2xf32>
    %155 = arith.addf %149, %154 : vector<1x2xf32>
    %156 = vector.extract_strided_slice %82 {offsets = [12, 0], sizes = [1, 2], strides = [1, 1]} : vector<25x2xf32> to vector<1x2xf32>
    %157 = arith.truncf %156 : vector<1x2xf32> to vector<1x2xbf16>
    %c12 = arith.constant 12 : index
    %c0_121 = arith.constant 0 : index
    %c0_122 = arith.constant 0 : index
    %158 = vector.load %arg12[%c12, %c0_121, %c0_122] : memref<25x2x2xbf16, #tpu.memory_space<vmem>>, vector<1x2x2xbf16>
    %159 = vector.shape_cast %158 : vector<1x2x2xbf16> to vector<2x2xbf16>
    %cst_123 = arith.constant dense<0.000000e+00> : vector<1x2xf32>
    %160 = tpu.matmul %157, %159, %cst_123 {dimension_numbers = #tpu.dot_dimension_numbers<[1], [0], [0], [1], [0, 0, 1, 1], [], []>} : vector<1x2xbf16>, vector<2x2xbf16>, vector<1x2xf32> -> vector<1x2xf32>
    %161 = arith.addf %155, %160 : vector<1x2xf32>
    %162 = vector.extract_strided_slice %82 {offsets = [13, 0], sizes = [1, 2], strides = [1, 1]} : vector<25x2xf32> to vector<1x2xf32>
    %163 = arith.truncf %162 : vector<1x2xf32> to vector<1x2xbf16>
    %c13 = arith.constant 13 : index
    %c0_124 = arith.constant 0 : index
    %c0_125 = arith.constant 0 : index
    %164 = vector.load %arg12[%c13, %c0_124, %c0_125] : memref<25x2x2xbf16, #tpu.memory_space<vmem>>, vector<1x2x2xbf16>
    %165 = vector.shape_cast %164 : vector<1x2x2xbf16> to vector<2x2xbf16>
    %cst_126 = arith.constant dense<0.000000e+00> : vector<1x2xf32>
    %166 = tpu.matmul %163, %165, %cst_126 {dimension_numbers = #tpu.dot_dimension_numbers<[1], [0], [0], [1], [0, 0, 1, 1], [], []>} : vector<1x2xbf16>, vector<2x2xbf16>, vector<1x2xf32> -> vector<1x2xf32>
    %167 = arith.addf %161, %166 : vector<1x2xf32>
    %168 = vector.extract_strided_slice %82 {offsets = [14, 0], sizes = [1, 2], strides = [1, 1]} : vector<25x2xf32> to vector<1x2xf32>
    %169 = arith.truncf %168 : vector<1x2xf32> to vector<1x2xbf16>
    %c14 = arith.constant 14 : index
    %c0_127 = arith.constant 0 : index
    %c0_128 = arith.constant 0 : index
    %170 = vector.load %arg12[%c14, %c0_127, %c0_128] : memref<25x2x2xbf16, #tpu.memory_space<vmem>>, vector<1x2x2xbf16>
    %171 = vector.shape_cast %170 : vector<1x2x2xbf16> to vector<2x2xbf16>
    %cst_129 = arith.constant dense<0.000000e+00> : vector<1x2xf32>
    %172 = tpu.matmul %169, %171, %cst_129 {dimension_numbers = #tpu.dot_dimension_numbers<[1], [0], [0], [1], [0, 0, 1, 1], [], []>} : vector<1x2xbf16>, vector<2x2xbf16>, vector<1x2xf32> -> vector<1x2xf32>
    %173 = arith.addf %167, %172 : vector<1x2xf32>
    %174 = vector.extract_strided_slice %82 {offsets = [15, 0], sizes = [1, 2], strides = [1, 1]} : vector<25x2xf32> to vector<1x2xf32>
    %175 = arith.truncf %174 : vector<1x2xf32> to vector<1x2xbf16>
    %c15 = arith.constant 15 : index
    %c0_130 = arith.constant 0 : index
    %c0_131 = arith.constant 0 : index
    %176 = vector.load %arg12[%c15, %c0_130, %c0_131] : memref<25x2x2xbf16, #tpu.memory_space<vmem>>, vector<1x2x2xbf16>
    %177 = vector.shape_cast %176 : vector<1x2x2xbf16> to vector<2x2xbf16>
    %cst_132 = arith.constant dense<0.000000e+00> : vector<1x2xf32>
    %178 = tpu.matmul %175, %177, %cst_132 {dimension_numbers = #tpu.dot_dimension_numbers<[1], [0], [0], [1], [0, 0, 1, 1], [], []>} : vector<1x2xbf16>, vector<2x2xbf16>, vector<1x2xf32> -> vector<1x2xf32>
    %179 = arith.addf %173, %178 : vector<1x2xf32>
    %180 = vector.extract_strided_slice %82 {offsets = [16, 0], sizes = [1, 2], strides = [1, 1]} : vector<25x2xf32> to vector<1x2xf32>
    %181 = arith.truncf %180 : vector<1x2xf32> to vector<1x2xbf16>
    %c16 = arith.constant 16 : index
    %c0_133 = arith.constant 0 : index
    %c0_134 = arith.constant 0 : index
    %182 = vector.load %arg12[%c16, %c0_133, %c0_134] : memref<25x2x2xbf16, #tpu.memory_space<vmem>>, vector<1x2x2xbf16>
    %183 = vector.shape_cast %182 : vector<1x2x2xbf16> to vector<2x2xbf16>
    %cst_135 = arith.constant dense<0.000000e+00> : vector<1x2xf32>
    %184 = tpu.matmul %181, %183, %cst_135 {dimension_numbers = #tpu.dot_dimension_numbers<[1], [0], [0], [1], [0, 0, 1, 1], [], []>} : vector<1x2xbf16>, vector<2x2xbf16>, vector<1x2xf32> -> vector<1x2xf32>
    %185 = arith.addf %179, %184 : vector<1x2xf32>
    %186 = vector.extract_strided_slice %82 {offsets = [17, 0], sizes = [1, 2], strides = [1, 1]} : vector<25x2xf32> to vector<1x2xf32>
    %187 = arith.truncf %186 : vector<1x2xf32> to vector<1x2xbf16>
    %c17 = arith.constant 17 : index
    %c0_136 = arith.constant 0 : index
    %c0_137 = arith.constant 0 : index
    %188 = vector.load %arg12[%c17, %c0_136, %c0_137] : memref<25x2x2xbf16, #tpu.memory_space<vmem>>, vector<1x2x2xbf16>
    %189 = vector.shape_cast %188 : vector<1x2x2xbf16> to vector<2x2xbf16>
    %cst_138 = arith.constant dense<0.000000e+00> : vector<1x2xf32>
    %190 = tpu.matmul %187, %189, %cst_138 {dimension_numbers = #tpu.dot_dimension_numbers<[1], [0], [0], [1], [0, 0, 1, 1], [], []>} : vector<1x2xbf16>, vector<2x2xbf16>, vector<1x2xf32> -> vector<1x2xf32>
    %191 = arith.addf %185, %190 : vector<1x2xf32>
    %192 = vector.extract_strided_slice %82 {offsets = [18, 0], sizes = [1, 2], strides = [1, 1]} : vector<25x2xf32> to vector<1x2xf32>
    %193 = arith.truncf %192 : vector<1x2xf32> to vector<1x2xbf16>
    %c18 = arith.constant 18 : index
    %c0_139 = arith.constant 0 : index
    %c0_140 = arith.constant 0 : index
    %194 = vector.load %arg12[%c18, %c0_139, %c0_140] : memref<25x2x2xbf16, #tpu.memory_space<vmem>>, vector<1x2x2xbf16>
    %195 = vector.shape_cast %194 : vector<1x2x2xbf16> to vector<2x2xbf16>
    %cst_141 = arith.constant dense<0.000000e+00> : vector<1x2xf32>
    %196 = tpu.matmul %193, %195, %cst_141 {dimension_numbers = #tpu.dot_dimension_numbers<[1], [0], [0], [1], [0, 0, 1, 1], [], []>} : vector<1x2xbf16>, vector<2x2xbf16>, vector<1x2xf32> -> vector<1x2xf32>
    %197 = arith.addf %191, %196 : vector<1x2xf32>
    %198 = vector.extract_strided_slice %82 {offsets = [19, 0], sizes = [1, 2], strides = [1, 1]} : vector<25x2xf32> to vector<1x2xf32>
    %199 = arith.truncf %198 : vector<1x2xf32> to vector<1x2xbf16>
    %c19 = arith.constant 19 : index
    %c0_142 = arith.constant 0 : index
    %c0_143 = arith.constant 0 : index
    %200 = vector.load %arg12[%c19, %c0_142, %c0_143] : memref<25x2x2xbf16, #tpu.memory_space<vmem>>, vector<1x2x2xbf16>
    %201 = vector.shape_cast %200 : vector<1x2x2xbf16> to vector<2x2xbf16>
    %cst_144 = arith.constant dense<0.000000e+00> : vector<1x2xf32>
    %202 = tpu.matmul %199, %201, %cst_144 {dimension_numbers = #tpu.dot_dimension_numbers<[1], [0], [0], [1], [0, 0, 1, 1], [], []>} : vector<1x2xbf16>, vector<2x2xbf16>, vector<1x2xf32> -> vector<1x2xf32>
    %203 = arith.addf %197, %202 : vector<1x2xf32>
    %204 = vector.extract_strided_slice %82 {offsets = [20, 0], sizes = [1, 2], strides = [1, 1]} : vector<25x2xf32> to vector<1x2xf32>
    %205 = arith.truncf %204 : vector<1x2xf32> to vector<1x2xbf16>
    %c20 = arith.constant 20 : index
    %c0_145 = arith.constant 0 : index
    %c0_146 = arith.constant 0 : index
    %206 = vector.load %arg12[%c20, %c0_145, %c0_146] : memref<25x2x2xbf16, #tpu.memory_space<vmem>>, vector<1x2x2xbf16>
    %207 = vector.shape_cast %206 : vector<1x2x2xbf16> to vector<2x2xbf16>
    %cst_147 = arith.constant dense<0.000000e+00> : vector<1x2xf32>
    %208 = tpu.matmul %205, %207, %cst_147 {dimension_numbers = #tpu.dot_dimension_numbers<[1], [0], [0], [1], [0, 0, 1, 1], [], []>} : vector<1x2xbf16>, vector<2x2xbf16>, vector<1x2xf32> -> vector<1x2xf32>
    %209 = arith.addf %203, %208 : vector<1x2xf32>
    %210 = vector.extract_strided_slice %82 {offsets = [21, 0], sizes = [1, 2], strides = [1, 1]} : vector<25x2xf32> to vector<1x2xf32>
    %211 = arith.truncf %210 : vector<1x2xf32> to vector<1x2xbf16>
    %c21 = arith.constant 21 : index
    %c0_148 = arith.constant 0 : index
    %c0_149 = arith.constant 0 : index
    %212 = vector.load %arg12[%c21, %c0_148, %c0_149] : memref<25x2x2xbf16, #tpu.memory_space<vmem>>, vector<1x2x2xbf16>
    %213 = vector.shape_cast %212 : vector<1x2x2xbf16> to vector<2x2xbf16>
    %cst_150 = arith.constant dense<0.000000e+00> : vector<1x2xf32>
    %214 = tpu.matmul %211, %213, %cst_150 {dimension_numbers = #tpu.dot_dimension_numbers<[1], [0], [0], [1], [0, 0, 1, 1], [], []>} : vector<1x2xbf16>, vector<2x2xbf16>, vector<1x2xf32> -> vector<1x2xf32>
    %215 = arith.addf %209, %214 : vector<1x2xf32>
    %216 = vector.extract_strided_slice %82 {offsets = [22, 0], sizes = [1, 2], strides = [1, 1]} : vector<25x2xf32> to vector<1x2xf32>
    %217 = arith.truncf %216 : vector<1x2xf32> to vector<1x2xbf16>
    %c22 = arith.constant 22 : index
    %c0_151 = arith.constant 0 : index
    %c0_152 = arith.constant 0 : index
    %218 = vector.load %arg12[%c22, %c0_151, %c0_152] : memref<25x2x2xbf16, #tpu.memory_space<vmem>>, vector<1x2x2xbf16>
    %219 = vector.shape_cast %218 : vector<1x2x2xbf16> to vector<2x2xbf16>
    %cst_153 = arith.constant dense<0.000000e+00> : vector<1x2xf32>
    %220 = tpu.matmul %217, %219, %cst_153 {dimension_numbers = #tpu.dot_dimension_numbers<[1], [0], [0], [1], [0, 0, 1, 1], [], []>} : vector<1x2xbf16>, vector<2x2xbf16>, vector<1x2xf32> -> vector<1x2xf32>
    %221 = arith.addf %215, %220 : vector<1x2xf32>
    %222 = vector.extract_strided_slice %82 {offsets = [23, 0], sizes = [1, 2], strides = [1, 1]} : vector<25x2xf32> to vector<1x2xf32>
    %223 = arith.truncf %222 : vector<1x2xf32> to vector<1x2xbf16>
    %c23 = arith.constant 23 : index
    %c0_154 = arith.constant 0 : index
    %c0_155 = arith.constant 0 : index
    %224 = vector.load %arg12[%c23, %c0_154, %c0_155] : memref<25x2x2xbf16, #tpu.memory_space<vmem>>, vector<1x2x2xbf16>
    %225 = vector.shape_cast %224 : vector<1x2x2xbf16> to vector<2x2xbf16>
    %cst_156 = arith.constant dense<0.000000e+00> : vector<1x2xf32>
    %226 = tpu.matmul %223, %225, %cst_156 {dimension_numbers = #tpu.dot_dimension_numbers<[1], [0], [0], [1], [0, 0, 1, 1], [], []>} : vector<1x2xbf16>, vector<2x2xbf16>, vector<1x2xf32> -> vector<1x2xf32>
    %227 = arith.addf %221, %226 : vector<1x2xf32>
    %228 = vector.extract_strided_slice %82 {offsets = [24, 0], sizes = [1, 2], strides = [1, 1]} : vector<25x2xf32> to vector<1x2xf32>
    %229 = arith.truncf %228 : vector<1x2xf32> to vector<1x2xbf16>
    %c24 = arith.constant 24 : index
    %c0_157 = arith.constant 0 : index
    %c0_158 = arith.constant 0 : index
    %230 = vector.load %arg12[%c24, %c0_157, %c0_158] : memref<25x2x2xbf16, #tpu.memory_space<vmem>>, vector<1x2x2xbf16>
    %231 = vector.shape_cast %230 : vector<1x2x2xbf16> to vector<2x2xbf16>
    %cst_159 = arith.constant dense<0.000000e+00> : vector<1x2xf32>
    %232 = tpu.matmul %229, %231, %cst_159 {dimension_numbers = #tpu.dot_dimension_numbers<[1], [0], [0], [1], [0, 0, 1, 1], [], []>} : vector<1x2xbf16>, vector<2x2xbf16>, vector<1x2xf32> -> vector<1x2xf32>
    %233 = arith.addf %227, %232 : vector<1x2xf32>
    %c0_160 = arith.constant 0 : index
    %c0_161 = arith.constant 0 : index
    %c0_162 = arith.constant 0 : index
    %234 = vector.load %arg15[%c0_160, %c0_161, %c0_162] : memref<1x1x2xf32, #tpu.memory_space<vmem>>, vector<1x1x2xf32>
    %235 = vector.shape_cast %234 : vector<1x1x2xf32> to vector<1x2xf32>
    %236 = vector.shape_cast %233 : vector<1x2xf32> to vector<1x1x2xf32>
    tpu.vector_store %arg15[%c0_160, %c0_161, %c0_162], %236 {strides = array<i32>} : memref<1x1x2xf32, #tpu.memory_space<vmem>>, vector<1x1x2xf32>,
    return
  }
  func.func @transform_0(%arg0: i32) -> (i32, i32, i32) {
    %c0_i32 = arith.constant 0 : i32
    %c0_i32_0 = arith.constant 0 : i32
    %c0_i32_1 = arith.constant 0 : i32
    return %arg0, %c0_i32, %c0_i32_0 : i32, i32, i32
  }
  func.func @transform_1(%arg0: i32) -> (i32, i32, i32) {
    %c0_i32 = arith.constant 0 : i32
    %c0_i32_0 = arith.constant 0 : i32
    %c0_i32_1 = arith.constant 0 : i32
    return %arg0, %c0_i32, %c0_i32_0 : i32, i32, i32
  }
  func.func @transform_2(%arg0: i32) -> (i32, i32, i32) {
    %c0_i32 = arith.constant 0 : i32
    %c0_i32_0 = arith.constant 0 : i32
    %c0_i32_1 = arith.constant 0 : i32
    %c0_i32_2 = arith.constant 0 : i32
    return %c0_i32, %c0_i32_0, %c0_i32_1 : i32, i32, i32
  }
  func.func @transform_3(%arg0: i32) -> (i32, i32) {
    %c0_i32 = arith.constant 0 : i32
    %c0_i32_0 = arith.constant 0 : i32
    %c0_i32_1 = arith.constant 0 : i32
    return %c0_i32, %c0_i32_0 : i32, i32
  }
  func.func @transform_4(%arg0: i32) -> (i32, i32) {
    %c0_i32 = arith.constant 0 : i32
    %c0_i32_0 = arith.constant 0 : i32
    %c0_i32_1 = arith.constant 0 : i32
    return %c0_i32, %c0_i32_0 : i32, i32
  }
  func.func @transform_5(%arg0: i32) -> (i32, i32) {
    %c0_i32 = arith.constant 0 : i32
    %c0_i32_0 = arith.constant 0 : i32
    %c0_i32_1 = arith.constant 0 : i32
    return %c0_i32, %c0_i32_0 : i32, i32
  }
  func.func @transform_6(%arg0: i32) -> (i32, i32) {
    %c0_i32 = arith.constant 0 : i32
    %c0_i32_0 = arith.constant 0 : i32
    %c0_i32_1 = arith.constant 0 : i32
    return %c0_i32, %c0_i32_0 : i32, i32
  }
  func.func @transform_7(%arg0: i32) -> (i32, i32) {
    %c0_i32 = arith.constant 0 : i32
    %c0_i32_0 = arith.constant 0 : i32
    %c0_i32_1 = arith.constant 0 : i32
    return %c0_i32, %c0_i32_0 : i32, i32
  }
  func.func @transform_8(%arg0: i32) -> (i32, i32) {
    %c0_i32 = arith.constant 0 : i32
    %c0_i32_0 = arith.constant 0 : i32
    %c0_i32_1 = arith.constant 0 : i32
    return %c0_i32, %c0_i32_0 : i32, i32
  }
  func.func @transform_9(%arg0: i32) -> (i32, i32) {
    %c0_i32 = arith.constant 0 : i32
    %c0_i32_0 = arith.constant 0 : i32
    %c0_i32_1 = arith.constant 0 : i32
    return %c0_i32, %c0_i32_0 : i32, i32
  }
  func.func @transform_10(%arg0: i32) -> (i32, i32) {
    %c0_i32 = arith.constant 0 : i32
    %c0_i32_0 = arith.constant 0 : i32
    %c0_i32_1 = arith.constant 0 : i32
    return %c0_i32, %c0_i32_0 : i32, i32
  }
  func.func @transform_11(%arg0: i32) -> (i32, i32, i32) {
    %c0_i32 = arith.constant 0 : i32
    %c0_i32_0 = arith.constant 0 : i32
    %c0_i32_1 = arith.constant 0 : i32
    %c0_i32_2 = arith.constant 0 : i32
    return %c0_i32, %c0_i32_0, %c0_i32_1 : i32, i32, i32
  }
  func.func @transform_12(%arg0: i32) -> (i32, i32) {
    %c0_i32 = arith.constant 0 : i32
    %c0_i32_0 = arith.constant 0 : i32
    %c0_i32_1 = arith.constant 0 : i32
    return %c0_i32, %c0_i32_0 : i32, i32
  }
  func.func @transform_13(%arg0: i32) -> (i32, i32, i32) {
    %c0_i32 = arith.constant 0 : i32
    %c0_i32_0 = arith.constant 0 : i32
    %c0_i32_1 = arith.constant 0 : i32
    return %arg0, %c0_i32, %c0_i32_0 : i32, i32, i32
  }
  func.func @transform_14(%arg0: i32) -> (i32, i32, i32) {
    %c0_i32 = arith.constant 0 : i32
    %c0_i32_0 = arith.constant 0 : i32
    %c0_i32_1 = arith.constant 0 : i32
    return %arg0, %c0_i32, %c0_i32_0 : i32, i32, i32
  }
}

module attributes {stable_mosaic.version = 11 : i64} {
  func.func @_fuse_up_kernel(%arg0: i32, %arg1: i32, %arg2: memref<1x104x2xf32, #tpu.memory_space<vmem>>, %arg3: memref<1x1x2xf32, #tpu.memory_space<vmem>>, %arg4: memref<1x104x2xf32, #tpu.memory_space<vmem>>, %arg5: memref<1x1x2xf32, #tpu.memory_space<vmem>>, %arg6: memref<1x104x2xf32, #tpu.memory_space<vmem>>, %arg7: memref<1x1x2xf32, #tpu.memory_space<vmem>>, %arg8: memref<2x4xf32, #tpu.memory_space<vmem>>, %arg9: memref<1x4xf32, #tpu.memory_space<vmem>>, %arg10: memref<2x4xf32, #tpu.memory_space<vmem>>, %arg11: memref<1x4xf32, #tpu.memory_space<vmem>>, %arg12: memref<2x4xf32, #tpu.memory_space<vmem>>, %arg13: memref<1x4xf32, #tpu.memory_space<vmem>>, %arg14: memref<4x4xf32, #tpu.memory_space<vmem>>, %arg15: memref<4x4xf32, #tpu.memory_space<vmem>>, %arg16: memref<4x4xf32, #tpu.memory_space<vmem>>, %arg17: memref<1x4xf32, #tpu.memory_space<vmem>>, %arg18: memref<1x104x4xf32, #tpu.memory_space<vmem>>) attributes {dimension_semantics = [#tpu.dimension_semantics<parallel>, #tpu.dimension_semantics<parallel>], iteration_bounds = array<i64: 2, 1>, scalar_prefetch = 0 : i64, scratch_operands = 0 : i64, tpu.core_type = #tpu.core_type<tc>, window_params = [{transform_indices = @transform_0, window_bounds = array<i64: 1, 104, 2>}, {transform_indices = @transform_1, window_bounds = array<i64: 1, 1, 2>}, {transform_indices = @transform_2, window_bounds = array<i64: 1, 104, 2>}, {transform_indices = @transform_3, window_bounds = array<i64: 1, 1, 2>}, {transform_indices = @transform_4, window_bounds = array<i64: 1, 104, 2>}, {transform_indices = @transform_5, window_bounds = array<i64: 1, 1, 2>}, {pipeline_mode = #tpu.pipeline_mode<synchronous>, transform_indices = @transform_6, window_bounds = array<i64: 2, 4>}, {pipeline_mode = #tpu.pipeline_mode<synchronous>, transform_indices = @transform_7, window_bounds = array<i64: 1, 4>}, {pipeline_mode = #tpu.pipeline_mode<synchronous>, transform_indices = @transform_8, window_bounds = array<i64: 2, 4>}, {pipeline_mode = #tpu.pipeline_mode<synchronous>, transform_indices = @transform_9, window_bounds = array<i64: 1, 4>}, {pipeline_mode = #tpu.pipeline_mode<synchronous>, transform_indices = @transform_10, window_bounds = array<i64: 2, 4>}, {pipeline_mode = #tpu.pipeline_mode<synchronous>, transform_indices = @transform_11, window_bounds = array<i64: 1, 4>}, {pipeline_mode = #tpu.pipeline_mode<synchronous>, transform_indices = @transform_12, window_bounds = array<i64: 4, 4>}, {pipeline_mode = #tpu.pipeline_mode<synchronous>, transform_indices = @transform_13, window_bounds = array<i64: 4, 4>}, {pipeline_mode = #tpu.pipeline_mode<synchronous>, transform_indices = @transform_14, window_bounds = array<i64: 4, 4>}, {pipeline_mode = #tpu.pipeline_mode<synchronous>, transform_indices = @transform_15, window_bounds = array<i64: 1, 4>}, {transform_indices = @transform_16, window_bounds = array<i64: 1, 104, 4>}]} {
    %cst = arith.constant 0.000000e+00 : f32
    %0 = vector.broadcast %cst : f32 to vector<104x4xf32>
    %c0 = arith.constant 0 : index
    %c0_0 = arith.constant 0 : index
    %1 = vector.load %arg17[%c0, %c0_0] : memref<1x4xf32, #tpu.memory_space<vmem>>, vector<1x4xf32>
    %2 = vector.broadcast %1 : vector<1x4xf32> to vector<104x4xf32>
    %3 = arith.addf %0, %2 : vector<104x4xf32>
    %c0_1 = arith.constant 0 : index
    %c0_2 = arith.constant 0 : index
    %c0_3 = arith.constant 0 : index
    %4 = vector.load %arg2[%c0_1, %c0_2, %c0_3] : memref<1x104x2xf32, #tpu.memory_space<vmem>>, vector<1x104x2xf32>
    %5 = vector.shape_cast %4 : vector<1x104x2xf32> to vector<104x2xf32>
    %c0_4 = arith.constant 0 : index
    %c0_5 = arith.constant 0 : index
    %c0_6 = arith.constant 0 : index
    %6 = vector.load %arg3[%c0_4, %c0_5, %c0_6] : memref<1x1x2xf32, #tpu.memory_space<vmem>>, vector<1x1x2xf32>
    %7 = vector.shape_cast %6 : vector<1x1x2xf32> to vector<1x2xf32>
    %8 = vector.broadcast %7 : vector<1x2xf32> to vector<104x2xf32>
    %9 = arith.mulf %5, %8 : vector<104x2xf32>
    %c0_7 = arith.constant 0 : index
    %c0_8 = arith.constant 0 : index
    %10 = vector.load %arg8[%c0_7, %c0_8] : memref<2x4xf32, #tpu.memory_space<vmem>>, vector<2x4xf32>
    %cst_9 = arith.constant dense<0.000000e+00> : vector<104x4xf32>
    %11 = tpu.matmul %9, %10, %cst_9 {dimension_numbers = #tpu.dot_dimension_numbers<[1], [0], [0], [1], [0, 0, 1, 1], [], []>} : vector<104x2xf32>, vector<2x4xf32>, vector<104x4xf32> -> vector<104x4xf32>
    %c0_10 = arith.constant 0 : index
    %c0_11 = arith.constant 0 : index
    %12 = vector.load %arg9[%c0_10, %c0_11] : memref<1x4xf32, #tpu.memory_space<vmem>>, vector<1x4xf32>
    %13 = vector.broadcast %12 : vector<1x4xf32> to vector<104x4xf32>
    %14 = arith.addf %11, %13 : vector<104x4xf32>
    %c0_12 = arith.constant 0 : index
    %c0_13 = arith.constant 0 : index
    %15 = vector.load %arg14[%c0_12, %c0_13] : memref<4x4xf32, #tpu.memory_space<vmem>>, vector<4x4xf32>
    %cst_14 = arith.constant dense<0.000000e+00> : vector<104x4xf32>
    %16 = tpu.matmul %14, %15, %cst_14 {dimension_numbers = #tpu.dot_dimension_numbers<[1], [0], [0], [1], [0, 0, 1, 1], [], []>} : vector<104x4xf32>, vector<4x4xf32>, vector<104x4xf32> -> vector<104x4xf32>
    %17 = arith.addf %3, %16 : vector<104x4xf32>
    %c0_15 = arith.constant 0 : index
    %c0_16 = arith.constant 0 : index
    %c0_17 = arith.constant 0 : index
    %18 = vector.load %arg4[%c0_15, %c0_16, %c0_17] : memref<1x104x2xf32, #tpu.memory_space<vmem>>, vector<1x104x2xf32>
    %19 = vector.shape_cast %18 : vector<1x104x2xf32> to vector<104x2xf32>
    %c0_18 = arith.constant 0 : index
    %c0_19 = arith.constant 0 : index
    %c0_20 = arith.constant 0 : index
    %20 = vector.load %arg5[%c0_18, %c0_19, %c0_20] : memref<1x1x2xf32, #tpu.memory_space<vmem>>, vector<1x1x2xf32>
    %21 = vector.shape_cast %20 : vector<1x1x2xf32> to vector<1x2xf32>
    %22 = vector.broadcast %21 : vector<1x2xf32> to vector<104x2xf32>
    %23 = arith.mulf %19, %22 : vector<104x2xf32>
    %c0_21 = arith.constant 0 : index
    %c0_22 = arith.constant 0 : index
    %24 = vector.load %arg10[%c0_21, %c0_22] : memref<2x4xf32, #tpu.memory_space<vmem>>, vector<2x4xf32>
    %cst_23 = arith.constant dense<0.000000e+00> : vector<104x4xf32>
    %25 = tpu.matmul %23, %24, %cst_23 {dimension_numbers = #tpu.dot_dimension_numbers<[1], [0], [0], [1], [0, 0, 1, 1], [], []>} : vector<104x2xf32>, vector<2x4xf32>, vector<104x4xf32> -> vector<104x4xf32>
    %c0_24 = arith.constant 0 : index
    %c0_25 = arith.constant 0 : index
    %26 = vector.load %arg11[%c0_24, %c0_25] : memref<1x4xf32, #tpu.memory_space<vmem>>, vector<1x4xf32>
    %27 = vector.broadcast %26 : vector<1x4xf32> to vector<104x4xf32>
    %28 = arith.addf %25, %27 : vector<104x4xf32>
    %c0_26 = arith.constant 0 : index
    %c0_27 = arith.constant 0 : index
    %29 = vector.load %arg15[%c0_26, %c0_27] : memref<4x4xf32, #tpu.memory_space<vmem>>, vector<4x4xf32>
    %cst_28 = arith.constant dense<0.000000e+00> : vector<104x4xf32>
    %30 = tpu.matmul %28, %29, %cst_28 {dimension_numbers = #tpu.dot_dimension_numbers<[1], [0], [0], [1], [0, 0, 1, 1], [], []>} : vector<104x4xf32>, vector<4x4xf32>, vector<104x4xf32> -> vector<104x4xf32>
    %31 = arith.addf %17, %30 : vector<104x4xf32>
    %c0_29 = arith.constant 0 : index
    %c0_30 = arith.constant 0 : index
    %c0_31 = arith.constant 0 : index
    %32 = vector.load %arg6[%c0_29, %c0_30, %c0_31] : memref<1x104x2xf32, #tpu.memory_space<vmem>>, vector<1x104x2xf32>
    %33 = vector.shape_cast %32 : vector<1x104x2xf32> to vector<104x2xf32>
    %c0_32 = arith.constant 0 : index
    %c0_33 = arith.constant 0 : index
    %c0_34 = arith.constant 0 : index
    %34 = vector.load %arg7[%c0_32, %c0_33, %c0_34] : memref<1x1x2xf32, #tpu.memory_space<vmem>>, vector<1x1x2xf32>
    %35 = vector.shape_cast %34 : vector<1x1x2xf32> to vector<1x2xf32>
    %36 = vector.broadcast %35 : vector<1x2xf32> to vector<104x2xf32>
    %37 = arith.mulf %33, %36 : vector<104x2xf32>
    %c0_35 = arith.constant 0 : index
    %c0_36 = arith.constant 0 : index
    %38 = vector.load %arg12[%c0_35, %c0_36] : memref<2x4xf32, #tpu.memory_space<vmem>>, vector<2x4xf32>
    %cst_37 = arith.constant dense<0.000000e+00> : vector<104x4xf32>
    %39 = tpu.matmul %37, %38, %cst_37 {dimension_numbers = #tpu.dot_dimension_numbers<[1], [0], [0], [1], [0, 0, 1, 1], [], []>} : vector<104x2xf32>, vector<2x4xf32>, vector<104x4xf32> -> vector<104x4xf32>
    %c0_38 = arith.constant 0 : index
    %c0_39 = arith.constant 0 : index
    %40 = vector.load %arg13[%c0_38, %c0_39] : memref<1x4xf32, #tpu.memory_space<vmem>>, vector<1x4xf32>
    %41 = vector.broadcast %40 : vector<1x4xf32> to vector<104x4xf32>
    %42 = arith.addf %39, %41 : vector<104x4xf32>
    %c0_40 = arith.constant 0 : index
    %c0_41 = arith.constant 0 : index
    %43 = vector.load %arg16[%c0_40, %c0_41] : memref<4x4xf32, #tpu.memory_space<vmem>>, vector<4x4xf32>
    %cst_42 = arith.constant dense<0.000000e+00> : vector<104x4xf32>
    %44 = tpu.matmul %42, %43, %cst_42 {dimension_numbers = #tpu.dot_dimension_numbers<[1], [0], [0], [1], [0, 0, 1, 1], [], []>} : vector<104x4xf32>, vector<4x4xf32>, vector<104x4xf32> -> vector<104x4xf32>
    %45 = arith.addf %31, %44 : vector<104x4xf32>
    %cst_43 = arith.constant 0.000000e+00 : f32
    %46 = vector.broadcast %cst_43 : f32 to vector<104x4xf32>
    %47 = arith.maximumf %45, %46 : vector<104x4xf32>
    %c0_44 = arith.constant 0 : index
    %c0_45 = arith.constant 0 : index
    %c0_46 = arith.constant 0 : index
    %48 = vector.load %arg18[%c0_44, %c0_45, %c0_46] : memref<1x104x4xf32, #tpu.memory_space<vmem>>, vector<1x104x4xf32>
    %49 = vector.shape_cast %48 : vector<1x104x4xf32> to vector<104x4xf32>
    %50 = vector.shape_cast %47 : vector<104x4xf32> to vector<1x104x4xf32>
    tpu.vector_store %arg18[%c0_44, %c0_45, %c0_46], %50 {strides = array<i32>} : memref<1x104x4xf32, #tpu.memory_space<vmem>>, vector<1x104x4xf32>,
    return
  }
  func.func @transform_0(%arg0: i32, %arg1: i32) -> (i32, i32, i32) {
    %c0_i32 = arith.constant 0 : i32
    %c0_i32_0 = arith.constant 0 : i32
    return %arg0, %arg1, %c0_i32 : i32, i32, i32
  }
  func.func @transform_1(%arg0: i32, %arg1: i32) -> (i32, i32, i32) {
    %c0_i32 = arith.constant 0 : i32
    %c0_i32_0 = arith.constant 0 : i32
    %c0_i32_1 = arith.constant 0 : i32
    return %arg0, %c0_i32, %c0_i32_0 : i32, i32, i32
  }
  func.func @transform_2(%arg0: i32, %arg1: i32) -> (i32, i32, i32) {
    %c0_i32 = arith.constant 0 : i32
    %c0_i32_0 = arith.constant 0 : i32
    return %arg0, %arg1, %c0_i32 : i32, i32, i32
  }
  func.func @transform_3(%arg0: i32, %arg1: i32) -> (i32, i32, i32) {
    %c0_i32 = arith.constant 0 : i32
    %c0_i32_0 = arith.constant 0 : i32
    %c0_i32_1 = arith.constant 0 : i32
    return %arg0, %c0_i32, %c0_i32_0 : i32, i32, i32
  }
  func.func @transform_4(%arg0: i32, %arg1: i32) -> (i32, i32, i32) {
    %c0_i32 = arith.constant 0 : i32
    %c0_i32_0 = arith.constant 0 : i32
    return %arg0, %arg1, %c0_i32 : i32, i32, i32
  }
  func.func @transform_5(%arg0: i32, %arg1: i32) -> (i32, i32, i32) {
    %c0_i32 = arith.constant 0 : i32
    %c0_i32_0 = arith.constant 0 : i32
    %c0_i32_1 = arith.constant 0 : i32
    return %arg0, %c0_i32, %c0_i32_0 : i32, i32, i32
  }
  func.func @transform_6(%arg0: i32, %arg1: i32) -> (i32, i32) {
    %c0_i32 = arith.constant 0 : i32
    %c0_i32_0 = arith.constant 0 : i32
    %c0_i32_1 = arith.constant 0 : i32
    return %c0_i32, %c0_i32_0 : i32, i32
  }
  func.func @transform_7(%arg0: i32, %arg1: i32) -> (i32, i32) {
    %c0_i32 = arith.constant 0 : i32
    %c0_i32_0 = arith.constant 0 : i32
    %c0_i32_1 = arith.constant 0 : i32
    return %c0_i32, %c0_i32_0 : i32, i32
  }
  func.func @transform_8(%arg0: i32, %arg1: i32) -> (i32, i32) {
    %c0_i32 = arith.constant 0 : i32
    %c0_i32_0 = arith.constant 0 : i32
    %c0_i32_1 = arith.constant 0 : i32
    return %c0_i32, %c0_i32_0 : i32, i32
  }
  func.func @transform_9(%arg0: i32, %arg1: i32) -> (i32, i32) {
    %c0_i32 = arith.constant 0 : i32
    %c0_i32_0 = arith.constant 0 : i32
    %c0_i32_1 = arith.constant 0 : i32
    return %c0_i32, %c0_i32_0 : i32, i32
  }
  func.func @transform_10(%arg0: i32, %arg1: i32) -> (i32, i32) {
    %c0_i32 = arith.constant 0 : i32
    %c0_i32_0 = arith.constant 0 : i32
    %c0_i32_1 = arith.constant 0 : i32
    return %c0_i32, %c0_i32_0 : i32, i32
  }
  func.func @transform_11(%arg0: i32, %arg1: i32) -> (i32, i32) {
    %c0_i32 = arith.constant 0 : i32
    %c0_i32_0 = arith.constant 0 : i32
    %c0_i32_1 = arith.constant 0 : i32
    return %c0_i32, %c0_i32_0 : i32, i32
  }
  func.func @transform_12(%arg0: i32, %arg1: i32) -> (i32, i32) {
    %c0_i32 = arith.constant 0 : i32
    %c0_i32_0 = arith.constant 0 : i32
    %c0_i32_1 = arith.constant 0 : i32
    return %c0_i32, %c0_i32_0 : i32, i32
  }
  func.func @transform_13(%arg0: i32, %arg1: i32) -> (i32, i32) {
    %c0_i32 = arith.constant 0 : i32
    %c0_i32_0 = arith.constant 0 : i32
    %c0_i32_1 = arith.constant 0 : i32
    return %c0_i32, %c0_i32_0 : i32, i32
  }
  func.func @transform_14(%arg0: i32, %arg1: i32) -> (i32, i32) {
    %c0_i32 = arith.constant 0 : i32
    %c0_i32_0 = arith.constant 0 : i32
    %c0_i32_1 = arith.constant 0 : i32
    return %c0_i32, %c0_i32_0 : i32, i32
  }
  func.func @transform_15(%arg0: i32, %arg1: i32) -> (i32, i32) {
    %c0_i32 = arith.constant 0 : i32
    %c0_i32_0 = arith.constant 0 : i32
    %c0_i32_1 = arith.constant 0 : i32
    return %c0_i32, %c0_i32_0 : i32, i32
  }
  func.func @transform_16(%arg0: i32, %arg1: i32) -> (i32, i32, i32) {
    %c0_i32 = arith.constant 0 : i32
    %c0_i32_0 = arith.constant 0 : i32
    return %arg0, %arg1, %c0_i32 : i32, i32, i32
  }
}

</mosaic_0001>

<bundles_post_ra>
// kernel: dmdconv_forward.4
= control target key start
LH: loop header
LB: loop body
LE: loop exit
PB: predicated region body
PF: predicated region fallthrough
CT: control target
= control target key end

     0   :  { %s3808_s29 = smov 0   ;;  %s4377_s0 = inlined_call_operand.vmem [shape: bf16[8,182,4], index: 0, kind: input, shape index: {}]   ;;  %s4378_s1 = inlined_call_operand.vmem [shape: bf16[2,256,4], index: 1, kind: input, shape index: {}]   ;;  %s4379_s2 = inlined_call_operand.vmem [shape: bf16[9,4,4], index: 2, kind: input, shape index: {}]   ;;  %s4380_s3 = inlined_call_operand.vmem [shape: f32[1,4], index: 3, kind: input, shape index: {}]   ;;  %s4381_s4 = inlined_call_operand.vmem [shape: bf16[4,2], index: 4, kind: input, shape index: {}]   ;;  %s4382_s5 = inlined_call_operand.vmem [shape: f32[1,2], index: 5, kind: input, shape index: {}]   ;;  %s4383_s6 = inlined_call_operand.vmem [shape: bf16[2,2], index: 6, kind: input, shape index: {}]   ;;  %s4384_s7 = inlined_call_operand.vmem [shape: f32[1,2], index: 7, kind: input, shape index: {}]   ;;  %s4385_s8 = inlined_call_operand.vmem [shape: bf16[1,256], index: 8, kind: input, shape index: {}]   ;;  %s4386_s9 = inlined_call_operand.vmem [shape: bf16[4,2], index: 9, kind: input, shape index: {}]   ;;  %s4387_s10 = inlined_call_operand.vmem [shape: f32[1,2], index: 10, kind: input, shape index: {}]   ;;  %s4388_s11 = inlined_call_operand.vmem [shape: bf16[1,2,2], index: 11, kind: input, shape index: {}]   ;;  %s4389_s12 = inlined_call_operand.vmem [shape: f32[1,2], index: 12, kind: input, shape index: {}]   ;;  %s4390_s13 = inlined_call_operand.vmem [shape: f32[2,104,2], index: 13, kind: output, shape index: {0}]   ;;  %s4391_s14 = inlined_call_operand.vmem [shape: f32[2,1,2], index: 14, kind: output, shape index: {1}]  }
   0x1 LB: > { %s3814_s30 = sadd.s32 4294967295, %s3728_s29   ;;  %p2938_p0 = scmp.ge.s32.totalorder %s3728_s29, 1  ;;  %s3728_s29 = sphi %s3808_s29, %s25_s29  }
   0x2   : > { %p427_p1 = scmp.lt.s32.totalorder %s3728_s29, 3 }
   0x4   : > { %p428_p2 = pnand %p2938_p0, %p427_p1 }
   0x5   : > { %v2957_v0 = vld [vmem:[%s4379_s2 + $0x2] sm:$0x3] (!%p428_p2)  ;;  %vm588_vm0 = vcmask (!%p428_p2), 1041408   ;;  %s2939_s17 = sshll.u32 (!%p428_p2), %s3814_s30, 2  ;;  %v3730_v1 = vmov (!%p428_p2), 0.0   ;;  %vm3731_vm1 = vmmov (!%p428_p2), 0  }
   0x6   : > { %431 = sbr.rel (%p428_p2) target bundleno = 1150 (0x47e), region = 72  ;;  %3292 = vmatprep.subr.bf16.mxu0 (!%p428_p2), %v3730_v1  ;;  %3634 = vmatprep.subr.bf16.mxu1 (!%p428_p2), %v3730_v1  ;;  %v590_v2 = vsel (!%p428_p2), %vm588_vm0, %v2957_v0, 0  ;;  %p483_p3 = scmp.lt.s32.totalorder (!%p428_p2), %s2939_s17, 7  ;;  %v2986_v3 = vld [vmem:[%s4379_s2 + $0x4] sm:$0x3] (!%p428_p2)  ;;  %vm566_vm2 = vcmask (!%p428_p2), 31744  }
   0x7   : > { %3293 = vmatpush3.bf16.msra.mxu0 (!%p428_p2), %v590_v2  ;;  %3635 = vmatpush3.bf16.msra.mxu1 (!%p428_p2), %v590_v2  ;;  %v516_v4 = vld [vmem:[%s4379_s2] sm:$0x3] (!%p428_p2)  ;;  %v954_v6 = vsel (!%p428_p2), %vm588_vm0, %v2986_v3, 0  ;;  %v3014_v12 = vld [vmem:[%s4379_s2 + $0x6] sm:$0x3] (!%p428_p2)  ;;  %vm2119_vm5 = vcmask (!%p428_p2), 1044480  }
   0x8   : > { %3294 = vmatprep.mubr.msk.bf16.mxu0 (!%p428_p2), %vm3731_vm1, %v3730_v1  ;;  %3314 = vmatprep.mubr.msk.bf16.mxu1 (!%p428_p2), %vm3731_vm1, %v3730_v1  ;;  %v735_v8 = vsel (!%p428_p2), %vm588_vm0, %v516_v4, 0  ;;  %v1128_v14 = vsel (!%p428_p2), %vm588_vm0, %v3014_v12, 0  ;;  %vm876_vm3 = vsmask.f32 (!%p428_p2), 7424  ;;  %v3042_v28 = vld [vmem:[%s4379_s2 + $0x8] sm:$0x3] (!%p428_p2) }
   0x9   : > { %3352 = vmatprep.subr.bf16.mxu0 (!%p428_p2), %v3730_v1  ;;  %3322 = vmatprep.subr.bf16.mxu1 (!%p428_p2), %v3730_v1  ;;  %v1302_v33 = vsel (!%p428_p2), %vm588_vm0, %v3042_v28, 0  ;;  %v3071_v58 = vld [vmem:[%s4379_s2 + $0xa] sm:$0x3] (!%p428_p2)  ;;  %v3115_v28 = vld [vmem:[%s4379_s2 + $0xe] sm:$0x3] (!%p428_p2)  ;;  %p489_p4 = scmp.lt.s32.totalorder (!%p428_p2), %s3814_s30, 1 }
   0xa   : > { %v1533_v63 = vsel (!%p428_p2), %vm588_vm0, %v3071_v58, 0  ;;  %vm1687_vm4 = vsmask.f32 (!%p428_p2), 5376  ;;  %vm2442_vm6 = vcmask (!%p428_p2), 1040384   ;;  %vm2420_vm7 = vcmask (!%p428_p2), 15360  }
   0xb   : > { %vm2840_vm8 = vcmask (!%p428_p2), 8192  }
   0xd   : > { %s4393_s17 = smov (!%p483_p3, %s2939_s17), 7  ;;  %s4395_s30 = smov (!%p489_p4, %s3814_s30), 1 }
   0xe   : > { %s3636_s18 = smul.u32 92, %s4393_s17  ;;  %s3177_s26 = sshll.u32 %s4395_s30, 7 }
   0xf   : > { %s4208_s15 = scalar_lea.vmem %s4378_s1, %s3177_s26  ;;  %s3637_s28 = smul.u32 104, %s4395_s30 }
  0x10   : > { %s3837_s23 = scalar_lea.vmem %s4377_s0, %s3636_s18  ;;  %s501_s26 = scalar_lea.vmem %s4391_s14, %s4395_s30 }
  0x11   : > { %v3649_v5 = vld [vmem:[%s3837_s23 + $0x5c] sm:$0xff]   ;;  %v3650_v7 = vld [vmem:[%s3837_s23 + $0x84] sm:$0xff]   ;;  %v3652_v10 = vld [vmem:[%s3837_s23 + $0x8c] ss:$0 sps:$4 sm:$0xff]   ;;  %s4335_s19 = scalar_lea.vmem %s4390_s13, %s3637_s28 }
  0x12   : > { %3295 = vmatmul.mubr.msk.bf16.vlgmr.msra.gmra.mrb[0].mxu0 %vm566_vm2, %v3649_v5  ;;  %3315 = vmatmul.mubr.msk.bf16.vlgmr.msra.gmra.mrb[0].mxu1 %vm566_vm2, %v3650_v7  ;;  %v3651_v9 = vld [vmem:[%s3837_s23 + $0x64] sm:$0xff]   ;;  %v3653_v11 = vld [vmem:[%s3837_s23 + $0x6c] sm:$0xff]   ;;  %v3655_v15 = vld [vmem:[%s3837_s23 + $0x74] sm:$0xff]  }
  0x13   : > { %3353 = vmatpush3.bf16.msra.mxu0 %v954_v6  ;;  %3298 = vmatprep.mubr.msk.bf16.mxu0 %vm3731_vm1, %v3730_v1  ;;  %v3654_v13 = vld [vmem:[%s3837_s23] sm:$0xff]   ;;  %v3656_v16 = vld [vmem:[%s3837_s23 + $0x8] sm:$0xff]   ;;  %v3658_v21 = vld [vmem:[%s3837_s23 + $0x10] sm:$0xff]  }
  0x14   : > { %3318 = vmatprep.mubr.msk.bf16.mxu1 %vm3731_vm1, %v3730_v1  ;;  %3323 = vmatpush3.bf16.msra.mxu1 %v735_v8  ;;  %v3660_v17 = vld [vmem:[%s3837_s23] sm:$0xff]   ;;  %v3661_v18 = vld [vmem:[%s3837_s23 + $0x8] sm:$0xff]   ;;  %v3663_v27 = vld [vmem:[%s3837_s23 + $0x10] sm:$0xff]  }
  0x15   : > { %3412 = vmatprep.subr.bf16.mxu0 %v3730_v1  ;;  %3382 = vmatprep.subr.bf16.mxu1 %v3730_v1  ;;  %v880_v19 = vshll.u32 %v3660_v17, 16  ;;  %v3657_v20 = vld [vmem:[%s3837_s23 + $0x7c] sm:$0xff]   ;;  %v878_v22 = vshrl.u32 %v3660_v17, 16  ;;  %v885_v24 = vshll.u32 %v3661_v18, 16  ;;  %v889_v31 = vshrl.u32 %v3661_v18, 16  ;;  %v3664_v44 = vld [vmem:[%s3837_s23 + $0x28] sm:$0xff]  }
  0x16   : > { %v3659_v29 = vld [vmem:[%s3837_s23 + $0x18] sm:$0xff]   ;;  %v893_v32 = vshll.u32 %v3663_v27, 16  ;;  %v3662_v37 = vld [vmem:[%s3837_s23 + $0x20] sm:$0xff]   ;;  %v897_v39 = vshrl.u32 %v3663_v27, 16  ;;  %v3668_v50 = vld [vmem:[%s3837_s23 + $0x28] sm:$0xff]  }
  0x17   : > { %v882_v23 = vrot.slane %v880_v19, 1  ;;  %v887_v26 = vrot.slane %v885_v24, 1  ;;  %v3665_v36 = vld [vmem:[%s3837_s23 + $0x18] sm:$0xff]   ;;  %v3667_v43 = vld [vmem:[%s3837_s23 + $0x20] sm:$0xff]   ;;  %v3666_v51 = vld [vmem:[%s3837_s23 + $0x30] ss:$0 sps:$4 sm:$0xff]  }
  0x18   : > { %v895_v35 = vrot.slane %v893_v32, 1  ;;  %v901_v40 = vshll.u32 %v3665_v36, 16  ;;  %v905_v46 = vshrl.u32 %v3665_v36, 16  ;;  %v909_v47 = vshll.u32 %v3667_v43, 16  ;;  %v3670_v57 = vld [vmem:[%s3837_s23 + $0x30] sm:$0x1f]  }
  0x19   : > { %v883_v25 = vor.u32 %v882_v23, %v878_v22  ;;  %v891_v34 = vor.u32 %v889_v31, %v887_v26  ;;  %v913_v53 = vshrl.u32 %v3667_v43, 16  ;;  %v917_v54 = vshll.u32 %v3668_v50, 16  ;;  %v3669_v60 = vld [vmem:[%s3837_s23 + $0xb8] sm:$0xff]   ;;  %v3671_v4 = vld [vmem:[%s3837_s23 + $0xc0] sm:$0xff]   ;;  %v3672_v7 = vld [vmem:[%s3837_s23 + $0xc8] sm:$0xff]  }
  0x1a   : > { %3299 = vmatmul.mubr.msk.bf16.gmra.mrb[4].mxu0 %vm566_vm2, %v3651_v9  ;;  %3319 = vmatmul.mubr.msk.bf16.gmra.mrb[4].mxu1 %vm566_vm2, %v3652_v10  ;;  %v899_v41 = vor.u32 %v897_v39, %v895_v35  ;;  %v903_v42 = vrot.slane %v901_v40, 1  ;;  %v911_v49 = vrot.slane %v909_v47, 1  ;;  %v921_v61 = vshrl.u32 %v3668_v50, 16  ;;  %v3086_v8 = vld [vmem:[%s4379_s2 + $0xc] sm:$0x3]  ;;  %v3674_v9 = vld [vmem:[%s3837_s23 + $0x114] sm:$0xff]  }
  0x1b   : > { %3302 = vmatprep.mubr.msk.bf16.mxu0 %vm3731_vm1, %v3730_v1  ;;  %3324 = vmatprep.mubr.msk.bf16.mxu1 %vm3731_vm1, %v3730_v1  ;;  %v888_v30 = vsel %vm876_vm3, %v883_v25, %v887_v26  ;;  %v896_v38 = vsel %vm876_vm3, %v891_v34, %v895_v35  ;;  %v919_v56 = vrot.slane %v917_v54, 1  ;;  %v925_v62 = vshll.u32 %v3670_v57, 16  ;;  %v3673_v10 = vld [vmem:[%s3837_s23 + $0xd0] sm:$0xff]   ;;  %v3676_v12 = vld [vmem:[%s3837_s23 + $0x11c] sm:$0xff]   ;;  %v3685_v26 = vld [vmem:[%s3837_s23 + $0xc8] sm:$0xff]  }
  0x1c   : > { %v904_v45 = vsel %vm876_vm3, %v899_v41, %v903_v42  ;;  %v907_v48 = vor.u32 %v905_v46, %v903_v42  ;;  %v915_v55 = vor.u32 %v913_v53, %v911_v49  ;;  %v929_v5 = vshrl.u32 %v3670_v57, 16  ;;  %v3683_v17 = vld [vmem:[%s3837_s23 + $0xc0] sm:$0xff]   ;;  %v3680_v19 = vld [vmem:[%s3837_s23 + $0x12c] sm:$0xff]   ;;  %v3681_v27 = vld [vmem:[%s3837_s23 + $0x134] sm:$0xff]  }
  0x1d   : > { %v923_v0 = vor.u32 %v921_v61, %v919_v56  ;;  %v927_v2 = vrot.slane %v925_v62, 1  ;;  %v1464_v23 = vshll.u32 %v3683_v17, 16  ;;  %v1472_v31 = vshll.u32 %v3685_v26, 16  ;;  %v3687_v35 = vld [vmem:[%s3837_s23 + $0xd0] sm:$0xff]   ;;  %v1636_v36 = vld [vmem:[%s3837_s23 + $0x4] sm:$0xc] }
  0x1e   : > { %v912_v52 = vsel %vm876_vm3, %v907_v48, %v911_v49  ;;  %v920_v59 = vsel %vm876_vm3, %v915_v55, %v919_v56  ;;  %v2010_v32 = vsel %vm588_vm0, %v3115_v28, 0  ;;  %v4024_v40 = vld [vmem:[%s3837_s23 + $0xc] sm:$0xff]   ;;  %v1476_v42 = vshrl.u32 %v3685_v26, 16  ;;  %v3688_v50 = vld [vmem:[%s3837_s23 + $0xd8] sm:$0xff]  }
  0x1f   : > { %v928_v3 = vsel %vm876_vm3, %v923_v0, %v927_v2  ;;  %v931_v6 = vor.u32 %v929_v5, %v927_v2  ;;  %v1466_v25 = vrot.slane %v1464_v23, 1  ;;  %v1474_v34 = vrot.slane %v1472_v31, 1  ;;  %v4038_v56 = vld [vmem:[%s3837_s23 + $0x14] sm:$0xff]  }
  0x20   : > { %v1480_v43 = vshll.u32 %v3687_v35, 16  ;;  %v1697_v46 = vshrl.u32 %v4024_v40, 16  ;;  %v1700_v47 = vshll.u32 %v4024_v40, 16  ;;  %v1484_v58 = vshrl.u32 %v3687_v35, 16 }
  0x21   : > { %v1478_v48 = vor.u32 %v1476_v42, %v1474_v34  ;;  %v1706_v62 = vshrl.u32 %v4038_v56, 16 }
  0x22   : > { %3303 = vmatmul.mubr.msk.bf16.gmra.mrb[8].mxu0 %vm566_vm2, %v3653_v11  ;;  %3325 = vmatmul.mubr.msk.bf16.vlgmr.msra.gmra.mrb[8].mxu1 %vm566_vm2, %v3654_v13  ;;  %v1772_v11 = vsel %vm588_vm0, %v3086_v8, 0  ;;  %v3675_v13 = vld [vmem:[%s3837_s23 + $0xd8] sm:$0xff]   ;;  %v1482_v49 = vrot.slane %v1480_v43, 1  ;;  %v1699_v54 = vrot.slane %v1697_v46, 2  ;;  %v1702_v55 = vrot.slane %v1700_v47, 3 }
  0x23   : > { %3306 = vmatprep.mubr.msk.bf16.mxu0 %vm3731_vm1, %v3730_v1  ;;  %3328 = vmatprep.mubr.msk.bf16.mxu1 %vm3731_vm1, %v3730_v1  ;;  %v4055_v8 = vld [vmem:[%s3837_s23 + $0x1c] sm:$0xff]  }
  0x24   : > { %3383 = vmatpush3.bf16.msra.mxu1 %v1128_v14  ;;  %v3678_v14 = vld [vmem:[%s3837_s23 + $0x124] sm:$0xff]   ;;  %v1483_v57 = vsel %vm876_vm3, %v1478_v48, %v1482_v49  ;;  %v1703_v61 = vor.u32 %v1702_v55, %v1699_v54  ;;  %v1486_v0 = vor.u32 %v1484_v58, %v1482_v49  ;;  %v3700_v58 = vld [vmem:[%s3837_s23 + $0x70] sm:$0xff]  }
  0x25   : > { %3442 = vmatprep.subr.bf16.mxu1 %v3730_v1 }
  0x2a   : > { %3307 = vmatmul.mubr.msk.bf16.gmra.mrb[12].mxu0 %vm566_vm2, %v3655_v15  ;;  %3329 = vmatmul.mubr.msk.bf16.gmra.mrb[12].mxu1 %vm566_vm2, %v3656_v16  ;;  %v3677_v15 = vld [vmem:[%s3837_s23 + $0xe0] sm:$0xff]   ;;  %v3682_v16 = vld [vmem:[%s3837_s23 + $0xb8] sm:$0xff]  }
  0x2b   : > { %3310 = vmatprep.mubr.msk.bf16.mxu0 %vm3731_vm1, %v3730_v1  ;;  %3332 = vmatprep.mubr.msk.bf16.mxu1 %vm3731_vm1, %v3730_v1  ;;  %v1459_v18 = vshll.u32 %v3682_v16, 16 }
  0x2d   : > { %v1461_v22 = vrot.slane %v1459_v18, 1  ;;  %v3693_v18 = vld [vmem:[%s3837_s23 + $0xe8] sm:$0x1f]  }
  0x32   : > { %3311 = vmatmul.mubr.msk.bf16.gmra.mrb[16].mxu0 %vm566_vm2, %v3657_v20  ;;  %3333 = vmatmul.mubr.msk.bf16.gmra.mrb[16].mxu1 %vm566_vm2, %v3658_v21  ;;  %v3679_v20 = vld [vmem:[%s3837_s23 + $0xe8] ss:$0 sps:$4 sm:$0xff]   ;;  %v1457_v21 = vshrl.u32 %v3682_v16, 16 }
  0x33   : > { %3354 = vmatprep.mubr.msk.bf16.mxu0 %vm3731_vm1, %v3730_v1  ;;  %3336 = vmatprep.mubr.msk.bf16.mxu1 %vm3731_vm1, %v3730_v1 }
  0x34   : > { %v1462_v24 = vor.u32 %v1461_v22, %v1457_v21  ;;  %v4071_v22 = vld [vmem:[%s3837_s23 + $0x24] sm:$0xff]  }
  0x35   : > { %v1727_v28 = vshll.u32 %v4071_v22, 16 }
  0x3a   : > { %3355 = vmatmul.mubr.msk.bf16.vlgmr.msra.gmra.mrb[20].mxu0 %vm566_vm2, %v888_v30  ;;  %3337 = vmatmul.mubr.msk.bf16.gmra.mrb[20].mxu1 %vm566_vm2, %v3659_v29  ;;  %v1467_v29 = vsel %vm876_vm3, %v1462_v24, %v1466_v25  ;;  %v1468_v30 = vshrl.u32 %v3683_v17, 16 }
  0x3b   : > { %3413 = vmatpush3.bf16.msra.mxu0 %v1302_v33  ;;  %3340 = vmatprep.mubr.msk.bf16.mxu1 %vm3731_vm1, %v3730_v1 }
  0x3c   : > { %3358 = vmatprep.mubr.msk.bf16.mxu0 %vm3731_vm1, %v3730_v1  ;;  %3472 = vmatprep.subr.bf16.mxu0 %v3730_v1  ;;  %v1470_v33 = vor.u32 %v1468_v30, %v1466_v25  ;;  %v1504_v25 = vshll.u32 %v3693_v18, 16 }
  0x3e   : > { %v1475_v41 = vsel %vm876_vm3, %v1470_v33, %v1474_v34  ;;  %v1506_v30 = vrot.slane %v1504_v25, 1  ;;  %v1729_v33 = vrot.slane %v1727_v28, 3  ;;  %v4084_v34 = vld [vmem:[%s3837_s23 + $0x2c] sm:$0xff]  }
  0x3f   : > { %v1733_v42 = vshrl.u32 %v4084_v34, 16  ;;  %v1736_v43 = vshll.u32 %v4084_v34, 16 }
  0x42   : > { %3359 = vmatmul.mubr.msk.bf16.gmra.mrb[24].mxu0 %vm566_vm2, %v896_v38  ;;  %3341 = vmatmul.mubr.msk.bf16.gmra.mrb[24].mxu1 %vm566_vm2, %v3662_v37  ;;  %v4018_v37 = vld [vmem:[%s3837_s23 + $0x8] sm:$0xf]  ;;  %v3684_v38 = vld [vmem:[%s3837_s23 + $0x13c] sm:$0xff]  }
  0x43   : > { %3362 = vmatprep.mubr.msk.bf16.mxu0 %vm3731_vm1, %v3730_v1  ;;  %3344 = vmatprep.mubr.msk.bf16.mxu1 %vm3731_vm1, %v3730_v1  ;;  %v3087_v39 = vcombine.low %v1636_v36, %v4018_v37  ;;  %v3697_v36 = vld [vmem:[%s3837_s23 + $0x60] sm:$0xfc]  }
  0x4a   : > { %3363 = vmatmul.mubr.msk.bf16.gmra.mrb[28].mxu0 %vm566_vm2, %v904_v45  ;;  %3345 = vmatmul.mubr.msk.bf16.gmra.mrb[28].mxu1 %vm566_vm2, %v3664_v44  ;;  %v1689_v44 = vshrl.u32 %v3087_v39, 16  ;;  %v1692_v45 = vshll.u32 %v3087_v39, 16  ;;  %v1508_v39 = vshrl.u32 %v3693_v18, 16 }
  0x4b   : > { %3366 = vmatprep.mubr.msk.bf16.mxu0 %vm3731_vm1, %v3730_v1  ;;  %3348 = vmatprep.mubr.msk.bf16.mxu1 %vm3731_vm1, %v3730_v1 }
  0x4c   : > { %v1694_v53 = vrot.slane %v1692_v45, 3  ;;  %v1930_v45 = vshll.u32 %v3697_v36, 16  ;;  %v1510_v48 = vor.u32 %v1508_v39, %v1506_v30 }
  0x4e   : > { %v1932_v54 = vrot.slane %v1930_v45, 3 }
  0x52   : > { %3367 = vmatmul.mubr.msk.bf16.gmra.mrb[32].mxu0 %vm566_vm2, %v912_v52  ;;  %3349 = vmatmul.mubr.msk.bf16.gmra.mrb[32].mxu1 %vm566_vm2, %v3666_v51  ;;  %v3686_v51 = vld [vmem:[%s3837_s23 + $0x144] ss:$0 sps:$4 sm:$0xff]   ;;  %v1691_v52 = vrot.slane %v1689_v44, 2  ;;  %v1927_v44 = vshrl.u32 %v3697_v36, 16 }
  0x53   : > { %3370 = vmatprep.mubr.msk.bf16.mxu0 %vm3731_vm1, %v3730_v1  ;;  %3384 = vmatprep.mubr.msk.bf16.mxu1 %vm3731_vm1, %v3730_v1 }
  0x5a   : > { %3371 = vmatmul.mubr.msk.bf16.gmra.mrb[36].mxu0 %vm566_vm2, %v920_v59  ;;  %3385 = vmatmul.mubr.msk.bf16.vlgmr.msra.gmra.mrb[36].mxu1 %vm566_vm2, %v3669_v60  ;;  %v1488_v59 = vshll.u32 %v3688_v50, 16  ;;  %v1695_v60 = vor.u32 %v1694_v53, %v1691_v52  ;;  %v4099_v52 = vld [vmem:[%s3837_s23 + $0x34] sm:$0x7f]   ;;  %v1929_v53 = vrot.slane %v1927_v44, 2 }
  0x5b   : > { %3374 = vmatprep.mubr.msk.bf16.mxu0 %vm3731_vm1, %v3730_v1  ;;  %3388 = vmatprep.mubr.msk.bf16.mxu1 %vm3731_vm1, %v3730_v1 }
  0x5c   : > { %3443 = vmatpush3.bf16.msra.mxu1 %v1533_v63  ;;  %v1709_v63 = vshll.u32 %v4038_v56, 16  ;;  %v1490_v2 = vrot.slane %v1488_v59, 1  ;;  %v1704_v5 = vsel %vm1687_vm4, %v1695_v60, %v1703_v61  ;;  %v1742_v60 = vshrl.u32 %v4099_v52, 16 }
  0x5d   : > { %3502 = vmatprep.subr.bf16.mxu1 %v3730_v1 }
  0x62   : > { %3375 = vmatmul.mubr.msk.bf16.gmra.mrb[40].mxu0 %vm566_vm2, %v928_v3  ;;  %3389 = vmatmul.mubr.msk.bf16.gmra.mrb[40].mxu1 %vm566_vm2, %v3671_v4  ;;  %v3691_v3 = vld [vmem:[%s3837_s23 + $0xe0] sm:$0xff]   ;;  %v3130_v4 = vld [vmem:[%s4379_s2 + $0x10] sm:$0x3] }
  0x63   : > { %3378 = vmatprep.mubr.msk.bf16.mxu0 %vm3731_vm1, %v3730_v1  ;;  %3392 = vmatprep.mubr.msk.bf16.mxu1 %vm3731_vm1, %v3730_v1  ;;  %v1500_v24 = vshrl.u32 %v3691_v3, 16 }
  0x6a   : > { %3379 = vmatmul.mubr.msk.bf16.gmra.mrb[44].mxu0 %vm566_vm2, %v931_v6  ;;  %3393 = vmatmul.mubr.msk.bf16.gmra.mrb[44].mxu1 %vm566_vm2, %v3672_v7  ;;  %v1708_v6 = vrot.slane %v1706_v62, 2  ;;  %v1711_v7 = vrot.slane %v1709_v63, 3  ;;  %v1933_v62 = vor.u32 %v1932_v54, %v1929_v53 }
  0x6b   : > { %3414 = vmatprep.mubr.msk.bf16.mxu0 %vm3731_vm1, %v3730_v1  ;;  %3396 = vmatprep.mubr.msk.bf16.mxu1 %vm3731_vm1, %v3730_v1 }
  0x72   : > { %3415 = vmatmul.mubr.msk.bf16.vlgmr.msra.gmra.mrb[48].mxu0 %vm566_vm2, %v3674_v9  ;;  %3397 = vmatmul.mubr.msk.bf16.gmra.mrb[48].mxu1 %vm566_vm2, %v3673_v10  ;;  %v1491_v9 = vsel %vm876_vm3, %v1486_v0, %v1490_v2  ;;  %v2155_v10 = vsel %vm588_vm0, %v3130_v4, 0  ;;  %v1944_v0 = vshrl.u32 %v3700_v58, 16  ;;  %v1744_v4 = vrot.slane %v1742_v60, 2 }
  0x73   : > { %3473 = vmatpush3.bf16.msra.mxu0 %v1772_v11  ;;  %3400 = vmatprep.mubr.msk.bf16.mxu1 %vm3731_vm1, %v3730_v1  ;;  %v1492_v11 = vshrl.u32 %v3688_v50, 16  ;;  %v1735_v50 = vrot.slane %v1733_v42, 2 }
  0x74   : > { %3418 = vmatprep.mubr.msk.bf16.mxu0 %vm3731_vm1, %v3730_v1  ;;  %3532 = vmatprep.subr.bf16.mxu0 %v3730_v1 }
  0x75   : > { %v1494_v16 = vor.u32 %v1492_v11, %v1490_v2  ;;  %v1947_v2 = vshll.u32 %v3700_v58, 16  ;;  %v2125_v58 = vrot.slane %v4055_v8, 3 }
  0x7a   : > { %3419 = vmatmul.mubr.msk.bf16.gmra.mrb[52].mxu0 %vm566_vm2, %v3676_v12  ;;  %3401 = vmatmul.mubr.msk.bf16.gmra.mrb[52].mxu1 %vm566_vm2, %v3675_v13  ;;  %v1496_v12 = vshll.u32 %v3691_v3, 16  ;;  %v1712_v13 = vor.u32 %v1711_v7, %v1708_v6  ;;  %v1946_v7 = vrot.slane %v1944_v0, 2 }
  0x7b   : > { %3422 = vmatprep.mubr.msk.bf16.mxu0 %vm3731_vm1, %v3730_v1  ;;  %3404 = vmatprep.mubr.msk.bf16.mxu1 %vm3731_vm1, %v3730_v1 }
  0x7c   : > { %v1498_v17 = vrot.slane %v1496_v12, 1 }
  0x7e   : > { %v1499_v23 = vsel %vm876_vm3, %v1494_v16, %v1498_v17 }
  0x82   : > { %3423 = vmatmul.mubr.msk.bf16.gmra.mrb[56].mxu0 %vm566_vm2, %v3678_v14  ;;  %3405 = vmatmul.mubr.msk.bf16.gmra.mrb[56].mxu1 %vm566_vm2, %v3677_v15  ;;  %v1715_v14 = vshrl.u32 %v4055_v8, 16  ;;  %v1718_v15 = vshll.u32 %v4055_v8, 16  ;;  %v2127_v8 = vrot.slane %v4071_v22, 3 }
  0x83   : > { %3426 = vmatprep.mubr.msk.bf16.mxu0 %vm3731_vm1, %v3730_v1  ;;  %3408 = vmatprep.mubr.msk.bf16.mxu1 %vm3731_vm1, %v3730_v1 }
  0x84   : > { %v1720_v21 = vrot.slane %v1718_v15, 3 }
  0x8a   : > { %3427 = vmatmul.mubr.msk.bf16.gmra.mrb[60].mxu0 %vm566_vm2, %v3680_v19  ;;  %3409 = vmatmul.mubr.msk.bf16.gmra.mrb[60].mxu1 %vm566_vm2, %v3679_v20  ;;  %v1713_v19 = vsel %vm1687_vm4, %v1703_v61, %v1712_v13  ;;  %v1717_v20 = vrot.slane %v1715_v14, 2  ;;  %v1745_v61 = vshll.u32 %v4099_v52, 16 }
  0x8b   : > { %3430 = vmatprep.mubr.msk.bf16.mxu0 %vm3731_vm1, %v3730_v1  ;;  %3444 = vmatprep.mubr.msk.bf16.mxu1 %vm3731_vm1, %v3730_v1 }
  0x8c   : > { %v1721_v26 = vor.u32 %v1720_v21, %v1717_v20 }
  0x8e   : > { %v1722_v31 = vsel %vm1687_vm4, %v1712_v13, %v1721_v26 }
  0x92   : > { %3431 = vmatmul.mubr.msk.bf16.gmra.mrb[64].mxu0 %vm566_vm2, %v3681_v27  ;;  %3445 = vmatmul.mubr.msk.bf16.vlgmr.msra.gmra.mrb[64].mxu1 %vm566_vm2, %v1467_v29  ;;  %v1724_v27 = vshrl.u32 %v4071_v22, 16  ;;  %v1502_v29 = vor.u32 %v1500_v24, %v1498_v17  ;;  %v2113_v24 = vld [vmem:[%s3837_s23 + $0x4] sm:$0x8]  ;;  %v2129_v22 = vrot.slane %v4084_v34, 3  ;;  %v2131_v34 = vrot.slane %v4099_v52, 3 }
  0x93   : > { %3434 = vmatprep.mubr.msk.bf16.mxu0 %vm3731_vm1, %v3730_v1  ;;  %3448 = vmatprep.mubr.msk.bf16.mxu1 %vm3731_vm1, %v3730_v1  ;;  %v3131_v25 = vcombine.low %v2113_v24, %v4018_v37 }
  0x94   : > { %3503 = vmatpush3.bf16.msra.mxu1 %v2010_v32  ;;  %v1726_v32 = vrot.slane %v1724_v27, 2  ;;  %v1507_v35 = vsel %vm876_vm3, %v1502_v29, %v1506_v30  ;;  %v3704_v29 = vld [vmem:[%s3837_s23 + $0x88] sm:$0xff]  }
  0x95   : > { %3562 = vmatprep.subr.bf16.mxu1 %v3730_v1  ;;  %v2120_v30 = vrot.slane %v3131_v25, 3 }
  0x9a   : > { %3435 = vmatmul.mubr.msk.bf16.gmra.mrb[68].mxu0 %vm566_vm2, %v3684_v38  ;;  %3449 = vmatmul.mubr.msk.bf16.gmra.mrb[68].mxu1 %vm566_vm2, %v1475_v41  ;;  %v3698_v38 = vld [vmem:[%s3837_s23 + $0x68] sm:$0xff]   ;;  %v1730_v41 = vor.u32 %v1729_v33, %v1726_v32  ;;  %v1971_v32 = vshrl.u32 %v3704_v29, 16  ;;  %v1974_v33 = vshll.u32 %v3704_v29, 16 }
  0x9b   : > { %3438 = vmatprep.mubr.msk.bf16.mxu0 %vm3731_vm1, %v3730_v1  ;;  %3452 = vmatprep.mubr.msk.bf16.mxu1 %vm3731_vm1, %v3730_v1  ;;  %v1935_v46 = vshrl.u32 %v3698_v38, 16  ;;  %v1938_v47 = vshll.u32 %v3698_v38, 16 }
  0x9c   : > { %v1731_v49 = vsel %vm1687_vm4, %v1721_v26, %v1730_v41  ;;  %v1973_v38 = vrot.slane %v1971_v32, 2  ;;  %v1976_v39 = vrot.slane %v1974_v33, 3 }
  0x9d   : > { %v1937_v55 = vrot.slane %v1935_v46, 2 }
  0x9e   : > { %v1977_v42 = vor.u32 %v1976_v39, %v1973_v38  ;;  %v2132_v38 = vsel %vm2119_vm5, %v2129_v22, %v2131_v34  ;;  %v2285_v39 = vld [vmem:[%s4381_s4] sm:$0x3] }
  0xa2   : > { %3439 = vmatmul.mubr.msk.bf16.gmra.mrb[72].mxu0 %vm566_vm2, %v3686_v51  ;;  %3453 = vmatmul.mubr.msk.bf16.gmra.mrb[72].mxu1 %vm566_vm2, %v1483_v57  ;;  %v1738_v51 = vrot.slane %v1736_v43, 3  ;;  %v1940_v57 = vrot.slane %v1938_v47, 3 }
  0xa3   : > { %3474 = vmatprep.mubr.msk.bf16.mxu0 %vm3731_vm1, %v3730_v1  ;;  %3456 = vmatprep.mubr.msk.bf16.mxu1 %vm3731_vm1, %v3730_v1 }
  0xa4   : > { %v1739_v59 = vor.u32 %v1738_v51, %v1735_v50  ;;  %v1941_v63 = vor.u32 %v1940_v57, %v1937_v55 }
  0xa6   : > { %v1740_v3 = vsel %vm1687_vm4, %v1730_v41, %v1739_v59  ;;  %v1942_v6 = vsel %vm1687_vm4, %v1933_v62, %v1941_v63  ;;  %v3705_v41 = vld [vmem:[%s3837_s23 + $0x90] sm:$0x7f]  }
  0xa7   : > { %v1980_v43 = vshrl.u32 %v3705_v41, 16  ;;  %v1983_v44 = vshll.u32 %v3705_v41, 16 }
  0xa9   : > { %v1985_v55 = vrot.slane %v1983_v44, 3 }
  0xaa   : > { %3475 = vmatmul.mubr.msk.bf16.vlgmr.msra.gmra.mrb[76].mxu0 %vm566_vm2, %v1704_v5  ;;  %3457 = vmatmul.mubr.msk.bf16.gmra.mrb[76].mxu1 %vm566_vm2, %v1491_v9  ;;  %v1747_v5 = vrot.slane %v1745_v61, 3  ;;  %v1949_v9 = vrot.slane %v1947_v2, 3 }
  0xab   : > { %3533 = vmatpush3.bf16.msra.mxu0 %v2155_v10  ;;  %3460 = vmatprep.mubr.msk.bf16.mxu1 %vm3731_vm1, %v3730_v1  ;;  %v3701_v10 = vld [vmem:[%s3837_s23 + $0x78] sm:$0xff]  }
  0xac   : > { %3478 = vmatprep.mubr.msk.bf16.mxu0 %vm3731_vm1, %v3730_v1  ;;  %3592 = vmatprep.subr.bf16.mxu0 %v3730_v1  ;;  %v1748_v11 = vor.u32 %v1747_v5, %v1744_v4  ;;  %v1950_v12 = vor.u32 %v1949_v9, %v1946_v7  ;;  %v1953_v13 = vshrl.u32 %v3701_v10, 16  ;;  %v1956_v14 = vshll.u32 %v3701_v10, 16 }
  0xae   : > { %v1749_v15 = vsel %vm1687_vm4, %v1739_v59, %v1748_v11  ;;  %v1951_v16 = vsel %vm1687_vm4, %v1941_v63, %v1950_v12  ;;  %v1955_v17 = vrot.slane %v1953_v13, 2  ;;  %v1958_v18 = vrot.slane %v1956_v14, 3 }
  0xaf   : > { %v2128_v14 = vsel %vm2119_vm5, %v2125_v58, %v2127_v8 }
  0xb0   : > { %v1959_v20 = vor.u32 %v1958_v18, %v1955_v17 }
  0xb2   : > { %3479 = vmatmul.mubr.msk.bf16.gmra.mrb[80].mxu0 %vm566_vm2, %v1713_v19  ;;  %3461 = vmatmul.mubr.msk.bf16.gmra.mrb[80].mxu1 %vm566_vm2, %v1499_v23  ;;  %v3702_v19 = vld [vmem:[%s3837_s23 + $0x80] sm:$0xff]   ;;  %v1960_v26 = vsel %vm1687_vm4, %v1950_v12, %v1959_v20 }
  0xb3   : > { %3482 = vmatprep.mubr.msk.bf16.mxu0 %vm3731_vm1, %v3730_v1  ;;  %3464 = vmatprep.mubr.msk.bf16.mxu1 %vm3731_vm1, %v3730_v1  ;;  %v1962_v21 = vshrl.u32 %v3702_v19, 16  ;;  %v1965_v23 = vshll.u32 %v3702_v19, 16 }
  0xb5   : > { %v1964_v27 = vrot.slane %v1962_v21, 2  ;;  %v1967_v28 = vrot.slane %v1965_v23, 3 }
  0xb7   : > { %v1968_v37 = vor.u32 %v1967_v28, %v1964_v27 }
  0xb9   : > { %v1969_v36 = vsel %vm1687_vm4, %v1959_v20, %v1968_v37  ;;  %v1978_v53 = vsel %vm1687_vm4, %v1968_v37, %v1977_v42 }
  0xba   : > { %3483 = vmatmul.mubr.msk.bf16.gmra.mrb[84].mxu0 %vm566_vm2, %v1722_v31  ;;  %3465 = vmatmul.mubr.msk.bf16.gmra.mrb[84].mxu1 %vm566_vm2, %v1507_v35  ;;  %v2121_v31 = vrot.slane %v4024_v40, 3  ;;  %v2123_v40 = vrot.slane %v4038_v56, 3  ;;  %v1982_v56 = vrot.slane %v1980_v43, 2 }
  0xbb   : > { %3486 = vmatprep.mubr.msk.bf16.mxu0 %vm3731_vm1, %v3730_v1  ;;  %3468 = vmatprep.mubr.msk.bf16.mxu1 %vm3731_vm1, %v3730_v1 }
  0xbc   : > { %v2122_v35 = vsel %vm2119_vm5, %v2120_v30, %v2121_v31  ;;  %v1986_v59 = vor.u32 %v1985_v55, %v1982_v56  ;;  %v2126_v2 = vsel %vm2119_vm5, %v2123_v40, %v2125_v58 }
  0xbe   : > { %v1987_v4 = vsel %vm1687_vm4, %v1977_v42, %v1986_v59  ;;  %v2315_v42 = vsel %vm588_vm0, %v2285_v39, 0 }
  0xc2   : > { %3487 = vmatmul.mubr.msk.bf16.gmra.mrb[88].mxu0 %vm566_vm2, %v1731_v49  ;;  %3469 = vmatmul.mubr.msk.bf16.gmra.mrb[88].mxu1 %vm566_vm2, %v1510_v48  ;;  %v2124_v49 = vsel %vm2119_vm5, %v2121_v31, %v2123_v40 }
  0xc3   : > { %3490 = vmatprep.mubr.msk.bf16.mxu0 %vm3731_vm1, %v3730_v1  ;;  %3504 = vmatprep.mubr.msk.bf16.mxu1 %vm3731_vm1, %v3730_v1 }
  0xca   : > { %3491 = vmatmul.mubr.msk.bf16.gmra.mrb[92].mxu0 %vm566_vm2, %v1740_v3  ;;  %3505 = vmatmul.mubr.msk.bf16.vlgmr.msra.gmra.mrb[92].mxu1 %vm566_vm2, %v1942_v6 }
  0xcb   : > { %3494 = vmatprep.mubr.msk.bf16.mxu0 %vm3731_vm1, %v3730_v1  ;;  %3508 = vmatprep.mubr.msk.bf16.mxu1 %vm3731_vm1, %v3730_v1 }
  0xcc   : > { %3563 = vmatpush3.bf16.msra.mxu1 %v2315_v42 }
  0xd2   : > { %3495 = vmatmul.mubr.msk.bf16.gmra.mrb[96].mxu0 %vm566_vm2, %v1749_v15  ;;  %3509 = vmatmul.mubr.msk.bf16.gmra.mrb[96].mxu1 %vm566_vm2, %v1951_v16 }
  0xd3   : > { %3498 = vmatprep.mubr.msk.bf16.mxu0 %vm3731_vm1, %v3730_v1  ;;  %3512 = vmatprep.mubr.msk.bf16.mxu1 %vm3731_vm1, %v3730_v1 }
  0xda   : > { %3499 = vmatmul.mubr.msk.bf16.gmra.mrb[100].mxu0 %vm566_vm2, %v1748_v11  ;;  %3513 = vmatmul.mubr.msk.bf16.gmra.mrb[100].mxu1 %vm566_vm2, %v1960_v26  ;;  %v2130_v26 = vsel %vm2119_vm5, %v2127_v8, %v2129_v22 }
  0xdb   : > { %3534 = vmatprep.mubr.msk.bf16.mxu0 %vm3731_vm1, %v3730_v1  ;;  %3516 = vmatprep.mubr.msk.bf16.mxu1 %vm3731_vm1, %v3730_v1 }
  0xe2   : > { %3535 = vmatmul.mubr.msk.bf16.vlgmr.msra.gmra.mrb[104].mxu0 %vm566_vm2, %v2122_v35  ;;  %3517 = vmatmul.mubr.msk.bf16.gmra.mrb[104].mxu1 %vm566_vm2, %v1969_v36 }
  0xe3   : > { %3538 = vmatprep.mubr.msk.bf16.mxu0 %vm3731_vm1, %v3730_v1  ;;  %3520 = vmatprep.mubr.msk.bf16.mxu1 %vm3731_vm1, %v3730_v1 }
  0xe5   : > { %v626_v45 = vpop.f32.mrb[0].mxu0  ;;  %v4149_v47 = vpop.f32.mrb[0].mxu1 }
  0xe6   : > { %v3296_v46 = vpop.f32.mrb[1].mxu0  ;;  %v3316_v50 = vpop.f32.mrb[1].mxu1 }
  0xe7   : > { %v629_v48 = vpop.f32.mrb[2].mxu0  ;;  %v4153_v54 = vpop.f32.mrb[2].mxu1 }
  0xe8   : > { %v3297_v51 = vpop.f32.mrb[3].mxu0  ;;  %v3317_v57 = vpop.f32.mrb[3].mxu1 }
  0xea   : > { %3539 = vmatmul.mubr.msk.bf16.gmra.mrb[108].mxu0 %vm566_vm2, %v2124_v49  ;;  %3521 = vmatmul.mubr.msk.bf16.gmra.mrb[108].mxu1 %vm566_vm2, %v1978_v53 }
  0xeb   : > { %3542 = vmatprep.mubr.msk.bf16.mxu0 %vm3731_vm1, %v3730_v1  ;;  %3524 = vmatprep.mubr.msk.bf16.mxu1 %vm3731_vm1, %v3730_v1 }
  0xed   : > { %v634_v60 = vpop.f32.mrb[4].mxu0  ;;  %v4162_v62 = vpop.f32.mrb[4].mxu1 }
  0xee   : > { %v3300_v61 = vpop.f32.mrb[5].mxu0  ;;  %v3320_v0 = vpop.f32.mrb[5].mxu1 }
  0xef   : > { %v637_v63 = vpop.f32.mrb[6].mxu0  ;;  %v677_v5 = vpop.f32.mrb[6].mxu1 }
  0xf0   : > { %v3301_v3 = vpop.f32.mrb[7].mxu0  ;;  %v3321_v6 = vpop.f32.mrb[7].mxu1 }
  0xf2   : > { %3543 = vmatmul.mubr.msk.bf16.gmra.mrb[112].mxu0 %vm566_vm2, %v2126_v2  ;;  %3525 = vmatmul.mubr.msk.bf16.gmra.mrb[112].mxu1 %vm566_vm2, %v1987_v4 }
  0xf3   : > { %3546 = vmatprep.mubr.msk.bf16.mxu0 %vm3731_vm1, %v3730_v1  ;;  %3528 = vmatprep.mubr.msk.bf16.mxu1 %vm3731_vm1, %v3730_v1 }
  0xf5   : > { %v642_v7 = vpop.f32.mrb[8].mxu0  ;;  %v771_v9 = vpop.f32.mrb[8].mxu1 }
  0xf6   : > { %v3304_v10 = vpop.f32.mrb[9].mxu0  ;;  %v772_v11 = vadd.f32 %v771_v9, %v626_v45  ;;  %v3326_v12 = vpop.f32.mrb[9].mxu1 }
  0xf7   : > { %v645_v13 = vpop.f32.mrb[10].mxu0  ;;  %v774_v15 = vpop.f32.mrb[10].mxu1 }
  0xf8   : > { %v3305_v16 = vpop.f32.mrb[11].mxu0  ;;  %v775_v17 = vadd.f32 %v774_v15, %v629_v48  ;;  %v3327_v18 = vpop.f32.mrb[11].mxu1 }
  0xfa   : > { %3547 = vmatmul.mubr.msk.bf16.gmra.mrb[116].mxu0 %vm566_vm2, %v2128_v14  ;;  %3529 = vmatmul.mubr.msk.bf16.gmra.mrb[116].mxu1 %vm566_vm2, %v1986_v59 }
  0xfb   : > { %3550 = vmatprep.mubr.msk.bf16.mxu0 %vm3731_vm1, %v3730_v1  ;;  %3564 = vmatprep.mubr.msk.bf16.mxu1 %vm3731_vm1, %v3730_v1 }
  0xfd   : > { %v650_v19 = vpop.f32.mrb[12].mxu0  ;;  %v779_v20 = vpop.f32.mrb[12].mxu1 }
  0xfe   : > { %v3308_v21 = vpop.f32.mrb[13].mxu0  ;;  %v780_v23 = vadd.f32 %v779_v20, %v634_v60  ;;  %v3330_v24 = vpop.f32.mrb[13].mxu1 }
  0xff   : > { %v653_v25 = vpop.f32.mrb[14].mxu0  ;;  %v782_v27 = vpop.f32.mrb[14].mxu1 }
 0x100   : > { %v3309_v28 = vpop.f32.mrb[15].mxu0  ;;  %v783_v29 = vadd.f32 %v782_v27, %v637_v63  ;;  %v3331_v30 = vpop.f32.mrb[15].mxu1 }
 0x102   : > { %3551 = vmatmul.mubr.msk.bf16.gmra.mrb[120].mxu0 %vm566_vm2, %v2130_v26 }
 0x103   : > { %3554 = vmatprep.mubr.msk.bf16.mxu0 %vm3731_vm1, %v3730_v1 }
 0x105   : > { %v658_v31 = vpop.f32.mrb[16].mxu0  ;;  %v787_v37 = vpop.f32.mrb[16].mxu1 }
 0x106   : > { %v3312_v32 = vpop.f32.mrb[17].mxu0  ;;  %v788_v33 = vadd.f32 %v787_v37, %v642_v7  ;;  %v3334_v35 = vpop.f32.mrb[17].mxu1 }
 0x107   : > { %v661_v36 = vpop.f32.mrb[18].mxu0  ;;  %v790_v41 = vpop.f32.mrb[18].mxu1 }
 0x108   : > { %v3313_v40 = vpop.f32.mrb[19].mxu0  ;;  %v791_v43 = vadd.f32 %v790_v41, %v645_v13  ;;  %v3335_v44 = vpop.f32.mrb[19].mxu1 }
 0x10a   : > { %3555 = vmatmul.mubr.msk.bf16.gmra.mrb[124].mxu0 %vm566_vm2, %v2132_v38 }
 0x10b   : > { %3558 = vmatprep.mubr.msk.bf16.mxu0 %vm3731_vm1, %v3730_v1 }
 0x10d   : > { %v990_v52 = vpop.f32.mrb[20].mxu0  ;;  %v795_v45 = vpop.f32.mrb[20].mxu1 }
 0x10e   : > { %v1044_v46 = vadd.f32 %v990_v52, %v772_v11  ;;  %v3356_v48 = vpop.f32.mrb[21].mxu0  ;;  %v796_v49 = vadd.f32 %v795_v45, %v650_v19  ;;  %v3338_v50 = vpop.f32.mrb[21].mxu1 }
 0x10f   : > { %v993_v51 = vpop.f32.mrb[22].mxu0  ;;  %v798_v53 = vpop.f32.mrb[22].mxu1 }
 0x110   : > { %v1045_v56 = vadd.f32 %v993_v51, %v775_v17  ;;  %v3357_v55 = vpop.f32.mrb[23].mxu0  ;;  %v799_v57 = vadd.f32 %v798_v53, %v653_v25  ;;  %v3339_v58 = vpop.f32.mrb[23].mxu1 }
 0x112   : > { %3559 = vmatmul.mubr.msk.bf16.gmra.mrb[128].mxu0 %vm566_vm2, %v2131_v34 }
 0x113   : > { %3594 = vmatprep.mubr.msk.bf16.mxu0 %vm3731_vm1, %v3730_v1 }
 0x115   : > { %v998_v59 = vpop.f32.mrb[24].mxu0  ;;  %v803_v60 = vpop.f32.mrb[24].mxu1 }
 0x116   : > { %v1046_v61 = vadd.f32 %v998_v59, %v780_v23  ;;  %v3360_v63 = vpop.f32.mrb[25].mxu0  ;;  %v804_v0 = vadd.f32 %v803_v60, %v658_v31  ;;  %v3342_v2 = vpop.f32.mrb[25].mxu1 }
 0x117   : > { %v1001_v3 = vpop.f32.mrb[26].mxu0  ;;  %v806_v4 = vpop.f32.mrb[26].mxu1 }
 0x118   : > { %v1047_v5 = vadd.f32 %v1001_v3, %v783_v29  ;;  %v3361_v6 = vpop.f32.mrb[27].mxu0  ;;  %v807_v8 = vadd.f32 %v806_v4, %v661_v36  ;;  %v3343_v7 = vpop.f32.mrb[27].mxu1 }
 0x11d   : > { %v1006_v9 = vpop.f32.mrb[28].mxu0  ;;  %v811_v10 = vpop.f32.mrb[28].mxu1 }
 0x11e   : > { %v1048_v11 = vadd.f32 %v1006_v9, %v788_v33  ;;  %v3364_v12 = vpop.f32.mrb[29].mxu0  ;;  %v812_v13 = vadd.f32 %v811_v10, %v4149_v47  ;;  %v3346_v14 = vpop.f32.mrb[29].mxu1 }
 0x11f   : > { %v1009_v15 = vpop.f32.mrb[30].mxu0  ;;  %v814_v16 = vpop.f32.mrb[30].mxu1 }
 0x120   : > { %v1049_v17 = vadd.f32 %v1009_v15, %v791_v43  ;;  %v3365_v18 = vpop.f32.mrb[31].mxu0  ;;  %v815_v22 = vadd.f32 %v814_v16, %v4153_v54  ;;  %v3347_v19 = vpop.f32.mrb[31].mxu1 }
 0x125   : > { %v1014_v20 = vpop.f32.mrb[32].mxu0  ;;  %v819_v21 = vpop.f32.mrb[32].mxu1 }
 0x126   : > { %v1050_v23 = vadd.f32 %v1014_v20, %v796_v49  ;;  %v3368_v24 = vpop.f32.mrb[33].mxu0  ;;  %v820_v25 = vadd.f32 %v819_v21, %v4162_v62  ;;  %v3350_v27 = vpop.f32.mrb[33].mxu1 }
 0x127   : > { %v1017_v26 = vpop.f32.mrb[34].mxu0  ;;  %v822_v30 = vpop.f32.mrb[34].mxu1 }
 0x128   : > { %v1051_v28 = vadd.f32 %v1017_v26, %v799_v57  ;;  %v3369_v29 = vpop.f32.mrb[35].mxu0  ;;  %v3351_v47 = vpop.f32.mrb[35].mxu1 }
 0x12d   : > { %v1022_v34 = vpop.f32.mrb[36].mxu0  ;;  %v1164_v37 = vpop.f32.mrb[36].mxu1 }
 0x12e   : > { %v1052_v31 = vadd.f32 %v1022_v34, %v804_v0  ;;  %v3372_v32 = vpop.f32.mrb[37].mxu0  ;;  %v1218_v33 = vadd.f32 %v1164_v37, %v1044_v46  ;;  %v3386_v35 = vpop.f32.mrb[37].mxu1 }
 0x12f   : > { %v1025_v54 = vpop.f32.mrb[38].mxu0  ;;  %v1167_v38 = vpop.f32.mrb[38].mxu1 }
 0x130   : > { %v1053_v36 = vadd.f32 %v1025_v54, %v807_v8  ;;  %v3373_v39 = vpop.f32.mrb[39].mxu0  ;;  %v1219_v41 = vadd.f32 %v1167_v38, %v1045_v56  ;;  %v3387_v40 = vpop.f32.mrb[39].mxu1 }
 0x135   : > { %v1030_v42 = vpop.f32.mrb[40].mxu0  ;;  %v1172_v43 = vpop.f32.mrb[40].mxu1 }
 0x136   : > { %v1054_v62 = vadd.f32 %v1030_v42, %v812_v13  ;;  %v3376_v44 = vpop.f32.mrb[41].mxu0  ;;  %v1220_v52 = vadd.f32 %v1172_v43, %v1046_v61  ;;  %v3390_v45 = vpop.f32.mrb[41].mxu1 }
 0x137   : > { %v1033_v48 = vpop.f32.mrb[42].mxu0  ;;  %v1175_v50 = vpop.f32.mrb[42].mxu1 }
 0x138   : > { %v1055_v49 = vadd.f32 %v1033_v48, %v815_v22  ;;  %v3377_v51 = vpop.f32.mrb[43].mxu0  ;;  %v1221_v46 = vadd.f32 %v1175_v50, %v1047_v5  ;;  %v3391_v53 = vpop.f32.mrb[43].mxu1 }
 0x13d   : > { %v1038_v55 = vpop.f32.mrb[44].mxu0  ;;  %v1180_v58 = vpop.f32.mrb[44].mxu1 }
 0x13e   : > { %v1056_v57 = vadd.f32 %v1038_v55, %v820_v25  ;;  %v3380_v59 = vpop.f32.mrb[45].mxu0  ;;  %v1222_v56 = vadd.f32 %v1180_v58, %v1048_v11  ;;  %v3394_v60 = vpop.f32.mrb[45].mxu1  ;;  %v3706_v11 = vld [vmem:[%s4208_s15 + $0x40] sm:$0xff]  }
 0x13f   : > { %v1041_v63 = vpop.f32.mrb[46].mxu0  ;;  %v1183_v0 = vpop.f32.mrb[46].mxu1  ;;  %3266 = vmatprep.subr.bf16.mxu1 %v3706_v11 }
 0x140   : > { %v3381_v2 = vpop.f32.mrb[47].mxu0  ;;  %v1223_v61 = vadd.f32 %v1183_v0, %v1049_v17  ;;  %v3395_v3 = vpop.f32.mrb[47].mxu1 }
 0x145   : > { %v1338_v4 = vpop.f32.mrb[48].mxu0  ;;  %v1188_v5 = vpop.f32.mrb[48].mxu1 }
 0x146   : > { %v1392_v6 = vadd.f32 %v1338_v4, %v1218_v33  ;;  %v3416_v8 = vpop.f32.mrb[49].mxu0  ;;  %v1224_v7 = vadd.f32 %v1188_v5, %v1050_v23  ;;  %v3398_v9 = vpop.f32.mrb[49].mxu1 }
 0x147   : > { %v1341_v10 = vpop.f32.mrb[50].mxu0  ;;  %v1191_v12 = vpop.f32.mrb[50].mxu1 }
 0x148   : > { %v1393_v13 = vadd.f32 %v1341_v10, %v1219_v41  ;;  %v3417_v14 = vpop.f32.mrb[51].mxu0  ;;  %v1225_v15 = vadd.f32 %v1191_v12, %v1051_v28  ;;  %v3399_v16 = vpop.f32.mrb[51].mxu1 }
 0x14d   : > { %v1346_v17 = vpop.f32.mrb[52].mxu0  ;;  %v1196_v18 = vpop.f32.mrb[52].mxu1 }
 0x14e   : > { %v1394_v22 = vadd.f32 %v1346_v17, %v1220_v52  ;;  %v3420_v19 = vpop.f32.mrb[53].mxu0  ;;  %v1226_v20 = vadd.f32 %v1196_v18, %v1052_v31  ;;  %v3402_v21 = vpop.f32.mrb[53].mxu1 }
 0x14f   : > { %v1349_v24 = vpop.f32.mrb[54].mxu0  ;;  %v1199_v25 = vpop.f32.mrb[54].mxu1 }
 0x150   : > { %v1395_v26 = vadd.f32 %v1349_v24, %v1221_v46  ;;  %v3421_v27 = vpop.f32.mrb[55].mxu0  ;;  %v1227_v23 = vadd.f32 %v1199_v25, %v1053_v36  ;;  %v3403_v29 = vpop.f32.mrb[55].mxu1 }
 0x155   : > { %v1354_v30 = vpop.f32.mrb[56].mxu0  ;;  %v1204_v47 = vpop.f32.mrb[56].mxu1 }
 0x156   : > { %v1396_v34 = vadd.f32 %v1354_v30, %v1222_v56  ;;  %v3424_v37 = vpop.f32.mrb[57].mxu0  ;;  %v1228_v32 = vadd.f32 %v1204_v47, %v1054_v62  ;;  %v3406_v28 = vpop.f32.mrb[57].mxu1 }
 0x157   : > { %v1357_v33 = vpop.f32.mrb[58].mxu0  ;;  %v1207_v35 = vpop.f32.mrb[58].mxu1 }
 0x158   : > { %v1397_v54 = vadd.f32 %v1357_v33, %v1223_v61  ;;  %v3425_v38 = vpop.f32.mrb[59].mxu0  ;;  %v1229_v39 = vadd.f32 %v1207_v35, %v1055_v49  ;;  %v3407_v41 = vpop.f32.mrb[59].mxu1 }
 0x15d   : > { %v1362_v31 = vpop.f32.mrb[60].mxu0  ;;  %v1212_v40 = vpop.f32.mrb[60].mxu1 }
 0x15e   : > { %v1398_v42 = vadd.f32 %v1362_v31, %v1224_v7  ;;  %v3428_v43 = vpop.f32.mrb[61].mxu0  ;;  %v1230_v44 = vadd.f32 %v1212_v40, %v1056_v57  ;;  %v3410_v36 = vpop.f32.mrb[61].mxu1 }
 0x15f   : > { %v1365_v52 = vpop.f32.mrb[62].mxu0  ;;  %v1215_v50 = vpop.f32.mrb[62].mxu1 }
 0x160   : > { %v1399_v45 = vadd.f32 %v1365_v52, %v1225_v15  ;;  %v3429_v48 = vpop.f32.mrb[63].mxu0  ;;  %v3411_v51 = vpop.f32.mrb[63].mxu1 }
 0x165   : > { %v1370_v46 = vpop.f32.mrb[64].mxu0  ;;  %v1569_v53 = vpop.f32.mrb[64].mxu1 }
 0x166   : > { %v1400_v62 = vadd.f32 %v1370_v46, %v1226_v20  ;;  %v3432_v55 = vpop.f32.mrb[65].mxu0  ;;  %v1623_v58 = vadd.f32 %v1569_v53, %v1392_v6  ;;  %v3446_v59 = vpop.f32.mrb[65].mxu1 }
 0x167   : > { %v1373_v56 = vpop.f32.mrb[66].mxu0  ;;  %v1572_v60 = vpop.f32.mrb[66].mxu1 }
 0x168   : > { %v1401_v49 = vadd.f32 %v1373_v56, %v1227_v23  ;;  %v3433_v63 = vpop.f32.mrb[67].mxu0  ;;  %v1624_v0 = vadd.f32 %v1572_v60, %v1393_v13  ;;  %v3447_v2 = vpop.f32.mrb[67].mxu1 }
 0x16d   : > { %v1378_v61 = vpop.f32.mrb[68].mxu0  ;;  %v1577_v3 = vpop.f32.mrb[68].mxu1 }
 0x16e   : > { %v1402_v57 = vadd.f32 %v1378_v61, %v1228_v32  ;;  %v3436_v4 = vpop.f32.mrb[69].mxu0  ;;  %v1625_v5 = vadd.f32 %v1577_v3, %v1394_v22  ;;  %v3450_v8 = vpop.f32.mrb[69].mxu1 }
 0x16f   : > { %v1381_v7 = vpop.f32.mrb[70].mxu0  ;;  %v1580_v10 = vpop.f32.mrb[70].mxu1 }
 0x170   : > { %v1403_v9 = vadd.f32 %v1381_v7, %v1229_v39  ;;  %v3437_v11 = vpop.f32.mrb[71].mxu0  ;;  %v1626_v12 = vadd.f32 %v1580_v10, %v1395_v26  ;;  %v3451_v14 = vpop.f32.mrb[71].mxu1 }
 0x175   : > { %v1386_v6 = vpop.f32.mrb[72].mxu0  ;;  %v1585_v16 = vpop.f32.mrb[72].mxu1 }
 0x176   : > { %v1404_v15 = vadd.f32 %v1386_v6, %v1230_v44  ;;  %v3440_v17 = vpop.f32.mrb[73].mxu0  ;;  %v1627_v18 = vadd.f32 %v1585_v16, %v1396_v34  ;;  %v3454_v19 = vpop.f32.mrb[73].mxu1 }
 0x177   : > { %v1389_v13 = vpop.f32.mrb[74].mxu0  ;;  %v1588_v20 = vpop.f32.mrb[74].mxu1 }
 0x178   : > { %v3441_v21 = vpop.f32.mrb[75].mxu0  ;;  %v1628_v24 = vadd.f32 %v1588_v20, %v1397_v54  ;;  %v3455_v25 = vpop.f32.mrb[75].mxu1 }
 0x17d   : > { %v1808_v27 = vpop.f32.mrb[76].mxu0  ;;  %v1593_v22 = vpop.f32.mrb[76].mxu1 }
 0x17e   : > { %v1862_v23 = vadd.f32 %v1808_v27, %v1623_v58  ;;  %v3476_v29 = vpop.f32.mrb[77].mxu0  ;;  %v1629_v30 = vadd.f32 %v1593_v22, %v1398_v42  ;;  %v3458_v47 = vpop.f32.mrb[77].mxu1 }
 0x17f   : > { %v1811_v37 = vpop.f32.mrb[78].mxu0  ;;  %v1596_v26 = vpop.f32.mrb[78].mxu1 }
 0x180   : > { %v1863_v32 = vadd.f32 %v1811_v37, %v1624_v0  ;;  %v3477_v28 = vpop.f32.mrb[79].mxu0  ;;  %v1630_v33 = vadd.f32 %v1596_v26, %v1399_v45  ;;  %v3459_v35 = vpop.f32.mrb[79].mxu1 }
 0x185   : > { %v1816_v38 = vpop.f32.mrb[80].mxu0  ;;  %v1601_v34 = vpop.f32.mrb[80].mxu1 }
 0x186   : > { %v1864_v39 = vadd.f32 %v1816_v38, %v1625_v5  ;;  %v3480_v41 = vpop.f32.mrb[81].mxu0  ;;  %v1631_v31 = vadd.f32 %v1601_v34, %v1400_v62  ;;  %v3462_v40 = vpop.f32.mrb[81].mxu1 }
 0x187   : > { %v1819_v54 = vpop.f32.mrb[82].mxu0  ;;  %v1604_v43 = vpop.f32.mrb[82].mxu1 }
 0x188   : > { %v1865_v44 = vadd.f32 %v1819_v54, %v1626_v12  ;;  %v3481_v52 = vpop.f32.mrb[83].mxu0  ;;  %v1632_v36 = vadd.f32 %v1604_v43, %v1401_v49  ;;  %v3463_v48 = vpop.f32.mrb[83].mxu1 }
 0x18d   : > { %v1824_v42 = vpop.f32.mrb[84].mxu0  ;;  %v1609_v50 = vpop.f32.mrb[84].mxu1 }
 0x18e   : > { %v1866_v51 = vadd.f32 %v1824_v42, %v1627_v18  ;;  %v3484_v46 = vpop.f32.mrb[85].mxu0  ;;  %v1633_v53 = vadd.f32 %v1609_v50, %v1402_v57  ;;  %v3466_v55 = vpop.f32.mrb[85].mxu1  ;;  %v4222_v42 = vld [vmem:[%s4380_s3] ss:$0 sm:$0xff] }
 0x18f   : > { %v1827_v45 = vpop.f32.mrb[86].mxu0  ;;  %v1612_v58 = vpop.f32.mrb[86].mxu1 }
 0x190   : > { %v1867_v59 = vadd.f32 %v1827_v45, %v1628_v24  ;;  %v3485_v56 = vpop.f32.mrb[87].mxu0  ;;  %v1634_v60 = vadd.f32 %v1612_v58, %v1403_v9  ;;  %v3467_v63 = vpop.f32.mrb[87].mxu1 }
 0x195   : > { %v1832_v62 = vpop.f32.mrb[88].mxu0  ;;  %v1617_v0 = vpop.f32.mrb[88].mxu1 }
 0x196   : > { %v1868_v2 = vadd.f32 %v1832_v62, %v1629_v30  ;;  %v3488_v61 = vpop.f32.mrb[89].mxu0  ;;  %v1635_v3 = vadd.f32 %v1617_v0, %v1404_v15  ;;  %v3470_v49 = vpop.f32.mrb[89].mxu1  ;;  %v3708_v62 = vld [vmem:[%s4208_s15 + $0x48] sm:$0xff]  }
 0x197   : > { %v1835_v4 = vpop.f32.mrb[90].mxu0  ;;  %v1620_v7 = vpop.f32.mrb[90].mxu1 }
 0x198   : > { %v1869_v5 = vadd.f32 %v1835_v4, %v1630_v33  ;;  %v3489_v8 = vpop.f32.mrb[91].mxu0  ;;  %v3471_v10 = vpop.f32.mrb[91].mxu1 }
 0x199   : > { %v3709_v8 = vld [vmem:[%s4208_s15 + $0x8] sm:$0xff]  }
 0x19d   : > { %v1840_v11 = vpop.f32.mrb[92].mxu0  ;;  %v2046_v12 = vpop.f32.mrb[92].mxu1 }
 0x19e   : > { %v1870_v57 = vadd.f32 %v1840_v11, %v1631_v31  ;;  %v3492_v14 = vpop.f32.mrb[93].mxu0  ;;  %v2100_v6 = vadd.f32 %v2046_v12, %v1862_v23  ;;  %v3506_v16 = vpop.f32.mrb[93].mxu1  ;;  %v3710_v12 = vld [vmem:[%s4208_s15 + $0x50] sm:$0xff]  }
 0x19f   : > { %v1843_v17 = vpop.f32.mrb[94].mxu0  ;;  %v2049_v18 = vpop.f32.mrb[94].mxu1 }
 0x1a0   : > { %v1871_v9 = vadd.f32 %v1843_v17, %v1632_v36  ;;  %v3493_v19 = vpop.f32.mrb[95].mxu0  ;;  %v2101_v13 = vadd.f32 %v2049_v18, %v1863_v32  ;;  %v3507_v20 = vpop.f32.mrb[95].mxu1  ;;  %v3711_v17 = vld [vmem:[%s4208_s15 + $0x10] sm:$0xff]  }
 0x1a1   : > { %v3712_v19 = vld [vmem:[%s4208_s15 + $0x58] sm:$0xff]  }
 0x1a5   : > { %v1848_v21 = vpop.f32.mrb[96].mxu0  ;;  %v2054_v24 = vpop.f32.mrb[96].mxu1 }
 0x1a6   : > { %v4211_v15 = vadd.f32 %v1848_v21, %v1633_v53  ;;  %v3496_v25 = vpop.f32.mrb[97].mxu0  ;;  %v2102_v27 = vadd.f32 %v2054_v24, %v1864_v39  ;;  %v3510_v22 = vpop.f32.mrb[97].mxu1 }
 0x1a7   : > { %v1851_v29 = vpop.f32.mrb[98].mxu0  ;;  %v2057_v47 = vpop.f32.mrb[98].mxu1  ;;  %v3713_v22 = vld [vmem:[%s4208_s15 + $0x18] sm:$0xff]  }
 0x1a8   : > { %v4213_v30 = vadd.f32 %v1851_v29, %v1634_v60  ;;  %v3497_v37 = vpop.f32.mrb[99].mxu0  ;;  %v2103_v23 = vadd.f32 %v2057_v47, %v1865_v44  ;;  %v3511_v26 = vpop.f32.mrb[99].mxu1  ;;  %v3707_v60 = vld [vmem:[%s4208_s15] sm:$0xff]  }
 0x1ad   : > { %v1856_v28 = vpop.f32.mrb[100].mxu0  ;;  %v2062_v35 = vpop.f32.mrb[100].mxu1 }
 0x1ae   : > { %v4215_v33 = vadd.f32 %v1856_v28, %v1635_v3  ;;  %v3500_v32 = vpop.f32.mrb[101].mxu0  ;;  %v2104_v38 = vadd.f32 %v2062_v35, %v1866_v51  ;;  %v3514_v34 = vpop.f32.mrb[101].mxu1 }
 0x1af   : > { %v1859_v41 = vpop.f32.mrb[102].mxu0  ;;  %v2065_v31 = vpop.f32.mrb[102].mxu1  ;;  %v3715_v32 = vld [vmem:[%s4208_s15 + $0x20] sm:$0xff]   ;;  %v3716_v34 = vld [vmem:[%s4208_s15 + $0x68] sm:$0xff]  }
 0x1b0   : > { %v3501_v40 = vpop.f32.mrb[103].mxu0  ;;  %v2105_v54 = vadd.f32 %v2065_v31, %v1867_v59  ;;  %v3515_v39 = vpop.f32.mrb[103].mxu1 }
 0x1b5   : > { %v2191_v43 = vpop.f32.mrb[104].mxu0  ;;  %v2070_v52 = vpop.f32.mrb[104].mxu1 }
 0x1b6   : > { %v2245_v36 = vadd.f32 %v2191_v43, %v2100_v6  ;;  %v3536_v48 = vpop.f32.mrb[105].mxu0  ;;  %v4217_v44 = vadd.f32 %v2070_v52, %v1868_v2  ;;  %v3518_v50 = vpop.f32.mrb[105].mxu1  ;;  %v3717_v43 = vld [vmem:[%s4208_s15 + $0x28] sm:$0xff]  }
 0x1b7   : > { %v2194_v51 = vpop.f32.mrb[106].mxu0  ;;  %v2073_v46 = vpop.f32.mrb[106].mxu1 }
 0x1b8   : > { %v2246_v53 = vadd.f32 %v2194_v51, %v2101_v13  ;;  %v3537_v55 = vpop.f32.mrb[107].mxu0  ;;  %v4224_v45 = vadd.f32 %v2073_v46, %v1869_v5  ;;  %v3519_v58 = vpop.f32.mrb[107].mxu1  ;;  %v2265_v59 = vadd.f32 %v4222_v42, %v2245_v36 }
 0x1b9   : > { %v3720_v58 = vld [vmem:[%s4208_s15 + $0x78] sm:$0xff]  }
 0x1ba   : > { %v2266_v56 = vadd.f32 %v4222_v42, %v2246_v53  ;;  %v3719_v53 = vld [vmem:[%s4208_s15 + $0x30] sm:$0xff]  }
 0x1bc   : > { %v2278_v63 = vpack.c.bf16 %v2266_v56, %v2265_v59 }
 0x1bd   : > { %v2199_v0 = vpop.f32.mrb[108].mxu0  ;;  %v2078_v2 = vpop.f32.mrb[108].mxu1 }
 0x1be   : > { %v2247_v61 = vadd.f32 %v2199_v0, %v2102_v27  ;;  %v3540_v3 = vpop.f32.mrb[109].mxu0  ;;  %3565 = vmatmul.mubr.msk.bf16.vlgmr.msra.gmra.mrb[120].mxu1 %vm566_vm2, %v2278_v63  ;;  %v4231_v4 = vadd.f32 %v2078_v2, %v1870_v57  ;;  %v3522_v49 = vpop.f32.mrb[109].mxu1  ;;  %v3721_v63 = vld [vmem:[%s4208_s15 + $0x38] sm:$0xff]  }
 0x1bf   : > { %3267 = vmatpush3.bf16.msra.mxu1 %v3707_v60  ;;  %v2202_v5 = vpop.f32.mrb[110].mxu0  ;;  %3568 = vmatprep.mubr.msk.bf16.mxu1 %vm3731_vm1, %v3730_v1  ;;  %v2081_v7 = vpop.f32.mrb[110].mxu1 }
 0x1c0   : > { %v2248_v10 = vadd.f32 %v2202_v5, %v2103_v23  ;;  %v3541_v11 = vpop.f32.mrb[111].mxu0  ;;  %3268 = vmatprep.subr.bf16.mxu1 %v3708_v62  ;;  %v4237_v14 = vadd.f32 %v2081_v7, %v1871_v9  ;;  %v3523_v6 = vpop.f32.mrb[111].mxu1  ;;  %v2267_v57 = vadd.f32 %v4222_v42, %v2247_v61  ;;  %v3714_v23 = vld [vmem:[%s4208_s15 + $0x60] sm:$0xff]   ;;  %v3732_v7 = vmov 1966171168  }
 0x1c1   : > { %v2592_v11 = vlaneseq }
 0x1c2   : > { %v2268_v16 = vadd.f32 %v4222_v42, %v2248_v10  ;;  %v2590_v10 = vunpack.c.l.s4 %v3732_v7 }
 0x1c3   : > { %3269 = vmatpush3.bf16.msra.mxu1 %v3709_v8 }
 0x1c4   : > { %v2279_v18 = vpack.c.bf16 %v2268_v16, %v2267_v57  ;;  %3270 = vmatprep.subr.bf16.mxu1 %v3710_v12  ;;  %v2591_v16 = vunpack.c.0.s8 %v2590_v10 }
 0x1c5   : > { %v2207_v13 = vpop.f32.mrb[112].mxu0  ;;  %v2086_v20 = vpop.f32.mrb[112].mxu1 }
 0x1c6   : > { %v2249_v21 = vadd.f32 %v2207_v13, %v2104_v38  ;;  %v3544_v24 = vpop.f32.mrb[113].mxu0  ;;  %3569 = vmatmul.mubr.msk.bf16.gmra.mrb[124].mxu1 %vm566_vm2, %v2279_v18  ;;  %v2110_v9 = vadd.f32 %v2086_v20, %v4211_v15  ;;  %v3526_v25 = vpop.f32.mrb[113].mxu1 }
 0x1c7   : > { %v2210_v27 = vpop.f32.mrb[114].mxu0  ;;  %3271 = vmatpush3.bf16.msra.mxu1 %v3711_v17  ;;  %3572 = vmatprep.mubr.msk.bf16.mxu1 %vm3731_vm1, %v3730_v1  ;;  %v2089_v29 = vpop.f32.mrb[114].mxu1  ;;  %v2593_v17 = vshrl.u32 %v2592_v11, 7 }
 0x1c8   : > { %v2250_v47 = vadd.f32 %v2210_v27, %v2105_v54  ;;  %v3545_v37 = vpop.f32.mrb[115].mxu0  ;;  %3272 = vmatprep.subr.bf16.mxu1 %v3712_v19  ;;  %v2111_v26 = vadd.f32 %v2089_v29, %v4213_v30  ;;  %v3527_v28 = vpop.f32.mrb[115].mxu1  ;;  %v2269_v35 = vadd.f32 %v4222_v42, %v2249_v21  ;;  %v3156_v19 = vld.sshfl [vmem:[%s4385_s8] sm:$0x11 pattern:$0x75316420] }
 0x1c9   : > { %v2594_v25 = vsub.s32 %v2591_v16, %v2593_v17 }
 0x1ca   : > { %v2270_v15 = vadd.f32 %v4222_v42, %v2250_v47 }
 0x1cb   : > { %3273 = vmatpush3.bf16.msra.mxu1 %v3713_v22  ;;  %v2595_v37 = vrot.slane %v3156_v19, %v2594_v25 }
 0x1cc   : > { %v2280_v38 = vpack.c.bf16 %v2270_v15, %v2269_v35  ;;  %3274 = vmatprep.subr.bf16.mxu1 %v3714_v23  ;;  %v2412_v23 = vld [vmem:[%s4383_s6] sm:$0x1] }
 0x1cd   : > { %v2215_v41 = vpop.f32.mrb[116].mxu0  ;;  %v2094_v31 = vpop.f32.mrb[116].mxu1  ;;  %v3140_v35 = vld [vmem:[%s4382_s5] ss:$0 sm:$0xff] }
 0x1ce   : > { %v2251_v40 = vadd.f32 %v2215_v41, %v4217_v44  ;;  %v3548_v54 = vpop.f32.mrb[117].mxu0  ;;  %3573 = vmatmul.mubr.msk.bf16.gmra.mrb[128].mxu1 %vm566_vm2, %v2280_v38  ;;  %v2112_v30 = vadd.f32 %v2094_v31, %v4215_v33  ;;  %v3530_v52 = vpop.f32.mrb[117].mxu1  ;;  %v3718_v44 = vld [vmem:[%s4208_s15 + $0x70] sm:$0xff]  }
 0x1cf   : > { %v2218_v39 = vpop.f32.mrb[118].mxu0  ;;  %3576 = vmatprep.mubr.msk.bf16.mxu1 %vm3731_vm1, %v3730_v1  ;;  %3275 = vmatpush3.bf16.msra.mxu1 %v3715_v32  ;;  %v2097_v50 = vpop.f32.mrb[118].mxu1 }
 0x1d0   : > { %v2252_v36 = vadd.f32 %v2218_v39, %v4224_v45  ;;  %v3549_v48 = vpop.f32.mrb[119].mxu0  ;;  %3276 = vmatprep.subr.bf16.mxu1 %v3716_v34  ;;  %v3531_v51 = vpop.f32.mrb[119].mxu1  ;;  %v2271_v46 = vadd.f32 %v4222_v42, %v2251_v40 }
 0x1d2   : > { %v2272_v33 = vadd.f32 %v4222_v42, %v2252_v36 }
 0x1d3   : > { %3277 = vmatpush3.bf16.msra.mxu1 %v3717_v43 }
 0x1d4   : > { %v2281_v55 = vpack.c.bf16 %v2272_v33, %v2271_v46  ;;  %3278 = vmatprep.subr.bf16.mxu1 %v3718_v44 }
 0x1d5   : > { %v2223_v59 = vpop.f32.mrb[120].mxu0 }
 0x1d6   : > { %v2253_v56 = vadd.f32 %v2223_v59, %v4231_v4  ;;  %v3552_v60 = vpop.f32.mrb[121].mxu0  ;;  %3577 = vmatmul.mubr.msk.bf16.gmra.mrb[132].mxu1 %vm566_vm2, %v2281_v55 }
 0x1d7   : > { %v2226_v45 = vpop.f32.mrb[122].mxu0  ;;  %3580 = vmatprep.mubr.msk.bf16.mxu1 %vm3731_vm1, %v3730_v1  ;;  %3279 = vmatpush3.bf16.msra.mxu1 %v3719_v53 }
 0x1d8   : > { %v2254_v62 = vadd.f32 %v2226_v45, %v4237_v14  ;;  %v3553_v0 = vpop.f32.mrb[123].mxu0  ;;  %3280 = vmatprep.subr.bf16.mxu1 %v3720_v58  ;;  %v2273_v2 = vadd.f32 %v4222_v42, %v2253_v56 }
 0x1da   : > { %v2274_v61 = vadd.f32 %v4222_v42, %v2254_v62 }
 0x1db   : > { %3281 = vmatpush3.bf16.msra.mxu1 %v3721_v63 }
 0x1dc   : > { %v2282_v3 = vpack.c.bf16 %v2274_v61, %v2273_v2  ;;  %3622 = vmatprep.subr.bf16.mxu1 %v3730_v1 }
 0x1dd   : > { %v2231_v4 = vpop.f32.mrb[124].mxu0 }
 0x1de   : > { %v2255_v49 = vadd.f32 %v2231_v4, %v2110_v9  ;;  %v3556_v5 = vpop.f32.mrb[125].mxu0  ;;  %3581 = vmatmul.mubr.msk.bf16.gmra.mrb[136].mxu1 %vm566_vm2, %v2282_v3  ;;  %v2588_v9 = vcombine.high %v3156_v19, %v3156_v19 }
 0x1df   : > { %v2234_v8 = vpop.f32.mrb[126].mxu0  ;;  %3584 = vmatprep.mubr.msk.bf16.mxu1 %vm3731_vm1, %v3730_v1 }
 0x1e0   : > { %v2256_v12 = vadd.f32 %v2234_v8, %v2111_v26  ;;  %v3557_v14 = vpop.f32.mrb[127].mxu0  ;;  %v2275_v6 = vadd.f32 %v4222_v42, %v2255_v49  ;;  %v2602_v29 = vrot.slane %v2588_v9, %v2594_v25  ;;  %v2444_v26 = vsel %vm2442_vm6, %v2412_v23, 0 }
 0x1e1   : > { %3593 = vmatpush3.bf16.msra.mxu0 %v2444_v26 }
 0x1e2   : > { %v2276_v57 = vadd.f32 %v4222_v42, %v2256_v12 }
 0x1e4   : > { %v2283_v18 = vpack.c.bf16 %v2276_v57, %v2275_v6 }
 0x1e5   : > { %v2239_v13 = vpop.f32.mrb[128].mxu0 }
 0x1e6   : > { %v2257_v20 = vadd.f32 %v2239_v13, %v2112_v30  ;;  %v3560_v21 = vpop.f32.mrb[129].mxu0  ;;  %3585 = vmatmul.mubr.msk.bf16.gmra.mrb[140].mxu1 %vm566_vm2, %v2283_v18 }
 0x1e7   : > { %v2242_v24 = vpop.f32.mrb[130].mxu0  ;;  %3588 = vmatprep.mubr.msk.bf16.mxu1 %vm3731_vm1, %v3730_v1 }
 0x1e8   : > { %v2277_v27 = vadd.f32 %v4222_v42, %v2257_v20  ;;  %v3561_v22 = vpop.f32.mrb[131].mxu0  ;;  %v2742_v42 = vld [vmem:[%s4386_s9] sm:$0x3] }
 0x1e9   : > { %v2748_v28 = vsel %vm588_vm0, %v2742_v42, 0  ;;  %v2792_v22 = vld [vmem:[%s4388_s11] sm:$0x1] }
 0x1ea   : > { %v2284_v47 = vpack.c.bf16 %v2277_v27, %v2277_v27 }
 0x1ee   : > { %3589 = vmatmul.mubr.msk.bf16.gmra.mrb[144].mxu1 %vm566_vm2, %v2284_v47  ;;  %v3148_v47 = vld [vmem:[%s4384_s7] ss:$0 sm:$0xff] }
 0x1ef   : > { %2733 = vmatprep.mubr.bf16.mxu1 %v2602_v29  ;;  %v2797_v29 = vsel %vm2442_vm6, %v2792_v22, 0 }
 0x1f6   : > { %2734 = vmatmul.mubr.bf16.vlgmr.msra.gmra.mrb[148].mxu1 %v2595_v37 }
 0x1f7   : > { %3624 = vmatprep.mubr.msk.bf16.mxu1 %vm3731_vm1, %v3730_v1  ;;  %3623 = vmatpush3.bf16.msra.mxu1 %v2748_v28 }
 0x1f8   : > { %3628 = vmatprep.subr.bf16.mxu1 %v3730_v1 }
 0x291   : > { %v2351_v15 = vpop.f32.mrb[120].mxu1 }
 0x292   : > { %v3566_v32 = vpop.f32.mrb[121].mxu1  ;;  %v2352_v34 = vadd.f32 %v3140_v35, %v2351_v15 }
 0x293   : > { %v2354_v38 = vpop.f32.mrb[122].mxu1 }
 0x294   : > { %v2355_v41 = vadd.f32 %v3140_v35, %v2354_v38  ;;  %v3567_v31 = vpop.f32.mrb[123].mxu1 }
 0x296   : > { %v2405_v40 = vpack.c.bf16 %v2355_v41, %v2352_v34 }
 0x298   : > { %3595 = vmatmul.mubr.msk.bf16.vlgmr.msra.gmra.mrb[132].mxu0 %vm2420_vm7, %v2405_v40 }
 0x299   : > { %v2359_v54 = vpop.f32.mrb[124].mxu1  ;;  %3598 = vmatprep.mubr.msk.bf16.mxu0 %vm3731_vm1, %v3730_v1 }
 0x29a   : > { %v3570_v30 = vpop.f32.mrb[125].mxu1  ;;  %v2360_v43 = vadd.f32 %v3140_v35, %v2359_v54 }
 0x29b   : > { %v2362_v39 = vpop.f32.mrb[126].mxu1 }
 0x29c   : > { %v2363_v52 = vadd.f32 %v3140_v35, %v2362_v39  ;;  %v3571_v36 = vpop.f32.mrb[127].mxu1 }
 0x29e   : > { %v2406_v48 = vpack.c.bf16 %v2363_v52, %v2360_v43 }
 0x2a0   : > { %3599 = vmatmul.mubr.msk.bf16.gmra.mrb[136].mxu0 %vm2420_vm7, %v2406_v48 }
 0x2a1   : > { %v2367_v50 = vpop.f32.mrb[128].mxu1  ;;  %3602 = vmatprep.mubr.msk.bf16.mxu0 %vm3731_vm1, %v3730_v1 }
 0x2a2   : > { %v3574_v44 = vpop.f32.mrb[129].mxu1  ;;  %v2368_v46 = vadd.f32 %v3140_v35, %v2367_v50 }
 0x2a3   : > { %v2370_v51 = vpop.f32.mrb[130].mxu1 }
 0x2a4   : > { %v2371_v33 = vadd.f32 %v3140_v35, %v2370_v51  ;;  %v3575_v53 = vpop.f32.mrb[131].mxu1 }
 0x2a6   : > { %v2407_v55 = vpack.c.bf16 %v2371_v33, %v2368_v46 }
 0x2a8   : > { %3603 = vmatmul.mubr.msk.bf16.gmra.mrb[140].mxu0 %vm2420_vm7, %v2407_v55 }
 0x2a9   : > { %v2375_v58 = vpop.f32.mrb[132].mxu1  ;;  %3606 = vmatprep.mubr.msk.bf16.mxu0 %vm3731_vm1, %v3730_v1 }
 0x2aa   : > { %v3578_v59 = vpop.f32.mrb[133].mxu1  ;;  %v2376_v60 = vadd.f32 %v3140_v35, %v2375_v58 }
 0x2ab   : > { %v2378_v56 = vpop.f32.mrb[134].mxu1 }
 0x2ac   : > { %v2379_v45 = vadd.f32 %v3140_v35, %v2378_v56  ;;  %v3579_v63 = vpop.f32.mrb[135].mxu1 }
 0x2ae   : > { %v2408_v62 = vpack.c.bf16 %v2379_v45, %v2376_v60 }
 0x2b0   : > { %3607 = vmatmul.mubr.msk.bf16.gmra.mrb[144].mxu0 %vm2420_vm7, %v2408_v62 }
 0x2b1   : > { %v2383_v0 = vpop.f32.mrb[136].mxu1  ;;  %3610 = vmatprep.mubr.msk.bf16.mxu0 %vm3731_vm1, %v3730_v1 }
 0x2b2   : > { %v3582_v2 = vpop.f32.mrb[137].mxu1  ;;  %v2384_v3 = vadd.f32 %v3140_v35, %v2383_v0 }
 0x2b3   : > { %v2386_v61 = vpop.f32.mrb[138].mxu1 }
 0x2b4   : > { %v2387_v4 = vadd.f32 %v3140_v35, %v2386_v61  ;;  %v3583_v49 = vpop.f32.mrb[139].mxu1 }
 0x2b6   : > { %v2409_v5 = vpack.c.bf16 %v2387_v4, %v2384_v3 }
 0x2b8   : > { %3611 = vmatmul.mubr.msk.bf16.gmra.mrb[148].mxu0 %vm2420_vm7, %v2409_v5  ;;  %v2743_v5 = vld [vmem:[%s4387_s10] sm:$0x1] }
 0x2b9   : > { %v2391_v8 = vpop.f32.mrb[140].mxu1  ;;  %3614 = vmatprep.mubr.msk.bf16.mxu0 %vm3731_vm1, %v3730_v1 }
 0x2ba   : > { %v3586_v7 = vpop.f32.mrb[141].mxu1  ;;  %v2392_v11 = vadd.f32 %v3140_v35, %v2391_v8 }
 0x2bb   : > { %v2394_v10 = vpop.f32.mrb[142].mxu1 }
 0x2bc   : > { %v2395_v12 = vadd.f32 %v3140_v35, %v2394_v10  ;;  %v3587_v14 = vpop.f32.mrb[143].mxu1 }
 0x2be   : > { %v2410_v6 = vpack.c.bf16 %v2395_v12, %v2392_v11 }
 0x2c0   : > { %3615 = vmatmul.mubr.msk.bf16.gmra.mrb[152].mxu0 %vm2420_vm7, %v2410_v6  ;;  %v2790_v6 = vld [vmem:[%s4389_s12] sm:$0x1] }
 0x2c1   : > { %v2399_v57 = vpop.f32.mrb[144].mxu1  ;;  %3618 = vmatprep.mubr.msk.bf16.mxu0 %vm3731_vm1, %v3730_v1 }
 0x2c2   : > { %v2400_v16 = vadd.f32 %v3140_v35, %v2399_v57  ;;  %v3590_v17 = vpop.f32.mrb[145].mxu1 }
 0x2c3   : > { %v2402_v18 = vpop.f32.mrb[146].mxu1 }
 0x2c4   : > { %v3591_v19 = vpop.f32.mrb[147].mxu1  ;;  %v2411_v13 = vpack.c.bf16 %v2400_v16, %v2400_v16 }
 0x2c8   : > { %3619 = vmatmul.mubr.msk.bf16.gmra.mrb[156].mxu0 %vm2420_vm7, %v2411_v13 }
 0x2c9   : > { %v3282_v20 = vpop.f32.mrb[148].mxu1 }
 0x2ca   : > { %v3283_v21 = vpop.f32.mrb[149].mxu1 }
 0x2cb   : > { %v3284_v24 = vadd.f32 %v3283_v21, %v3282_v20  ;;  %v3285_v9 = vpop.f32.mrb[150].mxu1 }
 0x2cc   : > { %v3286_v25 = vpop.f32.mrb[151].mxu1 }
 0x2cd   : > { %v2741_v27 = vpack.c.bf16 %v3284_v24, %v3284_v24 }
 0x2cf   : > { %3625 = vmatmul.mubr.msk.bf16.vlgmr.msra.gmra.mrb[152].mxu1 %vm566_vm2, %v2741_v27 }
 0x2d0   : > { %3630 = vmatprep.mubr.msk.bf16.mxu1 %vm3731_vm1, %v3730_v1  ;;  %3629 = vmatpush3.bf16.msra.mxu1 %v2797_v29 }
 0x36b   : > { %v2480_v1 = vpop.f32.mrb[132].mxu0 }
 0x36c   : > { %v2481_v37 = vadd.f32 %v3148_v47, %v2480_v1  ;;  %v3596_v23 = vpop.f32.mrb[133].mxu0 }
 0x36d   : > { %v2483_v26 = vpop.f32.mrb[134].mxu0 }
 0x36e   : > { %2534 = vst.msk [vmem:[%s4335_s19] sm:$0xff] %vm2420_vm7, %v2481_v37  ;;  %v2484_v42 = vadd.f32 %v3148_v47, %v2483_v26  ;;  %v3597_v28 = vpop.f32.mrb[135].mxu0 }
 0x370   : > { %2535 = vst.msk [vmem:[%s4335_s19 + $0x8] sm:$0xff] %vm2420_vm7, %v2484_v42 }
 0x373   : > { %v2488_v35 = vpop.f32.mrb[136].mxu0 }
 0x374   : > { %v2489_v15 = vadd.f32 %v3148_v47, %v2488_v35  ;;  %v3600_v32 = vpop.f32.mrb[137].mxu0 }
 0x375   : > { %v2491_v38 = vpop.f32.mrb[138].mxu0 }
 0x376   : > { %2536 = vst.msk [vmem:[%s4335_s19 + $0x10] sm:$0xff] %vm2420_vm7, %v2489_v15  ;;  %v2492_v34 = vadd.f32 %v3148_v47, %v2491_v38  ;;  %v3601_v41 = vpop.f32.mrb[139].mxu0 }
 0x378   : > { %2537 = vst.msk [vmem:[%s4335_s19 + $0x18] sm:$0xff] %vm2420_vm7, %v2492_v34 }
 0x37b   : > { %v2496_v31 = vpop.f32.mrb[140].mxu0 }
 0x37c   : > { %v2497_v40 = vadd.f32 %v3148_v47, %v2496_v31  ;;  %v3604_v54 = vpop.f32.mrb[141].mxu0 }
 0x37d   : > { %v2499_v30 = vpop.f32.mrb[142].mxu0 }
 0x37e   : > { %2538 = vst.msk [vmem:[%s4335_s19 + $0x20] sm:$0xff] %vm2420_vm7, %v2497_v40  ;;  %v2500_v39 = vadd.f32 %v3148_v47, %v2499_v30  ;;  %v3605_v43 = vpop.f32.mrb[143].mxu0 }
 0x380   : > { %2539 = vst.msk [vmem:[%s4335_s19 + $0x28] sm:$0xff] %vm2420_vm7, %v2500_v39 }
 0x383   : > { %v2504_v52 = vpop.f32.mrb[144].mxu0 }
 0x384   : > { %v2505_v36 = vadd.f32 %v3148_v47, %v2504_v52  ;;  %v3608_v48 = vpop.f32.mrb[145].mxu0 }
 0x385   : > { %v2507_v50 = vpop.f32.mrb[146].mxu0 }
 0x386   : > { %2540 = vst.msk [vmem:[%s4335_s19 + $0x30] sm:$0xff] %vm2420_vm7, %v2505_v36  ;;  %v2508_v44 = vadd.f32 %v3148_v47, %v2507_v50  ;;  %v3609_v51 = vpop.f32.mrb[147].mxu0 }
 0x388   : > { %2541 = vst.msk [vmem:[%s4335_s19 + $0x38] sm:$0xff] %vm2420_vm7, %v2508_v44 }
 0x38b   : > { %v2512_v46 = vpop.f32.mrb[148].mxu0 }
 0x38c   : > { %v2513_v33 = vadd.f32 %v3148_v47, %v2512_v46  ;;  %v3612_v53 = vpop.f32.mrb[149].mxu0 }
 0x38d   : > { %v2515_v55 = vpop.f32.mrb[150].mxu0 }
 0x38e   : > { %2542 = vst.msk [vmem:[%s4335_s19 + $0x40] sm:$0xff] %vm2420_vm7, %v2513_v33  ;;  %v2516_v58 = vadd.f32 %v3148_v47, %v2515_v55  ;;  %v3613_v59 = vpop.f32.mrb[151].mxu0 }
 0x390   : > { %2543 = vst.msk [vmem:[%s4335_s19 + $0x48] sm:$0xff] %vm2420_vm7, %v2516_v58 }
 0x393   : > { %v2520_v56 = vpop.f32.mrb[152].mxu0 }
 0x394   : > { %v2521_v60 = vadd.f32 %v3148_v47, %v2520_v56  ;;  %v3616_v45 = vpop.f32.mrb[153].mxu0 }
 0x395   : > { %v2523_v63 = vpop.f32.mrb[154].mxu0 }
 0x396   : > { %2544 = vst.msk [vmem:[%s4335_s19 + $0x50] sm:$0xff] %vm2420_vm7, %v2521_v60  ;;  %v2524_v62 = vadd.f32 %v3148_v47, %v2523_v63  ;;  %v3617_v0 = vpop.f32.mrb[155].mxu0 }
 0x398   : > { %2545 = vst.msk [vmem:[%s4335_s19 + $0x58] sm:$0xff] %vm2420_vm7, %v2524_v62 }
 0x39b   : > { %v2528_v2 = vpop.f32.mrb[156].mxu0 }
 0x39c   : > { %v2529_v61 = vadd.f32 %v3148_v47, %v2528_v2  ;;  %v3620_v3 = vpop.f32.mrb[157].mxu0 }
 0x39d   : > { %v2531_v4 = vpop.f32.mrb[158].mxu0 }
 0x39e   : > { %2546 = vst.msk [vmem:[%s4335_s19 + $0x60] sm:$0xff] %vm2420_vm7, %v2529_v61  ;;  %v3621_v49 = vpop.f32.mrb[159].mxu0 }
 0x3a2   : > { %v2784_v8 = vpop.f32.mrb[152].mxu1 }
 0x3a3   : > { %v2785_v7 = vadd.f32 %v2784_v8, %v2743_v5  ;;  %v3626_v10 = vpop.f32.mrb[153].mxu1 }
 0x3a4   : > { %v2787_v11 = vpop.f32.mrb[154].mxu1 }
 0x3a5   : > { %v2791_v12 = vpack.c.bf16 %v2785_v7, %v2785_v7  ;;  %v3627_v14 = vpop.f32.mrb[155].mxu1 }
 0x3a7   : > { %3631 = vmatmul.mubr.msk.bf16.vlgmr.msra.gmra.mrb[156].mxu1 %vm2420_vm7, %v2791_v12 }
 0x47a   : > { %v2833_v57 = vpop.f32.mrb[156].mxu1 }
 0x47b   : > { %v2839_v16 = vadd.f32 %v2833_v57, %v2790_v6  ;;  %v3632_v17 = vpop.f32.mrb[157].mxu1 }
 0x47c   : > { %v2836_v18 = vpop.f32.mrb[158].mxu1 }
 0x47d   : > { %2841 = vst.msk [vmem:[%s501_s26] sm:$0x1] %vm2840_vm8, %v2839_v16  ;;  %v3633_v19 = vpop.f32.mrb[159].mxu1 }
 0x47e PF: > { %s25_s29 = sadd.s32 1, %s3728_s29  }
 0x47f   : > { %p22_p5 = scmp.ge.s32.totalorder %s25_s29, 4  }
 0x481   :  { %24 = sbr.rel (!%p22_p5) target bundleno = 1 (0x1), region = 128 }

// kernel: dmdconv_forward.5
= control target key start
LH: loop header
LB: loop body
LE: loop exit
PB: predicated region body
PF: predicated region fallthrough
CT: control target
= control target key end

     0   :  { %s4356_s29 = smov 0   ;;  %s5156_s0 = inlined_call_operand.vmem [shape: bf16[8,182,4], index: 0, kind: input, shape index: {}]   ;;  %s5157_s1 = inlined_call_operand.vmem [shape: bf16[2,256,4], index: 1, kind: input, shape index: {}]   ;;  %s5158_s2 = inlined_call_operand.vmem [shape: bf16[9,4,4], index: 2, kind: input, shape index: {}]   ;;  %s5159_s3 = inlined_call_operand.vmem [shape: f32[1,4], index: 3, kind: input, shape index: {}]   ;;  %s5160_s4 = inlined_call_operand.vmem [shape: bf16[4,2], index: 4, kind: input, shape index: {}]   ;;  %s5161_s5 = inlined_call_operand.vmem [shape: f32[1,2], index: 5, kind: input, shape index: {}]   ;;  %s5162_s6 = inlined_call_operand.vmem [shape: bf16[2,2], index: 6, kind: input, shape index: {}]   ;;  %s5163_s7 = inlined_call_operand.vmem [shape: f32[1,2], index: 7, kind: input, shape index: {}]   ;;  %s5164_s8 = inlined_call_operand.vmem [shape: bf16[9,256], index: 8, kind: input, shape index: {}]   ;;  %s5165_s9 = inlined_call_operand.vmem [shape: bf16[4,2], index: 9, kind: input, shape index: {}]   ;;  %s5166_s10 = inlined_call_operand.vmem [shape: f32[1,2], index: 10, kind: input, shape index: {}]   ;;  %s5167_s11 = inlined_call_operand.vmem [shape: bf16[9,2,2], index: 11, kind: input, shape index: {}]   ;;  %s5168_s12 = inlined_call_operand.vmem [shape: f32[1,2], index: 12, kind: input, shape index: {}]   ;;  %s5169_s13 = inlined_call_operand.vmem [shape: f32[2,104,2], index: 13, kind: output, shape index: {0}]   ;;  %s5170_s14 = inlined_call_operand.vmem [shape: f32[2,1,2], index: 14, kind: output, shape index: {1}]  }
   0x1 LB: > { %s4362_s30 = sadd.s32 4294967295, %s4277_s29   ;;  %p3369_p0 = scmp.ge.s32.totalorder %s4277_s29, 1  ;;  %s4277_s29 = sphi %s4356_s29, %s25_s29  }
   0x2   : > { %p427_p1 = scmp.lt.s32.totalorder %s4277_s29, 3 }
   0x4   : > { %p428_p2 = pnand %p3369_p0, %p427_p1 }
   0x5   : > { %v3389_v0 = vld [vmem:[%s5158_s2 + $0x2] sm:$0x3] (!%p428_p2)  ;;  %vm647_vm0 = vcmask (!%p428_p2), 1041408   ;;  %s3370_s17 = sshll.u32 (!%p428_p2), %s4362_s30, 2  ;;  %v4279_v1 = vmov (!%p428_p2), 0.0   ;;  %vm4280_vm1 = vmmov (!%p428_p2), 0  }
   0x6   : > { %431 = sbr.rel (%p428_p2) target bundleno = 1287 (0x507), region = 72  ;;  %3752 = vmatprep.subr.bf16.mxu0 (!%p428_p2), %v4279_v1  ;;  %v649_v2 = vsel (!%p428_p2), %vm647_vm0, %v3389_v0, 0  ;;  %3754 = vmatprep.mubr.msk.bf16.mxu0 (!%p428_p2), %vm4280_vm1, %v4279_v1  ;;  %p483_p3 = scmp.lt.s32.totalorder (!%p428_p2), %s3370_s17, 7  ;;  %v516_v3 = vld [vmem:[%s5158_s2] sm:$0x3] (!%p428_p2)  ;;  %vm625_vm2 = vcmask (!%p428_p2), 31744  }
   0x7   : > { %3753 = vmatpush3.bf16.msra.mxu0 (!%p428_p2), %v649_v2  ;;  %4142 = vmatprep.subr.bf16.mxu1 (!%p428_p2), %v4279_v1  ;;  %v794_v4 = vsel (!%p428_p2), %vm647_vm0, %v516_v3, 0  ;;  %v3447_v5 = vld [vmem:[%s5158_s2 + $0x6] sm:$0x3] (!%p428_p2)  ;;  %vm569_vm3 = vsmask.f32 (!%p428_p2), 7424  ;;  %vm1415_vm6 = vcmask (!%p428_p2), 1044480  }
   0x8   : > { %3782 = vmatprep.subr.bf16.mxu0 (!%p428_p2), %v4279_v1  ;;  %3792 = vmatprep.mubr.msk.bf16.mxu1 (!%p428_p2), %vm4280_vm1, %v4279_v1  ;;  %v1260_v13 = vsel (!%p428_p2), %vm647_vm0, %v3447_v5, 0  ;;  %vm1175_vm4 = vsmask.f32 (!%p428_p2), 5376  ;;  %vm935_vm5 = vsmask.f32 (!%p428_p2), 6400  ;;  %vm2154_vm8 = vcmask (!%p428_p2), 1046528  }
   0x9   : > { %4143 = vmatpush3.bf16.msra.mxu1 (!%p428_p2), %v794_v4  ;;  %vm1742_vm7 = vsmask.f32 (!%p428_p2), 4352  ;;  %p489_p4 = scmp.lt.s32.totalorder (!%p428_p2), %s4362_s30, 1  ;;  %vm2477_vm9 = vcmask (!%p428_p2), 1040384   ;;  %vm2455_vm10 = vcmask (!%p428_p2), 15360   ;;  %vm3271_vm11 = vcmask (!%p428_p2), 8192  }
   0xa   : > { %3842 = vmatprep.subr.bf16.mxu1 (!%p428_p2), %v4279_v1 }
   0xd   : > { %s5172_s17 = smov (!%p483_p3, %s3370_s17), 7  ;;  %s5174_s30 = smov (!%p489_p4, %s4362_s30), 1 }
   0xe   : > { %s4177_s20 = smul.u32 92, %s5172_s17  ;;  %s3621_s26 = sshll.u32 %s5174_s30, 7 }
   0xf   : > { %s4862_s15 = scalar_lea.vmem %s5157_s1, %s3621_s26  ;;  %s4178_s16 = smul.u32 104, %s5174_s30 }
  0x10   : > { %s4386_s23 = scalar_lea.vmem %s5156_s0, %s4177_s20 }
  0x11   : > { %v4189_v6 = vld [vmem:[%s4386_s23 + $0x5c] sm:$0xff]   ;;  %v4190_v7 = vld [vmem:[%s4386_s23 + $0x64] sm:$0xff]   ;;  %v4191_v11 = vld [vmem:[%s4386_s23 + $0x6c] sm:$0xff]   ;;  %s5051_s21 = scalar_lea.vmem %s5169_s13, %s4178_s16  ;;  %s501_s16 = scalar_lea.vmem %s5170_s14, %s5174_s30 }
  0x12   : > { %v571_v8 = vshrl.u32 %v4189_v6, 16  ;;  %v573_v9 = vshll.u32 %v4189_v6, 16  ;;  %v578_v10 = vshll.u32 %v4190_v7, 16  ;;  %v4193_v12 = vld [vmem:[%s4386_s23 + $0x10] sm:$0xff]   ;;  %v582_v17 = vshrl.u32 %v4190_v7, 16  ;;  %v4195_v20 = vld [vmem:[%s4386_s23 + $0x18] sm:$0xff]  }
  0x13   : > { %3793 = vmatmul.mubr.msk.bf16.vlgmr.msra.gmra.mrb[0].mxu1 %vm625_vm2, %v4193_v12  ;;  %v586_v18 = vshll.u32 %v4191_v11, 16  ;;  %v4192_v23 = vld [vmem:[%s4386_s23 + $0x74] sm:$0xff]   ;;  %v590_v25 = vshrl.u32 %v4191_v11, 16  ;;  %v4194_v27 = vld [vmem:[%s4386_s23 + $0x7c] sm:$0xff]   ;;  %v4425_v36 = vld [vmem:[%s4386_s23 + $0xc4] sm:$0xf] }
  0x14   : > { %v575_v14 = vrot.slane %v573_v9, 1  ;;  %v580_v15 = vrot.slane %v578_v10, 1  ;;  %3796 = vmatprep.mubr.msk.bf16.mxu1 %vm4280_vm1, %v4279_v1  ;;  %3843 = vmatpush3.bf16.msra.mxu1 %v1260_v13  ;;  %v594_v26 = vshll.u32 %v4192_v23, 16  ;;  %v4197_v28 = vld [vmem:[%s4386_s23 + $0x20] sm:$0xff]   ;;  %v598_v31 = vshrl.u32 %v4192_v23, 16  ;;  %v4199_v39 = vld [vmem:[%s4386_s23 + $0x28] sm:$0xff]  }
  0x15   : > { %3902 = vmatprep.subr.bf16.mxu1 %v4279_v1  ;;  %v588_v22 = vrot.slane %v586_v18, 1  ;;  %v602_v32 = vshll.u32 %v4194_v27, 16  ;;  %v3433_v34 = vld [vmem:[%s4386_s23 + $0xbc] sm:$0xc]  ;;  %v4422_v35 = vld [vmem:[%s4386_s23 + $0xc0] sm:$0xf] }
  0x16   : > { %v576_v16 = vor.u32 %v575_v14, %v571_v8  ;;  %v584_v21 = vor.u32 %v582_v17, %v580_v15  ;;  %v596_v30 = vrot.slane %v594_v26, 1  ;;  %v4428_v37 = vld [vmem:[%s4386_s23 + $0xc8] sm:$0xf]  ;;  %v3448_v40 = vcombine.low %v3433_v34, %v4422_v35  ;;  %v4443_v51 = vld [vmem:[%s4386_s23 + $0xcc] sm:$0xf] }
  0x17   : > { %v592_v29 = vor.u32 %v590_v25, %v588_v22  ;;  %v4196_v38 = vld [vmem:[%s4386_s23 + $0x84] sm:$0xff]   ;;  %v604_v42 = vrot.slane %v602_v32, 1  ;;  %v3449_v43 = vcombine.low %v4425_v36, %v4428_v37  ;;  %v606_v44 = vshrl.u32 %v4194_v27, 16  ;;  %v4446_v52 = vld [vmem:[%s4386_s23 + $0xd0] sm:$0xf] }
  0x18   : > { %v581_v19 = vsel %vm569_vm3, %v576_v16, %v580_v15  ;;  %v589_v24 = vsel %vm569_vm3, %v584_v21, %v588_v22  ;;  %v600_v41 = vor.u32 %v598_v31, %v596_v30  ;;  %v610_v45 = vshll.u32 %v4196_v38, 16  ;;  %v4449_v53 = vld [vmem:[%s4386_s23 + $0xd4] sm:$0xf]  ;;  %v4452_v54 = vld [vmem:[%s4386_s23 + $0xd8] sm:$0xf] }
  0x19   : > { %3755 = vmatmul.mubr.msk.bf16.vlgmr.msra.gmra.mrb[0].mxu0 %vm625_vm2, %v581_v19  ;;  %v597_v33 = vsel %vm569_vm3, %v592_v29, %v596_v30  ;;  %v1177_v46 = vshrl.u32 %v3448_v40, 16  ;;  %v1180_v47 = vshll.u32 %v3448_v40, 16  ;;  %v1185_v49 = vshrl.u32 %v3449_v43, 16  ;;  %v4198_v57 = vld [vmem:[%s4386_s23 + $0x8c] sm:$0x1f]  }
  0x1a   : > { %3783 = vmatpush3.bf16.msra.mxu0 %v794_v4  ;;  %3758 = vmatprep.mubr.msk.bf16.mxu0 %vm4280_vm1, %v4279_v1  ;;  %v605_v48 = vsel %vm569_vm3, %v600_v41, %v604_v42  ;;  %v1188_v50 = vshll.u32 %v3449_v43, 16  ;;  %v608_v55 = vor.u32 %v606_v44, %v604_v42  ;;  %v612_v56 = vrot.slane %v610_v45, 1  ;;  %v4200_v58 = vld [vmem:[%s4386_s23 + $0x30] ss:$0 sps:$4 sm:$0xff]   ;;  %v4466_v5 = vld [vmem:[%s4386_s23 + $0xdc] sm:$0xf] }
  0x1b   : > { %3812 = vmatprep.subr.bf16.mxu0 %v4279_v1  ;;  %3797 = vmatmul.mubr.msk.bf16.gmra.mrb[4].mxu1 %vm625_vm2, %v4195_v20  ;;  %v1179_v59 = vrot.slane %v1177_v46, 2  ;;  %v1182_v60 = vrot.slane %v1180_v47, 3  ;;  %v1187_v61 = vrot.slane %v1185_v49, 2  ;;  %v3450_v63 = vcombine.low %v4443_v51, %v4446_v52  ;;  %v4471_v12 = vld [vmem:[%s4386_s23 + $0xe0] sm:$0xf]  ;;  %v4204_v43 = vld [vmem:[%s4386_s23 + $0x8] sm:$0xff]  }
  0x1c   : > { %3800 = vmatprep.mubr.msk.bf16.mxu1 %vm4280_vm1, %v4279_v1  ;;  %v1190_v62 = vrot.slane %v1188_v50, 3  ;;  %v3451_v0 = vcombine.low %v4449_v53, %v4452_v54  ;;  %v613_v2 = vsel %vm569_vm3, %v608_v55, %v612_v56  ;;  %v614_v3 = vshrl.u32 %v4196_v38, 16  ;;  %v3492_v13 = vld [vmem:[%s5158_s2 + $0xa] sm:$0x3]  ;;  %v4494_v30 = vld [vmem:[%s4386_s23 + $0xe4] sm:$0xf] }
  0x1d   : > { %v618_v4 = vshll.u32 %v4198_v57, 16  ;;  %v1183_v6 = vor.u32 %v1182_v60, %v1179_v59  ;;  %v1194_v8 = vshrl.u32 %v3450_v63, 16  ;;  %v1197_v9 = vshll.u32 %v3450_v63, 16  ;;  %v4497_v31 = vld [vmem:[%s4386_s23 + $0xe8] sm:$0xf]  ;;  %v4201_v41 = vld [vmem:[%s4386_s23] sm:$0xff]  }
  0x1e   : > { %v1191_v7 = vor.u32 %v1190_v62, %v1187_v61  ;;  %v1203_v10 = vshrl.u32 %v3451_v0, 16  ;;  %v1206_v11 = vshll.u32 %v3451_v0, 16  ;;  %v616_v14 = vor.u32 %v614_v3, %v612_v56  ;;  %v4203_v42 = vld [vmem:[%s4386_s23] sm:$0xfe]   ;;  %v3446_v49 = vld [vmem:[%s4386_s23 + $0xf0] sm:$0x7] }
  0x1f   : > { %v620_v15 = vrot.slane %v618_v4, 1  ;;  %v1196_v17 = vrot.slane %v1194_v8, 2  ;;  %v1199_v18 = vrot.slane %v1197_v9, 3  ;;  %v3452_v19 = vcombine.low %v4466_v5, %v4471_v12  ;;  %v4202_v62 = vld [vmem:[%s4386_s23 + $0x8] sm:$0xff]   ;;  %v4207_v4 = vld [vmem:[%s4386_s23 + $0x10] sm:$0xff]  }
  0x20   : > { %v1192_v16 = vsel %vm1175_vm4, %v1183_v6, %v1191_v7  ;;  %v622_v20 = vshrl.u32 %v4198_v57, 16  ;;  %v1588_v21 = vsel %vm647_vm0, %v3492_v13, 0  ;;  %v1205_v22 = vrot.slane %v1203_v10, 2 }
  0x21   : > { %3759 = vmatmul.mubr.msk.bf16.gmra.mrb[4].mxu0 %vm625_vm2, %v589_v24  ;;  %v1208_v23 = vrot.slane %v1206_v11, 3  ;;  %v621_v24 = vsel %vm569_vm3, %v616_v14, %v620_v15  ;;  %v1200_v25 = vor.u32 %v1199_v18, %v1196_v17  ;;  %v1212_v26 = vshrl.u32 %v3452_v19, 16  ;;  %v3476_v17 = vld [vmem:[%s5158_s2 + $0x8] sm:$0x3] }
  0x22   : > { %3762 = vmatprep.mubr.msk.bf16.mxu0 %vm4280_vm1, %v4279_v1  ;;  %v1215_v27 = vshll.u32 %v3452_v19, 16  ;;  %v624_v29 = vor.u32 %v622_v20, %v620_v15  ;;  %v3453_v40 = vcombine.low %v4494_v30, %v4497_v31  ;;  %v937_v50 = vshrl.u32 %v4203_v42, 16 }
  0x23   : > { %3801 = vmatmul.mubr.msk.bf16.gmra.mrb[8].mxu1 %vm625_vm2, %v4197_v28  ;;  %v1201_v28 = vsel %vm1175_vm4, %v1191_v7, %v1200_v25  ;;  %v1209_v32 = vor.u32 %v1208_v23, %v1205_v22  ;;  %v1214_v38 = vrot.slane %v1212_v26, 2  ;;  %v940_v55 = vshll.u32 %v4203_v42, 16 }
  0x24   : > { %3804 = vmatprep.mubr.msk.bf16.mxu1 %vm4280_vm1, %v4279_v1  ;;  %v1221_v45 = vshrl.u32 %v3453_v40, 16  ;;  %v1224_v46 = vshll.u32 %v3453_v40, 16  ;;  %v945_v56 = vshrl.u32 %v4204_v43, 16  ;;  %v948_v57 = vshll.u32 %v4204_v43, 16  ;;  %v4213_v43 = vld [vmem:[%s4386_s23 + $0x28] sm:$0xff]  }
  0x25   : > { %v1210_v34 = vsel %vm1175_vm4, %v1200_v25, %v1209_v32  ;;  %v939_v63 = vrot.slane %v937_v50, 1  ;;  %v942_v0 = vrot.slane %v940_v55, 2  ;;  %v954_v11 = vshrl.u32 %v4207_v4, 16 }
  0x26   : > { %v1223_v59 = vrot.slane %v1221_v45, 2  ;;  %v1226_v60 = vrot.slane %v1224_v46, 3  ;;  %v950_v3 = vrot.slane %v948_v57, 2  ;;  %v957_v13 = vshll.u32 %v4207_v4, 16 }
  0x27   : > { %v943_v9 = vor.u32 %v942_v0, %v939_v63  ;;  %v956_v19 = vrot.slane %v954_v11, 1  ;;  %v1451_v23 = vsel %vm647_vm0, %v3476_v17, 0  ;;  %v3493_v45 = vcombine.low %v4422_v35, %v4425_v36  ;;  %v4226_v17 = vld [vmem:[%s4386_s23 + $0x140] sm:$0xff]  }
  0x28   : > { %v1227_v6 = vor.u32 %v1226_v60, %v1223_v59  ;;  %v959_v20 = vrot.slane %v957_v13, 2  ;;  %v3494_v35 = vcombine.low %v4428_v37, %v4443_v51  ;;  %v3495_v37 = vcombine.low %v4446_v52, %v4449_v53  ;;  %v4217_v52 = vld [vmem:[%s4386_s23 + $0x118] sm:$0xf8]   ;;  %v4218_v53 = vld [vmem:[%s4386_s23 + $0x120] sm:$0xff]  }
  0x29   : > { %3763 = vmatmul.mubr.msk.bf16.gmra.mrb[8].mxu0 %vm625_vm2, %v597_v33  ;;  %v3418_v33 = vld [vmem:[%s5158_s2 + $0x4] sm:$0x3]  ;;  %v1416_v4 = vrot.slane %v4217_v52, 3  ;;  %v4224_v13 = vld [vmem:[%s4386_s23 + $0x138] sm:$0xff]  }
  0x2a   : > { %3766 = vmatprep.mubr.msk.bf16.mxu0 %vm4280_vm1, %v4279_v1  ;;  %v1020_v47 = vsel %vm647_vm0, %v3418_v33, 0  ;;  %v4211_v33 = vld [vmem:[%s4386_s23 + $0x20] sm:$0xff]  }
  0x2b   : > { %3805 = vmatmul.mubr.msk.bf16.gmra.mrb[12].mxu1 %vm625_vm2, %v4199_v39  ;;  %v1217_v39 = vrot.slane %v1215_v27, 3 }
  0x2c   : > { %3808 = vmatprep.mubr.msk.bf16.mxu1 %vm4280_vm1, %v4279_v1 }
  0x2d   : > { %v1218_v44 = vor.u32 %v1217_v39, %v1214_v38  ;;  %v972_v38 = vshrl.u32 %v4211_v33, 16  ;;  %v975_v39 = vshll.u32 %v4211_v33, 16 }
  0x2f   : > { %v1228_v14 = vsel %vm1175_vm4, %v1218_v44, %v1227_v6  ;;  %v977_v42 = vrot.slane %v975_v39, 2 }
  0x31   : > { %3767 = vmatmul.mubr.msk.bf16.gmra.mrb[12].mxu0 %vm625_vm2, %v605_v48  ;;  %v4518_v48 = vld [vmem:[%s4386_s23 + $0xec] sm:$0xf] }
  0x32   : > { %3770 = vmatprep.mubr.msk.bf16.mxu0 %vm4280_vm1, %v4279_v1  ;;  %v3454_v61 = vcombine.low %v4518_v48, %v3446_v49  ;;  %v984_v49 = vshll.u32 %v4213_v43, 16 }
  0x33   : > { %3809 = vmatmul.mubr.msk.bf16.gmra.mrb[16].mxu1 %vm625_vm2, %v4200_v58  ;;  %v1219_v58 = vsel %vm1175_vm4, %v1209_v32, %v1218_v44  ;;  %v3535_v44 = vld [vmem:[%s5158_s2 + $0xe] sm:$0x3] }
  0x34   : > { %3844 = vmatprep.mubr.msk.bf16.mxu1 %vm4280_vm1, %v4279_v1  ;;  %v1230_v7 = vshrl.u32 %v3454_v61, 16  ;;  %v1233_v8 = vshll.u32 %v3454_v61, 16  ;;  %v2000_v50 = vsel %vm647_vm0, %v3535_v44, 0  ;;  %v986_v57 = vrot.slane %v984_v49, 2 }
  0x36   : > { %v1232_v15 = vrot.slane %v1230_v7, 2  ;;  %v4220_v7 = vld [vmem:[%s4386_s23 + $0x128] sm:$0xff]  }
  0x39   : > { %3771 = vmatmul.mubr.msk.bf16.gmra.mrb[16].mxu0 %vm625_vm2, %v613_v2  ;;  %v947_v2 = vrot.slane %v945_v56, 1 }
  0x3a   : > { %3774 = vmatprep.mubr.msk.bf16.mxu0 %vm4280_vm1, %v4279_v1 }
  0x3b   : > { %3845 = vmatmul.mubr.msk.bf16.vlgmr.msra.gmra.mrb[20].mxu1 %vm625_vm2, %v1192_v16  ;;  %v951_v10 = vor.u32 %v950_v3, %v947_v2  ;;  %v1235_v16 = vrot.slane %v1233_v8, 3  ;;  %v3496_v2 = vcombine.low %v4452_v54, %v4466_v5  ;;  %v3497_v3 = vcombine.low %v4471_v12, %v4494_v30  ;;  %v3507_v5 = vld [vmem:[%s5158_s2 + $0xc] sm:$0x3] }
  0x3c   : > { %3848 = vmatprep.mubr.msk.bf16.mxu1 %vm4280_vm1, %v4279_v1  ;;  %3903 = vmatpush3.bf16.msra.mxu1 %v1588_v21  ;;  %v4209_v21 = vld [vmem:[%s4386_s23 + $0x18] sm:$0xff]   ;;  %v1417_v54 = vrot.slane %v4218_v53, 3  ;;  %v1827_v12 = vsel %vm647_vm0, %v3507_v5, 0  ;;  %v3498_v30 = vcombine.low %v4497_v31, %v4518_v48  ;;  %v1419_v8 = vrot.slane %v4220_v7, 3  ;;  %v4230_v31 = vld [vmem:[%s4386_s23 + $0xf0] ss:$0 sps:$4 sm:$0xff]  }
  0x3d   : > { %3962 = vmatprep.subr.bf16.mxu1 %v4279_v1  ;;  %v952_v18 = vsel %vm935_vm5, %v943_v9, %v951_v10  ;;  %v1236_v22 = vor.u32 %v1235_v16, %v1232_v15  ;;  %v963_v25 = vshrl.u32 %v4209_v21, 16  ;;  %v966_v26 = vshll.u32 %v4209_v21, 16  ;;  %v4228_v21 = vld [vmem:[%s4386_s23 + $0x148] sm:$0x7f]  }
  0x3e   : > { %v1420_v9 = vsel %vm1415_vm6, %v1417_v54, %v1419_v8  ;;  %v1423_v15 = vrot.slane %v4224_v13, 3 }
  0x3f   : > { %v1237_v27 = vsel %vm1175_vm4, %v1227_v6, %v1236_v22  ;;  %v968_v32 = vrot.slane %v966_v26, 2  ;;  %v1418_v6 = vsel %vm1415_vm6, %v1416_v4, %v1417_v54  ;;  %v4232_v26 = vld [vmem:[%s4386_s23 + $0x18] sm:$0xff]  }
  0x40   : > { %v1755_v33 = vshll.u32 %v4232_v26, 16  ;;  %v4240_v4 = vld [vmem:[%s4386_s23 + $0x38] sm:$0xff]  }
  0x41   : > { %3775 = vmatmul.mubr.msk.bf16.gmra.mrb[20].mxu0 %vm625_vm2, %v621_v24  ;;  %v960_v24 = vor.u32 %v959_v20, %v956_v19  ;;  %v1425_v19 = vrot.slane %v4226_v17, 3  ;;  %v1788_v5 = vshrl.u32 %v4240_v4, 16 }
  0x42   : > { %3778 = vmatprep.mubr.msk.bf16.mxu0 %vm4280_vm1, %v4279_v1 }
  0x43   : > { %3849 = vmatmul.mubr.msk.bf16.gmra.mrb[24].mxu1 %vm625_vm2, %v1201_v28  ;;  %v961_v28 = vsel %vm935_vm5, %v951_v10, %v960_v24  ;;  %v4222_v10 = vld [vmem:[%s4386_s23 + $0x130] sm:$0xff]   ;;  %v1426_v20 = vsel %vm1415_vm6, %v1423_v15, %v1425_v19 }
  0x44   : > { %3852 = vmatprep.mubr.msk.bf16.mxu1 %vm4280_vm1, %v4279_v1  ;;  %v1421_v48 = vrot.slane %v4222_v10, 3 }
  0x46   : > { %v1422_v11 = vsel %vm1415_vm6, %v1419_v8, %v1421_v48  ;;  %v1424_v16 = vsel %vm1415_vm6, %v1421_v48, %v1423_v15  ;;  %v4242_v8 = vld [vmem:[%s4386_s23 + $0x40] sm:$0xff]  }
  0x47   : > { %v1797_v48 = vshrl.u32 %v4242_v8, 16 }
  0x49   : > { %3779 = vmatmul.mubr.msk.bf16.gmra.mrb[24].mxu0 %vm625_vm2, %v624_v29  ;;  %v965_v29 = vrot.slane %v963_v25, 1  ;;  %v4231_v25 = vld [vmem:[%s4386_s23 + $0x10] sm:$0xf8]  }
  0x4a   : > { %3784 = vmatprep.mubr.msk.bf16.mxu0 %vm4280_vm1, %v4279_v1 }
  0x4b   : > { %3853 = vmatmul.mubr.msk.bf16.gmra.mrb[28].mxu1 %vm625_vm2, %v1210_v34  ;;  %v969_v34 = vor.u32 %v968_v32, %v965_v29  ;;  %v1747_v29 = vshll.u32 %v4231_v25, 16  ;;  %v1752_v32 = vshrl.u32 %v4232_v26, 16 }
  0x4c   : > { %3856 = vmatprep.mubr.msk.bf16.mxu1 %vm4280_vm1, %v4279_v1 }
  0x4d   : > { %v970_v40 = vsel %vm935_vm5, %v960_v24, %v969_v34  ;;  %v1754_v39 = vrot.slane %v1752_v32, 3 }
  0x51   : > { %3785 = vmatmul.mubr.msk.bf16.vlgmr.msra.gmra.mrb[28].mxu0 %vm625_vm2, %v4201_v41  ;;  %v974_v41 = vrot.slane %v972_v38, 1  ;;  %v1749_v38 = vrot.slane %v1747_v29, 4 }
  0x52   : > { %3813 = vmatpush3.bf16.msra.mxu0 %v1020_v47  ;;  %3788 = vmatprep.mubr.msk.bf16.mxu0 %vm4280_vm1, %v4279_v1  ;;  %v981_v47 = vshrl.u32 %v4213_v43, 16 }
  0x53   : > { %3872 = vmatprep.subr.bf16.mxu0 %v4279_v1  ;;  %3857 = vmatmul.mubr.msk.bf16.gmra.mrb[32].mxu1 %vm625_vm2, %v1219_v58  ;;  %v978_v46 = vor.u32 %v977_v42, %v974_v41  ;;  %v4215_v58 = vld [vmem:[%s4386_s23 + $0x30] sm:$0x3f]   ;;  %v4234_v41 = vld [vmem:[%s4386_s23 + $0x20] sm:$0xff]  }
  0x54   : > { %3860 = vmatprep.mubr.msk.bf16.mxu1 %vm4280_vm1, %v4279_v1  ;;  %v983_v56 = vrot.slane %v981_v47, 1  ;;  %v990_v59 = vshrl.u32 %v4215_v58, 16  ;;  %v993_v60 = vshll.u32 %v4215_v58, 16  ;;  %v4241_v42 = vld [vmem:[%s4386_s23 + $0x90] sm:$0xff]   ;;  %v4243_v58 = vld [vmem:[%s4386_s23 + $0x98] sm:$0xff]  }
  0x55   : > { %v979_v55 = vsel %vm935_vm5, %v969_v34, %v978_v46  ;;  %v3550_v47 = vld [vmem:[%s5158_s2 + $0x10] sm:$0x3] }
  0x56   : > { %v987_v36 = vor.u32 %v986_v57, %v983_v56  ;;  %v995_v63 = vrot.slane %v993_v60, 2  ;;  %v4236_v56 = vld [vmem:[%s4386_s23 + $0x28] sm:$0xff]   ;;  %v2190_v57 = vsel %vm647_vm0, %v3550_v47, 0 }
  0x58   : > { %v988_v61 = vsel %vm935_vm5, %v978_v46, %v987_v36  ;;  %v1764_v46 = vshll.u32 %v4234_v41, 16 }
  0x59   : > { %3789 = vmatmul.mubr.msk.bf16.gmra.mrb[32].mxu0 %vm625_vm2, %v4202_v62  ;;  %v992_v62 = vrot.slane %v990_v59, 1  ;;  %v1773_v59 = vshll.u32 %v4236_v56, 16 }
  0x5a   : > { %3814 = vmatprep.mubr.msk.bf16.mxu0 %vm4280_vm1, %v4279_v1 }
  0x5b   : > { %3861 = vmatmul.mubr.msk.bf16.gmra.mrb[36].mxu1 %vm625_vm2, %v1228_v14  ;;  %v996_v51 = vor.u32 %v995_v63, %v992_v62  ;;  %v4233_v14 = vld [vmem:[%s4386_s23 + $0x70] sm:$0xff]   ;;  %v1775_v62 = vrot.slane %v1773_v59, 4 }
  0x5c   : > { %3864 = vmatprep.mubr.msk.bf16.mxu1 %vm4280_vm1, %v4279_v1  ;;  %v4238_v63 = vld [vmem:[%s4386_s23 + $0x30] sm:$0xff]  }
  0x5d   : > { %v997_v0 = vsel %vm935_vm5, %v987_v36, %v996_v51  ;;  %v1770_v36 = vshrl.u32 %v4236_v56, 16 }
  0x61   : > { %3815 = vmatmul.mubr.msk.bf16.vlgmr.msra.gmra.mrb[36].mxu0 %vm625_vm2, %v952_v18  ;;  %v4235_v18 = vld [vmem:[%s4386_s23 + $0x78] sm:$0xff]  }
  0x62   : > { %3873 = vmatpush3.bf16.msra.mxu0 %v1451_v23  ;;  %3818 = vmatprep.mubr.msk.bf16.mxu0 %vm4280_vm1, %v4279_v1  ;;  %v1427_v23 = vrot.slane %v4228_v21, 3 }
  0x63   : > { %3932 = vmatprep.subr.bf16.mxu0 %v4279_v1  ;;  %3865 = vmatmul.mubr.msk.bf16.gmra.mrb[40].mxu1 %vm625_vm2, %v1237_v27  ;;  %v4239_v27 = vld [vmem:[%s4386_s23 + $0x88] sm:$0xff]  }
  0x64   : > { %3868 = vmatprep.mubr.msk.bf16.mxu1 %vm4280_vm1, %v4279_v1  ;;  %v1428_v24 = vsel %vm1415_vm6, %v1425_v19, %v1427_v23  ;;  %v1799_v19 = vrot.slane %v1797_v48, 3 }
  0x69   : > { %3819 = vmatmul.mubr.msk.bf16.gmra.mrb[40].mxu0 %vm625_vm2, %v961_v28  ;;  %v1744_v28 = vshrl.u32 %v4231_v25, 16 }
  0x6a   : > { %3822 = vmatprep.mubr.msk.bf16.mxu0 %vm4280_vm1, %v4279_v1 }
  0x6b   : > { %3869 = vmatmul.mubr.msk.bf16.gmra.mrb[44].mxu1 %vm625_vm2, %v1236_v22  ;;  %v4237_v22 = vld [vmem:[%s4386_s23 + $0x80] sm:$0xff]   ;;  %v1746_v34 = vrot.slane %v1744_v28, 3 }
  0x6c   : > { %3904 = vmatprep.mubr.msk.bf16.mxu1 %vm4280_vm1, %v4279_v1 }
  0x6d   : > { %v1750_v43 = vor.u32 %v1749_v38, %v1746_v34 }
  0x71   : > { %3823 = vmatmul.mubr.msk.bf16.gmra.mrb[44].mxu0 %vm625_vm2, %v970_v40  ;;  %v1757_v40 = vrot.slane %v1755_v33, 4 }
  0x72   : > { %3826 = vmatprep.mubr.msk.bf16.mxu0 %vm4280_vm1, %v4279_v1 }
  0x73   : > { %3905 = vmatmul.mubr.msk.bf16.vlgmr.msra.gmra.mrb[48].mxu1 %vm625_vm2, %v3493_v45  ;;  %v1758_v44 = vor.u32 %v1757_v40, %v1754_v39  ;;  %v1761_v45 = vshrl.u32 %v4234_v41, 16 }
  0x74   : > { %3908 = vmatprep.mubr.msk.bf16.mxu1 %vm4280_vm1, %v4279_v1  ;;  %3963 = vmatpush3.bf16.msra.mxu1 %v2000_v50 }
  0x75   : > { %4022 = vmatprep.subr.bf16.mxu1 %v4279_v1  ;;  %v1759_v49 = vsel %vm1742_vm7, %v1750_v43, %v1758_v44  ;;  %v1763_v50 = vrot.slane %v1761_v45, 3  ;;  %v4245_v45 = vld [vmem:[%s4386_s23 + $0x14] sm:$0xfe]  }
  0x76   : > { %v2155_v56 = vrot.slane %v4245_v45, 1 }
  0x79   : > { %3827 = vmatmul.mubr.msk.bf16.gmra.mrb[48].mxu0 %vm625_vm2, %v979_v55  ;;  %v1766_v55 = vrot.slane %v1764_v46, 4  ;;  %v4246_v46 = vld [vmem:[%s4386_s23 + $0x1c] sm:$0xff]  }
  0x7a   : > { %3830 = vmatprep.mubr.msk.bf16.mxu0 %vm4280_vm1, %v4279_v1 }
  0x7b   : > { %3909 = vmatmul.mubr.msk.bf16.gmra.mrb[52].mxu1 %vm625_vm2, %v3494_v35  ;;  %v1767_v35 = vor.u32 %v1766_v55, %v1763_v50 }
  0x7c   : > { %3912 = vmatprep.mubr.msk.bf16.mxu1 %vm4280_vm1, %v4279_v1 }
  0x7d   : > { %v1768_v60 = vsel %vm1742_vm7, %v1758_v44, %v1767_v35 }
  0x81   : > { %3831 = vmatmul.mubr.msk.bf16.gmra.mrb[52].mxu0 %vm625_vm2, %v988_v61  ;;  %v1772_v61 = vrot.slane %v1770_v36, 3 }
  0x82   : > { %3834 = vmatprep.mubr.msk.bf16.mxu0 %vm4280_vm1, %v4279_v1 }
  0x83   : > { %3913 = vmatmul.mubr.msk.bf16.gmra.mrb[56].mxu1 %vm625_vm2, %v3495_v37  ;;  %v4244_v37 = vld [vmem:[%s4386_s23 + $0xa0] ss:$0 sps:$4 sm:$0xff]  }
  0x84   : > { %3916 = vmatprep.mubr.msk.bf16.mxu1 %vm4280_vm1, %v4279_v1 }
  0x89   : > { %3835 = vmatmul.mubr.msk.bf16.gmra.mrb[56].mxu0 %vm625_vm2, %v997_v0  ;;  %v1779_v0 = vshrl.u32 %v4238_v63, 16 }
  0x8a   : > { %3838 = vmatprep.mubr.msk.bf16.mxu0 %vm4280_vm1, %v4279_v1 }
  0x8b   : > { %3917 = vmatmul.mubr.msk.bf16.gmra.mrb[60].mxu1 %vm625_vm2, %v3496_v2  ;;  %v1782_v2 = vshll.u32 %v4238_v63, 16  ;;  %v1781_v53 = vrot.slane %v1779_v0, 3  ;;  %v4247_v63 = vld [vmem:[%s4386_s23 + $0x24] sm:$0xff]  }
  0x8c   : > { %3920 = vmatprep.mubr.msk.bf16.mxu1 %vm4280_vm1, %v4279_v1 }
  0x91   : > { %3839 = vmatmul.mubr.msk.bf16.gmra.mrb[60].mxu0 %vm625_vm2, %v996_v51  ;;  %v1776_v51 = vor.u32 %v1775_v62, %v1772_v61 }
  0x92   : > { %3874 = vmatprep.mubr.msk.bf16.mxu0 %vm4280_vm1, %v4279_v1 }
  0x93   : > { %3921 = vmatmul.mubr.msk.bf16.gmra.mrb[64].mxu1 %vm625_vm2, %v3497_v3  ;;  %v1777_v52 = vsel %vm1742_vm7, %v1767_v35, %v1776_v51  ;;  %v1784_v3 = vrot.slane %v1782_v2, 4 }
  0x94   : > { %3924 = vmatprep.mubr.msk.bf16.mxu1 %vm4280_vm1, %v4279_v1 }
  0x95   : > { %v1785_v54 = vor.u32 %v1784_v3, %v1781_v53 }
  0x97   : > { %v1786_v7 = vsel %vm1742_vm7, %v1776_v51, %v1785_v54 }
  0x99   : > { %3875 = vmatmul.mubr.msk.bf16.vlgmr.msra.gmra.mrb[64].mxu0 %vm625_vm2, %v1418_v6  ;;  %v1791_v6 = vshll.u32 %v4240_v4, 16 }
  0x9a   : > { %3933 = vmatpush3.bf16.msra.mxu0 %v1827_v12  ;;  %3878 = vmatprep.mubr.msk.bf16.mxu0 %vm4280_vm1, %v4279_v1  ;;  %v1790_v12 = vrot.slane %v1788_v5, 3 }
  0x9b   : > { %3992 = vmatprep.subr.bf16.mxu0 %v4279_v1  ;;  %3925 = vmatmul.mubr.msk.bf16.gmra.mrb[68].mxu1 %vm625_vm2, %v3498_v30  ;;  %v1793_v30 = vrot.slane %v1791_v6, 4 }
  0x9c   : > { %3928 = vmatprep.mubr.msk.bf16.mxu1 %vm4280_vm1, %v4279_v1 }
  0xa1   : > { %3879 = vmatmul.mubr.msk.bf16.gmra.mrb[68].mxu0 %vm625_vm2, %v1420_v9 }
  0xa2   : > { %3882 = vmatprep.mubr.msk.bf16.mxu0 %vm4280_vm1, %v4279_v1 }
  0xa3   : > { %3929 = vmatmul.mubr.msk.bf16.gmra.mrb[72].mxu1 %vm625_vm2, %v4230_v31  ;;  %v1794_v31 = vor.u32 %v1793_v30, %v1790_v12  ;;  %v4248_v12 = vld [vmem:[%s4386_s23 + $0x2c] sm:$0xff]  }
  0xa4   : > { %3964 = vmatprep.mubr.msk.bf16.mxu1 %vm4280_vm1, %v4279_v1 }
  0xa9   : > { %3883 = vmatmul.mubr.msk.bf16.gmra.mrb[72].mxu0 %vm625_vm2, %v1422_v11  ;;  %v1800_v11 = vshll.u32 %v4242_v8, 16 }
  0xaa   : > { %3886 = vmatprep.mubr.msk.bf16.mxu0 %vm4280_vm1, %v4279_v1 }
  0xab   : > { %3965 = vmatmul.mubr.msk.bf16.vlgmr.msra.gmra.mrb[76].mxu1 %vm625_vm2, %v4233_v14 }
  0xac   : > { %3968 = vmatprep.mubr.msk.bf16.mxu1 %vm4280_vm1, %v4279_v1 }
  0xb1   : > { %3887 = vmatmul.mubr.msk.bf16.gmra.mrb[76].mxu0 %vm625_vm2, %v1424_v16 }
  0xb2   : > { %3890 = vmatprep.mubr.msk.bf16.mxu0 %vm4280_vm1, %v4279_v1 }
  0xb3   : > { %3969 = vmatmul.mubr.msk.bf16.gmra.mrb[80].mxu1 %vm625_vm2, %v4235_v18  ;;  %v1795_v18 = vsel %vm1742_vm7, %v1785_v54, %v1794_v31 }
  0xb4   : > { %3972 = vmatprep.mubr.msk.bf16.mxu1 %vm4280_vm1, %v4279_v1 }
  0xb9   : > { %3891 = vmatmul.mubr.msk.bf16.gmra.mrb[80].mxu0 %vm625_vm2, %v1426_v20  ;;  %v1802_v20 = vrot.slane %v1800_v11, 4 }
  0xba   : > { %3894 = vmatprep.mubr.msk.bf16.mxu0 %vm4280_vm1, %v4279_v1 }
  0xbb   : > { %3973 = vmatmul.mubr.msk.bf16.gmra.mrb[84].mxu1 %vm625_vm2, %v4237_v22 }
  0xbc   : > { %3976 = vmatprep.mubr.msk.bf16.mxu1 %vm4280_vm1, %v4279_v1 }
  0xc1   : > { %3895 = vmatmul.mubr.msk.bf16.gmra.mrb[84].mxu0 %vm625_vm2, %v1428_v24  ;;  %v1803_v24 = vor.u32 %v1802_v20, %v1799_v19  ;;  %v4249_v20 = vld [vmem:[%s4386_s23 + $0x34] sm:$0xff]  }
  0xc2   : > { %3898 = vmatprep.mubr.msk.bf16.mxu0 %vm4280_vm1, %v4279_v1 }
  0xc3   : > { %3977 = vmatmul.mubr.msk.bf16.gmra.mrb[88].mxu1 %vm625_vm2, %v4239_v27  ;;  %v1804_v32 = vsel %vm1742_vm7, %v1794_v31, %v1803_v24  ;;  %v2160_v31 = vrot.slane %v4248_v12, 1 }
  0xc4   : > { %3980 = vmatprep.mubr.msk.bf16.mxu1 %vm4280_vm1, %v4279_v1 }
  0xc9   : > { %3899 = vmatmul.mubr.msk.bf16.gmra.mrb[88].mxu0 %vm625_vm2, %v1427_v23 }
  0xca   : > { %3934 = vmatprep.mubr.msk.bf16.mxu0 %vm4280_vm1, %v4279_v1 }
  0xcb   : > { %3981 = vmatmul.mubr.msk.bf16.gmra.mrb[92].mxu1 %vm625_vm2, %v4241_v42 }
  0xcc   : > { %3984 = vmatprep.mubr.msk.bf16.mxu1 %vm4280_vm1, %v4279_v1 }
  0xd1   : > { %3935 = vmatmul.mubr.msk.bf16.vlgmr.msra.gmra.mrb[92].mxu0 %vm625_vm2, %v1759_v49 }
  0xd2   : > { %3993 = vmatpush3.bf16.msra.mxu0 %v2190_v57  ;;  %3938 = vmatprep.mubr.msk.bf16.mxu0 %vm4280_vm1, %v4279_v1  ;;  %v2156_v57 = vrot.slane %v4246_v46, 1 }
  0xd3   : > { %4052 = vmatprep.subr.bf16.mxu0 %v4279_v1  ;;  %3985 = vmatmul.mubr.msk.bf16.gmra.mrb[96].mxu1 %vm625_vm2, %v4243_v58 }
  0xd4   : > { %3988 = vmatprep.mubr.msk.bf16.mxu1 %vm4280_vm1, %v4279_v1  ;;  %v2157_v62 = vsel %vm2154_vm8, %v2155_v56, %v2156_v57 }
  0xd9   : > { %3939 = vmatmul.mubr.msk.bf16.gmra.mrb[96].mxu0 %vm625_vm2, %v1768_v60 }
  0xda   : > { %3942 = vmatprep.mubr.msk.bf16.mxu0 %vm4280_vm1, %v4279_v1 }
  0xdb   : > { %3989 = vmatmul.mubr.msk.bf16.gmra.mrb[100].mxu1 %vm625_vm2, %v4244_v37 }
  0xdc   : > { %4024 = vmatprep.mubr.msk.bf16.mxu1 %vm4280_vm1, %v4279_v1 }
  0xe1   : > { %3943 = vmatmul.mubr.msk.bf16.gmra.mrb[100].mxu0 %vm625_vm2, %v1777_v52  ;;  %v2158_v52 = vrot.slane %v4247_v63, 1 }
  0xe2   : > { %3946 = vmatprep.mubr.msk.bf16.mxu0 %vm4280_vm1, %v4279_v1 }
  0xe3   : > { %v2161_v19 = vsel %vm2154_vm8, %v2158_v52, %v2160_v31 }
  0xe6   : > { %v846_v9 = vpop.f32.mrb[0].mxu1 }
  0xe7   : > { %v3794_v10 = vpop.f32.mrb[1].mxu1 }
  0xe8   : > { %v849_v13 = vpop.f32.mrb[2].mxu1 }
  0xe9   : > { %3947 = vmatmul.mubr.msk.bf16.gmra.mrb[104].mxu0 %vm625_vm2, %v1786_v7  ;;  %v3795_v14 = vpop.f32.mrb[3].mxu1  ;;  %v2159_v7 = vsel %vm2154_vm8, %v2156_v57, %v2158_v52 }
  0xea   : > { %3950 = vmatprep.mubr.msk.bf16.mxu0 %vm4280_vm1, %v4279_v1 }
  0xec   : > { %v4716_v15 = vpop.f32.mrb[0].mxu0 }
  0xed   : > { %v3756_v16 = vpop.f32.mrb[1].mxu0 }
  0xee   : > { %v4718_v17 = vpop.f32.mrb[2].mxu0  ;;  %v854_v22 = vpop.f32.mrb[4].mxu1 }
  0xef   : > { %v3757_v21 = vpop.f32.mrb[3].mxu0  ;;  %v3798_v23 = vpop.f32.mrb[5].mxu1 }
  0xf0   : > { %v857_v25 = vpop.f32.mrb[6].mxu1 }
  0xf1   : > { %3951 = vmatmul.mubr.msk.bf16.gmra.mrb[108].mxu0 %vm625_vm2, %v1795_v18  ;;  %v3799_v26 = vpop.f32.mrb[7].mxu1 }
  0xf2   : > { %3954 = vmatprep.mubr.msk.bf16.mxu0 %vm4280_vm1, %v4279_v1 }
  0xf4   : > { %v4724_v27 = vpop.f32.mrb[4].mxu0 }
  0xf5   : > { %v3760_v28 = vpop.f32.mrb[5].mxu0 }
  0xf6   : > { %v4726_v29 = vpop.f32.mrb[6].mxu0  ;;  %v862_v34 = vpop.f32.mrb[8].mxu1 }
  0xf7   : > { %v3761_v33 = vpop.f32.mrb[7].mxu0  ;;  %v3802_v38 = vpop.f32.mrb[9].mxu1 }
  0xf8   : > { %v865_v39 = vpop.f32.mrb[10].mxu1 }
  0xf9   : > { %3955 = vmatmul.mubr.msk.bf16.gmra.mrb[112].mxu0 %vm625_vm2, %v1804_v32  ;;  %v3803_v40 = vpop.f32.mrb[11].mxu1 }
  0xfa   : > { %3958 = vmatprep.mubr.msk.bf16.mxu0 %vm4280_vm1, %v4279_v1  ;;  %v4250_v40 = vld [vmem:[%s4386_s23 + $0x3c] sm:$0xff]  }
  0xfb   : > { %v2164_v45 = vrot.slane %v4250_v40, 1 }
  0xfc   : > { %v701_v41 = vpop.f32.mrb[8].mxu0 }
  0xfd   : > { %v4732_v42 = vadd.f32 %v846_v9, %v701_v41  ;;  %v3764_v43 = vpop.f32.mrb[9].mxu0 }
  0xfe   : > { %v704_v44 = vpop.f32.mrb[10].mxu0  ;;  %v870_v50 = vpop.f32.mrb[12].mxu1 }
  0xff   : > { %v4736_v47 = vadd.f32 %v849_v13, %v704_v44  ;;  %v3765_v49 = vpop.f32.mrb[11].mxu0  ;;  %v3806_v55 = vpop.f32.mrb[13].mxu1 }
 0x100   : > { %v873_v58 = vpop.f32.mrb[14].mxu1 }
 0x101   : > { %3959 = vmatmul.mubr.msk.bf16.gmra.mrb[116].mxu0 %vm625_vm2, %v1803_v24  ;;  %v3807_v35 = vpop.f32.mrb[15].mxu1 }
 0x102   : > { %3994 = vmatprep.mubr.msk.bf16.mxu0 %vm4280_vm1, %v4279_v1  ;;  %v4251_v35 = vld [vmem:[%s4386_s23 + $0x44] sm:$0x1f]  }
 0x103   : > { %v2166_v63 = vrot.slane %v4251_v35, 1 }
 0x104   : > { %v709_v36 = vpop.f32.mrb[12].mxu0 }
 0x105   : > { %v4741_v59 = vadd.f32 %v854_v22, %v709_v36  ;;  %v3768_v60 = vpop.f32.mrb[13].mxu0 }
 0x106   : > { %v712_v61 = vpop.f32.mrb[14].mxu0  ;;  %v878_v0 = vpop.f32.mrb[16].mxu1 }
 0x107   : > { %v4745_v37 = vadd.f32 %v857_v25, %v712_v61  ;;  %v3769_v51 = vpop.f32.mrb[15].mxu0  ;;  %v3810_v2 = vpop.f32.mrb[17].mxu1  ;;  %v2162_v25 = vrot.slane %v4249_v20, 1 }
 0x108   : > { %v881_v53 = vpop.f32.mrb[18].mxu1 }
 0x109   : > { %3995 = vmatmul.mubr.msk.bf16.vlgmr.msra.gmra.mrb[120].mxu0 %vm625_vm2, %v2157_v62  ;;  %v3811_v3 = vpop.f32.mrb[19].mxu1 }
 0x10a   : > { %3998 = vmatprep.mubr.msk.bf16.mxu0 %vm4280_vm1, %v4279_v1  ;;  %v2167_v3 = vsel %vm2154_vm8, %v2164_v45, %v2166_v63 }
 0x10c   : > { %v717_v4 = vpop.f32.mrb[16].mxu0 }
 0x10d   : > { %v4750_v54 = vadd.f32 %v862_v34, %v717_v4  ;;  %v3772_v5 = vpop.f32.mrb[17].mxu0 }
 0x10e   : > { %v720_v6 = vpop.f32.mrb[18].mxu0  ;;  %v4756_v9 = vpop.f32.mrb[20].mxu1 }
 0x10f   : > { %v4754_v30 = vadd.f32 %v865_v39, %v720_v6  ;;  %v3773_v8 = vpop.f32.mrb[19].mxu0  ;;  %v3846_v10 = vpop.f32.mrb[21].mxu1  ;;  %v2163_v39 = vsel %vm2154_vm8, %v2160_v31, %v2162_v25 }
 0x110   : > { %v4761_v48 = vpop.f32.mrb[22].mxu1 }
 0x111   : > { %3999 = vmatmul.mubr.msk.bf16.gmra.mrb[124].mxu0 %vm625_vm2, %v2159_v7  ;;  %v3847_v11 = vpop.f32.mrb[23].mxu1 }
 0x112   : > { %4002 = vmatprep.mubr.msk.bf16.mxu0 %vm4280_vm1, %v4279_v1 }
 0x114   : > { %v725_v13 = vpop.f32.mrb[20].mxu0 }
 0x115   : > { %v4763_v14 = vadd.f32 %v870_v50, %v725_v13  ;;  %v3776_v16 = vpop.f32.mrb[21].mxu0 }
 0x116   : > { %v728_v18 = vpop.f32.mrb[22].mxu0  ;;  %v4769_v23 = vpop.f32.mrb[24].mxu1 }
 0x117   : > { %v4767_v21 = vadd.f32 %v873_v58, %v728_v18  ;;  %v3777_v22 = vpop.f32.mrb[23].mxu0  ;;  %v3850_v24 = vpop.f32.mrb[25].mxu1  ;;  %v2165_v58 = vsel %vm2154_vm8, %v2162_v25, %v2164_v45 }
 0x118   : > { %v4774_v26 = vpop.f32.mrb[26].mxu1 }
 0x119   : > { %4003 = vmatmul.mubr.msk.bf16.gmra.mrb[128].mxu0 %vm625_vm2, %v2161_v19  ;;  %v3851_v28 = vpop.f32.mrb[27].mxu1 }
 0x11a   : > { %4006 = vmatprep.mubr.msk.bf16.mxu0 %vm4280_vm1, %v4279_v1 }
 0x11c   : > { %v733_v32 = vpop.f32.mrb[24].mxu0 }
 0x11d   : > { %v4776_v33 = vadd.f32 %v878_v0, %v733_v32  ;;  %v3780_v34 = vpop.f32.mrb[25].mxu0 }
 0x11e   : > { %v736_v38 = vpop.f32.mrb[26].mxu0  ;;  %v4780_v43 = vpop.f32.mrb[28].mxu1 }
 0x11f   : > { %v3781_v41 = vpop.f32.mrb[27].mxu0  ;;  %v3854_v44 = vpop.f32.mrb[29].mxu1 }
 0x120   : > { %v4785_v46 = vpop.f32.mrb[30].mxu1 }
 0x121   : > { %4007 = vmatmul.mubr.msk.bf16.gmra.mrb[132].mxu0 %vm625_vm2, %v2163_v39  ;;  %v3855_v49 = vpop.f32.mrb[31].mxu1 }
 0x122   : > { %4010 = vmatprep.mubr.msk.bf16.mxu0 %vm4280_vm1, %v4279_v1 }
 0x124   : > { %v830_v50 = vpop.f32.mrb[28].mxu0 }
 0x125   : > { %v831_v55 = vadd.f32 %v830_v50, %v4716_v15  ;;  %v3786_v56 = vpop.f32.mrb[29].mxu0 }
 0x126   : > { %v833_v57 = vpop.f32.mrb[30].mxu0  ;;  %v4791_v61 = vpop.f32.mrb[32].mxu1 }
 0x127   : > { %v834_v36 = vadd.f32 %v833_v57, %v4718_v17  ;;  %v3787_v60 = vpop.f32.mrb[31].mxu0  ;;  %v3858_v62 = vpop.f32.mrb[33].mxu1  ;;  %v2320_v17 = vld [vmem:[%s5160_s4] sm:$0x3] }
 0x128   : > { %v4796_v51 = vpop.f32.mrb[34].mxu1  ;;  %v2350_v4 = vsel %vm647_vm0, %v2320_v17, 0 }
 0x129   : > { %4011 = vmatmul.mubr.msk.bf16.gmra.mrb[136].mxu0 %vm625_vm2, %v2165_v58  ;;  %v3859_v15 = vpop.f32.mrb[35].mxu1  ;;  %4023 = vmatpush3.bf16.msra.mxu1 %v2350_v4 }
 0x12a   : > { %4014 = vmatprep.mubr.msk.bf16.mxu0 %vm4280_vm1, %v4279_v1 }
 0x12c   : > { %v838_v0 = vpop.f32.mrb[32].mxu0 }
 0x12d   : > { %v839_v2 = vadd.f32 %v838_v0, %v4724_v27  ;;  %v3790_v52 = vpop.f32.mrb[33].mxu0 }
 0x12e   : > { %v841_v53 = vpop.f32.mrb[34].mxu0  ;;  %v1328_v7 = vpop.f32.mrb[36].mxu1 }
 0x12f   : > { %v842_v5 = vadd.f32 %v841_v53, %v4726_v29  ;;  %v3791_v6 = vpop.f32.mrb[35].mxu0  ;;  %v3862_v12 = vpop.f32.mrb[37].mxu1 }
 0x130   : > { %v1331_v27 = vpop.f32.mrb[38].mxu1 }
 0x131   : > { %4015 = vmatmul.mubr.msk.bf16.gmra.mrb[140].mxu0 %vm625_vm2, %v2167_v3  ;;  %v3863_v8 = vpop.f32.mrb[39].mxu1 }
 0x132   : > { %4018 = vmatprep.mubr.msk.bf16.mxu0 %vm4280_vm1, %v4279_v1 }
 0x134   : > { %v1056_v10 = vpop.f32.mrb[36].mxu0 }
 0x135   : > { %v1110_v31 = vadd.f32 %v1056_v10, %v831_v55  ;;  %v3816_v11 = vpop.f32.mrb[37].mxu0 }
 0x136   : > { %v1059_v13 = vpop.f32.mrb[38].mxu0  ;;  %v1336_v19 = vpop.f32.mrb[40].mxu1 }
 0x137   : > { %v1111_v16 = vadd.f32 %v1059_v13, %v834_v36  ;;  %v4809_v18 = vadd.f32 %v4756_v9, %v1110_v31  ;;  %v3817_v29 = vpop.f32.mrb[39].mxu0  ;;  %v3866_v22 = vpop.f32.mrb[41].mxu1 }
 0x138   : > { %v1339_v24 = vpop.f32.mrb[42].mxu1 }
 0x139   : > { %v4812_v20 = vadd.f32 %v4761_v48, %v1111_v16  ;;  %4019 = vmatmul.mubr.msk.bf16.gmra.mrb[144].mxu0 %vm625_vm2, %v2166_v63  ;;  %v3867_v25 = vpop.f32.mrb[43].mxu1 }
 0x13a   : > { %4054 = vmatprep.mubr.msk.bf16.mxu0 %vm4280_vm1, %v4279_v1 }
 0x13c   : > { %v1064_v28 = vpop.f32.mrb[40].mxu0 }
 0x13d   : > { %v1112_v32 = vadd.f32 %v1064_v28, %v839_v2  ;;  %v3820_v34 = vpop.f32.mrb[41].mxu0 }
 0x13e   : > { %v1067_v38 = vpop.f32.mrb[42].mxu0  ;;  %v1344_v41 = vpop.f32.mrb[44].mxu1 }
 0x13f   : > { %v1113_v39 = vadd.f32 %v1067_v38, %v842_v5  ;;  %v4818_v9 = vadd.f32 %v4769_v23, %v1112_v32  ;;  %v3821_v40 = vpop.f32.mrb[43].mxu0  ;;  %v3870_v44 = vpop.f32.mrb[45].mxu1 }
 0x140   : > { %v1347_v45 = vpop.f32.mrb[46].mxu1 }
 0x141   : > { %v4821_v48 = vadd.f32 %v4774_v26, %v1113_v39  ;;  %v3871_v49 = vpop.f32.mrb[47].mxu1 }
 0x144   : > { %v1072_v50 = vpop.f32.mrb[44].mxu0 }
 0x145   : > { %v1114_v55 = vadd.f32 %v1072_v50, %v4732_v42  ;;  %v3824_v56 = vpop.f32.mrb[45].mxu0 }
 0x146   : > { %v1075_v57 = vpop.f32.mrb[46].mxu0  ;;  %v1624_v36 = vpop.f32.mrb[48].mxu1  ;;  %v4252_v56 = vld [vmem:[%s4862_s15 + $0x40] sm:$0xff]  }
 0x147   : > { %v1115_v58 = vadd.f32 %v1075_v57, %v4736_v47  ;;  %v4826_v35 = vadd.f32 %v4780_v43, %v1114_v55  ;;  %v3825_v23 = vpop.f32.mrb[47].mxu0  ;;  %v3906_v26 = vpop.f32.mrb[49].mxu1  ;;  %3710 = vmatprep.subr.bf16.mxu1 %v4252_v56 }
 0x148   : > { %v1627_v62 = vpop.f32.mrb[50].mxu1 }
 0x149   : > { %v4829_v60 = vadd.f32 %v4785_v46, %v1115_v58  ;;  %v3907_v63 = vpop.f32.mrb[51].mxu1 }
 0x14c   : > { %v1080_v15 = vpop.f32.mrb[48].mxu0 }
 0x14d   : > { %v1116_v0 = vadd.f32 %v1080_v15, %v4741_v59  ;;  %v3828_v2 = vpop.f32.mrb[49].mxu0 }
 0x14e   : > { %v1083_v42 = vpop.f32.mrb[50].mxu0  ;;  %v1632_v17 = vpop.f32.mrb[52].mxu1 }
 0x14f   : > { %v1117_v52 = vadd.f32 %v1083_v42, %v4745_v37  ;;  %v4834_v47 = vadd.f32 %v4791_v61, %v1116_v0  ;;  %v3829_v43 = vpop.f32.mrb[51].mxu0  ;;  %v3910_v46 = vpop.f32.mrb[53].mxu1 }
 0x150   : > { %v1635_v3 = vpop.f32.mrb[54].mxu1 }
 0x151   : > { %v4837_v53 = vadd.f32 %v4796_v51, %v1117_v52  ;;  %v3911_v4 = vpop.f32.mrb[55].mxu1 }
 0x154   : > { %v1088_v5 = vpop.f32.mrb[52].mxu0 }
 0x155   : > { %v1118_v6 = vadd.f32 %v1088_v5, %v4750_v54  ;;  %v3832_v12 = vpop.f32.mrb[53].mxu0 }
 0x156   : > { %v1091_v59 = vpop.f32.mrb[54].mxu0  ;;  %v1640_v61 = vpop.f32.mrb[56].mxu1 }
 0x157   : > { %v1119_v8 = vadd.f32 %v1091_v59, %v4754_v30  ;;  %v4841_v10 = vadd.f32 %v1328_v7, %v1118_v6  ;;  %v3833_v37 = vpop.f32.mrb[55].mxu0  ;;  %v3914_v11 = vpop.f32.mrb[57].mxu1 }
 0x158   : > { %v1643_v13 = vpop.f32.mrb[58].mxu1 }
 0x159   : > { %v4843_v31 = vadd.f32 %v1331_v27, %v1119_v8  ;;  %v3915_v51 = vpop.f32.mrb[59].mxu1 }
 0x15c   : > { %v1096_v16 = vpop.f32.mrb[56].mxu0 }
 0x15d   : > { %v1120_v29 = vadd.f32 %v1096_v16, %v4763_v14  ;;  %v3836_v22 = vpop.f32.mrb[57].mxu0 }
 0x15e   : > { %v1099_v25 = vpop.f32.mrb[58].mxu0  ;;  %v1648_v7 = vpop.f32.mrb[60].mxu1 }
 0x15f   : > { %v1121_v54 = vadd.f32 %v1099_v25, %v4767_v21  ;;  %v4847_v28 = vadd.f32 %v1336_v19, %v1120_v29  ;;  %v3837_v30 = vpop.f32.mrb[59].mxu0  ;;  %v3918_v27 = vpop.f32.mrb[61].mxu1 }
 0x160   : > { %v1651_v34 = vpop.f32.mrb[62].mxu1 }
 0x161   : > { %v4849_v32 = vadd.f32 %v1339_v24, %v1121_v54  ;;  %v3919_v38 = vpop.f32.mrb[63].mxu1 }
 0x164   : > { %v1104_v39 = vpop.f32.mrb[60].mxu0 }
 0x165   : > { %v1122_v40 = vadd.f32 %v1104_v39, %v4776_v33  ;;  %v3840_v44 = vpop.f32.mrb[61].mxu0 }
 0x166   : > { %v1107_v14 = vpop.f32.mrb[62].mxu0  ;;  %v1656_v21 = vpop.f32.mrb[64].mxu1 }
 0x167   : > { %v4852_v45 = vadd.f32 %v1344_v41, %v1122_v40  ;;  %v3841_v49 = vpop.f32.mrb[63].mxu0  ;;  %v3922_v19 = vpop.f32.mrb[65].mxu1 }
 0x168   : > { %v1659_v50 = vpop.f32.mrb[66].mxu1 }
 0x169   : > { %v3923_v24 = vpop.f32.mrb[67].mxu1 }
 0x16c   : > { %v1487_v55 = vpop.f32.mrb[64].mxu0 }
 0x16d   : > { %v1541_v33 = vadd.f32 %v1487_v55, %v4809_v18  ;;  %v3876_v41 = vpop.f32.mrb[65].mxu0 }
 0x16e   : > { %v1490_v57 = vpop.f32.mrb[66].mxu0  ;;  %v1664_v63 = vpop.f32.mrb[68].mxu1 }
 0x16f   : > { %v1542_v58 = vadd.f32 %v1490_v57, %v4812_v20  ;;  %v4867_v23 = vadd.f32 %v1624_v36, %v1541_v33  ;;  %v3877_v26 = vpop.f32.mrb[67].mxu0  ;;  %v3926_v0 = vpop.f32.mrb[69].mxu1 }
 0x170   : > { %v1667_v2 = vpop.f32.mrb[70].mxu1 }
 0x171   : > { %v4869_v15 = vadd.f32 %v1627_v62, %v1542_v58  ;;  %v3927_v42 = vpop.f32.mrb[71].mxu1 }
 0x174   : > { %v1495_v52 = vpop.f32.mrb[68].mxu0 }
 0x175   : > { %v1543_v43 = vadd.f32 %v1495_v52, %v4818_v9  ;;  %v3880_v46 = vpop.f32.mrb[69].mxu0 }
 0x176   : > { %v1498_v18 = vpop.f32.mrb[70].mxu0  ;;  %v1672_v36 = vpop.f32.mrb[72].mxu1 }
 0x177   : > { %v1544_v4 = vadd.f32 %v1498_v18, %v4821_v48  ;;  %v4873_v5 = vadd.f32 %v1632_v17, %v1543_v43  ;;  %v3881_v20 = vpop.f32.mrb[71].mxu0  ;;  %v3930_v12 = vpop.f32.mrb[73].mxu1 }
 0x178   : > { %v1675_v59 = vpop.f32.mrb[74].mxu1 }
 0x179   : > { %v4875_v6 = vadd.f32 %v1635_v3, %v1544_v4  ;;  %v3931_v62 = vpop.f32.mrb[75].mxu1 }
 0x17c   : > { %v1503_v8 = vpop.f32.mrb[72].mxu0 }
 0x17d   : > { %v1545_v37 = vadd.f32 %v1503_v8, %v4826_v35  ;;  %v3884_v11 = vpop.f32.mrb[73].mxu0 }
 0x17e   : > { %v1506_v51 = vpop.f32.mrb[74].mxu0  ;;  %v2036_v48 = vpop.f32.mrb[76].mxu1 }
 0x17f   : > { %v1546_v9 = vadd.f32 %v1506_v51, %v4829_v60  ;;  %v4879_v16 = vadd.f32 %v1640_v61, %v1545_v37  ;;  %v3885_v29 = vpop.f32.mrb[75].mxu0  ;;  %v3966_v22 = vpop.f32.mrb[77].mxu1 }
 0x180   : > { %v2039_v25 = vpop.f32.mrb[78].mxu1 }
 0x181   : > { %v4881_v17 = vadd.f32 %v1643_v13, %v1546_v9  ;;  %v3967_v3 = vpop.f32.mrb[79].mxu1 }
 0x184   : > { %v1511_v54 = vpop.f32.mrb[76].mxu0 }
 0x185   : > { %v1547_v30 = vadd.f32 %v1511_v54, %v4834_v47  ;;  %v3888_v27 = vpop.f32.mrb[77].mxu0 }
 0x186   : > { %v1514_v38 = vpop.f32.mrb[78].mxu0  ;;  %v2044_v60 = vpop.f32.mrb[80].mxu1 }
 0x187   : > { %v1548_v35 = vadd.f32 %v1514_v38, %v4837_v53  ;;  %v4885_v39 = vadd.f32 %v1648_v7, %v1547_v30  ;;  %v3889_v40 = vpop.f32.mrb[79].mxu0  ;;  %v3970_v44 = vpop.f32.mrb[81].mxu1 }
 0x188   : > { %v2047_v14 = vpop.f32.mrb[82].mxu1 }
 0x189   : > { %v4887_v61 = vadd.f32 %v1651_v34, %v1548_v35  ;;  %v3971_v13 = vpop.f32.mrb[83].mxu1 }
 0x18c   : > { %v1519_v49 = vpop.f32.mrb[80].mxu0 }
 0x18d   : > { %v1549_v19 = vadd.f32 %v1519_v49, %v4841_v10  ;;  %v3892_v24 = vpop.f32.mrb[81].mxu0 }
 0x18e   : > { %v1522_v55 = vpop.f32.mrb[82].mxu0  ;;  %v2052_v53 = vpop.f32.mrb[84].mxu1 }
 0x18f   : > { %v1550_v47 = vadd.f32 %v1522_v55, %v4843_v31  ;;  %v4891_v33 = vadd.f32 %v1656_v21, %v1549_v19  ;;  %v3893_v41 = vpop.f32.mrb[83].mxu0  ;;  %v3974_v56 = vpop.f32.mrb[85].mxu1 }
 0x190   : > { %v2055_v57 = vpop.f32.mrb[86].mxu1 }
 0x191   : > { %v4893_v7 = vadd.f32 %v1659_v50, %v1550_v47  ;;  %v3975_v34 = vpop.f32.mrb[87].mxu1 }
 0x194   : > { %v1527_v58 = vpop.f32.mrb[84].mxu0 }
 0x195   : > { %v1551_v26 = vadd.f32 %v1527_v58, %v4847_v28  ;;  %v3896_v0 = vpop.f32.mrb[85].mxu0 }
 0x196   : > { %v1530_v42 = vpop.f32.mrb[86].mxu0  ;;  %v2060_v31 = vpop.f32.mrb[88].mxu1 }
 0x197   : > { %v1552_v10 = vadd.f32 %v1530_v42, %v4849_v32  ;;  %v4897_v52 = vadd.f32 %v1664_v63, %v1551_v26  ;;  %v3897_v43 = vpop.f32.mrb[87].mxu0  ;;  %v3978_v46 = vpop.f32.mrb[89].mxu1 }
 0x198   : > { %v2063_v18 = vpop.f32.mrb[90].mxu1 }
 0x199   : > { %v4899_v21 = vadd.f32 %v1667_v2, %v1552_v10  ;;  %v3979_v50 = vpop.f32.mrb[91].mxu1 }
 0x19c   : > { %v1535_v4 = vpop.f32.mrb[88].mxu0 }
 0x19d   : > { %v1553_v20 = vadd.f32 %v1535_v4, %v4852_v45  ;;  %v3900_v12 = vpop.f32.mrb[89].mxu0 }
 0x19e   : > { %v1538_v59 = vpop.f32.mrb[90].mxu0  ;;  %v2068_v8 = vpop.f32.mrb[92].mxu1 }
 0x19f   : > { %v4902_v62 = vadd.f32 %v1672_v36, %v1553_v20  ;;  %v3901_v28 = vpop.f32.mrb[91].mxu0  ;;  %v3982_v37 = vpop.f32.mrb[93].mxu1 }
 0x1a0   : > { %v2071_v32 = vpop.f32.mrb[94].mxu1 }
 0x1a1   : > { %v3983_v63 = vpop.f32.mrb[95].mxu1 }
 0x1a4   : > { %v1863_v11 = vpop.f32.mrb[92].mxu0 }
 0x1a5   : > { %v1917_v51 = vadd.f32 %v1863_v11, %v4867_v23  ;;  %v3936_v2 = vpop.f32.mrb[93].mxu0 }
 0x1a6   : > { %v1866_v9 = vpop.f32.mrb[94].mxu0  ;;  %v2076_v54 = vpop.f32.mrb[96].mxu1 }
 0x1a7   : > { %v1918_v29 = vadd.f32 %v1866_v9, %v4869_v15  ;;  %v2090_v22 = vadd.f32 %v2036_v48, %v1917_v51  ;;  %v3937_v3 = vpop.f32.mrb[95].mxu0  ;;  %v3986_v30 = vpop.f32.mrb[97].mxu1 }
 0x1a8   : > { %v2079_v27 = vpop.f32.mrb[98].mxu1 }
 0x1a9   : > { %v2091_v45 = vadd.f32 %v2039_v25, %v1918_v29  ;;  %v3987_v36 = vpop.f32.mrb[99].mxu1 }
 0x1ac   : > { %v1871_v38 = vpop.f32.mrb[96].mxu0 }
 0x1ad   : > { %v1919_v35 = vadd.f32 %v1871_v38, %v4873_v5  ;;  %v3940_v40 = vpop.f32.mrb[97].mxu0  ;;  %v4254_v38 = vld [vmem:[%s4862_s15 + $0x48] sm:$0xff]  }
 0x1ae   : > { %v1874_v44 = vpop.f32.mrb[98].mxu0  ;;  %v2084_v19 = vpop.f32.mrb[100].mxu1 }
 0x1af   : > { %v1920_v13 = vadd.f32 %v1874_v44, %v4875_v6  ;;  %v2092_v49 = vadd.f32 %v2044_v60, %v1919_v35  ;;  %v3941_v23 = vpop.f32.mrb[99].mxu0  ;;  %v3990_v55 = vpop.f32.mrb[101].mxu1 }
 0x1b0   : > { %v2087_v15 = vpop.f32.mrb[102].mxu1 }
 0x1b1   : > { %v2093_v24 = vadd.f32 %v2047_v14, %v1920_v13  ;;  %v3991_v48 = vpop.f32.mrb[103].mxu1 }
 0x1b4   : > { %v1879_v47 = vpop.f32.mrb[100].mxu0 }
 0x1b5   : > { %v1921_v25 = vadd.f32 %v1879_v47, %v4879_v16  ;;  %v3944_v41 = vpop.f32.mrb[101].mxu0  ;;  %v4258_v47 = vld [vmem:[%s4862_s15 + $0x58] sm:$0xff]  }
 0x1b6   : > { %v1882_v56 = vpop.f32.mrb[102].mxu0 }
 0x1b7   : > { %v1922_v34 = vadd.f32 %v1882_v56, %v4881_v17  ;;  %v4910_v58 = vadd.f32 %v2052_v53, %v1921_v25  ;;  %v3945_v5 = vpop.f32.mrb[103].mxu0 }
 0x1b9   : > { %v4912_v26 = vadd.f32 %v2055_v57, %v1922_v34  ;;  %v4259_v34 = vld [vmem:[%s4862_s15 + $0x18] sm:$0xff]  }
 0x1bc   : > { %v1887_v6 = vpop.f32.mrb[104].mxu0 }
 0x1bd   : > { %v1923_v60 = vadd.f32 %v1887_v6, %v4885_v39  ;;  %v3948_v0 = vpop.f32.mrb[105].mxu0 }
 0x1be   : > { %v1890_v14 = vpop.f32.mrb[106].mxu0 }
 0x1bf   : > { %v1924_v42 = vadd.f32 %v1890_v14, %v4887_v61  ;;  %v4916_v10 = vadd.f32 %v2060_v31, %v1923_v60  ;;  %v3949_v43 = vpop.f32.mrb[107].mxu0  ;;  %v4260_v60 = vld [vmem:[%s4862_s15 + $0x60] sm:$0xff]  }
 0x1c0   : > { %v4261_v14 = vld [vmem:[%s4862_s15 + $0x20] sm:$0xff]   ;;  %v4262_v43 = vld [vmem:[%s4862_s15 + $0x68] sm:$0xff]  }
 0x1c1   : > { %v4918_v16 = vadd.f32 %v2063_v18, %v1924_v42 }
 0x1c4   : > { %v1895_v46 = vpop.f32.mrb[108].mxu0 }
 0x1c5   : > { %v1925_v17 = vadd.f32 %v1895_v46, %v4891_v33  ;;  %v3952_v53 = vpop.f32.mrb[109].mxu0 }
 0x1c6   : > { %v1898_v50 = vpop.f32.mrb[110].mxu0 }
 0x1c7   : > { %v1926_v57 = vadd.f32 %v1898_v50, %v4893_v7  ;;  %v4922_v4 = vadd.f32 %v2068_v8, %v1925_v17  ;;  %v3953_v20 = vpop.f32.mrb[111].mxu0  ;;  %v4263_v50 = vld [vmem:[%s4862_s15 + $0x28] sm:$0xff]  }
 0x1c9   : > { %v4924_v39 = vadd.f32 %v2071_v32, %v1926_v57 }
 0x1cc   : > { %v1903_v12 = vpop.f32.mrb[112].mxu0 }
 0x1cd   : > { %v1927_v61 = vadd.f32 %v1903_v12, %v4897_v52  ;;  %v3956_v31 = vpop.f32.mrb[113].mxu0  ;;  %v4264_v12 = vld [vmem:[%s4862_s15 + $0x70] sm:$0xff]  }
 0x1ce   : > { %v1906_v59 = vpop.f32.mrb[114].mxu0  ;;  %v4265_v31 = vld [vmem:[%s4862_s15 + $0x30] sm:$0xff]  }
 0x1cf   : > { %v1928_v18 = vadd.f32 %v1906_v59, %v4899_v21  ;;  %v4928_v28 = vadd.f32 %v2076_v54, %v1927_v61  ;;  %v3957_v37 = vpop.f32.mrb[115].mxu0  ;;  %v4938_v21 = vld [vmem:[%s5159_s3] ss:$0 sm:$0xff] }
 0x1d1   : > { %v4930_v33 = vadd.f32 %v2079_v27, %v1928_v18  ;;  %v4253_v27 = vld [vmem:[%s4862_s15] sm:$0xff]   ;;  %v4266_v18 = vld [vmem:[%s4862_s15 + $0x78] sm:$0xff]  }
 0x1d4   : > { %v1911_v63 = vpop.f32.mrb[116].mxu0 }
 0x1d5   : > { %v1929_v7 = vadd.f32 %v1911_v63, %v4902_v62  ;;  %v3960_v8 = vpop.f32.mrb[117].mxu0 }
 0x1d6   : > { %v1914_v32 = vpop.f32.mrb[118].mxu0  ;;  %v4267_v8 = vld [vmem:[%s4862_s15 + $0x38] sm:$0xff]  }
 0x1d7   : > { %v4933_v11 = vadd.f32 %v2084_v19, %v1929_v7  ;;  %v3961_v51 = vpop.f32.mrb[119].mxu0  ;;  %v4256_v19 = vld [vmem:[%s4862_s15 + $0x50] sm:$0xff]  }
 0x1dc   : > { %v2226_v52 = vpop.f32.mrb[120].mxu0 }
 0x1dd   : > { %v2280_v2 = vadd.f32 %v2226_v52, %v2090_v22  ;;  %v3996_v9 = vpop.f32.mrb[121].mxu0 }
 0x1de   : > { %v2229_v29 = vpop.f32.mrb[122].mxu0 }
 0x1df   : > { %v2281_v3 = vadd.f32 %v2229_v29, %v2091_v45  ;;  %v3997_v54 = vpop.f32.mrb[123].mxu0  ;;  %v2300_v62 = vadd.f32 %v4938_v21, %v2280_v2  ;;  %v4255_v45 = vld [vmem:[%s4862_s15 + $0x8] sm:$0xff]  }
 0x1e1   : > { %v2301_v30 = vadd.f32 %v4938_v21, %v2281_v3 }
 0x1e3   : > { %v2313_v36 = vpack.c.bf16 %v2301_v30, %v2300_v62 }
 0x1e4   : > { %v2234_v22 = vpop.f32.mrb[124].mxu0 }
 0x1e5   : > { %v2282_v35 = vadd.f32 %v2234_v22, %v2092_v49  ;;  %v4000_v40 = vpop.f32.mrb[125].mxu0  ;;  %4025 = vmatmul.mubr.msk.bf16.vlgmr.msra.gmra.mrb[104].mxu1 %vm625_vm2, %v2313_v36  ;;  %v4257_v49 = vld [vmem:[%s4862_s15 + $0x10] sm:$0xff]  }
 0x1e6   : > { %3711 = vmatpush3.bf16.msra.mxu1 %v4253_v27  ;;  %v2237_v44 = vpop.f32.mrb[126].mxu0  ;;  %4028 = vmatprep.mubr.msk.bf16.mxu1 %vm4280_vm1, %v4279_v1 }
 0x1e7   : > { %v2283_v13 = vadd.f32 %v2237_v44, %v2093_v24  ;;  %v4001_v23 = vpop.f32.mrb[127].mxu0  ;;  %3712 = vmatprep.subr.bf16.mxu1 %v4254_v38  ;;  %v2302_v55 = vadd.f32 %v4938_v21, %v2282_v35 }
 0x1e8   : > { %v2764_v23 = vld [vmem:[%s5165_s9] sm:$0x3] }
 0x1e9   : > { %v2303_v15 = vadd.f32 %v4938_v21, %v2283_v13 }
 0x1ea   : > { %3713 = vmatpush3.bf16.msra.mxu1 %v4255_v45 }
 0x1eb   : > { %v2314_v48 = vpack.c.bf16 %v2303_v15, %v2302_v55  ;;  %3714 = vmatprep.subr.bf16.mxu1 %v4256_v19  ;;  %v2776_v19 = vsel %vm647_vm0, %v2764_v23, 0  ;;  %v3566_v55 = vld [vmem:[%s5161_s5] ss:$0 sm:$0xff] }
 0x1ec   : > { %v2242_v25 = vpop.f32.mrb[128].mxu0 }
 0x1ed   : > { %v2284_v41 = vadd.f32 %v2242_v25, %v4910_v58  ;;  %v4004_v56 = vpop.f32.mrb[129].mxu0  ;;  %4029 = vmatmul.mubr.msk.bf16.gmra.mrb[108].mxu1 %vm625_vm2, %v2314_v48 }
 0x1ee   : > { %v2245_v24 = vpop.f32.mrb[130].mxu0  ;;  %3715 = vmatpush3.bf16.msra.mxu1 %v4257_v49  ;;  %4032 = vmatprep.mubr.msk.bf16.mxu1 %vm4280_vm1, %v4279_v1 }
 0x1ef   : > { %v2285_v5 = vadd.f32 %v2245_v24, %v4912_v26  ;;  %v4005_v6 = vpop.f32.mrb[131].mxu0  ;;  %3716 = vmatprep.subr.bf16.mxu1 %v4258_v47  ;;  %v2304_v0 = vadd.f32 %v4938_v21, %v2284_v41 }
 0x1f1   : > { %v2305_v58 = vadd.f32 %v4938_v21, %v2285_v5 }
 0x1f2   : > { %3717 = vmatpush3.bf16.msra.mxu1 %v4259_v34 }
 0x1f3   : > { %v2315_v42 = vpack.c.bf16 %v2305_v58, %v2304_v0  ;;  %3718 = vmatprep.subr.bf16.mxu1 %v4260_v60 }
 0x1f4   : > { %v2250_v46 = vpop.f32.mrb[132].mxu0 }
 0x1f5   : > { %v2286_v17 = vadd.f32 %v2250_v46, %v4916_v10  ;;  %v4008_v53 = vpop.f32.mrb[133].mxu0  ;;  %4033 = vmatmul.mubr.msk.bf16.gmra.mrb[112].mxu1 %vm625_vm2, %v2315_v42 }
 0x1f6   : > { %v2253_v26 = vpop.f32.mrb[134].mxu0  ;;  %4036 = vmatprep.mubr.msk.bf16.mxu1 %vm4280_vm1, %v4279_v1  ;;  %3719 = vmatpush3.bf16.msra.mxu1 %v4261_v14 }
 0x1f7   : > { %v2287_v57 = vadd.f32 %v2253_v26, %v4918_v16  ;;  %v4009_v20 = vpop.f32.mrb[135].mxu0  ;;  %3720 = vmatprep.subr.bf16.mxu1 %v4262_v43  ;;  %v2306_v61 = vadd.f32 %v4938_v21, %v2286_v17 }
 0x1f9   : > { %v2307_v10 = vadd.f32 %v4938_v21, %v2287_v57 }
 0x1fa   : > { %3721 = vmatpush3.bf16.msra.mxu1 %v4263_v50 }
 0x1fb   : > { %v2316_v59 = vpack.c.bf16 %v2307_v10, %v2306_v61  ;;  %3722 = vmatprep.subr.bf16.mxu1 %v4264_v12 }
 0x1fc   : > { %v2258_v37 = vpop.f32.mrb[136].mxu0 }
 0x1fd   : > { %v2288_v63 = vadd.f32 %v2258_v37, %v4922_v4  ;;  %v4012_v7 = vpop.f32.mrb[137].mxu0  ;;  %4037 = vmatmul.mubr.msk.bf16.gmra.mrb[116].mxu1 %vm625_vm2, %v2316_v59 }
 0x1fe   : > { %v2261_v16 = vpop.f32.mrb[138].mxu0  ;;  %4040 = vmatprep.mubr.msk.bf16.mxu1 %vm4280_vm1, %v4279_v1  ;;  %3723 = vmatpush3.bf16.msra.mxu1 %v4265_v31 }
 0x1ff   : > { %v2289_v32 = vadd.f32 %v2261_v16, %v4924_v39  ;;  %v4013_v51 = vpop.f32.mrb[139].mxu0  ;;  %3724 = vmatprep.subr.bf16.mxu1 %v4266_v18  ;;  %v2308_v52 = vadd.f32 %v4938_v21, %v2288_v63 }
 0x201   : > { %v2309_v2 = vadd.f32 %v4938_v21, %v2289_v32 }
 0x202   : > { %3725 = vmatpush3.bf16.msra.mxu1 %v4267_v8 }
 0x203   : > { %v2317_v9 = vpack.c.bf16 %v2309_v2, %v2308_v52  ;;  %4082 = vmatprep.subr.bf16.mxu1 %v4279_v1 }
 0x204   : > { %v2266_v4 = vpop.f32.mrb[140].mxu0 }
 0x205   : > { %v2290_v29 = vadd.f32 %v2266_v4, %v4928_v28  ;;  %v4016_v3 = vpop.f32.mrb[141].mxu0  ;;  %4041 = vmatmul.mubr.msk.bf16.gmra.mrb[120].mxu1 %vm625_vm2, %v2317_v9 }
 0x206   : > { %v2269_v54 = vpop.f32.mrb[142].mxu0  ;;  %4044 = vmatprep.mubr.msk.bf16.mxu1 %vm4280_vm1, %v4279_v1 }
 0x207   : > { %v2291_v39 = vadd.f32 %v2269_v54, %v4930_v33  ;;  %v4017_v62 = vpop.f32.mrb[143].mxu0  ;;  %v2310_v30 = vadd.f32 %v4938_v21, %v2290_v29  ;;  %v4270_v33 = vld [vmem:[%s5164_s8 + $0x4] ss:$8 sps:$4 sm:$0x1f]  }
 0x209   : > { %v2311_v27 = vadd.f32 %v4938_v21, %v2291_v39 }
 0x20b   : > { %v2318_v36 = vpack.c.bf16 %v2311_v27, %v2310_v30 }
 0x20c   : > { %v2274_v38 = vpop.f32.mrb[144].mxu0 }
 0x20d   : > { %v2292_v22 = vadd.f32 %v2274_v38, %v4933_v11  ;;  %v4020_v35 = vpop.f32.mrb[145].mxu0  ;;  %4045 = vmatmul.mubr.msk.bf16.gmra.mrb[124].mxu1 %vm625_vm2, %v2318_v36  ;;  %v4268_v11 = vld [vmem:[%s5164_s8] ss:$8 sps:$4 sm:$0x1f]  }
 0x20e   : > { %v2277_v28 = vpop.f32.mrb[146].mxu0  ;;  %4048 = vmatprep.mubr.msk.bf16.mxu1 %vm4280_vm1, %v4279_v1 }
 0x20f   : > { %v2312_v40 = vadd.f32 %v4938_v21, %v2292_v22  ;;  %v4021_v44 = vpop.f32.mrb[147].mxu0  ;;  %v2447_v21 = vld [vmem:[%s5162_s6] sm:$0x1] }
 0x210   : > { %v2479_v13 = vsel %vm2477_vm9, %v2447_v21, 0 }
 0x211   : > { %v2319_v45 = vpack.c.bf16 %v2312_v40, %v2312_v40  ;;  %4053 = vmatpush3.bf16.msra.mxu0 %v2479_v13 }
 0x215   : > { %4049 = vmatmul.mubr.msk.bf16.gmra.mrb[128].mxu1 %vm625_vm2, %v2319_v45 }
 0x216   : > { %2754 = vmatprep.mubr.bf16.mxu1 %v4270_v33  ;;  %v2821_v33 = vld [vmem:[%s5167_s11] sm:$0x1] }
 0x217   : > { %v2826_v45 = vsel %vm2477_vm9, %v2821_v33, 0  ;;  %v3611_v33 = vld [vmem:[%s5167_s11 + $0x5] sm:$0x1] }
 0x21d   : > { %2755 = vmatmul.mubr.bf16.vlgmr.msra.gmra.mrb[132].mxu1 %v4268_v11  ;;  %v3574_v11 = vld [vmem:[%s5163_s7] ss:$0 sm:$0xff] }
 0x21e   : > { %4084 = vmatprep.mubr.msk.bf16.mxu1 %vm4280_vm1, %v4279_v1  ;;  %4083 = vmatpush3.bf16.msra.mxu1 %v2776_v19 }
 0x21f   : > { %4088 = vmatprep.subr.bf16.mxu1 %v4279_v1 }
 0x2b8   : > { %v2386_v15 = vpop.f32.mrb[104].mxu1 }
 0x2b9   : > { %v4026_v49 = vpop.f32.mrb[105].mxu1  ;;  %v2387_v47 = vadd.f32 %v3566_v55, %v2386_v15 }
 0x2ba   : > { %v2389_v48 = vpop.f32.mrb[106].mxu1 }
 0x2bb   : > { %v2390_v25 = vadd.f32 %v3566_v55, %v2389_v48  ;;  %v4027_v41 = vpop.f32.mrb[107].mxu1 }
 0x2bd   : > { %v2440_v56 = vpack.c.bf16 %v2390_v25, %v2387_v47 }
 0x2bf   : > { %4055 = vmatmul.mubr.msk.bf16.vlgmr.msra.gmra.mrb[148].mxu0 %vm2455_vm10, %v2440_v56 }
 0x2c0   : > { %v2394_v24 = vpop.f32.mrb[108].mxu1  ;;  %4058 = vmatprep.mubr.msk.bf16.mxu0 %vm4280_vm1, %v4279_v1 }
 0x2c1   : > { %v4030_v34 = vpop.f32.mrb[109].mxu1  ;;  %v2395_v6 = vadd.f32 %v3566_v55, %v2394_v24 }
 0x2c2   : > { %v2397_v5 = vpop.f32.mrb[110].mxu1 }
 0x2c3   : > { %v2398_v60 = vadd.f32 %v3566_v55, %v2397_v5  ;;  %v4031_v0 = vpop.f32.mrb[111].mxu1 }
 0x2c5   : > { %v2441_v58 = vpack.c.bf16 %v2398_v60, %v2395_v6 }
 0x2c7   : > { %4059 = vmatmul.mubr.msk.bf16.gmra.mrb[152].mxu0 %vm2455_vm10, %v2441_v58 }
 0x2c8   : > { %v2402_v14 = vpop.f32.mrb[112].mxu1  ;;  %4062 = vmatprep.mubr.msk.bf16.mxu0 %vm4280_vm1, %v4279_v1 }
 0x2c9   : > { %v4034_v42 = vpop.f32.mrb[113].mxu1  ;;  %v2403_v46 = vadd.f32 %v3566_v55, %v2402_v14 }
 0x2ca   : > { %v2405_v43 = vpop.f32.mrb[114].mxu1 }
 0x2cb   : > { %v2406_v17 = vadd.f32 %v3566_v55, %v2405_v43  ;;  %v4035_v53 = vpop.f32.mrb[115].mxu1 }
 0x2cd   : > { %v2442_v26 = vpack.c.bf16 %v2406_v17, %v2403_v46 }
 0x2cf   : > { %4063 = vmatmul.mubr.msk.bf16.gmra.mrb[156].mxu0 %vm2455_vm10, %v2442_v26 }
 0x2d0   : > { %v2410_v50 = vpop.f32.mrb[116].mxu1  ;;  %4066 = vmatprep.mubr.msk.bf16.mxu0 %vm4280_vm1, %v4279_v1 }
 0x2d1   : > { %v4038_v57 = vpop.f32.mrb[117].mxu1  ;;  %v2411_v12 = vadd.f32 %v3566_v55, %v2410_v50 }
 0x2d2   : > { %v2413_v20 = vpop.f32.mrb[118].mxu1 }
 0x2d3   : > { %v2414_v61 = vadd.f32 %v3566_v55, %v2413_v20  ;;  %v4039_v10 = vpop.f32.mrb[119].mxu1 }
 0x2d5   : > { %v2443_v31 = vpack.c.bf16 %v2414_v61, %v2411_v12 }
 0x2d7   : > { %4067 = vmatmul.mubr.msk.bf16.gmra.mrb[160].mxu0 %vm2455_vm10, %v2443_v31 }
 0x2d8   : > { %v2418_v59 = vpop.f32.mrb[120].mxu1  ;;  %4070 = vmatprep.mubr.msk.bf16.mxu0 %vm4280_vm1, %v4279_v1 }
 0x2d9   : > { %v4042_v18 = vpop.f32.mrb[121].mxu1  ;;  %v2419_v63 = vadd.f32 %v3566_v55, %v2418_v59 }
 0x2da   : > { %v2421_v37 = vpop.f32.mrb[122].mxu1 }
 0x2db   : > { %v2422_v7 = vadd.f32 %v3566_v55, %v2421_v37  ;;  %v4043_v16 = vpop.f32.mrb[123].mxu1 }
 0x2dd   : > { %v2444_v8 = vpack.c.bf16 %v2422_v7, %v2419_v63 }
 0x2df   : > { %4071 = vmatmul.mubr.msk.bf16.gmra.mrb[164].mxu0 %vm2455_vm10, %v2444_v8 }
 0x2e0   : > { %v2426_v32 = vpop.f32.mrb[124].mxu1  ;;  %4074 = vmatprep.mubr.msk.bf16.mxu0 %vm4280_vm1, %v4279_v1 }
 0x2e1   : > { %v4046_v51 = vpop.f32.mrb[125].mxu1  ;;  %v2427_v2 = vadd.f32 %v3566_v55, %v2426_v32 }
 0x2e2   : > { %v2429_v52 = vpop.f32.mrb[126].mxu1  ;;  %v3600_v51 = vld [vmem:[%s5166_s10] ss:$0 sm:$0xff] }
 0x2e3   : > { %v2430_v9 = vadd.f32 %v3566_v55, %v2429_v52  ;;  %v4047_v4 = vpop.f32.mrb[127].mxu1 }
 0x2e5   : > { %v2445_v29 = vpack.c.bf16 %v2430_v9, %v2427_v2  ;;  %v3603_v2 = vld [vmem:[%s5167_s11 + $0x1] sm:$0x1] }
 0x2e7   : > { %4075 = vmatmul.mubr.msk.bf16.gmra.mrb[168].mxu0 %vm2455_vm10, %v2445_v29 }
 0x2e8   : > { %v2434_v3 = vpop.f32.mrb[128].mxu1  ;;  %4078 = vmatprep.mubr.msk.bf16.mxu0 %vm4280_vm1, %v4279_v1 }
 0x2e9   : > { %v2435_v54 = vadd.f32 %v3566_v55, %v2434_v3  ;;  %v4050_v39 = vpop.f32.mrb[129].mxu1 }
 0x2ea   : > { %v2437_v62 = vpop.f32.mrb[130].mxu1 }
 0x2eb   : > { %v4051_v30 = vpop.f32.mrb[131].mxu1  ;;  %v2446_v27 = vpack.c.bf16 %v2435_v54, %v2435_v54  ;;  %v2877_v62 = vsel %vm2477_vm9, %v3603_v2, 0 }
 0x2ec   : > { %v3605_v30 = vld [vmem:[%s5167_s11 + $0x2] sm:$0x1] }
 0x2ef   : > { %4079 = vmatmul.mubr.msk.bf16.gmra.mrb[172].mxu0 %vm2455_vm10, %v2446_v27 }
 0x2f0   : > { %v3726_v36 = vpop.f32.mrb[132].mxu1 }
 0x2f1   : > { %v3727_v38 = vpop.f32.mrb[133].mxu1 }
 0x2f2   : > { %v3728_v22 = vadd.f32 %v3727_v38, %v3726_v36  ;;  %v3729_v35 = vpop.f32.mrb[134].mxu1  ;;  %v2928_v36 = vsel %vm2477_vm9, %v3605_v30, 0  ;;  %v3607_v38 = vld [vmem:[%s5167_s11 + $0x3] sm:$0x1] }
 0x2f3   : > { %v3730_v28 = vpop.f32.mrb[135].mxu1 }
 0x2f4   : > { %v3731_v40 = vadd.f32 %v3730_v28, %v3729_v35  ;;  %v2978_v35 = vsel %vm2477_vm9, %v3607_v38, 0  ;;  %v3609_v28 = vld [vmem:[%s5167_s11 + $0x4] sm:$0x1] }
 0x2f6   : > { %v2763_v44 = vpack.c.bf16 %v3731_v40, %v3728_v22 }
 0x2f8   : > { %4085 = vmatmul.mubr.msk.bf16.vlgmr.msra.gmra.mrb[136].mxu1 %vm625_vm2, %v2763_v44  ;;  %v3028_v44 = vsel %vm2477_vm9, %v3609_v28, 0 }
 0x2f9   : > { %4090 = vmatprep.mubr.msk.bf16.mxu1 %vm4280_vm1, %v4279_v1  ;;  %4089 = vmatpush3.bf16.msra.mxu1 %v2826_v45 }
 0x2fa   : > { %4094 = vmatprep.subr.bf16.mxu1 %v4279_v1 }
 0x392   : > { %v2515_v21 = vpop.f32.mrb[148].mxu0 }
 0x393   : > { %v2516_v13 = vadd.f32 %v3574_v11, %v2515_v21  ;;  %v4056_v23 = vpop.f32.mrb[149].mxu0  ;;  %v3613_v21 = vld [vmem:[%s5167_s11 + $0x6] sm:$0x1] }
 0x394   : > { %v2518_v19 = vpop.f32.mrb[150].mxu0  ;;  %v3128_v23 = vsel %vm2477_vm9, %v3613_v21, 0 }
 0x395   : > { %2569 = vst.msk [vmem:[%s5051_s21] sm:$0xff] %vm2455_vm10, %v2516_v13  ;;  %v2519_v55 = vadd.f32 %v3574_v11, %v2518_v19  ;;  %v4057_v15 = vpop.f32.mrb[151].mxu0  ;;  %v3615_v19 = vld [vmem:[%s5167_s11 + $0x7] sm:$0x1] }
 0x396   : > { %v3178_v15 = vsel %vm2477_vm9, %v3615_v19, 0 }
 0x397   : > { %2570 = vst.msk [vmem:[%s5051_s21 + $0x8] sm:$0xff] %vm2455_vm10, %v2519_v55 }
 0x39a   : > { %v2523_v49 = vpop.f32.mrb[152].mxu0 }
 0x39b   : > { %v2524_v48 = vadd.f32 %v3574_v11, %v2523_v49  ;;  %v4060_v47 = vpop.f32.mrb[153].mxu0  ;;  %v3617_v49 = vld [vmem:[%s5167_s11 + $0x8] sm:$0x1] }
 0x39c   : > { %v2526_v25 = vpop.f32.mrb[154].mxu0  ;;  %v3228_v47 = vsel %vm2477_vm9, %v3617_v49, 0 }
 0x39d   : > { %2571 = vst.msk [vmem:[%s5051_s21 + $0x10] sm:$0xff] %vm2455_vm10, %v2524_v48  ;;  %v2527_v41 = vadd.f32 %v3574_v11, %v2526_v25  ;;  %v4061_v56 = vpop.f32.mrb[155].mxu0 }
 0x39f   : > { %2572 = vst.msk [vmem:[%s5051_s21 + $0x18] sm:$0xff] %vm2455_vm10, %v2527_v41  ;;  %v2819_v41 = vld [vmem:[%s5168_s12] sm:$0x1] }
 0x3a2   : > { %v2531_v24 = vpop.f32.mrb[156].mxu0 }
 0x3a3   : > { %v2532_v34 = vadd.f32 %v3574_v11, %v2531_v24  ;;  %v4064_v5 = vpop.f32.mrb[157].mxu0 }
 0x3a4   : > { %v2534_v6 = vpop.f32.mrb[158].mxu0 }
 0x3a5   : > { %2573 = vst.msk [vmem:[%s5051_s21 + $0x20] sm:$0xff] %vm2455_vm10, %v2532_v34  ;;  %v2535_v60 = vadd.f32 %v3574_v11, %v2534_v6  ;;  %v4065_v0 = vpop.f32.mrb[159].mxu0 }
 0x3a7   : > { %2574 = vst.msk [vmem:[%s5051_s21 + $0x28] sm:$0xff] %vm2455_vm10, %v2535_v60 }
 0x3aa   : > { %v2539_v58 = vpop.f32.mrb[160].mxu0 }
 0x3ab   : > { %v2540_v14 = vadd.f32 %v3574_v11, %v2539_v58  ;;  %v4068_v42 = vpop.f32.mrb[161].mxu0 }
 0x3ac   : > { %v2542_v43 = vpop.f32.mrb[162].mxu0 }
 0x3ad   : > { %2575 = vst.msk [vmem:[%s5051_s21 + $0x30] sm:$0xff] %vm2455_vm10, %v2540_v14  ;;  %v2543_v46 = vadd.f32 %v3574_v11, %v2542_v43  ;;  %v4069_v17 = vpop.f32.mrb[163].mxu0 }
 0x3af   : > { %2576 = vst.msk [vmem:[%s5051_s21 + $0x38] sm:$0xff] %vm2455_vm10, %v2543_v46 }
 0x3b2   : > { %v2547_v53 = vpop.f32.mrb[164].mxu0 }
 0x3b3   : > { %v2548_v26 = vadd.f32 %v3574_v11, %v2547_v53  ;;  %v4072_v50 = vpop.f32.mrb[165].mxu0 }
 0x3b4   : > { %v2550_v57 = vpop.f32.mrb[166].mxu0 }
 0x3b5   : > { %2577 = vst.msk [vmem:[%s5051_s21 + $0x40] sm:$0xff] %vm2455_vm10, %v2548_v26  ;;  %v2551_v20 = vadd.f32 %v3574_v11, %v2550_v57  ;;  %v4073_v12 = vpop.f32.mrb[167].mxu0 }
 0x3b7   : > { %2578 = vst.msk [vmem:[%s5051_s21 + $0x48] sm:$0xff] %vm2455_vm10, %v2551_v20 }
 0x3ba   : > { %v2555_v61 = vpop.f32.mrb[168].mxu0 }
 0x3bb   : > { %v2556_v10 = vadd.f32 %v3574_v11, %v2555_v61  ;;  %v4076_v31 = vpop.f32.mrb[169].mxu0 }
 0x3bc   : > { %v2558_v59 = vpop.f32.mrb[170].mxu0 }
 0x3bd   : > { %2579 = vst.msk [vmem:[%s5051_s21 + $0x50] sm:$0xff] %vm2455_vm10, %v2556_v10  ;;  %v2559_v18 = vadd.f32 %v3574_v11, %v2558_v59  ;;  %v4077_v37 = vpop.f32.mrb[171].mxu0 }
 0x3bf   : > { %2580 = vst.msk [vmem:[%s5051_s21 + $0x58] sm:$0xff] %vm2455_vm10, %v2559_v18 }
 0x3c2   : > { %v2563_v63 = vpop.f32.mrb[172].mxu0 }
 0x3c3   : > { %v2564_v7 = vadd.f32 %v3574_v11, %v2563_v63  ;;  %v4080_v16 = vpop.f32.mrb[173].mxu0  ;;  %v3078_v11 = vsel %vm2477_vm9, %v3611_v33, 0 }
 0x3c4   : > { %v2566_v8 = vpop.f32.mrb[174].mxu0 }
 0x3c5   : > { %2581 = vst.msk [vmem:[%s5051_s21 + $0x60] sm:$0xff] %vm2455_vm10, %v2564_v7  ;;  %v4081_v32 = vpop.f32.mrb[175].mxu0 }
 0x3cb   : > { %v2812_v52 = vpop.f32.mrb[136].mxu1 }
 0x3cc   : > { %v2813_v9 = vadd.f32 %v3600_v51, %v2812_v52  ;;  %v4086_v4 = vpop.f32.mrb[137].mxu1 }
 0x3cd   : > { %v2815_v29 = vpop.f32.mrb[138].mxu1 }
 0x3ce   : > { %v2820_v3 = vpack.c.bf16 %v2813_v9, %v2813_v9  ;;  %v2816_v54 = vadd.f32 %v3600_v51, %v2815_v29  ;;  %v4087_v39 = vpop.f32.mrb[139].mxu1 }
 0x3d0   : > { %4091 = vmatmul.mubr.msk.bf16.vlgmr.msra.gmra.mrb[140].mxu1 %vm2455_vm10, %v2820_v3  ;;  %v2871_v27 = vshrl.u32 %v2820_v3, 16  ;;  %v2923_v22 = vrot.slane %v2820_v3, 1  ;;  %v3023_v45 = vrot.slane %v2820_v3, 2  ;;  %v3123_v55 = vrot.slane %v2820_v3, 3 }
 0x3d1   : > { %4095 = vmatpush3.bf16.msra.mxu1 %v2877_v62  ;;  %4096 = vmatprep.mubr.msk.bf16.mxu1 %vm4280_vm1, %v4279_v1  ;;  %v3221_v25 = vpack.c.bf16 %v2816_v54, %v2816_v54 }
 0x3d2   : > { %4100 = vmatprep.subr.bf16.mxu1 %v4279_v1  ;;  %v2973_v40 = vrot.slane %v2871_v27, 1  ;;  %v3073_v13 = vrot.slane %v2871_v27, 2  ;;  %v3173_v48 = vrot.slane %v2871_v27, 3 }
 0x3dc   : > { %4097 = vmatmul.mubr.msk.bf16.vlgmr.msra.gmra.mrb[140].mxu1 %vm2455_vm10, %v2871_v27 }
 0x3dd   : > { %4101 = vmatpush3.bf16.msra.mxu1 %v2928_v36  ;;  %4102 = vmatprep.mubr.msk.bf16.mxu1 %vm4280_vm1, %v4279_v1 }
 0x3de   : > { %4106 = vmatprep.subr.bf16.mxu1 %v4279_v1 }
 0x3e8   : > { %4103 = vmatmul.mubr.msk.bf16.vlgmr.msra.gmra.mrb[140].mxu1 %vm2455_vm10, %v2923_v22 }
 0x3e9   : > { %4107 = vmatpush3.bf16.msra.mxu1 %v2978_v35  ;;  %4108 = vmatprep.mubr.msk.bf16.mxu1 %vm4280_vm1, %v4279_v1 }
 0x3ea   : > { %4112 = vmatprep.subr.bf16.mxu1 %v4279_v1 }
 0x3f4   : > { %4109 = vmatmul.mubr.msk.bf16.vlgmr.msra.gmra.mrb[140].mxu1 %vm2455_vm10, %v2973_v40 }
 0x3f5   : > { %4113 = vmatpush3.bf16.msra.mxu1 %v3028_v44  ;;  %4114 = vmatprep.mubr.msk.bf16.mxu1 %vm4280_vm1, %v4279_v1 }
 0x3f6   : > { %4118 = vmatprep.subr.bf16.mxu1 %v4279_v1 }
 0x400   : > { %4115 = vmatmul.mubr.msk.bf16.vlgmr.msra.gmra.mrb[140].mxu1 %vm2455_vm10, %v3023_v45 }
 0x401   : > { %4119 = vmatpush3.bf16.msra.mxu1 %v3078_v11  ;;  %4120 = vmatprep.mubr.msk.bf16.mxu1 %vm4280_vm1, %v4279_v1 }
 0x402   : > { %4124 = vmatprep.subr.bf16.mxu1 %v4279_v1 }
 0x40c   : > { %4121 = vmatmul.mubr.msk.bf16.vlgmr.msra.gmra.mrb[140].mxu1 %vm2455_vm10, %v3073_v13 }
 0x40d   : > { %4125 = vmatpush3.bf16.msra.mxu1 %v3128_v23  ;;  %4126 = vmatprep.mubr.msk.bf16.mxu1 %vm4280_vm1, %v4279_v1 }
 0x40e   : > { %4130 = vmatprep.subr.bf16.mxu1 %v4279_v1 }
 0x418   : > { %4127 = vmatmul.mubr.msk.bf16.vlgmr.msra.gmra.mrb[140].mxu1 %vm2455_vm10, %v3123_v55 }
 0x419   : > { %4131 = vmatpush3.bf16.msra.mxu1 %v3178_v15  ;;  %4132 = vmatprep.mubr.msk.bf16.mxu1 %vm4280_vm1, %v4279_v1 }
 0x41a   : > { %4136 = vmatprep.subr.bf16.mxu1 %v4279_v1 }
 0x424   : > { %4133 = vmatmul.mubr.msk.bf16.vlgmr.msra.gmra.mrb[140].mxu1 %vm2455_vm10, %v3173_v48 }
 0x425   : > { %4137 = vmatpush3.bf16.msra.mxu1 %v3228_v47  ;;  %4138 = vmatprep.mubr.msk.bf16.mxu1 %vm4280_vm1, %v4279_v1 }
 0x430   : > { %4139 = vmatmul.mubr.msk.bf16.vlgmr.msra.gmra.mrb[140].mxu1 %vm2455_vm10, %v3221_v25 }
 0x503   : > { %v3264_v56 = vpop.f32.mrb[140].mxu1 }
 0x504   : > { %v4144_v24 = vadd.f32 %v3264_v56, %v2819_v41  ;;  %v4140_v34 = vpop.f32.mrb[141].mxu1 }
 0x505   : > { %v3267_v5 = vpop.f32.mrb[142].mxu1 }
 0x506   : > { %3272 = vst.msk [vmem:[%s501_s16] sm:$0x1] %vm3271_vm11, %v4144_v24  ;;  %v4141_v6 = vpop.f32.mrb[143].mxu1 }
 0x507 PF: > { %s25_s29 = sadd.s32 1, %s4277_s29  }
 0x508   : > { %p22_p5 = scmp.ge.s32.totalorder %s25_s29, 4  }
 0x50a   :  { %24 = sbr.rel (!%p22_p5) target bundleno = 1 (0x1), region = 136 }

// kernel: dmdconv_forward.6
= control target key start
LH: loop header
LB: loop body
LE: loop exit
PB: predicated region body
PF: predicated region fallthrough
CT: control target
= control target key end

     0   :  { %s5399_s29 = smov 0   ;;  %s6437_s0 = inlined_call_operand.vmem [shape: bf16[8,182,4], index: 0, kind: input, shape index: {}]   ;;  %s6438_s1 = inlined_call_operand.vmem [shape: bf16[2,256,4], index: 1, kind: input, shape index: {}]   ;;  %s6439_s2 = inlined_call_operand.vmem [shape: bf16[9,4,4], index: 2, kind: input, shape index: {}]   ;;  %s6440_s3 = inlined_call_operand.vmem [shape: f32[1,4], index: 3, kind: input, shape index: {}]   ;;  %s6441_s4 = inlined_call_operand.vmem [shape: bf16[4,2], index: 4, kind: input, shape index: {}]   ;;  %s6442_s5 = inlined_call_operand.vmem [shape: f32[1,2], index: 5, kind: input, shape index: {}]   ;;  %s6443_s6 = inlined_call_operand.vmem [shape: bf16[2,2], index: 6, kind: input, shape index: {}]   ;;  %s6444_s7 = inlined_call_operand.vmem [shape: f32[1,2], index: 7, kind: input, shape index: {}]   ;;  %s6445_s8 = inlined_call_operand.vmem [shape: bf16[25,256], index: 8, kind: input, shape index: {}]   ;;  %s6446_s9 = inlined_call_operand.vmem [shape: bf16[4,2], index: 9, kind: input, shape index: {}]   ;;  %s6447_s10 = inlined_call_operand.vmem [shape: f32[1,2], index: 10, kind: input, shape index: {}]   ;;  %s6448_s11 = inlined_call_operand.vmem [shape: bf16[25,2,2], index: 11, kind: input, shape index: {}]   ;;  %s6449_s12 = inlined_call_operand.vmem [shape: f32[1,2], index: 12, kind: input, shape index: {}]   ;;  %s6450_s13 = inlined_call_operand.vmem [shape: f32[2,104,2], index: 13, kind: output, shape index: {0}]   ;;  %s6451_s14 = inlined_call_operand.vmem [shape: f32[2,1,2], index: 14, kind: output, shape index: {1}]  }
   0x1 LB: > { %s5405_s30 = sadd.s32 4294967295, %s5320_s29   ;;  %p4192_p0 = scmp.ge.s32.totalorder %s5320_s29, 1  ;;  %s5320_s29 = sphi %s5399_s29, %s25_s29  }
   0x2   : > { %p427_p1 = scmp.lt.s32.totalorder %s5320_s29, 3 }
   0x4   : > { %p428_p2 = pnand %p4192_p0, %p427_p1 }
   0x5   : > { %v4212_v0 = vld [vmem:[%s6439_s2 + $0x2] sm:$0x3] (!%p428_p2)  ;;  %vm605_vm0 = vcmask (!%p428_p2), 1041408   ;;  %s4193_s17 = sshll.u32 (!%p428_p2), %s5405_s30, 2  ;;  %v5322_v1 = vmov (!%p428_p2), 0.0   ;;  %vm5323_vm1 = vmmov (!%p428_p2), 0  }
   0x6   : > { %431 = sbr.rel (%p428_p2) target bundleno = 1548 (0x60c), region = 72  ;;  %4641 = vmatprep.subr.bf16.mxu0 (!%p428_p2), %v5322_v1  ;;  %v607_v2 = vsel (!%p428_p2), %vm605_vm0, %v4212_v0, 0  ;;  %4643 = vmatprep.mubr.msk.bf16.mxu0 (!%p428_p2), %vm5323_vm1, %v5322_v1  ;;  %p483_p3 = scmp.lt.s32.totalorder (!%p428_p2), %s4193_s17, 7  ;;  %v4270_v3 = vld [vmem:[%s6439_s2 + $0x6] sm:$0x3] (!%p428_p2)  ;;  %vm569_vm2 = vcmask (!%p428_p2), 1046528  }
   0x7   : > { %4642 = vmatpush3.bf16.msra.mxu0 (!%p428_p2), %v607_v2  ;;  %5127 = vmatprep.subr.bf16.mxu1 (!%p428_p2), %v5322_v1  ;;  %v5425_v4 = vsel (!%p428_p2), %vm605_vm0, %v4270_v3, 0  ;;  %v516_v5 = vld [vmem:[%s6439_s2] sm:$0x3] (!%p428_p2)  ;;  %vm583_vm3 = vcmask (!%p428_p2), 31744   ;;  %v4241_v51 = vld [vmem:[%s6439_s2 + $0x4] sm:$0x3] (!%p428_p2) }
   0x8   : > { %4671 = vmatprep.subr.bf16.mxu0 (!%p428_p2), %v5322_v1  ;;  %4745 = vmatprep.mubr.msk.bf16.mxu1 (!%p428_p2), %vm5323_vm1, %v5322_v1  ;;  %v752_v11 = vsel (!%p428_p2), %vm605_vm0, %v516_v5, 0  ;;  %v978_v54 = vsel (!%p428_p2), %vm605_vm0, %v4241_v51, 0  ;;  %v4316_v56 = vld [vmem:[%s6439_s2 + $0xa] sm:$0x3] (!%p428_p2)  ;;  %vm1472_vm4 = vsmask.f32 (!%p428_p2), 4352 }
   0x9   : > { %5128 = vmatpush3.bf16.msra.mxu1 (!%p428_p2), %v5425_v4  ;;  %v1557_v57 = vsel (!%p428_p2), %vm605_vm0, %v4316_v56, 0  ;;  %vm893_vm5 = vsmask.f32 (!%p428_p2), 5376  ;;  %vm1943_vm6 = vsmask.f32 (!%p428_p2), 6400  ;;  %vm1323_vm7 = vcmask (!%p428_p2), 1045504  }
   0xa   : > { %4791 = vmatprep.subr.bf16.mxu1 (!%p428_p2), %v5322_v1  ;;  %vm1711_vm8 = vsmask.f32 (!%p428_p2), 7424  ;;  %vm2141_vm9 = vcmask (!%p428_p2), 1044480   ;;  %p489_p4 = scmp.lt.s32.totalorder (!%p428_p2), %s5405_s30, 1  ;;  %vm2464_vm10 = vcmask (!%p428_p2), 1040384   ;;  %vm2442_vm11 = vcmask (!%p428_p2), 15360  }
   0xb   : > { %vm4094_vm12 = vcmask (!%p428_p2), 8192  }
   0xd   : > { %s6453_s17 = smov (!%p483_p3, %s4193_s17), 7  ;;  %s6455_s30 = smov (!%p489_p4, %s5405_s30), 1 }
   0xe   : > { %s5227_s20 = smul.u32 92, %s6453_s17  ;;  %s4471_s26 = sshll.u32 %s6455_s30, 7 }
   0xf   : > { %s6021_s15 = scalar_lea.vmem %s6438_s1, %s4471_s26 }
  0x10   : > { %s5432_s23 = scalar_lea.vmem %s6437_s0, %s5227_s20  ;;  %s5228_s20 = smul.u32 104, %s6455_s30 }
  0x11   : > { %v5239_v6 = vld [vmem:[%s5432_s23 + $0x5c] sm:$0xfe]   ;;  %v5240_v7 = vld [vmem:[%s5432_s23 + $0x64] sm:$0xff]   ;;  %v5241_v8 = vld [vmem:[%s5432_s23 + $0x6c] sm:$0xff]  }
  0x12   : > { %v570_v9 = vrot.slane %v5239_v6, 1  ;;  %v571_v10 = vrot.slane %v5240_v7, 1  ;;  %v573_v13 = vrot.slane %v5241_v8, 1  ;;  %v5242_v15 = vld [vmem:[%s5432_s23 + $0x74] sm:$0xff]   ;;  %v5243_v18 = vld [vmem:[%s5432_s23 + $0x7c] sm:$0xff]   ;;  %v5460_v21 = vld [vmem:[%s5432_s23 + $0xe4] sm:$0xff]   ;;  %s6196_s25 = scalar_lea.vmem %s6450_s13, %s5228_s20 }
  0x13   : > { %v575_v16 = vrot.slane %v5242_v15, 1  ;;  %v577_v19 = vrot.slane %v5243_v18, 1  ;;  %v5457_v20 = vld [vmem:[%s5432_s23 + $0xdc] sm:$0xff]   ;;  %v1140_v23 = vrot.slane %v5460_v21, 1  ;;  %v5465_v24 = vld [vmem:[%s5432_s23 + $0xec] sm:$0xff]   ;;  %v5244_v26 = vld [vmem:[%s5432_s23 + $0x84] sm:$0xff]  }
  0x14   : > { %v572_v12 = vsel %vm569_vm2, %v570_v9, %v571_v10  ;;  %v574_v14 = vsel %vm569_vm2, %v571_v10, %v573_v13  ;;  %v1138_v22 = vrot.slane %v5457_v20, 1  ;;  %v5471_v28 = vld [vmem:[%s5432_s23 + $0xf4] sm:$0xf]  ;;  %v4269_v29 = vld [vmem:[%s5432_s23 + $0xf8] sm:$0x1]  ;;  %v1142_v30 = vrot.slane %v5465_v24, 1 }
  0x15   : > { %4644 = vmatmul.mubr.msk.bf16.vlgmr.msra.gmra.mrb[0].mxu0 %vm583_vm3, %v572_v12  ;;  %v576_v17 = vsel %vm569_vm2, %v573_v13, %v575_v16  ;;  %v578_v25 = vsel %vm569_vm2, %v575_v16, %v577_v19  ;;  %v4277_v31 = vcombine.low %v5471_v28, %v4269_v29  ;;  %v579_v32 = vrot.slane %v5244_v26, 1  ;;  %v5245_v34 = vld [vmem:[%s5432_s23 + $0x8c] sm:$0x1f]   ;;  %v4256_v38 = vld [vmem:[%s5432_s23 + $0xc4] sm:$0xe]  ;;  %v5268_v47 = vld [vmem:[%s5432_s23 + $0xd4] sm:$0xff]  }
  0x16   : > { %4672 = vmatpush3.bf16.msra.mxu0 %v752_v11  ;;  %4647 = vmatprep.mubr.msk.bf16.mxu0 %vm5323_vm1, %v5322_v1  ;;  %v1141_v27 = vsel %vm569_vm2, %v1138_v22, %v1140_v23  ;;  %v1143_v35 = vsel %vm569_vm2, %v1140_v23, %v1142_v30  ;;  %v581_v37 = vrot.slane %v5245_v34, 1  ;;  %v4257_v39 = vld [vmem:[%s5432_s23 + $0xc8] sm:$0xf]  ;;  %v5266_v40 = vld [vmem:[%s5432_s23 + $0xcc] sm:$0xff]   ;;  %v1136_v48 = vrot.slane %v5268_v47, 1  ;;  %v5246_v52 = vld [vmem:[%s5432_s23] sm:$0xff]  }
  0x17   : > { %4701 = vmatprep.subr.bf16.mxu0 %v5322_v1  ;;  %4746 = vmatmul.mubr.msk.bf16.vlgmr.msra.gmra.mrb[0].mxu1 %vm583_vm3, %v1141_v27  ;;  %v1144_v33 = vrot.slane %v4277_v31, 1  ;;  %v580_v36 = vsel %vm569_vm2, %v577_v19, %v579_v32  ;;  %v4271_v41 = vcombine.low %v4256_v38, %v4257_v39  ;;  %v1134_v43 = vrot.slane %v5266_v40, 1  ;;  %v4314_v53 = vld [vmem:[%s5432_s23 + $0xc4] sm:$0x8]  ;;  %v5247_v60 = vld [vmem:[%s5432_s23 + $0x8] sm:$0xff]   ;;  %v5248_v10 = vld [vmem:[%s5432_s23 + $0x10] sm:$0xff]  }
  0x18   : > { %4749 = vmatprep.mubr.msk.bf16.mxu1 %vm5323_vm1, %v5322_v1  ;;  %v582_v45 = vsel %vm569_vm2, %v579_v32, %v581_v37  ;;  %v5516_v50 = vsel %vm569_vm2, %v1136_v48, %v1138_v22  ;;  %v4317_v55 = vcombine.low %v4314_v53, %v4257_v39  ;;  %4792 = vmatpush3.bf16.msra.mxu1 %v1557_v57  ;;  %v1482_v61 = vshrl.u32 %v5266_v40, 16  ;;  %v5250_v26 = vld [vmem:[%s5432_s23 + $0x20] sm:$0xff]  }
  0x19   : > { %v1145_v42 = vsel %vm569_vm2, %v1142_v30, %v1144_v33  ;;  %v1133_v44 = vrot.slane %v4271_v41, 1  ;;  %v5507_v49 = vsel %vm569_vm2, %v1134_v43, %v1136_v48  ;;  %v1485_v62 = vshll.u32 %v5266_v40, 16  ;;  %4851 = vmatprep.subr.bf16.mxu1 %v5322_v1  ;;  %v5253_v34 = vld [vmem:[%s5432_s23] sm:$0xfc]   ;;  %v5252_v48 = vld [vmem:[%s5432_s23 + $0x30] ss:$0 sps:$4 sm:$0xff]  }
  0x1a   : > { %v1474_v58 = vshrl.u32 %v4317_v55, 16  ;;  %v1477_v59 = vshll.u32 %v4317_v55, 16  ;;  %v1484_v2 = vrot.slane %v1482_v61, 3  ;;  %v1491_v8 = vshrl.u32 %v5268_v47, 16 }
  0x1b   : > { %v5498_v46 = vsel %vm569_vm2, %v1133_v44, %v1134_v43  ;;  %v1487_v3 = vrot.slane %v1485_v62, 4  ;;  %v1494_v9 = vshll.u32 %v5268_v47, 16  ;;  %v1500_v15 = vshrl.u32 %v5457_v20, 16 }
  0x1c   : > { %v1476_v63 = vrot.slane %v1474_v58, 3  ;;  %v1479_v0 = vrot.slane %v1477_v59, 4  ;;  %v1493_v11 = vrot.slane %v1491_v8, 3  ;;  %v1503_v16 = vshll.u32 %v5457_v20, 16  ;;  %v5278_v8 = vld [vmem:[%s5432_s23 + $0x7c] sm:$0xfe]  }
  0x1d   : > { %4648 = vmatmul.mubr.msk.bf16.gmra.mrb[4].mxu0 %vm583_vm3, %v574_v14  ;;  %v1488_v6 = vor.u32 %v1487_v3, %v1484_v2  ;;  %v1496_v12 = vrot.slane %v1494_v9, 4  ;;  %v1502_v18 = vrot.slane %v1500_v15, 3  ;;  %v1509_v20 = vshrl.u32 %v5460_v21, 16  ;;  %v5256_v3 = vld [vmem:[%s5432_s23 + $0x18] sm:$0xff]   ;;  %v5279_v9 = vld [vmem:[%s5432_s23 + $0x84] sm:$0xff]  }
  0x1e   : > { %4651 = vmatprep.mubr.msk.bf16.mxu0 %vm5323_vm1, %v5322_v1  ;;  %v1480_v5 = vor.u32 %v1479_v0, %v1476_v63  ;;  %v1505_v19 = vrot.slane %v1503_v16, 4  ;;  %v1518_v32 = vshrl.u32 %v5465_v24, 16  ;;  %v895_v41 = vshrl.u32 %v5253_v34, 16 }
  0x1f   : > { %4750 = vmatmul.mubr.msk.bf16.gmra.mrb[4].mxu1 %vm583_vm3, %v1143_v35  ;;  %v1497_v13 = vor.u32 %v1496_v12, %v1493_v11  ;;  %v1511_v27 = vrot.slane %v1509_v20, 3  ;;  %v4315_v35 = vld [vmem:[%s5432_s23 + $0xf8] sm:$0xf]  ;;  %v5257_v11 = vld [vmem:[%s5432_s23 + $0x20] sm:$0xff]   ;;  %v1948_v12 = vshll.u32 %v5278_v8, 16 }
  0x20   : > { %4753 = vmatprep.mubr.msk.bf16.mxu1 %vm5323_vm1, %v5322_v1  ;;  %v1489_v7 = vsel %vm1472_vm4, %v1480_v5, %v1488_v6  ;;  %v1506_v22 = vor.u32 %v1505_v19, %v1502_v18  ;;  %v4318_v39 = vcombine.low %v5471_v28, %v4315_v35  ;;  %v897_v51 = vrot.slane %v895_v41, 2  ;;  %v5255_v28 = vld [vmem:[%s5432_s23 + $0x10] sm:$0xff]  }
  0x21   : > { %v1498_v14 = vsel %vm1472_vm4, %v1488_v6, %v1497_v13  ;;  %v912_v58 = vshrl.u32 %v5255_v28, 16  ;;  %v915_v61 = vshll.u32 %v5255_v28, 16  ;;  %v921_v6 = vshrl.u32 %v5256_v3, 16 }
  0x22   : > { %v1507_v23 = vsel %vm1472_vm4, %v1497_v13, %v1506_v22  ;;  %v1530_v47 = vshll.u32 %v4318_v39, 16  ;;  %v1953_v13 = vshrl.u32 %v5279_v9, 16 }
  0x23   : > { %v914_v0 = vrot.slane %v912_v58, 2  ;;  %v917_v2 = vrot.slane %v915_v61, 3  ;;  %v923_v15 = vrot.slane %v921_v6, 2 }
  0x24   : > { %v1532_v56 = vrot.slane %v1530_v47, 4 }
  0x25   : > { %4652 = vmatmul.mubr.msk.bf16.gmra.mrb[8].mxu0 %vm583_vm3, %v576_v17  ;;  %v5249_v17 = vld [vmem:[%s5432_s23 + $0x18] sm:$0xff]   ;;  %v918_v5 = vor.u32 %v917_v2, %v914_v0 }
  0x26   : > { %4655 = vmatprep.mubr.msk.bf16.mxu0 %vm5323_vm1, %v5322_v1 }
  0x27   : > { %4754 = vmatmul.mubr.msk.bf16.gmra.mrb[8].mxu1 %vm583_vm3, %v1145_v42  ;;  %v898_v42 = vshll.u32 %v5253_v34, 16 }
  0x28   : > { %4757 = vmatprep.mubr.msk.bf16.mxu1 %vm5323_vm1, %v5322_v1 }
  0x2d   : > { %4656 = vmatmul.mubr.msk.bf16.gmra.mrb[12].mxu0 %vm583_vm3, %v578_v25  ;;  %v1512_v25 = vshll.u32 %v5460_v21, 16  ;;  %v1521_v21 = vshll.u32 %v5465_v24, 16 }
  0x2e   : > { %4659 = vmatprep.mubr.msk.bf16.mxu0 %vm5323_vm1, %v5322_v1 }
  0x2f   : > { %4758 = vmatmul.mubr.msk.bf16.gmra.mrb[12].mxu1 %vm583_vm3, %v1144_v33  ;;  %v1514_v29 = vrot.slane %v1512_v25, 4  ;;  %v5251_v33 = vld [vmem:[%s5432_s23 + $0x28] sm:$0xff]   ;;  %v1523_v38 = vrot.slane %v1521_v21, 4  ;;  %v930_v25 = vshrl.u32 %v5257_v11, 16 }
  0x30   : > { %4793 = vmatprep.mubr.msk.bf16.mxu1 %vm5323_vm1, %v5322_v1 }
  0x31   : > { %v1515_v30 = vor.u32 %v1514_v29, %v1511_v27 }
  0x33   : > { %v1516_v31 = vsel %vm1472_vm4, %v1506_v22, %v1515_v30  ;;  %v1950_v22 = vrot.slane %v1948_v12, 2 }
  0x35   : > { %4660 = vmatmul.mubr.msk.bf16.gmra.mrb[16].mxu0 %vm583_vm3, %v580_v36  ;;  %v5254_v36 = vld [vmem:[%s5432_s23 + $0x8] sm:$0xff]  }
  0x36   : > { %4663 = vmatprep.mubr.msk.bf16.mxu0 %vm5323_vm1, %v5322_v1  ;;  %v903_v24 = vshrl.u32 %v5254_v36, 16  ;;  %v906_v43 = vshll.u32 %v5254_v36, 16 }
  0x37   : > { %4794 = vmatmul.mubr.msk.bf16.vlgmr.msra.gmra.mrb[16].mxu1 %vm583_vm3, %v1489_v7  ;;  %v924_v7 = vshll.u32 %v5256_v3, 16 }
  0x38   : > { %4797 = vmatprep.mubr.msk.bf16.mxu1 %vm5323_vm1, %v5322_v1  ;;  %v905_v53 = vrot.slane %v903_v24, 2 }
  0x39   : > { %v926_v16 = vrot.slane %v924_v7, 3 }
  0x3b   : > { %v927_v29 = vor.u32 %v926_v16, %v923_v15  ;;  %v5289_v16 = vld [vmem:[%s5432_s23 + $0xac] sm:$0x3f]  }
  0x3d   : > { %4664 = vmatmul.mubr.msk.bf16.gmra.mrb[20].mxu0 %vm583_vm3, %v582_v45  ;;  %v1527_v45 = vshrl.u32 %v4318_v39, 16  ;;  %v928_v36 = vsel %vm893_vm5, %v918_v5, %v927_v29 }
  0x3e   : > { %4667 = vmatprep.mubr.msk.bf16.mxu0 %vm5323_vm1, %v5322_v1 }
  0x3f   : > { %4798 = vmatmul.mubr.msk.bf16.gmra.mrb[20].mxu1 %vm583_vm3, %v1498_v14  ;;  %v1529_v55 = vrot.slane %v1527_v45, 3 }
  0x40   : > { %4801 = vmatprep.mubr.msk.bf16.mxu1 %vm5323_vm1, %v5322_v1 }
  0x41   : > { %v1533_v57 = vor.u32 %v1532_v56, %v1529_v55 }
  0x45   : > { %4668 = vmatmul.mubr.msk.bf16.gmra.mrb[24].mxu0 %vm583_vm3, %v581_v37  ;;  %v1520_v37 = vrot.slane %v1518_v32, 3 }
  0x46   : > { %4673 = vmatprep.mubr.msk.bf16.mxu0 %vm5323_vm1, %v5322_v1 }
  0x47   : > { %4802 = vmatmul.mubr.msk.bf16.gmra.mrb[24].mxu1 %vm583_vm3, %v1507_v23  ;;  %v1524_v40 = vor.u32 %v1523_v38, %v1520_v37  ;;  %v1955_v23 = vrot.slane %v1953_v13, 1  ;;  %v5260_v37 = vld [vmem:[%s5432_s23 + $0x28] sm:$0xff]  }
  0x48   : > { %4805 = vmatprep.mubr.msk.bf16.mxu1 %vm5323_vm1, %v5322_v1  ;;  %v942_v24 = vshll.u32 %v5260_v37, 16 }
  0x49   : > { %v1525_v44 = vsel %vm1472_vm4, %v1515_v30, %v1524_v40  ;;  %v1534_v62 = vsel %vm1472_vm4, %v1524_v40, %v1533_v57 }
  0x4a   : > { %v944_v28 = vrot.slane %v942_v24, 3  ;;  %v5274_v24 = vld [vmem:[%s5432_s23 + $0x148] sm:$0xff]  }
  0x4d   : > { %4674 = vmatmul.mubr.msk.bf16.vlgmr.msra.gmra.mrb[28].mxu0 %vm583_vm3, %v5246_v52  ;;  %v900_v52 = vrot.slane %v898_v42, 3  ;;  %v939_v42 = vshrl.u32 %v5260_v37, 16  ;;  %v5273_v37 = vld [vmem:[%s5432_s23 + $0x140] sm:$0xff]  }
  0x4e   : > { %4702 = vmatpush3.bf16.msra.mxu0 %v978_v54  ;;  %4677 = vmatprep.mubr.msk.bf16.mxu0 %vm5323_vm1, %v5322_v1  ;;  %v908_v54 = vrot.slane %v906_v43, 3  ;;  %v5283_v43 = vld [vmem:[%s5432_s23 + $0x94] sm:$0xff]  }
  0x4f   : > { %4731 = vmatprep.subr.bf16.mxu0 %v5322_v1  ;;  %4806 = vmatmul.mubr.msk.bf16.gmra.mrb[28].mxu1 %vm583_vm3, %v1516_v31  ;;  %v901_v59 = vor.u32 %v900_v52, %v897_v51  ;;  %v5281_v31 = vld [vmem:[%s5432_s23 + $0x8c] sm:$0xff]   ;;  %v1971_v45 = vshrl.u32 %v5283_v43, 16  ;;  %v1974_v47 = vshll.u32 %v5283_v43, 16  ;;  %v941_v52 = vrot.slane %v939_v42, 2 }
  0x50   : > { %4809 = vmatprep.mubr.msk.bf16.mxu1 %vm5323_vm1, %v5322_v1  ;;  %v1962_v21 = vshrl.u32 %v5281_v31, 16  ;;  %v1965_v35 = vshll.u32 %v5281_v31, 16  ;;  %v5262_v51 = vld [vmem:[%s5432_s23 + $0x30] sm:$0x7f]  }
  0x51   : > { %v948_v56 = vshrl.u32 %v5262_v51, 16  ;;  %v951_v58 = vshll.u32 %v5262_v51, 16 }
  0x52   : > { %v1964_v38 = vrot.slane %v1962_v21, 1  ;;  %v1967_v39 = vrot.slane %v1965_v35, 2 }
  0x53   : > { %v953_v2 = vrot.slane %v951_v58, 3 }
  0x54   : > { %v1968_v41 = vor.u32 %v1967_v39, %v1964_v38  ;;  %v1331_v38 = vrot.slane %v5273_v37, 2 }
  0x55   : > { %4678 = vmatmul.mubr.msk.bf16.gmra.mrb[32].mxu0 %vm583_vm3, %v5247_v60  ;;  %v909_v60 = vor.u32 %v908_v54, %v905_v53  ;;  %v1973_v53 = vrot.slane %v1971_v45, 1  ;;  %v1976_v54 = vrot.slane %v1974_v47, 2 }
  0x56   : > { %4681 = vmatprep.mubr.msk.bf16.mxu0 %vm5323_vm1, %v5322_v1 }
  0x57   : > { %4810 = vmatmul.mubr.msk.bf16.gmra.mrb[32].mxu1 %vm583_vm3, %v1525_v44  ;;  %v910_v63 = vsel %vm893_vm5, %v901_v59, %v909_v60  ;;  %v919_v14 = vsel %vm893_vm5, %v909_v60, %v918_v5  ;;  %v1977_v55 = vor.u32 %v1976_v54, %v1973_v53  ;;  %v5285_v60 = vld [vmem:[%s5432_s23 + $0x9c] sm:$0xff]  }
  0x58   : > { %4813 = vmatprep.mubr.msk.bf16.mxu1 %vm5323_vm1, %v5322_v1  ;;  %v1980_v61 = vshrl.u32 %v5285_v60, 16  ;;  %v1660_v54 = vld [vmem:[%s5432_s23 + $0x20] sm:$0xf] }
  0x59   : > { %v1978_v59 = vsel %vm1943_vm6, %v1968_v41, %v1977_v55 }
  0x5a   : > { %v1982_v3 = vrot.slane %v1980_v61, 1 }
  0x5d   : > { %4682 = vmatmul.mubr.msk.bf16.gmra.mrb[36].mxu0 %vm583_vm3, %v5248_v10  ;;  %v1945_v10 = vshrl.u32 %v5278_v8, 16 }
  0x5e   : > { %4685 = vmatprep.mubr.msk.bf16.mxu0 %vm5323_vm1, %v5322_v1 }
  0x5f   : > { %4814 = vmatmul.mubr.msk.bf16.gmra.mrb[36].mxu1 %vm583_vm3, %v1534_v62  ;;  %v1947_v18 = vrot.slane %v1945_v10, 1  ;;  %v1983_v62 = vshll.u32 %v5285_v60, 16 }
  0x60   : > { %4817 = vmatprep.mubr.msk.bf16.mxu1 %vm5323_vm1, %v5322_v1 }
  0x61   : > { %v1951_v27 = vor.u32 %v1950_v22, %v1947_v18  ;;  %v1985_v5 = vrot.slane %v1983_v62, 2  ;;  %v2001_v18 = vshll.u32 %v5289_v16, 16  ;;  %v5738_v62 = vld [vmem:[%s5432_s23 + $0x28] sm:$0xff]  }
  0x63   : > { %v1986_v6 = vor.u32 %v1985_v5, %v1982_v3  ;;  %v2003_v22 = vrot.slane %v2001_v18, 2  ;;  %v4370_v18 = vld [vmem:[%s6439_s2 + $0x10] sm:$0x3] }
  0x65   : > { %4686 = vmatmul.mubr.msk.bf16.gmra.mrb[40].mxu0 %vm583_vm3, %v5249_v17  ;;  %v4355_v17 = vld [vmem:[%s6439_s2 + $0xe] sm:$0x3]  ;;  %v1987_v8 = vsel %vm1943_vm6, %v1977_v55, %v1986_v6  ;;  %v5726_v55 = vld [vmem:[%s5432_s23 + $0x24] sm:$0xf] }
  0x66   : > { %4689 = vmatprep.mubr.msk.bf16.mxu0 %vm5323_vm1, %v5322_v1  ;;  %v2028_v19 = vsel %vm605_vm0, %v4355_v17, 0  ;;  %v1998_v17 = vshrl.u32 %v5289_v16, 16  ;;  %v4327_v60 = vcombine.low %v1660_v54, %v5726_v55 }
  0x67   : > { %4818 = vmatmul.mubr.msk.bf16.gmra.mrb[40].mxu1 %vm583_vm3, %v1533_v57  ;;  %v945_v57 = vor.u32 %v944_v28, %v941_v52  ;;  %v5275_v52 = vld [vmem:[%s5432_s23 + $0x150] sm:$0x3f]  }
  0x68   : > { %4853 = vmatprep.mubr.msk.bf16.mxu1 %vm5323_vm1, %v5322_v1  ;;  %4852 = vmatpush3.bf16.msra.mxu1 %v2028_v19  ;;  %v2000_v19 = vrot.slane %v1998_v17, 1  ;;  %v1335_v53 = vrot.slane %v5275_v52, 2 }
  0x69   : > { %4911 = vmatprep.subr.bf16.mxu1 %v5322_v1 }
  0x6d   : > { %4690 = vmatmul.mubr.msk.bf16.gmra.mrb[44].mxu0 %vm583_vm3, %v5250_v26  ;;  %v933_v26 = vshll.u32 %v5257_v11, 16 }
  0x6e   : > { %4693 = vmatprep.mubr.msk.bf16.mxu0 %vm5323_vm1, %v5322_v1 }
  0x6f   : > { %v935_v34 = vrot.slane %v933_v26, 3 }
  0x75   : > { %4694 = vmatmul.mubr.msk.bf16.gmra.mrb[48].mxu0 %vm583_vm3, %v5251_v33  ;;  %v932_v33 = vrot.slane %v930_v25, 2  ;;  %v4299_v25 = vld [vmem:[%s6439_s2 + $0x8] sm:$0x3] }
  0x76   : > { %4697 = vmatprep.mubr.msk.bf16.mxu0 %vm5323_vm1, %v5322_v1  ;;  %v1359_v26 = vsel %vm605_vm0, %v4299_v25, 0 }
  0x77   : > { %v936_v40 = vor.u32 %v935_v34, %v932_v33  ;;  %v5272_v34 = vld [vmem:[%s5432_s23 + $0x138] sm:$0xff]  }
  0x78   : > { %v1329_v35 = vrot.slane %v5272_v34, 2 }
  0x79   : > { %v946_v0 = vsel %vm893_vm5, %v936_v40, %v945_v57 }
  0x7a   : > { %v1332_v42 = vsel %vm1323_vm7, %v1329_v35, %v1331_v38 }
  0x7d   : > { %4698 = vmatmul.mubr.msk.bf16.gmra.mrb[52].mxu0 %vm583_vm3, %v5252_v48  ;;  %v937_v48 = vsel %vm893_vm5, %v927_v29, %v936_v40 }
  0x7e   : > { %4703 = vmatprep.mubr.msk.bf16.mxu0 %vm5323_vm1, %v5322_v1 }
  0x85   : > { %4704 = vmatmul.mubr.msk.bf16.vlgmr.msra.gmra.mrb[56].mxu0 %vm583_vm3, %v910_v63  ;;  %v950_v63 = vrot.slane %v948_v56, 2 }
  0x86   : > { %4732 = vmatpush3.bf16.msra.mxu0 %v5425_v4  ;;  %4707 = vmatprep.mubr.msk.bf16.mxu0 %vm5323_vm1, %v5322_v1  ;;  %v1956_v4 = vshll.u32 %v5279_v9, 16  ;;  %v5287_v9 = vld [vmem:[%s5432_s23 + $0xa4] sm:$0xff]  }
  0x87   : > { %4761 = vmatprep.subr.bf16.mxu0 %v5322_v1  ;;  %v954_v7 = vor.u32 %v953_v2, %v950_v63  ;;  %v1989_v10 = vshrl.u32 %v5287_v9, 16  ;;  %v1992_v11 = vshll.u32 %v5287_v9, 16  ;;  %v1715_v63 = vshll.u32 %v4327_v60, 16 }
  0x88   : > { %v1958_v20 = vrot.slane %v1956_v4, 2  ;;  %v1713_v9 = vshrl.u32 %v4327_v60, 16 }
  0x89   : > { %v955_v12 = vsel %vm893_vm5, %v945_v57, %v954_v7  ;;  %v1991_v13 = vrot.slane %v1989_v10, 1  ;;  %v1994_v4 = vrot.slane %v1992_v11, 2  ;;  %v1717_v10 = vrot.slane %v1715_v63, 1 }
  0x8a   : > { %v1959_v30 = vor.u32 %v1958_v20, %v1955_v23  ;;  %v2004_v23 = vor.u32 %v2003_v22, %v2000_v19  ;;  %v1720_v11 = vshll.u32 %v5738_v62, 16 }
  0x8c   : > { %v1960_v32 = vsel %vm1943_vm6, %v1951_v27, %v1959_v30  ;;  %v1969_v44 = vsel %vm1943_vm6, %v1959_v30, %v1968_v41  ;;  %v5269_v27 = vld [vmem:[%s5432_s23 + $0x120] sm:$0xfc]  }
  0x8d   : > { %4708 = vmatmul.mubr.msk.bf16.gmra.mrb[60].mxu0 %vm583_vm3, %v919_v14  ;;  %4854 = vmatmul.mubr.msk.bf16.vlgmr.msra.gmra.mrb[44].mxu1 %vm583_vm3, %v1960_v32  ;;  %v1995_v14 = vor.u32 %v1994_v4, %v1991_v13  ;;  %v1324_v29 = vrot.slane %v5269_v27, 2  ;;  %v5271_v32 = vld [vmem:[%s5432_s23 + $0x130] sm:$0xff]   ;;  %v1718_v13 = vor.u32 %v1717_v10, %v1713_v9  ;;  %v1722_v4 = vrot.slane %v1720_v11, 1 }
  0x8e   : > { %4711 = vmatprep.mubr.msk.bf16.mxu0 %vm5323_vm1, %v5322_v1  ;;  %4857 = vmatprep.mubr.msk.bf16.mxu1 %vm5323_vm1, %v5322_v1 }
  0x8f   : > { %v1996_v15 = vsel %vm1943_vm6, %v1986_v6, %v1995_v14  ;;  %v2005_v20 = vsel %vm1943_vm6, %v1995_v14, %v2004_v23  ;;  %v5753_v14 = vld [vmem:[%s5432_s23 + $0x30] sm:$0xff]   ;;  %v1723_v25 = vsel %vm1711_vm8, %v1718_v13, %v1722_v4 }
  0x90   : > { %v1728_v27 = vshll.u32 %v5753_v14, 16 }
  0x95   : > { %4712 = vmatmul.mubr.msk.bf16.gmra.mrb[64].mxu0 %vm583_vm3, %v928_v36  ;;  %4858 = vmatmul.mubr.msk.bf16.gmra.mrb[48].mxu1 %vm583_vm3, %v1969_v44  ;;  %v1333_v44 = vrot.slane %v5274_v24, 2 }
  0x96   : > { %4715 = vmatprep.mubr.msk.bf16.mxu0 %vm5323_vm1, %v5322_v1  ;;  %4861 = vmatprep.mubr.msk.bf16.mxu1 %vm5323_vm1, %v5322_v1 }
  0x97   : > { %v1334_v51 = vsel %vm1323_vm7, %v1331_v38, %v1333_v44  ;;  %v1732_v38 = vshrl.u32 %v5753_v14, 16 }
  0x9d   : > { %4716 = vmatmul.mubr.msk.bf16.gmra.mrb[68].mxu0 %vm583_vm3, %v937_v48  ;;  %4862 = vmatmul.mubr.msk.bf16.gmra.mrb[52].mxu1 %vm583_vm3, %v1978_v59  ;;  %v1336_v59 = vsel %vm1323_vm7, %v1333_v44, %v1335_v53  ;;  %v5792_v44 = vld [vmem:[%s5432_s23 + $0x40] sm:$0xff]  }
  0x9e   : > { %4719 = vmatprep.mubr.msk.bf16.mxu0 %vm5323_vm1, %v5322_v1  ;;  %4865 = vmatprep.mubr.msk.bf16.mxu1 %vm5323_vm1, %v5322_v1 }
  0xa5   : > { %4720 = vmatmul.mubr.msk.bf16.gmra.mrb[72].mxu0 %vm583_vm3, %v946_v0  ;;  %4866 = vmatmul.mubr.msk.bf16.gmra.mrb[56].mxu1 %vm583_vm3, %v1987_v8 }
  0xa6   : > { %4723 = vmatprep.mubr.msk.bf16.mxu0 %vm5323_vm1, %v5322_v1  ;;  %4869 = vmatprep.mubr.msk.bf16.mxu1 %vm5323_vm1, %v5322_v1 }
  0xad   : > { %4724 = vmatmul.mubr.msk.bf16.gmra.mrb[76].mxu0 %vm583_vm3, %v955_v12  ;;  %4870 = vmatmul.mubr.msk.bf16.gmra.mrb[60].mxu1 %vm583_vm3, %v1996_v15 }
  0xae   : > { %4727 = vmatprep.mubr.msk.bf16.mxu0 %vm5323_vm1, %v5322_v1  ;;  %4873 = vmatprep.mubr.msk.bf16.mxu1 %vm5323_vm1, %v5322_v1 }
  0xb5   : > { %4728 = vmatmul.mubr.msk.bf16.gmra.mrb[80].mxu0 %vm583_vm3, %v954_v7  ;;  %4874 = vmatmul.mubr.msk.bf16.gmra.mrb[64].mxu1 %vm583_vm3, %v2005_v20 }
  0xb6   : > { %4733 = vmatprep.mubr.msk.bf16.mxu0 %vm5323_vm1, %v5322_v1  ;;  %4877 = vmatprep.mubr.msk.bf16.mxu1 %vm5323_vm1, %v5322_v1 }
  0xbd   : > { %4734 = vmatmul.mubr.msk.bf16.vlgmr.msra.gmra.mrb[84].mxu0 %vm583_vm3, %v5498_v46  ;;  %4878 = vmatmul.mubr.msk.bf16.gmra.mrb[68].mxu1 %vm583_vm3, %v2004_v23  ;;  %v5270_v46 = vld [vmem:[%s5432_s23 + $0x128] sm:$0xff]  }
  0xbe   : > { %4762 = vmatpush3.bf16.msra.mxu0 %v1359_v26  ;;  %4737 = vmatprep.mubr.msk.bf16.mxu0 %vm5323_vm1, %v5322_v1  ;;  %v1325_v30 = vrot.slane %v5270_v46, 2  ;;  %v1724_v26 = vshrl.u32 %v5738_v62, 16 }
  0xbf   : > { %4821 = vmatprep.subr.bf16.mxu0 %v5322_v1  ;;  %4913 = vmatprep.mubr.msk.bf16.mxu1 %vm5323_vm1, %v5322_v1 }
  0xc0   : > { %v1326_v31 = vsel %vm1323_vm7, %v1324_v29, %v1325_v30  ;;  %v2177_v29 = vsel %vm605_vm0, %v4370_v18, 0 }
  0xc5   : > { %4738 = vmatmul.mubr.msk.bf16.gmra.mrb[88].mxu0 %vm583_vm3, %v5507_v49  ;;  %v4326_v49 = vld [vmem:[%s6439_s2 + $0xc] sm:$0x3] }
  0xc6   : > { %4741 = vmatprep.mubr.msk.bf16.mxu0 %vm5323_vm1, %v5322_v1  ;;  %v1789_v21 = vsel %vm605_vm0, %v4326_v49, 0  ;;  %v1730_v49 = vrot.slane %v1728_v27, 1 }
  0xc8   : > { %v1734_v24 = vor.u32 %v1732_v38, %v1730_v49 }
  0xcd   : > { %4742 = vmatmul.mubr.msk.bf16.gmra.mrb[92].mxu0 %vm583_vm3, %v5516_v50  ;;  %v1327_v50 = vrot.slane %v5271_v32, 2 }
  0xce   : > { %4763 = vmatprep.mubr.msk.bf16.mxu0 %vm5323_vm1, %v5322_v1 }
  0xcf   : > { %v1328_v33 = vsel %vm1323_vm7, %v1325_v30, %v1327_v50  ;;  %v1330_v36 = vsel %vm1323_vm7, %v1327_v50, %v1329_v35  ;;  %v1726_v30 = vor.u32 %v1724_v26, %v1722_v4  ;;  %v1748_v4 = vshrl.u32 %v5792_v44, 16 }
  0xd1   : > { %v1731_v37 = vsel %vm1711_vm8, %v1726_v30, %v1730_v49 }
  0xd5   : > { %4764 = vmatmul.mubr.msk.bf16.vlgmr.msra.gmra.mrb[96].mxu0 %vm583_vm3, %v1326_v31  ;;  %v5774_v31 = vld [vmem:[%s5432_s23 + $0x38] sm:$0xff]  }
  0xd6   : > { %4822 = vmatpush3.bf16.msra.mxu0 %v1789_v21  ;;  %4767 = vmatprep.mubr.msk.bf16.mxu0 %vm5323_vm1, %v5322_v1  ;;  %v1740_v60 = vshrl.u32 %v5774_v31, 16 }
  0xd7   : > { %4881 = vmatprep.subr.bf16.mxu0 %v5322_v1 }
  0xdd   : > { %4768 = vmatmul.mubr.msk.bf16.gmra.mrb[100].mxu0 %vm583_vm3, %v1328_v33 }
  0xde   : > { %4771 = vmatprep.mubr.msk.bf16.mxu0 %vm5323_vm1, %v5322_v1 }
  0xe5   : > { %4772 = vmatmul.mubr.msk.bf16.gmra.mrb[104].mxu0 %vm583_vm3, %v1330_v36 }
  0xe6   : > { %4775 = vmatprep.mubr.msk.bf16.mxu0 %vm5323_vm1, %v5322_v1 }
  0xe8   : > { %v5706_v39 = vpop.f32.mrb[0].mxu0 }
  0xe9   : > { %v4645_v40 = vpop.f32.mrb[1].mxu0 }
  0xea   : > { %v5708_v41 = vpop.f32.mrb[2].mxu0  ;;  %v5740_v0 = vpop.f32.mrb[0].mxu1  ;;  %v1736_v40 = vshll.u32 %v5774_v31, 16 }
  0xeb   : > { %v4646_v43 = vpop.f32.mrb[3].mxu0  ;;  %v4747_v2 = vpop.f32.mrb[1].mxu1 }
  0xec   : > { %v5744_v5 = vpop.f32.mrb[2].mxu1  ;;  %v1738_v43 = vrot.slane %v1736_v40, 1 }
  0xed   : > { %4776 = vmatmul.mubr.msk.bf16.gmra.mrb[108].mxu0 %vm583_vm3, %v1332_v42  ;;  %v4748_v7 = vpop.f32.mrb[3].mxu1 }
  0xee   : > { %4779 = vmatprep.mubr.msk.bf16.mxu0 %vm5323_vm1, %v5322_v1  ;;  %v1742_v2 = vor.u32 %v1740_v60, %v1738_v43  ;;  %v5805_v7 = vld [vmem:[%s5432_s23 + $0x48] sm:$0xff]  }
  0xf0   : > { %v5715_v45 = vpop.f32.mrb[4].mxu0 }
  0xf1   : > { %v4649_v47 = vpop.f32.mrb[5].mxu0 }
  0xf2   : > { %v5717_v48 = vpop.f32.mrb[6].mxu0  ;;  %v5755_v15 = vpop.f32.mrb[4].mxu1 }
  0xf3   : > { %v4650_v28 = vpop.f32.mrb[7].mxu0  ;;  %v4751_v16 = vpop.f32.mrb[5].mxu1 }
  0xf4   : > { %v5762_v19 = vpop.f32.mrb[6].mxu1  ;;  %v1752_v16 = vshll.u32 %v5805_v7, 16 }
  0xf5   : > { %4780 = vmatmul.mubr.msk.bf16.gmra.mrb[112].mxu0 %vm583_vm3, %v1334_v51  ;;  %v4752_v23 = vpop.f32.mrb[7].mxu1 }
  0xf6   : > { %4783 = vmatprep.mubr.msk.bf16.mxu0 %vm5323_vm1, %v5322_v1  ;;  %v5817_v23 = vld [vmem:[%s5432_s23 + $0x50] sm:$0xf]  ;;  %v1754_v26 = vrot.slane %v1752_v16, 1 }
  0xf8   : > { %v5728_v56 = vpop.f32.mrb[8].mxu0 }
  0xf9   : > { %v4653_v57 = vpop.f32.mrb[9].mxu0 }
  0xfa   : > { %v5730_v58 = vpop.f32.mrb[10].mxu0  ;;  %v5776_v32 = vpop.f32.mrb[8].mxu1 }
  0xfb   : > { %v4654_v61 = vpop.f32.mrb[11].mxu0  ;;  %v4755_v21 = vpop.f32.mrb[9].mxu1 }
  0xfc   : > { %v5781_v33 = vpop.f32.mrb[10].mxu1  ;;  %v1744_v61 = vshll.u32 %v5792_v44, 16  ;;  %v1756_v21 = vshrl.u32 %v5805_v7, 16 }
  0xfd   : > { %4784 = vmatmul.mubr.msk.bf16.gmra.mrb[116].mxu0 %vm583_vm3, %v1336_v59  ;;  %v4756_v35 = vpop.f32.mrb[11].mxu1  ;;  %v1739_v59 = vsel %vm1711_vm8, %v1734_v24, %v1738_v43 }
  0xfe   : > { %4787 = vmatprep.mubr.msk.bf16.mxu0 %vm5323_vm1, %v5322_v1 }
 0x100   : > { %v5742_v3 = vpop.f32.mrb[12].mxu0 }
 0x101   : > { %v4657_v6 = vpop.f32.mrb[13].mxu0 }
 0x102   : > { %v5746_v8 = vpop.f32.mrb[14].mxu0  ;;  %v5794_v47 = vpop.f32.mrb[12].mxu1  ;;  %v1746_v6 = vrot.slane %v1744_v61, 1 }
 0x103   : > { %v4658_v12 = vpop.f32.mrb[15].mxu0  ;;  %v4759_v51 = vpop.f32.mrb[13].mxu1 }
 0x104   : > { %v1255_v28 = vpop.f32.mrb[14].mxu1  ;;  %v1747_v13 = vsel %vm1711_vm8, %v1742_v2, %v1746_v6 }
 0x105   : > { %4788 = vmatmul.mubr.msk.bf16.gmra.mrb[120].mxu0 %vm583_vm3, %v1335_v53  ;;  %v4760_v54 = vpop.f32.mrb[15].mxu1 }
 0x106   : > { %4823 = vmatprep.mubr.msk.bf16.mxu0 %vm5323_vm1, %v5322_v1 }
 0x108   : > { %v5757_v17 = vpop.f32.mrb[16].mxu0 }
 0x109   : > { %v4661_v22 = vpop.f32.mrb[17].mxu0 }
 0x10a   : > { %v5764_v20 = vpop.f32.mrb[18].mxu0  ;;  %v5832_v38 = vpop.f32.mrb[16].mxu1 }
 0x10b   : > { %v4662_v46 = vpop.f32.mrb[19].mxu0  ;;  %v4795_v40 = vpop.f32.mrb[17].mxu1 }
 0x10d   : > { %4824 = vmatmul.mubr.msk.bf16.vlgmr.msra.gmra.mrb[124].mxu0 %vm583_vm3, %v1723_v25  ;;  %v1673_v25 = vld [vmem:[%s5432_s23 + $0x54] sm:$0x1] }
 0x10e   : > { %4882 = vmatpush3.bf16.msra.mxu0 %v2177_v29  ;;  %4827 = vmatprep.mubr.msk.bf16.mxu0 %vm5323_vm1, %v5322_v1  ;;  %v4333_v27 = vcombine.low %v5817_v23, %v1673_v25 }
 0x10f   : > { %4941 = vmatprep.subr.bf16.mxu0 %v5322_v1 }
 0x110   : > { %v5779_v50 = vpop.f32.mrb[20].mxu0 }
 0x111   : > { %v4665_v34 = vpop.f32.mrb[21].mxu0 }
 0x112   : > { %v5783_v36 = vpop.f32.mrb[22].mxu0  ;;  %v1760_v34 = vshll.u32 %v4333_v27, 16 }
 0x113   : > { %v4666_v42 = vpop.f32.mrb[23].mxu0 }
 0x114   : > { %v5835_v42 = vpop.f32.mrb[18].mxu1  ;;  %v1762_v24 = vrot.slane %v1760_v34, 1 }
 0x115   : > { %4828 = vmatmul.mubr.msk.bf16.gmra.mrb[128].mxu0 %vm583_vm3, %v1731_v37  ;;  %v4796_v43 = vpop.f32.mrb[19].mxu1 }
 0x116   : > { %4831 = vmatprep.mubr.msk.bf16.mxu0 %vm5323_vm1, %v5322_v1  ;;  %v5846_v60 = vpop.f32.mrb[20].mxu1 }
 0x117   : > { %v4799_v61 = vpop.f32.mrb[21].mxu1 }
 0x118   : > { %v5796_v52 = vpop.f32.mrb[24].mxu0  ;;  %v5849_v2 = vpop.f32.mrb[22].mxu1 }
 0x119   : > { %v4669_v53 = vpop.f32.mrb[25].mxu0 }
 0x11a   : > { %v694_v57 = vpop.f32.mrb[26].mxu0 }
 0x11b   : > { %v4670_v63 = vpop.f32.mrb[27].mxu0 }
 0x11c   : > { %v1764_v63 = vshrl.u32 %v4333_v27, 16  ;;  %v2143_v27 = vrot.slane %v5738_v62, 3 }
 0x11d   : > { %4832 = vmatmul.mubr.msk.bf16.gmra.mrb[132].mxu0 %vm583_vm3, %v1739_v59 }
 0x11e   : > { %4835 = vmatprep.mubr.msk.bf16.mxu0 %vm5323_vm1, %v5322_v1 }
 0x120   : > { %v788_v9 = vpop.f32.mrb[28].mxu0 }
 0x121   : > { %v5808_v10 = vadd.f32 %v788_v9, %v5706_v39  ;;  %v4675_v11 = vpop.f32.mrb[29].mxu0  ;;  %v1750_v39 = vor.u32 %v1748_v4, %v1746_v6  ;;  %v2131_v6 = vld [vmem:[%s5432_s23 + $0x20] sm:$0x8] }
 0x122   : > { %v791_v12 = vpop.f32.mrb[30].mxu0  ;;  %v4371_v4 = vcombine.low %v2131_v6, %v5726_v55 }
 0x123   : > { %v5814_v18 = vadd.f32 %v791_v12, %v5708_v41  ;;  %v4676_v22 = vpop.f32.mrb[31].mxu0  ;;  %v1755_v49 = vsel %vm1711_vm8, %v1750_v39, %v1754_v26  ;;  %v1766_v12 = vor.u32 %v1764_v63, %v1762_v24 }
 0x125   : > { %4836 = vmatmul.mubr.msk.bf16.gmra.mrb[136].mxu0 %vm583_vm3, %v1747_v13 }
 0x126   : > { %4839 = vmatprep.mubr.msk.bf16.mxu0 %vm5323_vm1, %v5322_v1 }
 0x128   : > { %v796_v46 = vpop.f32.mrb[32].mxu0 }
 0x129   : > { %v5825_v29 = vadd.f32 %v796_v46, %v5715_v45  ;;  %v4679_v30 = vpop.f32.mrb[33].mxu0  ;;  %v1758_v45 = vor.u32 %v1756_v21, %v1754_v26 }
 0x12a   : > { %v799_v41 = vpop.f32.mrb[34].mxu0 }
 0x12b   : > { %v5830_v35 = vadd.f32 %v799_v41, %v5717_v48  ;;  %v4680_v37 = vpop.f32.mrb[35].mxu0  ;;  %v1763_v54 = vsel %vm1711_vm8, %v1758_v45, %v1762_v24 }
 0x12d   : > { %4840 = vmatmul.mubr.msk.bf16.gmra.mrb[140].mxu0 %vm583_vm3, %v1755_v49 }
 0x12e   : > { %4843 = vmatprep.mubr.msk.bf16.mxu0 %vm5323_vm1, %v5322_v1 }
 0x130   : > { %v804_v51 = vpop.f32.mrb[36].mxu0 }
 0x131   : > { %v5840_v28 = vadd.f32 %v804_v51, %v5728_v56  ;;  %v4683_v48 = vpop.f32.mrb[37].mxu0  ;;  %v4800_v56 = vpop.f32.mrb[23].mxu1 }
 0x132   : > { %v807_v53 = vpop.f32.mrb[38].mxu0  ;;  %v5861_v25 = vpop.f32.mrb[24].mxu1 }
 0x133   : > { %v5844_v57 = vadd.f32 %v807_v53, %v5730_v58  ;;  %v4684_v59 = vpop.f32.mrb[39].mxu0  ;;  %v4803_v39 = vpop.f32.mrb[25].mxu1 }
 0x134   : > { %v5864_v26 = vpop.f32.mrb[26].mxu1 }
 0x135   : > { %4844 = vmatmul.mubr.msk.bf16.gmra.mrb[144].mxu0 %vm583_vm3, %v1763_v54  ;;  %v4804_v46 = vpop.f32.mrb[27].mxu1 }
 0x136   : > { %4847 = vmatprep.mubr.msk.bf16.mxu0 %vm5323_vm1, %v5322_v1  ;;  %v5876_v37 = vpop.f32.mrb[28].mxu1 }
 0x137   : > { %v4807_v40 = vpop.f32.mrb[29].mxu1 }
 0x138   : > { %v812_v9 = vpop.f32.mrb[40].mxu0  ;;  %v5879_v62 = vpop.f32.mrb[30].mxu1 }
 0x139   : > { %v5855_v11 = vadd.f32 %v812_v9, %v5742_v3  ;;  %v4687_v58 = vpop.f32.mrb[41].mxu0  ;;  %v2142_v3 = vrot.slane %v4371_v4, 3  ;;  %v4808_v45 = vpop.f32.mrb[31].mxu1 }
 0x13a   : > { %v815_v13 = vpop.f32.mrb[42].mxu0  ;;  %v5891_v59 = vpop.f32.mrb[32].mxu1 }
 0x13b   : > { %v5859_v16 = vadd.f32 %v815_v13, %v5746_v8  ;;  %v4688_v22 = vpop.f32.mrb[43].mxu0  ;;  %v2144_v49 = vsel %vm2141_vm9, %v2142_v3, %v2143_v27  ;;  %v4811_v61 = vpop.f32.mrb[33].mxu1 }
 0x13c   : > { %v5894_v63 = vpop.f32.mrb[34].mxu1 }
 0x13d   : > { %4848 = vmatmul.mubr.msk.bf16.gmra.mrb[148].mxu0 %vm583_vm3, %v1766_v12 }
 0x13e   : > { %4883 = vmatprep.mubr.msk.bf16.mxu0 %vm5323_vm1, %v5322_v1 }
 0x140   : > { %v820_v55 = vpop.f32.mrb[44].mxu0 }
 0x141   : > { %v5870_v8 = vadd.f32 %v820_v55, %v5757_v17  ;;  %v4691_v30 = vpop.f32.mrb[45].mxu0  ;;  %v2145_v17 = vrot.slane %v5753_v14, 3  ;;  %v2147_v14 = vrot.slane %v5774_v31, 3  ;;  %v2149_v31 = vrot.slane %v5792_v44, 3 }
 0x142   : > { %v823_v41 = vpop.f32.mrb[46].mxu0 }
 0x143   : > { %v5874_v21 = vadd.f32 %v823_v41, %v5764_v20  ;;  %v4692_v34 = vpop.f32.mrb[47].mxu0  ;;  %v2146_v48 = vsel %vm2141_vm9, %v2143_v27, %v2145_v17  ;;  %v2148_v58 = vsel %vm2141_vm9, %v2145_v17, %v2147_v14  ;;  %v2150_v55 = vsel %vm2141_vm9, %v2147_v14, %v2149_v31  ;;  %v2132_v17 = vld [vmem:[%s5432_s23 + $0x54] sm:$0x7]  ;;  %s501_s23 = scalar_lea.vmem %s6451_s14, %s6455_s30 }
 0x145   : > { %4884 = vmatmul.mubr.msk.bf16.vlgmr.msra.gmra.mrb[152].mxu0 %vm583_vm3, %v2144_v49 }
 0x146   : > { %4887 = vmatprep.mubr.msk.bf16.mxu0 %vm5323_vm1, %v5322_v1 }
 0x148   : > { %v828_v24 = vpop.f32.mrb[48].mxu0 }
 0x149   : > { %v5885_v43 = vadd.f32 %v828_v24, %v5779_v50  ;;  %v4695_v20 = vpop.f32.mrb[49].mxu0  ;;  %v4812_v50 = vpop.f32.mrb[35].mxu1 }
 0x14a   : > { %v831_v51 = vpop.f32.mrb[50].mxu0  ;;  %v5903_v13 = vpop.f32.mrb[36].mxu1 }
 0x14b   : > { %v5889_v53 = vadd.f32 %v831_v51, %v5783_v36  ;;  %v4696_v54 = vpop.f32.mrb[51].mxu0  ;;  %v4815_v4 = vpop.f32.mrb[37].mxu1 }
 0x14c   : > { %v5906_v22 = vpop.f32.mrb[38].mxu1 }
 0x14d   : > { %4888 = vmatmul.mubr.msk.bf16.gmra.mrb[156].mxu0 %vm583_vm3, %v2146_v48  ;;  %v4372_v48 = vcombine.low %v5817_v23, %v2132_v17 }
 0x14e   : > { %4891 = vmatprep.mubr.msk.bf16.mxu0 %vm5323_vm1, %v5322_v1 }
 0x150   : > { %v836_v56 = vpop.f32.mrb[52].mxu0 }
 0x151   : > { %v5900_v6 = vadd.f32 %v836_v56, %v5796_v52  ;;  %v4699_v36 = vpop.f32.mrb[53].mxu0  ;;  %v4816_v52 = vpop.f32.mrb[39].mxu1 }
 0x152   : > { %v839_v9 = vpop.f32.mrb[54].mxu0  ;;  %v5918_v49 = vpop.f32.mrb[40].mxu1 }
 0x153   : > { %v4700_v12 = vpop.f32.mrb[55].mxu0  ;;  %v4819_v34 = vpop.f32.mrb[41].mxu1 }
 0x154   : > { %v1644_v44 = vpop.f32.mrb[42].mxu1 }
 0x155   : > { %4892 = vmatmul.mubr.msk.bf16.gmra.mrb[160].mxu0 %vm583_vm3, %v2148_v58  ;;  %v4820_v40 = vpop.f32.mrb[43].mxu1 }
 0x156   : > { %4895 = vmatprep.mubr.msk.bf16.mxu0 %vm5323_vm1, %v5322_v1 }
 0x158   : > { %v1014_v39 = vpop.f32.mrb[56].mxu0 }
 0x159   : > { %v5912_v3 = vadd.f32 %v1014_v39, %v5808_v10  ;;  %v4705_v27 = vpop.f32.mrb[57].mxu0  ;;  %v2151_v10 = vrot.slane %v5805_v7, 3 }
 0x15a   : > { %v1017_v46 = vpop.f32.mrb[58].mxu0 }
 0x15b   : > { %v5916_v30 = vadd.f32 %v1017_v46, %v5814_v18  ;;  %v4706_v41 = vpop.f32.mrb[59].mxu0  ;;  %v2152_v51 = vsel %vm2141_vm9, %v2149_v31, %v2151_v10 }
 0x15d   : > { %4896 = vmatmul.mubr.msk.bf16.gmra.mrb[164].mxu0 %vm583_vm3, %v2150_v55 }
 0x15e   : > { %4899 = vmatprep.mubr.msk.bf16.mxu0 %vm5323_vm1, %v5322_v1 }
 0x160   : > { %v1022_v45 = vpop.f32.mrb[60].mxu0  ;;  %v5933_v14 = vpop.f32.mrb[44].mxu1 }
 0x161   : > { %v5926_v24 = vadd.f32 %v1022_v45, %v5825_v29  ;;  %v4709_v18 = vpop.f32.mrb[61].mxu0  ;;  %v4855_v7 = vpop.f32.mrb[45].mxu1  ;;  %v2153_v29 = vrot.slane %v4372_v48, 3 }
 0x162   : > { %v1025_v20 = vpop.f32.mrb[62].mxu0  ;;  %v5938_v50 = vpop.f32.mrb[46].mxu1 }
 0x163   : > { %v5931_v54 = vadd.f32 %v1025_v20, %v5830_v35  ;;  %v4710_v61 = vpop.f32.mrb[63].mxu0  ;;  %v4856_v56 = vpop.f32.mrb[47].mxu1  ;;  %v2307_v35 = vld [vmem:[%s6441_s4] sm:$0x3]  ;;  %v2154_v12 = vsel %vm2141_vm9, %v2151_v10, %v2153_v29 }
 0x164   : > { %v2337_v4 = vsel %vm605_vm0, %v2307_v35, 0 }
 0x165   : > { %4900 = vmatmul.mubr.msk.bf16.gmra.mrb[168].mxu0 %vm583_vm3, %v2152_v51  ;;  %4912 = vmatpush3.bf16.msra.mxu1 %v2337_v4 }
 0x166   : > { %4903 = vmatprep.mubr.msk.bf16.mxu0 %vm5323_vm1, %v5322_v1 }
 0x168   : > { %v1030_v36 = vpop.f32.mrb[64].mxu0  ;;  %v5951_v39 = vpop.f32.mrb[48].mxu1 }
 0x169   : > { %v5941_v9 = vadd.f32 %v1030_v36, %v5840_v28  ;;  %v4713_v23 = vpop.f32.mrb[65].mxu0  ;;  %v4859_v28 = vpop.f32.mrb[49].mxu1 }
 0x16a   : > { %v1033_v58 = vpop.f32.mrb[66].mxu0  ;;  %v5956_v27 = vpop.f32.mrb[50].mxu1 }
 0x16b   : > { %v5949_v31 = vadd.f32 %v1033_v58, %v5844_v57  ;;  %v4714_v52 = vpop.f32.mrb[67].mxu0  ;;  %v4860_v46 = vpop.f32.mrb[51].mxu1 }
 0x16d   : > { %4904 = vmatmul.mubr.msk.bf16.gmra.mrb[172].mxu0 %vm583_vm3, %v2154_v12 }
 0x16e   : > { %4907 = vmatprep.mubr.msk.bf16.mxu0 %vm5323_vm1, %v5322_v1 }
 0x170   : > { %v1038_v55 = vpop.f32.mrb[68].mxu0  ;;  %v5963_v17 = vpop.f32.mrb[52].mxu1 }
 0x171   : > { %v1074_v41 = vadd.f32 %v1038_v55, %v5855_v11  ;;  %v4717_v34 = vpop.f32.mrb[69].mxu0  ;;  %v4863_v18 = vpop.f32.mrb[53].mxu1 }
 0x172   : > { %v1041_v44 = vpop.f32.mrb[70].mxu0  ;;  %v5969_v20 = vpop.f32.mrb[54].mxu1 }
 0x173   : > { %v1075_v57 = vadd.f32 %v1041_v44, %v5859_v16  ;;  %v5961_v10 = vadd.f32 %v5740_v0, %v1074_v41  ;;  %v4718_v40 = vpop.f32.mrb[71].mxu0  ;;  %v4864_v11 = vpop.f32.mrb[55].mxu1 }
 0x175   : > { %v5966_v45 = vadd.f32 %v5744_v5, %v1075_v57  ;;  %4908 = vmatmul.mubr.msk.bf16.gmra.mrb[176].mxu0 %vm583_vm3, %v2153_v29 }
 0x176   : > { %4943 = vmatprep.mubr.msk.bf16.mxu0 %vm5323_vm1, %v5322_v1 }
 0x178   : > { %v1046_v51 = vpop.f32.mrb[72].mxu0  ;;  %v5978_v56 = vpop.f32.mrb[56].mxu1 }
 0x179   : > { %v1076_v16 = vadd.f32 %v1046_v51, %v5870_v8  ;;  %v4721_v0 = vpop.f32.mrb[73].mxu0  ;;  %v4867_v36 = vpop.f32.mrb[57].mxu1 }
 0x17a   : > { %v1049_v48 = vpop.f32.mrb[74].mxu0  ;;  %v5983_v23 = vpop.f32.mrb[58].mxu1 }
 0x17b   : > { %v1077_v61 = vadd.f32 %v1049_v48, %v5874_v21  ;;  %v5976_v7 = vadd.f32 %v5755_v15, %v1076_v16  ;;  %v4722_v5 = vpop.f32.mrb[75].mxu0  ;;  %v4868_v35 = vpop.f32.mrb[59].mxu1 }
 0x17d   : > { %v5981_v29 = vadd.f32 %v5762_v19, %v1077_v61 }
 0x180   : > { %v1054_v58 = vpop.f32.mrb[76].mxu0  ;;  %v5990_v28 = vpop.f32.mrb[60].mxu1 }
 0x181   : > { %v1078_v8 = vadd.f32 %v1054_v58, %v5885_v43  ;;  %v4725_v12 = vpop.f32.mrb[77].mxu0  ;;  %v4871_v46 = vpop.f32.mrb[61].mxu1 }
 0x182   : > { %v1057_v4 = vpop.f32.mrb[78].mxu0  ;;  %v5995_v55 = vpop.f32.mrb[62].mxu1 }
 0x183   : > { %v1079_v21 = vadd.f32 %v1057_v4, %v5889_v53  ;;  %v5988_v15 = vadd.f32 %v5776_v32, %v1078_v8  ;;  %v4726_v52 = vpop.f32.mrb[79].mxu0  ;;  %v4872_v41 = vpop.f32.mrb[63].mxu1 }
 0x185   : > { %v5993_v19 = vadd.f32 %v5781_v33, %v1079_v21 }
 0x188   : > { %v1062_v34 = vpop.f32.mrb[80].mxu0  ;;  %v6001_v40 = vpop.f32.mrb[64].mxu1 }
 0x189   : > { %v1080_v43 = vadd.f32 %v1062_v34, %v5900_v6  ;;  %v4729_v44 = vpop.f32.mrb[81].mxu0  ;;  %v4875_v18 = vpop.f32.mrb[65].mxu1 }
 0x18a   : > { %v1065_v57 = vpop.f32.mrb[82].mxu0  ;;  %v6003_v11 = vpop.f32.mrb[66].mxu1 }
 0x18b   : > { %v5999_v53 = vadd.f32 %v5794_v47, %v1080_v43  ;;  %v4730_v32 = vpop.f32.mrb[83].mxu0  ;;  %v4876_v33 = vpop.f32.mrb[67].mxu1 }
 0x190   : > { %v1204_v51 = vpop.f32.mrb[84].mxu0  ;;  %v6007_v5 = vpop.f32.mrb[68].mxu1 }
 0x191   : > { %v1258_v16 = vadd.f32 %v1204_v51, %v5912_v3  ;;  %v4735_v0 = vpop.f32.mrb[85].mxu0  ;;  %v4879_v47 = vpop.f32.mrb[69].mxu1 }
 0x192   : > { %v1207_v48 = vpop.f32.mrb[86].mxu0  ;;  %v2115_v36 = vpop.f32.mrb[70].mxu1 }
 0x193   : > { %v1259_v61 = vadd.f32 %v1207_v48, %v5916_v30  ;;  %v4736_v6 = vpop.f32.mrb[87].mxu0  ;;  %v4880_v35 = vpop.f32.mrb[71].mxu1 }
 0x198   : > { %v1212_v58 = vpop.f32.mrb[88].mxu0 }
 0x199   : > { %v1260_v8 = vadd.f32 %v1212_v58, %v5926_v24  ;;  %v4739_v12 = vpop.f32.mrb[89].mxu0 }
 0x19a   : > { %v1215_v4 = vpop.f32.mrb[90].mxu0 }
 0x19b   : > { %v1261_v21 = vadd.f32 %v1215_v4, %v5931_v54  ;;  %v4740_v3 = vpop.f32.mrb[91].mxu0 }
 0x1a0   : > { %v1220_v52 = vpop.f32.mrb[92].mxu0 }
 0x1a1   : > { %v1262_v46 = vadd.f32 %v1220_v52, %v5941_v9  ;;  %v4743_v30 = vpop.f32.mrb[93].mxu0  ;;  %v5292_v9 = vld [vmem:[%s6021_s15 + $0x40] sm:$0xff]  }
 0x1a2   : > { %v1223_v41 = vpop.f32.mrb[94].mxu0  ;;  %4560 = vmatprep.subr.bf16.mxu1 %v5292_v9 }
 0x1a3   : > { %v1263_v34 = vadd.f32 %v1223_v41, %v5949_v31  ;;  %v4744_v43 = vpop.f32.mrb[95].mxu0 }
 0x1a8   : > { %v1395_v44 = vpop.f32.mrb[96].mxu0 }
 0x1a9   : > { %v1449_v24 = vadd.f32 %v1395_v44, %v1258_v16  ;;  %v4765_v54 = vpop.f32.mrb[97].mxu0 }
 0x1aa   : > { %v1398_v57 = vpop.f32.mrb[98].mxu0 }
 0x1ab   : > { %v1450_v32 = vadd.f32 %v1398_v57, %v1259_v61  ;;  %v1647_v31 = vadd.f32 %v5832_v38, %v1449_v24  ;;  %v4766_v18 = vpop.f32.mrb[99].mxu0 }
 0x1ad   : > { %v1648_v33 = vadd.f32 %v5835_v42, %v1450_v32 }
 0x1b0   : > { %v1403_v51 = vpop.f32.mrb[100].mxu0 }
 0x1b1   : > { %v1451_v0 = vadd.f32 %v1403_v51, %v1260_v8  ;;  %v4769_v48 = vpop.f32.mrb[101].mxu0 }
 0x1b2   : > { %v1406_v6 = vpop.f32.mrb[102].mxu0 }
 0x1b3   : > { %v1452_v47 = vadd.f32 %v1406_v6, %v1261_v21  ;;  %v1649_v36 = vadd.f32 %v5846_v60, %v1451_v0  ;;  %v4770_v35 = vpop.f32.mrb[103].mxu0 }
 0x1b5   : > { %v1650_v16 = vadd.f32 %v5849_v2, %v1452_v47 }
 0x1b8   : > { %v1411_v58 = vpop.f32.mrb[104].mxu0 }
 0x1b9   : > { %v1453_v12 = vadd.f32 %v1411_v58, %v1262_v46  ;;  %v4773_v4 = vpop.f32.mrb[105].mxu0 }
 0x1ba   : > { %v1414_v61 = vpop.f32.mrb[106].mxu0 }
 0x1bb   : > { %v1454_v3 = vadd.f32 %v1414_v61, %v1263_v34  ;;  %v1651_v38 = vadd.f32 %v5861_v25, %v1453_v12  ;;  %v4774_v52 = vpop.f32.mrb[107].mxu0 }
 0x1bd   : > { %v1652_v42 = vadd.f32 %v5864_v26, %v1454_v3 }
 0x1c0   : > { %v1419_v30 = vpop.f32.mrb[108].mxu0 }
 0x1c1   : > { %v1455_v8 = vadd.f32 %v1419_v30, %v5961_v10  ;;  %v4777_v41 = vpop.f32.mrb[109].mxu0 }
 0x1c2   : > { %v1422_v21 = vpop.f32.mrb[110].mxu0 }
 0x1c3   : > { %v1456_v60 = vadd.f32 %v1422_v21, %v5966_v45  ;;  %v1653_v43 = vadd.f32 %v5876_v37, %v1455_v8  ;;  %v4778_v2 = vpop.f32.mrb[111].mxu0 }
 0x1c5   : > { %v1654_v46 = vadd.f32 %v5879_v62, %v1456_v60 }
 0x1c8   : > { %v1427_v44 = vpop.f32.mrb[112].mxu0 }
 0x1c9   : > { %v1457_v34 = vadd.f32 %v1427_v44, %v5976_v7  ;;  %v4781_v24 = vpop.f32.mrb[113].mxu0 }
 0x1ca   : > { %v1430_v25 = vpop.f32.mrb[114].mxu0 }
 0x1cb   : > { %v1458_v54 = vadd.f32 %v1430_v25, %v5981_v29  ;;  %v1655_v26 = vadd.f32 %v5891_v59, %v1457_v34  ;;  %v4782_v9 = vpop.f32.mrb[115].mxu0 }
 0x1cd   : > { %v1656_v10 = vadd.f32 %v5894_v63, %v1458_v54 }
 0x1d0   : > { %v1435_v57 = vpop.f32.mrb[116].mxu0 }
 0x1d1   : > { %v1459_v45 = vadd.f32 %v1435_v57, %v5988_v15  ;;  %v4785_v32 = vpop.f32.mrb[117].mxu0 }
 0x1d2   : > { %v1438_v37 = vpop.f32.mrb[118].mxu0 }
 0x1d3   : > { %v1460_v18 = vadd.f32 %v1438_v37, %v5993_v19  ;;  %v1657_v62 = vadd.f32 %v5903_v13, %v1459_v45  ;;  %v4786_v51 = vpop.f32.mrb[119].mxu0 }
 0x1d5   : > { %v1658_v7 = vadd.f32 %v5906_v22, %v1460_v18 }
 0x1d8   : > { %v1443_v0 = vpop.f32.mrb[120].mxu0 }
 0x1d9   : > { %v1461_v29 = vadd.f32 %v1443_v0, %v5999_v53  ;;  %v4789_v48 = vpop.f32.mrb[121].mxu0 }
 0x1da   : > { %v1446_v59 = vpop.f32.mrb[122].mxu0 }
 0x1db   : > { %v1659_v6 = vadd.f32 %v5918_v49, %v1461_v29  ;;  %v4790_v63 = vpop.f32.mrb[123].mxu0 }
 0x1e0   : > { %v1825_v47 = vpop.f32.mrb[124].mxu0 }
 0x1e1   : > { %v1879_v35 = vadd.f32 %v1825_v47, %v1647_v31  ;;  %v4825_v15 = vpop.f32.mrb[125].mxu0 }
 0x1e2   : > { %v1828_v58 = vpop.f32.mrb[126].mxu0  ;;  %v5294_v15 = vld [vmem:[%s6021_s15 + $0x48] sm:$0xff]  }
 0x1e3   : > { %v1880_v12 = vadd.f32 %v1828_v58, %v1648_v33  ;;  %v2118_v19 = vadd.f32 %v5933_v14, %v1879_v35  ;;  %v4826_v4 = vpop.f32.mrb[127].mxu0 }
 0x1e5   : > { %v2119_v13 = vadd.f32 %v5938_v50, %v1880_v12 }
 0x1e8   : > { %v1833_v61 = vpop.f32.mrb[128].mxu0 }
 0x1e9   : > { %v1881_v22 = vadd.f32 %v1833_v61, %v1649_v36  ;;  %v4829_v3 = vpop.f32.mrb[129].mxu0 }
 0x1ea   : > { %v1836_v52 = vpop.f32.mrb[130].mxu0  ;;  %v5296_v3 = vld [vmem:[%s6021_s15 + $0x50] sm:$0xff]  }
 0x1eb   : > { %v1882_v53 = vadd.f32 %v1836_v52, %v1650_v16  ;;  %v2120_v30 = vadd.f32 %v5951_v39, %v1881_v22  ;;  %v4830_v8 = vpop.f32.mrb[131].mxu0 }
 0x1ed   : > { %v2121_v49 = vadd.f32 %v5956_v27, %v1882_v53 }
 0x1f0   : > { %v1841_v41 = vpop.f32.mrb[132].mxu0 }
 0x1f1   : > { %v1883_v31 = vadd.f32 %v1841_v41, %v1651_v38  ;;  %v4833_v21 = vpop.f32.mrb[133].mxu0  ;;  %v5298_v41 = vld [vmem:[%s6021_s15 + $0x58] sm:$0xff]  }
 0x1f2   : > { %v1844_v60 = vpop.f32.mrb[134].mxu0 }
 0x1f3   : > { %v1884_v33 = vadd.f32 %v1844_v60, %v1652_v42  ;;  %v6049_v14 = vadd.f32 %v5963_v17, %v1883_v31  ;;  %v4834_v2 = vpop.f32.mrb[135].mxu0 }
 0x1f5   : > { %v6052_v50 = vadd.f32 %v5969_v20, %v1884_v33  ;;  %v5299_v33 = vld [vmem:[%s6021_s15 + $0x18] sm:$0xff]  }
 0x1f8   : > { %v1849_v36 = vpop.f32.mrb[136].mxu0 }
 0x1f9   : > { %v1885_v44 = vadd.f32 %v1849_v36, %v1653_v43  ;;  %v4837_v16 = vpop.f32.mrb[137].mxu0 }
 0x1fa   : > { %v1852_v34 = vpop.f32.mrb[138].mxu0 }
 0x1fb   : > { %v1886_v39 = vadd.f32 %v1852_v34, %v1654_v46  ;;  %v6055_v24 = vadd.f32 %v5978_v56, %v1885_v44  ;;  %v4838_v27 = vpop.f32.mrb[139].mxu0  ;;  %v5300_v44 = vld [vmem:[%s6021_s15 + $0x60] sm:$0xff]  }
 0x1fc   : > { %v5301_v34 = vld [vmem:[%s6021_s15 + $0x20] sm:$0xff]   ;;  %v5302_v27 = vld [vmem:[%s6021_s15 + $0x68] sm:$0xff]  }
 0x1fd   : > { %v6058_v38 = vadd.f32 %v5983_v23, %v1886_v39 }
 0x200   : > { %v1857_v42 = vpop.f32.mrb[140].mxu0 }
 0x201   : > { %v1887_v25 = vadd.f32 %v1857_v42, %v1655_v26  ;;  %v4841_v17 = vpop.f32.mrb[141].mxu0 }
 0x202   : > { %v1860_v54 = vpop.f32.mrb[142].mxu0 }
 0x203   : > { %v1888_v9 = vadd.f32 %v1860_v54, %v1656_v10  ;;  %v6061_v20 = vadd.f32 %v5990_v28, %v1887_v25  ;;  %v4842_v57 = vpop.f32.mrb[143].mxu0  ;;  %v5303_v54 = vld [vmem:[%s6021_s15 + $0x28] sm:$0xff]  }
 0x205   : > { %v6064_v43 = vadd.f32 %v5995_v55, %v1888_v9 }
 0x208   : > { %v1865_v46 = vpop.f32.mrb[144].mxu0 }
 0x209   : > { %v1889_v45 = vadd.f32 %v1865_v46, %v1657_v62  ;;  %v4845_v56 = vpop.f32.mrb[145].mxu0  ;;  %v5304_v46 = vld [vmem:[%s6021_s15 + $0x70] sm:$0xff]  }
 0x20a   : > { %v1868_v32 = vpop.f32.mrb[146].mxu0  ;;  %v5305_v56 = vld [vmem:[%s6021_s15 + $0x30] sm:$0xff]  }
 0x20b   : > { %v1890_v37 = vadd.f32 %v1868_v32, %v1658_v7  ;;  %v6067_v23 = vadd.f32 %v6001_v40, %v1889_v45  ;;  %v4846_v18 = vpop.f32.mrb[147].mxu0  ;;  %v6078_v40 = vld [vmem:[%s6440_s3] ss:$0 sm:$0xff] }
 0x20d   : > { %v6070_v26 = vadd.f32 %v6003_v11, %v1890_v37  ;;  %v5306_v37 = vld [vmem:[%s6021_s15 + $0x78] sm:$0xff]  }
 0x210   : > { %v1873_v10 = vpop.f32.mrb[148].mxu0 }
 0x211   : > { %v1891_v28 = vadd.f32 %v1873_v10, %v1659_v6  ;;  %v4849_v51 = vpop.f32.mrb[149].mxu0 }
 0x212   : > { %v1876_v0 = vpop.f32.mrb[150].mxu0  ;;  %v5307_v51 = vld [vmem:[%s6021_s15 + $0x38] sm:$0xff]  }
 0x213   : > { %v6073_v55 = vadd.f32 %v6007_v5, %v1891_v28  ;;  %v4850_v62 = vpop.f32.mrb[151].mxu0  ;;  %v5293_v5 = vld [vmem:[%s6021_s15] sm:$0xff]  }
 0x218   : > { %v2213_v29 = vpop.f32.mrb[152].mxu0 }
 0x219   : > { %v2267_v48 = vadd.f32 %v2213_v29, %v2118_v19  ;;  %v4885_v7 = vpop.f32.mrb[153].mxu0 }
 0x21a   : > { %v2216_v11 = vpop.f32.mrb[154].mxu0 }
 0x21b   : > { %v2268_v59 = vadd.f32 %v2216_v11, %v2119_v13  ;;  %v4886_v63 = vpop.f32.mrb[155].mxu0  ;;  %v2287_v6 = vadd.f32 %v6078_v40, %v2267_v48  ;;  %v5295_v13 = vld [vmem:[%s6021_s15 + $0x8] sm:$0xff]  }
 0x21d   : > { %v2288_v47 = vadd.f32 %v6078_v40, %v2268_v59 }
 0x21f   : > { %v2300_v35 = vpack.c.bf16 %v2288_v47, %v2287_v6 }
 0x220   : > { %v2221_v58 = vpop.f32.mrb[156].mxu0 }
 0x221   : > { %v2269_v12 = vadd.f32 %v2221_v58, %v2120_v30  ;;  %v4889_v19 = vpop.f32.mrb[157].mxu0  ;;  %4914 = vmatmul.mubr.msk.bf16.vlgmr.msra.gmra.mrb[72].mxu1 %vm583_vm3, %v2300_v35  ;;  %v5297_v30 = vld [vmem:[%s6021_s15 + $0x10] sm:$0xff]  }
 0x222   : > { %4561 = vmatpush3.bf16.msra.mxu1 %v5293_v5  ;;  %v2224_v4 = vpop.f32.mrb[158].mxu0  ;;  %4917 = vmatprep.mubr.msk.bf16.mxu1 %vm5323_vm1, %v5322_v1 }
 0x223   : > { %v2270_v61 = vadd.f32 %v2224_v4, %v2121_v49  ;;  %v4890_v22 = vpop.f32.mrb[159].mxu0  ;;  %4562 = vmatprep.subr.bf16.mxu1 %v5294_v15  ;;  %v2289_v52 = vadd.f32 %v6078_v40, %v2269_v12 }
 0x224   : > { %v2434_v22 = vld [vmem:[%s6443_s6] sm:$0x1] }
 0x225   : > { %v2290_v53 = vadd.f32 %v6078_v40, %v2270_v61  ;;  %v5311_v61 = vld [vmem:[%s6445_s8 + $0x14] ss:$8 sps:$4 sm:$0x1f]  }
 0x226   : > { %4563 = vmatpush3.bf16.msra.mxu1 %v5295_v13 }
 0x227   : > { %v2301_v8 = vpack.c.bf16 %v2290_v53, %v2289_v52  ;;  %4564 = vmatprep.subr.bf16.mxu1 %v5296_v3  ;;  %v2466_v3 = vsel %vm2464_vm10, %v2434_v22, 0  ;;  %v2772_v52 = vld [vmem:[%s6446_s9] sm:$0x3] }
 0x228   : > { %v2229_v31 = vpop.f32.mrb[160].mxu0  ;;  %4942 = vmatpush3.bf16.msra.mxu0 %v2466_v3  ;;  %v2787_v53 = vsel %vm605_vm0, %v2772_v52, 0 }
 0x229   : > { %v2271_v21 = vadd.f32 %v2229_v31, %v6049_v14  ;;  %v4893_v60 = vpop.f32.mrb[161].mxu0  ;;  %4918 = vmatmul.mubr.msk.bf16.gmra.mrb[76].mxu1 %vm583_vm3, %v2301_v8 }
 0x22a   : > { %v2232_v49 = vpop.f32.mrb[162].mxu0  ;;  %4565 = vmatpush3.bf16.msra.mxu1 %v5297_v30  ;;  %4921 = vmatprep.mubr.msk.bf16.mxu1 %vm5323_vm1, %v5322_v1  ;;  %v4381_v30 = vld [vmem:[%s6442_s5] ss:$0 sm:$0xff] }
 0x22b   : > { %v2272_v2 = vadd.f32 %v2232_v49, %v6052_v50  ;;  %v4894_v36 = vpop.f32.mrb[163].mxu0  ;;  %4566 = vmatprep.subr.bf16.mxu1 %v5298_v41  ;;  %v2291_v16 = vadd.f32 %v6078_v40, %v2271_v21 }
 0x22d   : > { %v2292_v14 = vadd.f32 %v6078_v40, %v2272_v2 }
 0x22e   : > { %4567 = vmatpush3.bf16.msra.mxu1 %v5299_v33 }
 0x22f   : > { %v2302_v39 = vpack.c.bf16 %v2292_v14, %v2291_v16  ;;  %4568 = vmatprep.subr.bf16.mxu1 %v5300_v44 }
 0x230   : > { %v2237_v42 = vpop.f32.mrb[164].mxu0 }
 0x231   : > { %v2273_v25 = vadd.f32 %v2237_v42, %v6055_v24  ;;  %v4897_v17 = vpop.f32.mrb[165].mxu0  ;;  %4922 = vmatmul.mubr.msk.bf16.gmra.mrb[80].mxu1 %vm583_vm3, %v2302_v39 }
 0x232   : > { %v2240_v50 = vpop.f32.mrb[166].mxu0  ;;  %4925 = vmatprep.mubr.msk.bf16.mxu1 %vm5323_vm1, %v5322_v1  ;;  %4569 = vmatpush3.bf16.msra.mxu1 %v5301_v34 }
 0x233   : > { %v2274_v9 = vadd.f32 %v2240_v50, %v6058_v38  ;;  %v4898_v57 = vpop.f32.mrb[167].mxu0  ;;  %4570 = vmatprep.subr.bf16.mxu1 %v5302_v27  ;;  %v2293_v45 = vadd.f32 %v6078_v40, %v2273_v25 }
 0x235   : > { %v2294_v24 = vadd.f32 %v6078_v40, %v2274_v9 }
 0x236   : > { %4571 = vmatpush3.bf16.msra.mxu1 %v5303_v54 }
 0x237   : > { %v2303_v32 = vpack.c.bf16 %v2294_v24, %v2293_v45  ;;  %4572 = vmatprep.subr.bf16.mxu1 %v5304_v46 }
 0x238   : > { %v2245_v18 = vpop.f32.mrb[168].mxu0 }
 0x239   : > { %v2275_v10 = vadd.f32 %v2245_v18, %v6061_v20  ;;  %v4901_v28 = vpop.f32.mrb[169].mxu0  ;;  %4926 = vmatmul.mubr.msk.bf16.gmra.mrb[84].mxu1 %vm583_vm3, %v2303_v32 }
 0x23a   : > { %v2248_v38 = vpop.f32.mrb[170].mxu0  ;;  %4929 = vmatprep.mubr.msk.bf16.mxu1 %vm5323_vm1, %v5322_v1  ;;  %4573 = vmatpush3.bf16.msra.mxu1 %v5305_v56 }
 0x23b   : > { %v2276_v0 = vadd.f32 %v2248_v38, %v6064_v43  ;;  %v4902_v62 = vpop.f32.mrb[171].mxu0  ;;  %4574 = vmatprep.subr.bf16.mxu1 %v5306_v37  ;;  %v2295_v29 = vadd.f32 %v6078_v40, %v2275_v10 }
 0x23d   : > { %v2296_v48 = vadd.f32 %v6078_v40, %v2276_v0 }
 0x23e   : > { %4575 = vmatpush3.bf16.msra.mxu1 %v5307_v51 }
 0x23f   : > { %v2304_v7 = vpack.c.bf16 %v2296_v48, %v2295_v29  ;;  %5226 = vmatprep.subr.msk.bf16.mxu1 %vm605_vm0, %v2772_v52 }
 0x240   : > { %v2253_v20 = vpop.f32.mrb[172].mxu0 }
 0x241   : > { %v2277_v11 = vadd.f32 %v2253_v20, %v6067_v23  ;;  %v4905_v59 = vpop.f32.mrb[173].mxu0  ;;  %4930 = vmatmul.mubr.msk.bf16.gmra.mrb[88].mxu1 %vm583_vm3, %v2304_v7 }
 0x242   : > { %v2256_v63 = vpop.f32.mrb[174].mxu0  ;;  %4933 = vmatprep.mubr.msk.bf16.mxu1 %vm5323_vm1, %v5322_v1 }
 0x243   : > { %v2278_v43 = vadd.f32 %v2256_v63, %v6070_v26  ;;  %v4906_v6 = vpop.f32.mrb[175].mxu0  ;;  %v2297_v47 = vadd.f32 %v6078_v40, %v2277_v11  ;;  %v5310_v26 = vld [vmem:[%s6445_s8 + $0x4] ss:$8 sps:$4 sm:$0xff]  }
 0x245   : > { %v2298_v5 = vadd.f32 %v6078_v40, %v2278_v43 }
 0x247   : > { %v2305_v35 = vpack.c.bf16 %v2298_v5, %v2297_v47 }
 0x248   : > { %v2261_v15 = vpop.f32.mrb[176].mxu0 }
 0x249   : > { %v2279_v58 = vadd.f32 %v2261_v15, %v6073_v55  ;;  %v4909_v12 = vpop.f32.mrb[177].mxu0  ;;  %4934 = vmatmul.mubr.msk.bf16.gmra.mrb[92].mxu1 %vm583_vm3, %v2305_v35  ;;  %v5308_v55 = vld [vmem:[%s6445_s8] ss:$8 sps:$4 sm:$0xff]  }
 0x24a   : > { %v2264_v23 = vpop.f32.mrb[178].mxu0  ;;  %4937 = vmatprep.mubr.msk.bf16.mxu1 %vm5323_vm1, %v5322_v1 }
 0x24b   : > { %v2299_v19 = vadd.f32 %v6078_v40, %v2279_v58  ;;  %v4910_v4 = vpop.f32.mrb[179].mxu0  ;;  %v5313_v40 = vld [vmem:[%s6445_s8 + $0x10] ss:$8 sps:$4 sm:$0x1f]  }
 0x24d   : > { %v2306_v13 = vpack.c.bf16 %v2299_v19, %v2299_v19 }
 0x251   : > { %4938 = vmatmul.mubr.msk.bf16.gmra.mrb[96].mxu1 %vm583_vm3, %v2306_v13 }
 0x252   : > { %2753 = vmatprep.mubr.bf16.mxu1 %v5310_v26 }
 0x259   : > { %2754 = vmatmul.mubr.bf16.vlgmr.msra.gmra.mrb[100].mxu1 %v5308_v55 }
 0x25a   : > { %2761 = vmatprep.mubr.bf16.mxu1 %v5311_v61  ;;  %4972 = vmatpush3.bf16.msra.mxu1 %v2787_v53 }
 0x25b   : > { %4977 = vmatprep.subr.bf16.mxu1 %v5322_v1 }
 0x261   : > { %2762 = vmatmul.mubr.bf16.gmra.mrb[104].mxu1 %v5313_v40 }
 0x2f4   : > { %v2373_v8 = vpop.f32.mrb[72].mxu1 }
 0x2f5   : > { %v4915_v41 = vpop.f32.mrb[73].mxu1  ;;  %v2374_v21 = vadd.f32 %v4381_v30, %v2373_v8 }
 0x2f6   : > { %v2376_v31 = vpop.f32.mrb[74].mxu1  ;;  %v4389_v41 = vld [vmem:[%s6444_s7] ss:$0 sm:$0xff] }
 0x2f7   : > { %v2377_v60 = vadd.f32 %v4381_v30, %v2376_v31  ;;  %v4916_v49 = vpop.f32.mrb[75].mxu1 }
 0x2f9   : > { %v2427_v33 = vpack.c.bf16 %v2377_v60, %v2374_v21 }
 0x2fb   : > { %4944 = vmatmul.mubr.msk.bf16.vlgmr.msra.gmra.mrb[180].mxu0 %vm2442_vm11, %v2427_v33 }
 0x2fc   : > { %v2381_v2 = vpop.f32.mrb[76].mxu1  ;;  %4947 = vmatprep.mubr.msk.bf16.mxu0 %vm5323_vm1, %v5322_v1 }
 0x2fd   : > { %v4919_v36 = vpop.f32.mrb[77].mxu1  ;;  %v2382_v16 = vadd.f32 %v4381_v30, %v2381_v2 }
 0x2fe   : > { %v2384_v44 = vpop.f32.mrb[78].mxu1 }
 0x2ff   : > { %v2385_v14 = vadd.f32 %v4381_v30, %v2384_v44  ;;  %v4920_v34 = vpop.f32.mrb[79].mxu1 }
 0x301   : > { %v2428_v39 = vpack.c.bf16 %v2385_v14, %v2382_v16 }
 0x303   : > { %4948 = vmatmul.mubr.msk.bf16.gmra.mrb[184].mxu0 %vm2442_vm11, %v2428_v39 }
 0x304   : > { %v2389_v27 = vpop.f32.mrb[80].mxu1  ;;  %4951 = vmatprep.mubr.msk.bf16.mxu0 %vm5323_vm1, %v5322_v1 }
 0x305   : > { %v4923_v42 = vpop.f32.mrb[81].mxu1  ;;  %v2390_v17 = vadd.f32 %v4381_v30, %v2389_v27 }
 0x306   : > { %v2392_v25 = vpop.f32.mrb[82].mxu1 }
 0x307   : > { %v2393_v50 = vadd.f32 %v4381_v30, %v2392_v25  ;;  %v4924_v54 = vpop.f32.mrb[83].mxu1 }
 0x309   : > { %v2429_v9 = vpack.c.bf16 %v2393_v50, %v2390_v17 }
 0x30b   : > { %4952 = vmatmul.mubr.msk.bf16.gmra.mrb[188].mxu0 %vm2442_vm11, %v2429_v9 }
 0x30c   : > { %v2397_v57 = vpop.f32.mrb[84].mxu1  ;;  %4955 = vmatprep.mubr.msk.bf16.mxu0 %vm5323_vm1, %v5322_v1 }
 0x30d   : > { %v4927_v46 = vpop.f32.mrb[85].mxu1  ;;  %v2398_v24 = vadd.f32 %v4381_v30, %v2397_v57 }
 0x30e   : > { %v2400_v45 = vpop.f32.mrb[86].mxu1 }
 0x30f   : > { %v2401_v56 = vadd.f32 %v4381_v30, %v2400_v45  ;;  %v4928_v32 = vpop.f32.mrb[87].mxu1 }
 0x311   : > { %v2430_v37 = vpack.c.bf16 %v2401_v56, %v2398_v24 }
 0x313   : > { %4956 = vmatmul.mubr.msk.bf16.gmra.mrb[192].mxu0 %vm2442_vm11, %v2430_v37 }
 0x314   : > { %v2405_v18 = vpop.f32.mrb[88].mxu1  ;;  %4959 = vmatprep.mubr.msk.bf16.mxu0 %vm5323_vm1, %v5322_v1 }
 0x315   : > { %v4931_v10 = vpop.f32.mrb[89].mxu1  ;;  %v2406_v38 = vadd.f32 %v4381_v30, %v2405_v18 }
 0x316   : > { %v2408_v28 = vpop.f32.mrb[90].mxu1 }
 0x317   : > { %v2409_v51 = vadd.f32 %v4381_v30, %v2408_v28  ;;  %v4932_v0 = vpop.f32.mrb[91].mxu1 }
 0x319   : > { %v2431_v62 = vpack.c.bf16 %v2409_v51, %v2406_v38 }
 0x31b   : > { %4960 = vmatmul.mubr.msk.bf16.gmra.mrb[196].mxu0 %vm2442_vm11, %v2431_v62 }
 0x31c   : > { %v2413_v29 = vpop.f32.mrb[92].mxu1  ;;  %4963 = vmatprep.mubr.msk.bf16.mxu0 %vm5323_vm1, %v5322_v1 }
 0x31d   : > { %v4935_v48 = vpop.f32.mrb[93].mxu1  ;;  %v2414_v20 = vadd.f32 %v4381_v30, %v2413_v29 }
 0x31e   : > { %v2416_v7 = vpop.f32.mrb[94].mxu1 }
 0x31f   : > { %v2417_v11 = vadd.f32 %v4381_v30, %v2416_v7  ;;  %v4936_v59 = vpop.f32.mrb[95].mxu1 }
 0x321   : > { %v2432_v63 = vpack.c.bf16 %v2417_v11, %v2414_v20 }
 0x323   : > { %4964 = vmatmul.mubr.msk.bf16.gmra.mrb[200].mxu0 %vm2442_vm11, %v2432_v63 }
 0x324   : > { %v2421_v43 = vpop.f32.mrb[96].mxu1  ;;  %4967 = vmatprep.mubr.msk.bf16.mxu0 %vm5323_vm1, %v5322_v1 }
 0x325   : > { %v2422_v6 = vadd.f32 %v4381_v30, %v2421_v43  ;;  %v4939_v47 = vpop.f32.mrb[97].mxu1  ;;  %v2840_v30 = vld [vmem:[%s6448_s11] sm:$0x1] }
 0x326   : > { %v2424_v5 = vpop.f32.mrb[98].mxu1  ;;  %v2845_v8 = vsel %vm2464_vm10, %v2840_v30, 0 }
 0x327   : > { %v4940_v35 = vpop.f32.mrb[99].mxu1  ;;  %v2433_v15 = vpack.c.bf16 %v2422_v6, %v2422_v6  ;;  %v4417_v6 = vld [vmem:[%s6447_s10] ss:$0 sm:$0xff] }
 0x32b   : > { %4968 = vmatmul.mubr.msk.bf16.gmra.mrb[204].mxu0 %vm2442_vm11, %v2433_v15  ;;  %v4421_v15 = vld [vmem:[%s6448_s11 + $0x1] sm:$0x1] }
 0x32c   : > { %v4576_v58 = vpop.f32.mrb[100].mxu1 }
 0x32d   : > { %v4577_v12 = vpop.f32.mrb[101].mxu1 }
 0x32e   : > { %v4578_v23 = vadd.f32 %v4577_v12, %v4576_v58  ;;  %v4579_v19 = vpop.f32.mrb[102].mxu1 }
 0x32f   : > { %v4580_v4 = vpop.f32.mrb[103].mxu1 }
 0x330   : > { %v4581_v26 = vadd.f32 %v4580_v4, %v4579_v19 }
 0x332   : > { %v2770_v13 = vpack.c.bf16 %v4581_v26, %v4578_v23 }
 0x334   : > { %v4582_v55 = vpop.f32.mrb[104].mxu1  ;;  %4973 = vmatprep.mubr.msk.bf16.mxu1 %vm583_vm3, %v2770_v13  ;;  %v2896_v13 = vsel %vm2464_vm10, %v4421_v15, 0 }
 0x335   : > { %v4583_v61 = vpop.f32.mrb[105].mxu1 }
 0x336   : > { %v4584_v40 = vadd.f32 %v4583_v61, %v4582_v55  ;;  %v4585_v22 = vpop.f32.mrb[106].mxu1  ;;  %v4423_v55 = vld [vmem:[%s6448_s11 + $0x2] sm:$0x1] }
 0x337   : > { %v4586_v3 = vpop.f32.mrb[107].mxu1 }
 0x338   : > { %v4587_v52 = vadd.f32 %v4586_v3, %v4585_v22  ;;  %v4425_v22 = vld [vmem:[%s6448_s11 + $0x3] sm:$0x1] }
 0x33a   : > { %v2771_v53 = vpack.c.bf16 %v4587_v52, %v4584_v40  ;;  %v2947_v40 = vsel %vm2464_vm10, %v4423_v55, 0  ;;  %v2997_v52 = vsel %vm2464_vm10, %v4425_v22, 0 }
 0x33c   : > { %4974 = vmatmul.mubr.msk.bf16.vlgmr.msra.gmra.mrb[108].mxu1 %vm583_vm3, %v2771_v53  ;;  %v4427_v53 = vld [vmem:[%s6448_s11 + $0x4] sm:$0x1] }
 0x33d   : > { %4979 = vmatprep.mubr.msk.bf16.mxu1 %vm5323_vm1, %v5322_v1  ;;  %4978 = vmatpush3.bf16.msra.mxu1 %v2845_v8  ;;  %v3047_v8 = vsel %vm2464_vm10, %v4427_v53, 0 }
 0x33e   : > { %4983 = vmatprep.subr.bf16.mxu1 %v5322_v1 }
 0x3ce   : > { %v2502_v31 = vpop.f32.mrb[180].mxu0 }
 0x3cf   : > { %v2503_v21 = vadd.f32 %v4389_v41, %v2502_v31  ;;  %v4945_v60 = vpop.f32.mrb[181].mxu0 }
 0x3d0   : > { %v2505_v49 = vpop.f32.mrb[182].mxu0  ;;  %v4431_v60 = vld [vmem:[%s6448_s11 + $0x6] sm:$0x1] }
 0x3d1   : > { %2556 = vst.msk [vmem:[%s6196_s25] sm:$0xff] %vm2442_vm11, %v2503_v21  ;;  %v2506_v33 = vadd.f32 %v4389_v41, %v2505_v49  ;;  %v4946_v2 = vpop.f32.mrb[183].mxu0 }
 0x3d2   : > { %v4433_v2 = vld [vmem:[%s6448_s11 + $0x7] sm:$0x1] }
 0x3d3   : > { %2557 = vst.msk [vmem:[%s6196_s25 + $0x8] sm:$0xff] %vm2442_vm11, %v2506_v33  ;;  %v3147_v33 = vsel %vm2464_vm10, %v4431_v60, 0 }
 0x3d6   : > { %v2510_v36 = vpop.f32.mrb[184].mxu0 }
 0x3d7   : > { %v2511_v44 = vadd.f32 %v4389_v41, %v2510_v36  ;;  %v4949_v16 = vpop.f32.mrb[185].mxu0 }
 0x3d8   : > { %v2513_v14 = vpop.f32.mrb[186].mxu0  ;;  %v4435_v16 = vld [vmem:[%s6448_s11 + $0x8] sm:$0x1] }
 0x3d9   : > { %2558 = vst.msk [vmem:[%s6196_s25 + $0x10] sm:$0xff] %vm2442_vm11, %v2511_v44  ;;  %v2514_v34 = vadd.f32 %v4389_v41, %v2513_v14  ;;  %v4950_v39 = vpop.f32.mrb[187].mxu0  ;;  %v3197_v44 = vsel %vm2464_vm10, %v4433_v2, 0 }
 0x3da   : > { %v4437_v39 = vld [vmem:[%s6448_s11 + $0x9] sm:$0x1] }
 0x3db   : > { %2559 = vst.msk [vmem:[%s6196_s25 + $0x18] sm:$0xff] %vm2442_vm11, %v2514_v34  ;;  %v3247_v34 = vsel %vm2464_vm10, %v4435_v16, 0 }
 0x3de   : > { %v2518_v27 = vpop.f32.mrb[188].mxu0 }
 0x3df   : > { %v2519_v42 = vadd.f32 %v4389_v41, %v2518_v27  ;;  %v4953_v25 = vpop.f32.mrb[189].mxu0 }
 0x3e0   : > { %v2521_v17 = vpop.f32.mrb[190].mxu0  ;;  %v4439_v25 = vld [vmem:[%s6448_s11 + $0xa] sm:$0x1] }
 0x3e1   : > { %2560 = vst.msk [vmem:[%s6196_s25 + $0x20] sm:$0xff] %vm2442_vm11, %v2519_v42  ;;  %v2522_v50 = vadd.f32 %v4389_v41, %v2521_v17  ;;  %v4954_v54 = vpop.f32.mrb[191].mxu0  ;;  %v3298_v42 = vsel %vm2464_vm10, %v4437_v39, 0 }
 0x3e2   : > { %v4441_v54 = vld [vmem:[%s6448_s11 + $0xb] sm:$0x1] }
 0x3e3   : > { %2561 = vst.msk [vmem:[%s6196_s25 + $0x28] sm:$0xff] %vm2442_vm11, %v2522_v50  ;;  %v3349_v50 = vsel %vm2464_vm10, %v4439_v25, 0 }
 0x3e6   : > { %v2526_v9 = vpop.f32.mrb[192].mxu0 }
 0x3e7   : > { %v2527_v57 = vadd.f32 %v4389_v41, %v2526_v9  ;;  %v4957_v46 = vpop.f32.mrb[193].mxu0 }
 0x3e8   : > { %v2529_v45 = vpop.f32.mrb[194].mxu0  ;;  %v4443_v46 = vld [vmem:[%s6448_s11 + $0xc] sm:$0x1] }
 0x3e9   : > { %2562 = vst.msk [vmem:[%s6196_s25 + $0x30] sm:$0xff] %vm2442_vm11, %v2527_v57  ;;  %v2530_v24 = vadd.f32 %v4389_v41, %v2529_v45  ;;  %v4958_v56 = vpop.f32.mrb[195].mxu0  ;;  %v3399_v57 = vsel %vm2464_vm10, %v4441_v54, 0 }
 0x3ea   : > { %v4445_v56 = vld [vmem:[%s6448_s11 + $0xd] sm:$0x1] }
 0x3eb   : > { %2563 = vst.msk [vmem:[%s6196_s25 + $0x38] sm:$0xff] %vm2442_vm11, %v2530_v24  ;;  %v3449_v24 = vsel %vm2464_vm10, %v4443_v46, 0 }
 0x3ee   : > { %v2534_v32 = vpop.f32.mrb[196].mxu0 }
 0x3ef   : > { %v2535_v37 = vadd.f32 %v4389_v41, %v2534_v32  ;;  %v4961_v18 = vpop.f32.mrb[197].mxu0 }
 0x3f0   : > { %v2537_v10 = vpop.f32.mrb[198].mxu0  ;;  %v4447_v18 = vld [vmem:[%s6448_s11 + $0xe] sm:$0x1] }
 0x3f1   : > { %2564 = vst.msk [vmem:[%s6196_s25 + $0x40] sm:$0xff] %vm2442_vm11, %v2535_v37  ;;  %v2538_v28 = vadd.f32 %v4389_v41, %v2537_v10  ;;  %v4962_v38 = vpop.f32.mrb[199].mxu0  ;;  %v3499_v37 = vsel %vm2464_vm10, %v4445_v56, 0 }
 0x3f2   : > { %v4449_v38 = vld [vmem:[%s6448_s11 + $0xf] sm:$0x1] }
 0x3f3   : > { %2565 = vst.msk [vmem:[%s6196_s25 + $0x48] sm:$0xff] %vm2442_vm11, %v2538_v28  ;;  %v3549_v28 = vsel %vm2464_vm10, %v4447_v18, 0 }
 0x3f6   : > { %v2542_v51 = vpop.f32.mrb[200].mxu0 }
 0x3f7   : > { %v2543_v0 = vadd.f32 %v4389_v41, %v2542_v51  ;;  %v4965_v62 = vpop.f32.mrb[201].mxu0 }
 0x3f8   : > { %v2545_v29 = vpop.f32.mrb[202].mxu0  ;;  %v4451_v62 = vld [vmem:[%s6448_s11 + $0x10] sm:$0x1] }
 0x3f9   : > { %2566 = vst.msk [vmem:[%s6196_s25 + $0x50] sm:$0xff] %vm2442_vm11, %v2543_v0  ;;  %v2546_v48 = vadd.f32 %v4389_v41, %v2545_v29  ;;  %v4966_v7 = vpop.f32.mrb[203].mxu0  ;;  %v3599_v0 = vsel %vm2464_vm10, %v4449_v38, 0 }
 0x3fa   : > { %v4453_v7 = vld [vmem:[%s6448_s11 + $0x11] sm:$0x1] }
 0x3fb   : > { %2567 = vst.msk [vmem:[%s6196_s25 + $0x58] sm:$0xff] %vm2442_vm11, %v2546_v48  ;;  %v3649_v48 = vsel %vm2464_vm10, %v4451_v62, 0 }
 0x3fe   : > { %v2550_v20 = vpop.f32.mrb[204].mxu0 }
 0x3ff   : > { %v2551_v11 = vadd.f32 %v4389_v41, %v2550_v20  ;;  %v4969_v59 = vpop.f32.mrb[205].mxu0  ;;  %v4429_v41 = vld [vmem:[%s6448_s11 + $0x5] sm:$0x1] }
 0x400   : > { %v2553_v63 = vpop.f32.mrb[206].mxu0  ;;  %v3097_v21 = vsel %vm2464_vm10, %v4429_v41, 0  ;;  %v4455_v59 = vld [vmem:[%s6448_s11 + $0x12] sm:$0x1] }
 0x401   : > { %2568 = vst.msk [vmem:[%s6196_s25 + $0x60] sm:$0xff] %vm2442_vm11, %v2551_v11  ;;  %v4970_v43 = vpop.f32.mrb[207].mxu0  ;;  %v3700_v11 = vsel %vm2464_vm10, %v4453_v7, 0 }
 0x402   : > { %v3751_v43 = vsel %vm2464_vm10, %v4455_v59, 0 }
 0x40f   : > { %v4975_v47 = vpop.f32.mrb[108].mxu1 }
 0x410   : > { %v6227_v5 = vadd.f32 %v4975_v47, %v4417_v6  ;;  %v2823_v35 = vpop.f32.mrb[109].mxu1 }
 0x411   : > { %v2824_v58 = vadd.f32 %v4417_v6, %v2823_v35  ;;  %v4976_v12 = vpop.f32.mrb[110].mxu1  ;;  %v4459_v35 = vld [vmem:[%s6448_s11 + $0x14] sm:$0x1] }
 0x412   : > { %v6232_v23 = vadd.f32 %v4976_v12, %v4417_v6  ;;  %v2826_v19 = vpop.f32.mrb[111].mxu1  ;;  %v3642_v20 = vpack.c.bf16 %v6227_v5, %v6227_v5  ;;  %v4461_v12 = vld [vmem:[%s6448_s11 + $0x15] sm:$0x1] }
 0x413   : > { %v2839_v4 = vpack.c.bf16 %v2824_v58, %v2824_v58  ;;  %v2827_v26 = vadd.f32 %v4417_v6, %v2826_v19  ;;  %v4457_v6 = vld [vmem:[%s6448_s11 + $0x13] sm:$0x1]  ;;  %v3851_v58 = vsel %vm2464_vm10, %v4459_v35, 0 }
 0x414   : > { %v3694_v63 = vshrl.u32 %v3642_v20, 16  ;;  %v3746_v47 = vrot.slane %v3642_v20, 1  ;;  %v3801_v5 = vsel %vm2464_vm10, %v4457_v6, 0  ;;  %v3846_v19 = vrot.slane %v3642_v20, 2 }
 0x415   : > { %4980 = vmatmul.mubr.msk.bf16.vlgmr.msra.gmra.mrb[112].mxu1 %vm2442_vm11, %v2839_v4  ;;  %v2890_v61 = vshrl.u32 %v2839_v4, 16  ;;  %v2942_v3 = vrot.slane %v2839_v4, 1  ;;  %v3042_v31 = vrot.slane %v2839_v4, 2  ;;  %v3142_v36 = vrot.slane %v2839_v4, 3 }
 0x416   : > { %4984 = vmatpush3.bf16.msra.mxu1 %v2896_v13  ;;  %4985 = vmatprep.mubr.msk.bf16.mxu1 %vm5323_vm1, %v5322_v1  ;;  %v3240_v27 = vpack.c.bf16 %v2827_v26, %v2827_v26  ;;  %v3796_v15 = vrot.slane %v3694_v63, 1  ;;  %v3901_v4 = vsel %vm2464_vm10, %v4461_v12, 0  ;;  %v4463_v26 = vld [vmem:[%s6448_s11 + $0x16] sm:$0x1]  ;;  %v3896_v13 = vrot.slane %v3694_v63, 2 }
 0x417   : > { %4989 = vmatprep.subr.bf16.mxu1 %v5322_v1  ;;  %v2992_v30 = vrot.slane %v2890_v61, 1  ;;  %v3092_v49 = vrot.slane %v2890_v61, 2  ;;  %v3192_v14 = vrot.slane %v2890_v61, 3  ;;  %v3951_v55 = vsel %vm2464_vm10, %v4463_v26, 0 }
 0x418   : > { %v3292_v17 = vshrl.u32 %v3240_v27, 16  ;;  %v3344_v9 = vrot.slane %v3240_v27, 1  ;;  %v3444_v32 = vrot.slane %v3240_v27, 2  ;;  %v3544_v51 = vrot.slane %v3240_v27, 3 }
 0x41a   : > { %v3394_v45 = vrot.slane %v3292_v17, 1  ;;  %v3494_v10 = vrot.slane %v3292_v17, 2  ;;  %v3594_v29 = vrot.slane %v3292_v17, 3 }
 0x421   : > { %4986 = vmatmul.mubr.msk.bf16.vlgmr.msra.gmra.mrb[112].mxu1 %vm2442_vm11, %v2890_v61  ;;  %v4465_v61 = vld [vmem:[%s6448_s11 + $0x17] sm:$0x1] }
 0x422   : > { %4990 = vmatpush3.bf16.msra.mxu1 %v2947_v40  ;;  %4991 = vmatprep.mubr.msk.bf16.mxu1 %vm5323_vm1, %v5322_v1  ;;  %v3946_v40 = vrot.slane %v3642_v20, 3  ;;  %v4001_v22 = vsel %vm2464_vm10, %v4465_v61, 0 }
 0x423   : > { %4995 = vmatprep.subr.bf16.mxu1 %v5322_v1 }
 0x42d   : > { %4992 = vmatmul.mubr.msk.bf16.vlgmr.msra.gmra.mrb[112].mxu1 %vm2442_vm11, %v2942_v3  ;;  %v4467_v3 = vld [vmem:[%s6448_s11 + $0x18] sm:$0x1] }
 0x42e   : > { %4996 = vmatpush3.bf16.msra.mxu1 %v2997_v52  ;;  %4997 = vmatprep.mubr.msk.bf16.mxu1 %vm5323_vm1, %v5322_v1  ;;  %v3996_v52 = vrot.slane %v3694_v63, 3  ;;  %v4051_v53 = vsel %vm2464_vm10, %v4467_v3, 0 }
 0x42f   : > { %5001 = vmatprep.subr.bf16.mxu1 %v5322_v1 }
 0x439   : > { %4998 = vmatmul.mubr.msk.bf16.vlgmr.msra.gmra.mrb[112].mxu1 %vm2442_vm11, %v2992_v30  ;;  %v4044_v30 = vpack.c.bf16 %v6232_v23, %v6232_v23 }
 0x43a   : > { %5002 = vmatpush3.bf16.msra.mxu1 %v3047_v8  ;;  %5003 = vmatprep.mubr.msk.bf16.mxu1 %vm5323_vm1, %v5322_v1  ;;  %v2838_v8 = vld [vmem:[%s6449_s12] sm:$0x1] }
 0x43b   : > { %5007 = vmatprep.subr.bf16.mxu1 %v5322_v1 }
 0x445   : > { %5004 = vmatmul.mubr.msk.bf16.vlgmr.msra.gmra.mrb[112].mxu1 %vm2442_vm11, %v3042_v31 }
 0x446   : > { %5008 = vmatpush3.bf16.msra.mxu1 %v3097_v21  ;;  %5009 = vmatprep.mubr.msk.bf16.mxu1 %vm5323_vm1, %v5322_v1 }
 0x447   : > { %5013 = vmatprep.subr.bf16.mxu1 %v5322_v1 }
 0x451   : > { %5010 = vmatmul.mubr.msk.bf16.vlgmr.msra.gmra.mrb[112].mxu1 %vm2442_vm11, %v3092_v49 }
 0x452   : > { %5014 = vmatpush3.bf16.msra.mxu1 %v3147_v33  ;;  %5015 = vmatprep.mubr.msk.bf16.mxu1 %vm5323_vm1, %v5322_v1 }
 0x453   : > { %5019 = vmatprep.subr.bf16.mxu1 %v5322_v1 }
 0x45d   : > { %5016 = vmatmul.mubr.msk.bf16.vlgmr.msra.gmra.mrb[112].mxu1 %vm2442_vm11, %v3142_v36 }
 0x45e   : > { %5020 = vmatpush3.bf16.msra.mxu1 %v3197_v44  ;;  %5021 = vmatprep.mubr.msk.bf16.mxu1 %vm5323_vm1, %v5322_v1 }
 0x45f   : > { %5025 = vmatprep.subr.bf16.mxu1 %v5322_v1 }
 0x469   : > { %5022 = vmatmul.mubr.msk.bf16.vlgmr.msra.gmra.mrb[112].mxu1 %vm2442_vm11, %v3192_v14 }
 0x46a   : > { %5026 = vmatpush3.bf16.msra.mxu1 %v3247_v34  ;;  %5027 = vmatprep.mubr.msk.bf16.mxu1 %vm5323_vm1, %v5322_v1 }
 0x46b   : > { %5031 = vmatprep.subr.bf16.mxu1 %v5322_v1 }
 0x475   : > { %5028 = vmatmul.mubr.msk.bf16.vlgmr.msra.gmra.mrb[112].mxu1 %vm2442_vm11, %v3240_v27 }
 0x476   : > { %5032 = vmatpush3.bf16.msra.mxu1 %v3298_v42  ;;  %5033 = vmatprep.mubr.msk.bf16.mxu1 %vm5323_vm1, %v5322_v1 }
 0x477   : > { %5037 = vmatprep.subr.bf16.mxu1 %v5322_v1 }
 0x481   : > { %5034 = vmatmul.mubr.msk.bf16.vlgmr.msra.gmra.mrb[112].mxu1 %vm2442_vm11, %v3292_v17 }
 0x482   : > { %5038 = vmatpush3.bf16.msra.mxu1 %v3349_v50  ;;  %5039 = vmatprep.mubr.msk.bf16.mxu1 %vm5323_vm1, %v5322_v1 }
 0x483   : > { %5043 = vmatprep.subr.bf16.mxu1 %v5322_v1 }
 0x48d   : > { %5040 = vmatmul.mubr.msk.bf16.vlgmr.msra.gmra.mrb[112].mxu1 %vm2442_vm11, %v3344_v9 }
 0x48e   : > { %5044 = vmatpush3.bf16.msra.mxu1 %v3399_v57  ;;  %5045 = vmatprep.mubr.msk.bf16.mxu1 %vm5323_vm1, %v5322_v1 }
 0x48f   : > { %5049 = vmatprep.subr.bf16.mxu1 %v5322_v1 }
 0x499   : > { %5046 = vmatmul.mubr.msk.bf16.vlgmr.msra.gmra.mrb[112].mxu1 %vm2442_vm11, %v3394_v45 }
 0x49a   : > { %5050 = vmatpush3.bf16.msra.mxu1 %v3449_v24  ;;  %5051 = vmatprep.mubr.msk.bf16.mxu1 %vm5323_vm1, %v5322_v1 }
 0x49b   : > { %5055 = vmatprep.subr.bf16.mxu1 %v5322_v1 }
 0x4a5   : > { %5052 = vmatmul.mubr.msk.bf16.vlgmr.msra.gmra.mrb[112].mxu1 %vm2442_vm11, %v3444_v32 }
 0x4a6   : > { %5056 = vmatpush3.bf16.msra.mxu1 %v3499_v37  ;;  %5057 = vmatprep.mubr.msk.bf16.mxu1 %vm5323_vm1, %v5322_v1 }
 0x4a7   : > { %5061 = vmatprep.subr.bf16.mxu1 %v5322_v1 }
 0x4b1   : > { %5058 = vmatmul.mubr.msk.bf16.vlgmr.msra.gmra.mrb[112].mxu1 %vm2442_vm11, %v3494_v10 }
 0x4b2   : > { %5062 = vmatpush3.bf16.msra.mxu1 %v3549_v28  ;;  %5063 = vmatprep.mubr.msk.bf16.mxu1 %vm5323_vm1, %v5322_v1 }
 0x4b3   : > { %5067 = vmatprep.subr.bf16.mxu1 %v5322_v1 }
 0x4bd   : > { %5064 = vmatmul.mubr.msk.bf16.vlgmr.msra.gmra.mrb[112].mxu1 %vm2442_vm11, %v3544_v51 }
 0x4be   : > { %5068 = vmatpush3.bf16.msra.mxu1 %v3599_v0  ;;  %5069 = vmatprep.mubr.msk.bf16.mxu1 %vm5323_vm1, %v5322_v1 }
 0x4bf   : > { %5073 = vmatprep.subr.bf16.mxu1 %v5322_v1 }
 0x4c9   : > { %5070 = vmatmul.mubr.msk.bf16.vlgmr.msra.gmra.mrb[112].mxu1 %vm2442_vm11, %v3594_v29 }
 0x4ca   : > { %5074 = vmatpush3.bf16.msra.mxu1 %v3649_v48  ;;  %5075 = vmatprep.mubr.msk.bf16.mxu1 %vm5323_vm1, %v5322_v1 }
 0x4cb   : > { %5079 = vmatprep.subr.bf16.mxu1 %v5322_v1 }
 0x4d5   : > { %5076 = vmatmul.mubr.msk.bf16.vlgmr.msra.gmra.mrb[112].mxu1 %vm2442_vm11, %v3642_v20 }
 0x4d6   : > { %5080 = vmatpush3.bf16.msra.mxu1 %v3700_v11  ;;  %5081 = vmatprep.mubr.msk.bf16.mxu1 %vm5323_vm1, %v5322_v1 }
 0x4d7   : > { %5085 = vmatprep.subr.bf16.mxu1 %v5322_v1 }
 0x4e1   : > { %5082 = vmatmul.mubr.msk.bf16.vlgmr.msra.gmra.mrb[112].mxu1 %vm2442_vm11, %v3694_v63 }
 0x4e2   : > { %5086 = vmatpush3.bf16.msra.mxu1 %v3751_v43  ;;  %5087 = vmatprep.mubr.msk.bf16.mxu1 %vm5323_vm1, %v5322_v1 }
 0x4e3   : > { %5091 = vmatprep.subr.bf16.mxu1 %v5322_v1 }
 0x4ed   : > { %5088 = vmatmul.mubr.msk.bf16.vlgmr.msra.gmra.mrb[112].mxu1 %vm2442_vm11, %v3746_v47 }
 0x4ee   : > { %5092 = vmatpush3.bf16.msra.mxu1 %v3801_v5  ;;  %5093 = vmatprep.mubr.msk.bf16.mxu1 %vm5323_vm1, %v5322_v1 }
 0x4ef   : > { %5097 = vmatprep.subr.bf16.mxu1 %v5322_v1 }
 0x4f9   : > { %5094 = vmatmul.mubr.msk.bf16.vlgmr.msra.gmra.mrb[112].mxu1 %vm2442_vm11, %v3796_v15 }
 0x4fa   : > { %5098 = vmatpush3.bf16.msra.mxu1 %v3851_v58  ;;  %5099 = vmatprep.mubr.msk.bf16.mxu1 %vm5323_vm1, %v5322_v1 }
 0x4fb   : > { %5103 = vmatprep.subr.bf16.mxu1 %v5322_v1 }
 0x505   : > { %5100 = vmatmul.mubr.msk.bf16.vlgmr.msra.gmra.mrb[112].mxu1 %vm2442_vm11, %v3846_v19 }
 0x506   : > { %5104 = vmatpush3.bf16.msra.mxu1 %v3901_v4  ;;  %5105 = vmatprep.mubr.msk.bf16.mxu1 %vm5323_vm1, %v5322_v1 }
 0x507   : > { %5109 = vmatprep.subr.bf16.mxu1 %v5322_v1 }
 0x511   : > { %5106 = vmatmul.mubr.msk.bf16.vlgmr.msra.gmra.mrb[112].mxu1 %vm2442_vm11, %v3896_v13 }
 0x512   : > { %5110 = vmatpush3.bf16.msra.mxu1 %v3951_v55  ;;  %5111 = vmatprep.mubr.msk.bf16.mxu1 %vm5323_vm1, %v5322_v1 }
 0x513   : > { %5115 = vmatprep.subr.bf16.mxu1 %v5322_v1 }
 0x51d   : > { %5112 = vmatmul.mubr.msk.bf16.vlgmr.msra.gmra.mrb[112].mxu1 %vm2442_vm11, %v3946_v40 }
 0x51e   : > { %5116 = vmatpush3.bf16.msra.mxu1 %v4001_v22  ;;  %5117 = vmatprep.mubr.msk.bf16.mxu1 %vm5323_vm1, %v5322_v1 }
 0x51f   : > { %5121 = vmatprep.subr.bf16.mxu1 %v5322_v1 }
 0x529   : > { %5118 = vmatmul.mubr.msk.bf16.vlgmr.msra.gmra.mrb[112].mxu1 %vm2442_vm11, %v3996_v52 }
 0x52a   : > { %5122 = vmatpush3.bf16.msra.mxu1 %v4051_v53  ;;  %5123 = vmatprep.mubr.msk.bf16.mxu1 %vm5323_vm1, %v5322_v1 }
 0x535   : > { %5124 = vmatmul.mubr.msk.bf16.vlgmr.msra.gmra.mrb[112].mxu1 %vm2442_vm11, %v4044_v30 }
 0x608   : > { %v4087_v41 = vpop.f32.mrb[112].mxu1 }
 0x609   : > { %v5129_v31 = vadd.f32 %v4087_v41, %v2838_v8  ;;  %v5125_v21 = vpop.f32.mrb[113].mxu1 }
 0x60a   : > { %v4090_v60 = vpop.f32.mrb[114].mxu1 }
 0x60b   : > { %4095 = vst.msk [vmem:[%s501_s23] sm:$0x1] %vm4094_vm12, %v5129_v31  ;;  %v5126_v1 = vpop.f32.mrb[115].mxu1 }
 0x60c PF: > { %s25_s29 = sadd.s32 1, %s5320_s29  }
 0x60d   : > { %p22_p5 = scmp.ge.s32.totalorder %s25_s29, 4  }
 0x60f   :  { %24 = sbr.rel (!%p22_p5) target bundleno = 1 (0x1), region = 152 }

// kernel: dmdconv_forward.7
= control target key start
LH: loop header
LB: loop body
LE: loop exit
PB: predicated region body
PF: predicated region fallthrough
CT: control target
= control target key end

     0   :  { %s2695_s21 = smov 0   ;;  %s2697_s22 = smov 0   ;;  %s3164_s0 = inlined_call_operand.vmem [shape: f32[2,104,2], index: 0, kind: input, shape index: {}]   ;;  %s3165_s1 = inlined_call_operand.vmem [shape: f32[2,1,2], index: 1, kind: input, shape index: {}]   ;;  %s3166_s2 = inlined_call_operand.vmem [shape: f32[2,104,2], index: 2, kind: input, shape index: {}]   ;;  %s3167_s3 = inlined_call_operand.vmem [shape: f32[2,1,2], index: 3, kind: input, shape index: {}]   ;;  %s3168_s4 = inlined_call_operand.vmem [shape: f32[2,104,2], index: 4, kind: input, shape index: {}]   ;;  %s3169_s5 = inlined_call_operand.vmem [shape: f32[2,1,2], index: 5, kind: input, shape index: {}]   ;;  %s3170_s6 = inlined_call_operand.vmem [shape: f32[2,4], index: 6, kind: input, shape index: {}]   ;;  %s3171_s7 = inlined_call_operand.vmem [shape: f32[1,4], index: 7, kind: input, shape index: {}]   ;;  %s3172_s8 = inlined_call_operand.vmem [shape: f32[2,4], index: 8, kind: input, shape index: {}]   ;;  %s3173_s9 = inlined_call_operand.vmem [shape: f32[1,4], index: 9, kind: input, shape index: {}]   ;;  %s3174_s10 = inlined_call_operand.vmem [shape: f32[2,4], index: 10, kind: input, shape index: {}]   ;;  %s3175_s11 = inlined_call_operand.vmem [shape: f32[1,4], index: 11, kind: input, shape index: {}]   ;;  %s3176_s12 = inlined_call_operand.vmem [shape: f32[4,4], index: 12, kind: input, shape index: {}]   ;;  %s3177_s13 = inlined_call_operand.vmem [shape: f32[4,4], index: 13, kind: input, shape index: {}]   ;;  %s3178_s14 = inlined_call_operand.vmem [shape: f32[4,4], index: 14, kind: input, shape index: {}]   ;;  %s3179_s15 = inlined_call_operand.vmem [shape: f32[1,4], index: 15, kind: input, shape index: {}]   ;;  %s3180_s16 = inlined_call_operand.vmem [shape: f32[2,104,4], index: 16, kind: output, shape index: {}]  }
   0x1   :  { %3181 = sst [smem:[#allocation2_spill]] %s3164_s0  ;;  %s2699_s23 = smov 0  }
   0x2 LB: > { %s38_s24 = sadd.s32 1, %s2602_s22  ;;  %p2064_p0 = scmp.ge.s32.totalorder %s2606_s23, 1  ;;  %s2606_s23 = sphi %s2699_s23, %s26_s23   ;;  %s2602_s22 = sphi %s2697_s22, %s3184_s22   ;;  %s2598_s21 = sphi %s2695_s21, %s3183_s21  }
   0x3   : > { %p40_p1 = scmp.ge.s32.totalorder %s38_s24, 2  ;;  %p541_p2 = scmp.lt.s32.totalorder %s2606_s23, 3 }
   0x5   : > { %s3186_s24 = smov (%p40_p1, %s38_s24), 0  ;;  %p542_p3 = pnand %p2064_p0, %p541_p2 }
   0x6   : > { %v716_v0 = vld [vmem:[%s3170_s6] sm:$0x3] (!%p542_p3)  ;;  %vm764_vm0 = vcmask (!%p542_p3), 1041408   ;;  %p627_p4 = scmp.lt.s32.totalorder (!%p542_p3), %s2598_s21, 1  ;;  %v2608_v1 = vmov (!%p542_p3), 0.0   ;;  %vm2609_vm1 = vmmov (!%p542_p3), 0  }
   0x7   : > { %545 = sbr.rel (%p542_p3) target bundleno = 604 (0x25c), region = 84  ;;  %2246 = vmatprep.subr.mxu0 (!%p542_p3), %v2608_v1  ;;  %2248 = vmatprep.mubr.msk.f32.mxu0 (!%p542_p3), %vm2609_vm1, %v2608_v1  ;;  %s3182_s18 = sld [smem:[#allocation2_spill]] (!%p542_p3)  ;;  %vm724_vm2 = vcmask (!%p542_p3), 15360   ;;  %v1119_v6 = vld [vmem:[%s3172_s8] sm:$0x3] (!%p542_p3)  ;;  %vm939_vm3 = vcmask (!%p542_p3), 1043456  }
   0x8   : > { %2247 = vmatpush3.msk.msra.mxu0 (!%p542_p3), %vm764_vm0, %v716_v0  ;;  %2287 = vmatprep.subr.mxu1 (!%p542_p3), %v2608_v1  ;;  %v1518_v34 = vld [vmem:[%s3174_s10] sm:$0x3] (!%p542_p3)  ;;  %vm899_vm4 = vcmask (!%p542_p3), 31744  }
   0x9   : > { %2328 = vmatprep.subr.mxu0 (!%p542_p3), %v2608_v1  ;;  %2289 = vmatprep.mubr.msk.f32.mxu1 (!%p542_p3), %vm2609_vm1, %v2608_v1  ;;  %v898_v52 = vld [vmem:[%s3176_s12] sm:$0xf] (!%p542_p3) }
   0xa   : > { %2288 = vmatpush3.msk.msra.mxu1 (!%p542_p3), %vm939_vm3, %v898_v52 }
   0xb   : > { %2369 = vmatprep.subr.mxu1 (!%p542_p3), %v2608_v1 }
   0xe   : > { %s3188_s21 = smov (!%p627_p4, %s2598_s21), 1 }
   0xf   : > { %s2727_s27 = smul.u32 104, %s3188_s21  ;;  %s638_s30 = scalar_lea.vmem %s3165_s1, %s3188_s21 }
  0x10   : > { %v2070_v2 = vld [vmem:[%s638_s30] ss:$0 sm:$0xff]  ;;  %s651_s17 = scalar_lea.vmem %s3167_s3, %s3188_s21 }
  0x11   : > { %s2737_s19 = scalar_lea.vmem %s3182_s18, %s2727_s27  ;;  %s2794_s29 = scalar_lea.vmem %s3166_s2, %s2727_s27  ;;  %v2100_v31 = vld [vmem:[%s651_s17] ss:$0 sm:$0xff] }
  0x12   : > { %v683_v3 = vld [vmem:[%s2737_s19] sm:$0xff]  ;;  %v684_v4 = vld [vmem:[%s2737_s19 + $0x8] sm:$0xff]  ;;  %v685_v8 = vld [vmem:[%s2737_s19 + $0x10] sm:$0xff]  ;;  %s2865_s30 = scalar_lea.vmem %s3168_s4, %s2727_s27  ;;  %s664_s18 = scalar_lea.vmem %s3169_s5, %s3188_s21 }
  0x13   : > { %v703_v5 = vmul.f32 %v2070_v2, %v683_v3  ;;  %v704_v7 = vmul.f32 %v2070_v2, %v684_v4  ;;  %v705_v9 = vmul.f32 %v2070_v2, %v685_v8  ;;  %v686_v10 = vld [vmem:[%s2737_s19 + $0x18] sm:$0xff]  ;;  %v687_v12 = vld [vmem:[%s2737_s19 + $0x20] sm:$0xff]  ;;  %v688_v14 = vld [vmem:[%s2737_s19 + $0x28] sm:$0xff]  ;;  %s3115_s20 = scalar_lea.vmem %s3180_s16, %s2727_s27 }
  0x14   : > { %v706_v11 = vmul.f32 %v2070_v2, %v686_v10  ;;  %v707_v13 = vmul.f32 %v2070_v2, %v687_v12  ;;  %v708_v15 = vmul.f32 %v2070_v2, %v688_v14  ;;  %v689_v16 = vld [vmem:[%s2737_s19 + $0x30] sm:$0xff]  ;;  %v690_v18 = vld [vmem:[%s2737_s19 + $0x38] sm:$0xff]  ;;  %v691_v20 = vld [vmem:[%s2737_s19 + $0x40] sm:$0xff] }
  0x15   : > { %2249 = vmatmul.mubr.msk.f32.vlgmr.msra.gmra.mrb[0].mxu0 %vm724_vm2, %v703_v5  ;;  %v709_v17 = vmul.f32 %v2070_v2, %v689_v16  ;;  %v710_v19 = vmul.f32 %v2070_v2, %v690_v18  ;;  %v711_v21 = vmul.f32 %v2070_v2, %v691_v20  ;;  %v692_v22 = vld [vmem:[%s2737_s19 + $0x48] sm:$0xff]  ;;  %v693_v24 = vld [vmem:[%s2737_s19 + $0x50] sm:$0xff]  ;;  %v694_v26 = vld [vmem:[%s2737_s19 + $0x58] sm:$0xff] }
  0x16   : > { %2329 = vmatpush3.msk.msra.mxu0 %vm764_vm0, %v1119_v6  ;;  %2251 = vmatprep.mubr.msk.f32.mxu0 %vm2609_vm1, %v2608_v1  ;;  %v712_v23 = vmul.f32 %v2070_v2, %v692_v22  ;;  %v713_v25 = vmul.f32 %v2070_v2, %v693_v24  ;;  %v714_v27 = vmul.f32 %v2070_v2, %v694_v26  ;;  %v695_v28 = vld [vmem:[%s2737_s19 + $0x60] sm:$0xff]  ;;  %v1087_v33 = vld [vmem:[%s2794_s29 + $0x8] sm:$0xff]  ;;  %v1088_v36 = vld [vmem:[%s2794_s29 + $0x10] sm:$0xff] }
  0x17   : > { %2410 = vmatprep.subr.mxu0 %v2608_v1  ;;  %v715_v29 = vmul.f32 %v2070_v2, %v695_v28  ;;  %v1086_v30 = vld [vmem:[%s2794_s29] sm:$0xff]  ;;  %v1107_v35 = vmul.f32 %v2100_v31, %v1087_v33  ;;  %v1108_v37 = vmul.f32 %v2100_v31, %v1088_v36  ;;  %v1089_v38 = vld [vmem:[%s2794_s29 + $0x18] sm:$0xff]  ;;  %v1091_v42 = vld [vmem:[%s2794_s29 + $0x28] sm:$0xff] }
  0x18   : > { %v1106_v32 = vmul.f32 %v2100_v31, %v1086_v30  ;;  %v1109_v39 = vmul.f32 %v2100_v31, %v1089_v38  ;;  %v1090_v40 = vld [vmem:[%s2794_s29 + $0x20] sm:$0xff]  ;;  %v1111_v43 = vmul.f32 %v2100_v31, %v1091_v42  ;;  %v1092_v44 = vld [vmem:[%s2794_s29 + $0x30] sm:$0xff]  ;;  %v1093_v46 = vld [vmem:[%s2794_s29 + $0x38] sm:$0xff] }
  0x19   : > { %2252 = vmatmul.mubr.msk.f32.gmra.mrb[2].mxu0 %vm724_vm2, %v704_v7  ;;  %v1110_v41 = vmul.f32 %v2100_v31, %v1090_v40  ;;  %v1112_v45 = vmul.f32 %v2100_v31, %v1092_v44  ;;  %v1113_v47 = vmul.f32 %v2100_v31, %v1093_v46  ;;  %v1094_v48 = vld [vmem:[%s2794_s29 + $0x40] sm:$0xff]  ;;  %v1095_v50 = vld [vmem:[%s2794_s29 + $0x48] sm:$0xff]  ;;  %v1096_v53 = vld [vmem:[%s2794_s29 + $0x50] sm:$0xff] }
  0x1a   : > { %2254 = vmatprep.mubr.msk.f32.mxu0 %vm2609_vm1, %v2608_v1  ;;  %v1114_v49 = vmul.f32 %v2100_v31, %v1094_v48  ;;  %v1115_v51 = vmul.f32 %v2100_v31, %v1095_v50  ;;  %v1116_v54 = vmul.f32 %v2100_v31, %v1096_v53  ;;  %v1097_v55 = vld [vmem:[%s2794_s29 + $0x58] sm:$0xff]  ;;  %v1098_v57 = vld [vmem:[%s2794_s29 + $0x60] sm:$0xff]  ;;  %v1486_v62 = vld [vmem:[%s2865_s30 + $0x8] sm:$0xff] }
  0x1b   : > { %v1117_v56 = vmul.f32 %v2100_v31, %v1097_v55  ;;  %v1118_v58 = vmul.f32 %v2100_v31, %v1098_v57  ;;  %v1485_v59 = vld [vmem:[%s2865_s30] sm:$0xff]  ;;  %v1487_v0 = vld [vmem:[%s2865_s30 + $0x10] sm:$0xff]  ;;  %v1488_v3 = vld [vmem:[%s2865_s30 + $0x18] sm:$0xff] }
  0x1c   : > { %v2130_v60 = vld [vmem:[%s664_s18] ss:$0 sm:$0xff]  ;;  %v1490_v7 = vld [vmem:[%s2865_s30 + $0x28] sm:$0xff] }
  0x1d   : > { %2255 = vmatmul.mubr.msk.f32.gmra.mrb[4].mxu0 %vm724_vm2, %v705_v9  ;;  %v1505_v61 = vmul.f32 %v2130_v60, %v1485_v59  ;;  %v1506_v63 = vmul.f32 %v2130_v60, %v1486_v62  ;;  %v1507_v2 = vmul.f32 %v2130_v60, %v1487_v0  ;;  %v1508_v4 = vmul.f32 %v2130_v60, %v1488_v3  ;;  %v1489_v5 = vld [vmem:[%s2865_s30 + $0x20] sm:$0xff]  ;;  %v1491_v9 = vld [vmem:[%s2865_s30 + $0x30] sm:$0xff] }
  0x1e   : > { %2257 = vmatprep.mubr.msk.f32.mxu0 %vm2609_vm1, %v2608_v1  ;;  %v1509_v6 = vmul.f32 %v2130_v60, %v1489_v5  ;;  %v1510_v8 = vmul.f32 %v2130_v60, %v1490_v7  ;;  %v1511_v10 = vmul.f32 %v2130_v60, %v1491_v9  ;;  %v2989_v0 = vld [vmem:[%s3173_s9] ss:$0 sm:$0xff] }
  0x1f   : > { %v1698_v5 = vld [vmem:[%s3178_s14] sm:$0xf] }
  0x21   : > { %2258 = vmatmul.mubr.msk.f32.gmra.mrb[6].mxu0 %vm724_vm2, %v706_v11  ;;  %v1492_v11 = vld [vmem:[%s2865_s30 + $0x38] sm:$0xff] }
  0x22   : > { %2260 = vmatprep.mubr.msk.f32.mxu0 %vm2609_vm1, %v2608_v1  ;;  %v1512_v12 = vmul.f32 %v2130_v60, %v1492_v11 }
  0x25   : > { %2261 = vmatmul.mubr.msk.f32.gmra.mrb[8].mxu0 %vm724_vm2, %v707_v13  ;;  %v1493_v13 = vld [vmem:[%s2865_s30 + $0x40] sm:$0xff] }
  0x26   : > { %2263 = vmatprep.mubr.msk.f32.mxu0 %vm2609_vm1, %v2608_v1  ;;  %v1513_v14 = vmul.f32 %v2130_v60, %v1493_v13 }
  0x29   : > { %2264 = vmatmul.mubr.msk.f32.gmra.mrb[10].mxu0 %vm724_vm2, %v708_v15  ;;  %v1494_v15 = vld [vmem:[%s2865_s30 + $0x48] sm:$0xff] }
  0x2a   : > { %2266 = vmatprep.mubr.msk.f32.mxu0 %vm2609_vm1, %v2608_v1  ;;  %v1514_v16 = vmul.f32 %v2130_v60, %v1494_v15 }
  0x2d   : > { %2267 = vmatmul.mubr.msk.f32.gmra.mrb[12].mxu0 %vm724_vm2, %v709_v17  ;;  %v1495_v17 = vld [vmem:[%s2865_s30 + $0x50] sm:$0xff] }
  0x2e   : > { %2269 = vmatprep.mubr.msk.f32.mxu0 %vm2609_vm1, %v2608_v1  ;;  %v1515_v18 = vmul.f32 %v2130_v60, %v1495_v17 }
  0x31   : > { %2270 = vmatmul.mubr.msk.f32.gmra.mrb[14].mxu0 %vm724_vm2, %v710_v19  ;;  %v1496_v19 = vld [vmem:[%s2865_s30 + $0x58] sm:$0xff] }
  0x32   : > { %2272 = vmatprep.mubr.msk.f32.mxu0 %vm2609_vm1, %v2608_v1  ;;  %v1516_v20 = vmul.f32 %v2130_v60, %v1496_v19 }
  0x35   : > { %2273 = vmatmul.mubr.msk.f32.gmra.mrb[16].mxu0 %vm724_vm2, %v711_v21  ;;  %v1497_v21 = vld [vmem:[%s2865_s30 + $0x60] sm:$0xff] }
  0x36   : > { %2275 = vmatprep.mubr.msk.f32.mxu0 %vm2609_vm1, %v2608_v1  ;;  %v1517_v22 = vmul.f32 %v2130_v60, %v1497_v21 }
  0x39   : > { %2276 = vmatmul.mubr.msk.f32.gmra.mrb[18].mxu0 %vm724_vm2, %v712_v23  ;;  %v2930_v23 = vld [vmem:[%s3171_s7] ss:$0 sm:$0xff] }
  0x3a   : > { %2278 = vmatprep.mubr.msk.f32.mxu0 %vm2609_vm1, %v2608_v1 }
  0x3d   : > { %2279 = vmatmul.mubr.msk.f32.gmra.mrb[20].mxu0 %vm724_vm2, %v713_v25 }
  0x3e   : > { %2281 = vmatprep.mubr.msk.f32.mxu0 %vm2609_vm1, %v2608_v1 }
  0x41   : > { %2282 = vmatmul.mubr.msk.f32.gmra.mrb[22].mxu0 %vm724_vm2, %v714_v27  ;;  %v1299_v27 = vld [vmem:[%s3177_s13] sm:$0xf] }
  0x42   : > { %2284 = vmatprep.mubr.msk.f32.mxu0 %vm2609_vm1, %v2608_v1 }
  0x45   : > { %2285 = vmatmul.mubr.msk.f32.gmra.mrb[24].mxu0 %vm724_vm2, %v715_v29 }
  0x46   : > { %2330 = vmatprep.mubr.msk.f32.mxu0 %vm2609_vm1, %v2608_v1 }
  0x49   : > { %2331 = vmatmul.mubr.msk.f32.vlgmr.msra.gmra.mrb[26].mxu0 %vm724_vm2, %v1106_v32 }
  0x4a   : > { %2411 = vmatpush3.msk.msra.mxu0 %vm764_vm0, %v1518_v34  ;;  %2333 = vmatprep.mubr.msk.f32.mxu0 %vm2609_vm1, %v2608_v1 }
  0x4d   : > { %2334 = vmatmul.mubr.msk.f32.gmra.mrb[28].mxu0 %vm724_vm2, %v1107_v35 }
  0x4e   : > { %2336 = vmatprep.mubr.msk.f32.mxu0 %vm2609_vm1, %v2608_v1 }
  0x51   : > { %2337 = vmatmul.mubr.msk.f32.gmra.mrb[30].mxu0 %vm724_vm2, %v1108_v37 }
  0x52   : > { %2339 = vmatprep.mubr.msk.f32.mxu0 %vm2609_vm1, %v2608_v1 }
  0x55   : > { %2340 = vmatmul.mubr.msk.f32.gmra.mrb[32].mxu0 %vm724_vm2, %v1109_v39 }
  0x56   : > { %2342 = vmatprep.mubr.msk.f32.mxu0 %vm2609_vm1, %v2608_v1 }
  0x59   : > { %2343 = vmatmul.mubr.msk.f32.gmra.mrb[34].mxu0 %vm724_vm2, %v1110_v41 }
  0x5a   : > { %2345 = vmatprep.mubr.msk.f32.mxu0 %vm2609_vm1, %v2608_v1 }
  0x5d   : > { %2346 = vmatmul.mubr.msk.f32.gmra.mrb[36].mxu0 %vm724_vm2, %v1111_v43 }
  0x5e   : > { %2348 = vmatprep.mubr.msk.f32.mxu0 %vm2609_vm1, %v2608_v1 }
  0x61   : > { %2349 = vmatmul.mubr.msk.f32.gmra.mrb[38].mxu0 %vm724_vm2, %v1112_v45 }
  0x62   : > { %2351 = vmatprep.mubr.msk.f32.mxu0 %vm2609_vm1, %v2608_v1 }
  0x65   : > { %2352 = vmatmul.mubr.msk.f32.gmra.mrb[40].mxu0 %vm724_vm2, %v1113_v47 }
  0x66   : > { %2354 = vmatprep.mubr.msk.f32.mxu0 %vm2609_vm1, %v2608_v1 }
  0x69   : > { %2355 = vmatmul.mubr.msk.f32.gmra.mrb[42].mxu0 %vm724_vm2, %v1114_v49 }
  0x6a   : > { %2357 = vmatprep.mubr.msk.f32.mxu0 %vm2609_vm1, %v2608_v1 }
  0x6d   : > { %2358 = vmatmul.mubr.msk.f32.gmra.mrb[44].mxu0 %vm724_vm2, %v1115_v51 }
  0x6e   : > { %2360 = vmatprep.mubr.msk.f32.mxu0 %vm2609_vm1, %v2608_v1 }
  0x71   : > { %2361 = vmatmul.mubr.msk.f32.gmra.mrb[46].mxu0 %vm724_vm2, %v1116_v54 }
  0x72   : > { %2363 = vmatprep.mubr.msk.f32.mxu0 %vm2609_vm1, %v2608_v1 }
  0x75   : > { %2364 = vmatmul.mubr.msk.f32.gmra.mrb[48].mxu0 %vm724_vm2, %v1117_v56 }
  0x76   : > { %2366 = vmatprep.mubr.msk.f32.mxu0 %vm2609_vm1, %v2608_v1 }
  0x79   : > { %2367 = vmatmul.mubr.msk.f32.gmra.mrb[50].mxu0 %vm724_vm2, %v1118_v58 }
  0x7a   : > { %2412 = vmatprep.mubr.msk.f32.mxu0 %vm2609_vm1, %v2608_v1 }
  0x7d   : > { %2413 = vmatmul.mubr.msk.f32.vlgmr.msra.gmra.mrb[52].mxu0 %vm724_vm2, %v1505_v61 }
  0x7e   : > { %2415 = vmatprep.mubr.msk.f32.mxu0 %vm2609_vm1, %v2608_v1 }
  0x81   : > { %2416 = vmatmul.mubr.msk.f32.gmra.mrb[54].mxu0 %vm724_vm2, %v1506_v63 }
  0x82   : > { %2418 = vmatprep.mubr.msk.f32.mxu0 %vm2609_vm1, %v2608_v1 }
  0x85   : > { %2419 = vmatmul.mubr.msk.f32.gmra.mrb[56].mxu0 %vm724_vm2, %v1507_v2 }
  0x86   : > { %2421 = vmatprep.mubr.msk.f32.mxu0 %vm2609_vm1, %v2608_v1 }
  0x89   : > { %2422 = vmatmul.mubr.msk.f32.gmra.mrb[58].mxu0 %vm724_vm2, %v1508_v4 }
  0x8a   : > { %2424 = vmatprep.mubr.msk.f32.mxu0 %vm2609_vm1, %v2608_v1 }
  0x8d   : > { %2425 = vmatmul.mubr.msk.f32.gmra.mrb[60].mxu0 %vm724_vm2, %v1509_v6 }
  0x8e   : > { %2427 = vmatprep.mubr.msk.f32.mxu0 %vm2609_vm1, %v2608_v1 }
  0x91   : > { %2428 = vmatmul.mubr.msk.f32.gmra.mrb[62].mxu0 %vm724_vm2, %v1510_v8 }
  0x92   : > { %2430 = vmatprep.mubr.msk.f32.mxu0 %vm2609_vm1, %v2608_v1 }
  0x95   : > { %2431 = vmatmul.mubr.msk.f32.gmra.mrb[64].mxu0 %vm724_vm2, %v1511_v10 }
  0x96   : > { %2433 = vmatprep.mubr.msk.f32.mxu0 %vm2609_vm1, %v2608_v1 }
  0x99   : > { %2434 = vmatmul.mubr.msk.f32.gmra.mrb[66].mxu0 %vm724_vm2, %v1512_v12 }
  0x9a   : > { %2436 = vmatprep.mubr.msk.f32.mxu0 %vm2609_vm1, %v2608_v1 }
  0x9d   : > { %2437 = vmatmul.mubr.msk.f32.gmra.mrb[68].mxu0 %vm724_vm2, %v1513_v14 }
  0x9e   : > { %2439 = vmatprep.mubr.msk.f32.mxu0 %vm2609_vm1, %v2608_v1 }
  0xa1   : > { %2440 = vmatmul.mubr.msk.f32.gmra.mrb[70].mxu0 %vm724_vm2, %v1514_v16 }
  0xa2   : > { %2442 = vmatprep.mubr.msk.f32.mxu0 %vm2609_vm1, %v2608_v1 }
  0xa5   : > { %2443 = vmatmul.mubr.msk.f32.gmra.mrb[72].mxu0 %vm724_vm2, %v1515_v18 }
  0xa6   : > { %2445 = vmatprep.mubr.msk.f32.mxu0 %vm2609_vm1, %v2608_v1 }
  0xa9   : > { %2446 = vmatmul.mubr.msk.f32.gmra.mrb[74].mxu0 %vm724_vm2, %v1516_v20 }
  0xaa   : > { %2448 = vmatprep.mubr.msk.f32.mxu0 %vm2609_vm1, %v2608_v1 }
  0xad   : > { %2449 = vmatmul.mubr.msk.f32.gmra.mrb[76].mxu0 %vm724_vm2, %v1517_v22 }
  0xe8   : > { %v834_v24 = vpop.f32.mrb[0].mxu0 }
  0xe9   : > { %v835_v25 = vadd.f32 %v2930_v23, %v834_v24  ;;  %v2250_v26 = vpop.f32.mrb[1].mxu0 }
  0xeb   : > { %2290 = vmatmul.mubr.msk.f32.vlgmr.msra.gmra.mrb[0].mxu1 %vm899_vm4, %v835_v25 }
  0xec   : > { %2370 = vmatpush3.msk.msra.mxu1 %vm939_vm3, %v1299_v27  ;;  %v839_v28 = vpop.f32.mrb[2].mxu0  ;;  %2292 = vmatprep.mubr.msk.f32.mxu1 %vm2609_vm1, %v2608_v1 }
  0xed   : > { %v840_v29 = vadd.f32 %v2930_v23, %v839_v28  ;;  %v2253_v30 = vpop.f32.mrb[3].mxu0  ;;  %2451 = vmatprep.subr.mxu1 %v2608_v1 }
  0xef   : > { %2293 = vmatmul.mubr.msk.f32.gmra.mrb[2].mxu1 %vm899_vm4, %v840_v29 }
  0xf0   : > { %v844_v31 = vpop.f32.mrb[4].mxu0  ;;  %2295 = vmatprep.mubr.msk.f32.mxu1 %vm2609_vm1, %v2608_v1 }
  0xf1   : > { %v845_v32 = vadd.f32 %v2930_v23, %v844_v31  ;;  %v2256_v33 = vpop.f32.mrb[5].mxu0 }
  0xf3   : > { %2296 = vmatmul.mubr.msk.f32.gmra.mrb[4].mxu1 %vm899_vm4, %v845_v32 }
  0xf4   : > { %v849_v34 = vpop.f32.mrb[6].mxu0  ;;  %2298 = vmatprep.mubr.msk.f32.mxu1 %vm2609_vm1, %v2608_v1 }
  0xf5   : > { %v850_v35 = vadd.f32 %v2930_v23, %v849_v34  ;;  %v2259_v36 = vpop.f32.mrb[7].mxu0 }
  0xf7   : > { %2299 = vmatmul.mubr.msk.f32.gmra.mrb[6].mxu1 %vm899_vm4, %v850_v35 }
  0xf8   : > { %v854_v37 = vpop.f32.mrb[8].mxu0  ;;  %2301 = vmatprep.mubr.msk.f32.mxu1 %vm2609_vm1, %v2608_v1 }
  0xf9   : > { %v855_v38 = vadd.f32 %v2930_v23, %v854_v37  ;;  %v2262_v39 = vpop.f32.mrb[9].mxu0 }
  0xfb   : > { %2302 = vmatmul.mubr.msk.f32.gmra.mrb[8].mxu1 %vm899_vm4, %v855_v38 }
  0xfc   : > { %v859_v40 = vpop.f32.mrb[10].mxu0  ;;  %2304 = vmatprep.mubr.msk.f32.mxu1 %vm2609_vm1, %v2608_v1 }
  0xfd   : > { %v860_v41 = vadd.f32 %v2930_v23, %v859_v40  ;;  %v2265_v42 = vpop.f32.mrb[11].mxu0 }
  0xfe   : > { %v3050_v42 = vld [vmem:[%s3175_s11] ss:$0 sm:$0xff] }
  0xff   : > { %2305 = vmatmul.mubr.msk.f32.gmra.mrb[10].mxu1 %vm899_vm4, %v860_v41 }
 0x100   : > { %v864_v43 = vpop.f32.mrb[12].mxu0  ;;  %2307 = vmatprep.mubr.msk.f32.mxu1 %vm2609_vm1, %v2608_v1 }
 0x101   : > { %v865_v44 = vadd.f32 %v2930_v23, %v864_v43  ;;  %v2268_v45 = vpop.f32.mrb[13].mxu0 }
 0x103   : > { %2308 = vmatmul.mubr.msk.f32.gmra.mrb[12].mxu1 %vm899_vm4, %v865_v44 }
 0x104   : > { %v869_v46 = vpop.f32.mrb[14].mxu0  ;;  %2310 = vmatprep.mubr.msk.f32.mxu1 %vm2609_vm1, %v2608_v1 }
 0x105   : > { %v870_v47 = vadd.f32 %v2930_v23, %v869_v46  ;;  %v2271_v48 = vpop.f32.mrb[15].mxu0 }
 0x107   : > { %2311 = vmatmul.mubr.msk.f32.gmra.mrb[14].mxu1 %vm899_vm4, %v870_v47 }
 0x108   : > { %v874_v49 = vpop.f32.mrb[16].mxu0  ;;  %2313 = vmatprep.mubr.msk.f32.mxu1 %vm2609_vm1, %v2608_v1 }
 0x109   : > { %v875_v50 = vadd.f32 %v2930_v23, %v874_v49  ;;  %v2274_v51 = vpop.f32.mrb[17].mxu0 }
 0x10b   : > { %2314 = vmatmul.mubr.msk.f32.gmra.mrb[16].mxu1 %vm899_vm4, %v875_v50 }
 0x10c   : > { %v879_v52 = vpop.f32.mrb[18].mxu0  ;;  %2316 = vmatprep.mubr.msk.f32.mxu1 %vm2609_vm1, %v2608_v1 }
 0x10d   : > { %v880_v53 = vadd.f32 %v2930_v23, %v879_v52  ;;  %v2277_v54 = vpop.f32.mrb[19].mxu0 }
 0x10f   : > { %2317 = vmatmul.mubr.msk.f32.gmra.mrb[18].mxu1 %vm899_vm4, %v880_v53 }
 0x110   : > { %v884_v55 = vpop.f32.mrb[20].mxu0  ;;  %2319 = vmatprep.mubr.msk.f32.mxu1 %vm2609_vm1, %v2608_v1 }
 0x111   : > { %v885_v56 = vadd.f32 %v2930_v23, %v884_v55  ;;  %v2280_v57 = vpop.f32.mrb[21].mxu0 }
 0x113   : > { %2320 = vmatmul.mubr.msk.f32.gmra.mrb[20].mxu1 %vm899_vm4, %v885_v56 }
 0x114   : > { %v889_v58 = vpop.f32.mrb[22].mxu0  ;;  %2322 = vmatprep.mubr.msk.f32.mxu1 %vm2609_vm1, %v2608_v1 }
 0x115   : > { %v890_v59 = vadd.f32 %v2930_v23, %v889_v58  ;;  %v2283_v60 = vpop.f32.mrb[23].mxu0 }
 0x117   : > { %2323 = vmatmul.mubr.msk.f32.gmra.mrb[22].mxu1 %vm899_vm4, %v890_v59 }
 0x118   : > { %v894_v61 = vpop.f32.mrb[24].mxu0  ;;  %2325 = vmatprep.mubr.msk.f32.mxu1 %vm2609_vm1, %v2608_v1 }
 0x119   : > { %v895_v62 = vadd.f32 %v2930_v23, %v894_v61  ;;  %v2286_v63 = vpop.f32.mrb[25].mxu0 }
 0x11b   : > { %2326 = vmatmul.mubr.msk.f32.gmra.mrb[24].mxu1 %vm899_vm4, %v895_v62 }
 0x11c   : > { %v1235_v2 = vpop.f32.mrb[26].mxu0  ;;  %2371 = vmatprep.mubr.msk.f32.mxu1 %vm2609_vm1, %v2608_v1 }
 0x11d   : > { %v1236_v3 = vadd.f32 %v2989_v0, %v1235_v2  ;;  %v2332_v4 = vpop.f32.mrb[27].mxu0 }
 0x11f   : > { %2372 = vmatmul.mubr.msk.f32.vlgmr.msra.gmra.mrb[0].mxu1 %vm899_vm4, %v1236_v3 }
 0x120   : > { %2452 = vmatpush3.msk.msra.mxu1 %vm939_vm3, %v1698_v5  ;;  %v1240_v6 = vpop.f32.mrb[28].mxu0  ;;  %2374 = vmatprep.mubr.msk.f32.mxu1 %vm2609_vm1, %v2608_v1 }
 0x121   : > { %v1241_v7 = vadd.f32 %v2989_v0, %v1240_v6  ;;  %v2335_v8 = vpop.f32.mrb[29].mxu0 }
 0x123   : > { %2375 = vmatmul.mubr.msk.f32.gmra.mrb[2].mxu1 %vm899_vm4, %v1241_v7 }
 0x124   : > { %v1245_v9 = vpop.f32.mrb[30].mxu0  ;;  %2377 = vmatprep.mubr.msk.f32.mxu1 %vm2609_vm1, %v2608_v1 }
 0x125   : > { %v1246_v10 = vadd.f32 %v2989_v0, %v1245_v9  ;;  %v2338_v11 = vpop.f32.mrb[31].mxu0 }
 0x127   : > { %2378 = vmatmul.mubr.msk.f32.gmra.mrb[4].mxu1 %vm899_vm4, %v1246_v10 }
 0x128   : > { %v1250_v12 = vpop.f32.mrb[32].mxu0  ;;  %2380 = vmatprep.mubr.msk.f32.mxu1 %vm2609_vm1, %v2608_v1 }
 0x129   : > { %v1251_v13 = vadd.f32 %v2989_v0, %v1250_v12  ;;  %v2341_v14 = vpop.f32.mrb[33].mxu0 }
 0x12b   : > { %2381 = vmatmul.mubr.msk.f32.gmra.mrb[6].mxu1 %vm899_vm4, %v1251_v13 }
 0x12c   : > { %v1255_v15 = vpop.f32.mrb[34].mxu0  ;;  %2383 = vmatprep.mubr.msk.f32.mxu1 %vm2609_vm1, %v2608_v1 }
 0x12d   : > { %v1256_v16 = vadd.f32 %v2989_v0, %v1255_v15  ;;  %v2344_v17 = vpop.f32.mrb[35].mxu0 }
 0x12f   : > { %2384 = vmatmul.mubr.msk.f32.gmra.mrb[8].mxu1 %vm899_vm4, %v1256_v16 }
 0x130   : > { %v1260_v18 = vpop.f32.mrb[36].mxu0  ;;  %2386 = vmatprep.mubr.msk.f32.mxu1 %vm2609_vm1, %v2608_v1 }
 0x131   : > { %v1261_v19 = vadd.f32 %v2989_v0, %v1260_v18  ;;  %v2347_v20 = vpop.f32.mrb[37].mxu0 }
 0x133   : > { %2387 = vmatmul.mubr.msk.f32.gmra.mrb[10].mxu1 %vm899_vm4, %v1261_v19  ;;  %v3108_v19 = vld [vmem:[%s3179_s15] ss:$0 sm:$0xff] }
 0x134   : > { %v1265_v21 = vpop.f32.mrb[38].mxu0  ;;  %2389 = vmatprep.mubr.msk.f32.mxu1 %vm2609_vm1, %v2608_v1 }
 0x135   : > { %v1266_v22 = vadd.f32 %v2989_v0, %v1265_v21  ;;  %v2350_v23 = vpop.f32.mrb[39].mxu0 }
 0x137   : > { %2390 = vmatmul.mubr.msk.f32.gmra.mrb[12].mxu1 %vm899_vm4, %v1266_v22 }
 0x138   : > { %v1270_v24 = vpop.f32.mrb[40].mxu0  ;;  %2392 = vmatprep.mubr.msk.f32.mxu1 %vm2609_vm1, %v2608_v1 }
 0x139   : > { %v1271_v25 = vadd.f32 %v2989_v0, %v1270_v24  ;;  %v2353_v26 = vpop.f32.mrb[41].mxu0 }
 0x13b   : > { %2393 = vmatmul.mubr.msk.f32.gmra.mrb[14].mxu1 %vm899_vm4, %v1271_v25 }
 0x13c   : > { %v1275_v27 = vpop.f32.mrb[42].mxu0  ;;  %2395 = vmatprep.mubr.msk.f32.mxu1 %vm2609_vm1, %v2608_v1 }
 0x13d   : > { %v1276_v28 = vadd.f32 %v2989_v0, %v1275_v27  ;;  %v2356_v29 = vpop.f32.mrb[43].mxu0 }
 0x13f   : > { %2396 = vmatmul.mubr.msk.f32.gmra.mrb[16].mxu1 %vm899_vm4, %v1276_v28 }
 0x140   : > { %v1280_v30 = vpop.f32.mrb[44].mxu0  ;;  %2398 = vmatprep.mubr.msk.f32.mxu1 %vm2609_vm1, %v2608_v1 }
 0x141   : > { %v1281_v31 = vadd.f32 %v2989_v0, %v1280_v30  ;;  %v2359_v32 = vpop.f32.mrb[45].mxu0 }
 0x143   : > { %2399 = vmatmul.mubr.msk.f32.gmra.mrb[18].mxu1 %vm899_vm4, %v1281_v31 }
 0x144   : > { %v1285_v33 = vpop.f32.mrb[46].mxu0  ;;  %2401 = vmatprep.mubr.msk.f32.mxu1 %vm2609_vm1, %v2608_v1 }
 0x145   : > { %v1286_v34 = vadd.f32 %v2989_v0, %v1285_v33  ;;  %v2362_v35 = vpop.f32.mrb[47].mxu0 }
 0x147   : > { %2402 = vmatmul.mubr.msk.f32.gmra.mrb[20].mxu1 %vm899_vm4, %v1286_v34 }
 0x148   : > { %v1290_v36 = vpop.f32.mrb[48].mxu0  ;;  %2404 = vmatprep.mubr.msk.f32.mxu1 %vm2609_vm1, %v2608_v1 }
 0x149   : > { %v1291_v37 = vadd.f32 %v2989_v0, %v1290_v36  ;;  %v2365_v38 = vpop.f32.mrb[49].mxu0 }
 0x14b   : > { %2405 = vmatmul.mubr.msk.f32.gmra.mrb[22].mxu1 %vm899_vm4, %v1291_v37 }
 0x14c   : > { %v1295_v39 = vpop.f32.mrb[50].mxu0  ;;  %2407 = vmatprep.mubr.msk.f32.mxu1 %vm2609_vm1, %v2608_v1 }
 0x14d   : > { %v1296_v40 = vadd.f32 %v2989_v0, %v1295_v39  ;;  %v2368_v41 = vpop.f32.mrb[51].mxu0 }
 0x14f   : > { %2408 = vmatmul.mubr.msk.f32.gmra.mrb[24].mxu1 %vm899_vm4, %v1296_v40 }
 0x150   : > { %v1634_v43 = vpop.f32.mrb[52].mxu0  ;;  %2453 = vmatprep.mubr.msk.f32.mxu1 %vm2609_vm1, %v2608_v1 }
 0x151   : > { %v1635_v44 = vadd.f32 %v3050_v42, %v1634_v43  ;;  %v2414_v45 = vpop.f32.mrb[53].mxu0 }
 0x153   : > { %2454 = vmatmul.mubr.msk.f32.vlgmr.msra.gmra.mrb[0].mxu1 %vm899_vm4, %v1635_v44 }
 0x154   : > { %v1639_v46 = vpop.f32.mrb[54].mxu0  ;;  %2456 = vmatprep.mubr.msk.f32.mxu1 %vm2609_vm1, %v2608_v1 }
 0x155   : > { %v1640_v47 = vadd.f32 %v3050_v42, %v1639_v46  ;;  %v2417_v48 = vpop.f32.mrb[55].mxu0 }
 0x157   : > { %2457 = vmatmul.mubr.msk.f32.gmra.mrb[2].mxu1 %vm899_vm4, %v1640_v47 }
 0x158   : > { %v1644_v49 = vpop.f32.mrb[56].mxu0  ;;  %2459 = vmatprep.mubr.msk.f32.mxu1 %vm2609_vm1, %v2608_v1 }
 0x159   : > { %v1645_v50 = vadd.f32 %v3050_v42, %v1644_v49  ;;  %v2420_v51 = vpop.f32.mrb[57].mxu0 }
 0x15b   : > { %2460 = vmatmul.mubr.msk.f32.gmra.mrb[4].mxu1 %vm899_vm4, %v1645_v50 }
 0x15c   : > { %v1649_v52 = vpop.f32.mrb[58].mxu0  ;;  %2462 = vmatprep.mubr.msk.f32.mxu1 %vm2609_vm1, %v2608_v1 }
 0x15d   : > { %v1650_v53 = vadd.f32 %v3050_v42, %v1649_v52  ;;  %v2423_v54 = vpop.f32.mrb[59].mxu0 }
 0x15f   : > { %2463 = vmatmul.mubr.msk.f32.gmra.mrb[6].mxu1 %vm899_vm4, %v1650_v53 }
 0x160   : > { %v1654_v55 = vpop.f32.mrb[60].mxu0  ;;  %2465 = vmatprep.mubr.msk.f32.mxu1 %vm2609_vm1, %v2608_v1 }
 0x161   : > { %v1655_v56 = vadd.f32 %v3050_v42, %v1654_v55  ;;  %v2426_v57 = vpop.f32.mrb[61].mxu0 }
 0x163   : > { %2466 = vmatmul.mubr.msk.f32.gmra.mrb[8].mxu1 %vm899_vm4, %v1655_v56 }
 0x164   : > { %v1659_v58 = vpop.f32.mrb[62].mxu0  ;;  %2468 = vmatprep.mubr.msk.f32.mxu1 %vm2609_vm1, %v2608_v1 }
 0x165   : > { %v1660_v59 = vadd.f32 %v3050_v42, %v1659_v58  ;;  %v2429_v60 = vpop.f32.mrb[63].mxu0 }
 0x167   : > { %2469 = vmatmul.mubr.msk.f32.gmra.mrb[10].mxu1 %vm899_vm4, %v1660_v59 }
 0x168   : > { %v1664_v61 = vpop.f32.mrb[64].mxu0  ;;  %2471 = vmatprep.mubr.msk.f32.mxu1 %vm2609_vm1, %v2608_v1 }
 0x169   : > { %v1665_v62 = vadd.f32 %v3050_v42, %v1664_v61  ;;  %v2432_v63 = vpop.f32.mrb[65].mxu0 }
 0x16b   : > { %2472 = vmatmul.mubr.msk.f32.gmra.mrb[12].mxu1 %vm899_vm4, %v1665_v62 }
 0x16c   : > { %v1669_v0 = vpop.f32.mrb[66].mxu0  ;;  %2474 = vmatprep.mubr.msk.f32.mxu1 %vm2609_vm1, %v2608_v1 }
 0x16d   : > { %v1670_v2 = vadd.f32 %v3050_v42, %v1669_v0  ;;  %v2435_v3 = vpop.f32.mrb[67].mxu0 }
 0x16f   : > { %2475 = vmatmul.mubr.msk.f32.gmra.mrb[14].mxu1 %vm899_vm4, %v1670_v2 }
 0x170   : > { %v1674_v4 = vpop.f32.mrb[68].mxu0  ;;  %2477 = vmatprep.mubr.msk.f32.mxu1 %vm2609_vm1, %v2608_v1 }
 0x171   : > { %v1675_v5 = vadd.f32 %v3050_v42, %v1674_v4  ;;  %v2438_v6 = vpop.f32.mrb[69].mxu0 }
 0x173   : > { %2478 = vmatmul.mubr.msk.f32.gmra.mrb[16].mxu1 %vm899_vm4, %v1675_v5 }
 0x174   : > { %v1679_v7 = vpop.f32.mrb[70].mxu0  ;;  %2480 = vmatprep.mubr.msk.f32.mxu1 %vm2609_vm1, %v2608_v1 }
 0x175   : > { %v1680_v8 = vadd.f32 %v3050_v42, %v1679_v7  ;;  %v2441_v9 = vpop.f32.mrb[71].mxu0 }
 0x177   : > { %2481 = vmatmul.mubr.msk.f32.gmra.mrb[18].mxu1 %vm899_vm4, %v1680_v8 }
 0x178   : > { %v1684_v10 = vpop.f32.mrb[72].mxu0  ;;  %2483 = vmatprep.mubr.msk.f32.mxu1 %vm2609_vm1, %v2608_v1 }
 0x179   : > { %v1685_v11 = vadd.f32 %v3050_v42, %v1684_v10  ;;  %v2444_v12 = vpop.f32.mrb[73].mxu0 }
 0x17b   : > { %2484 = vmatmul.mubr.msk.f32.gmra.mrb[20].mxu1 %vm899_vm4, %v1685_v11 }
 0x17c   : > { %v1689_v13 = vpop.f32.mrb[74].mxu0  ;;  %2486 = vmatprep.mubr.msk.f32.mxu1 %vm2609_vm1, %v2608_v1 }
 0x17d   : > { %v1690_v14 = vadd.f32 %v3050_v42, %v1689_v13  ;;  %v2447_v15 = vpop.f32.mrb[75].mxu0 }
 0x17f   : > { %2487 = vmatmul.mubr.msk.f32.gmra.mrb[22].mxu1 %vm899_vm4, %v1690_v14 }
 0x180   : > { %v1694_v16 = vpop.f32.mrb[76].mxu0  ;;  %2489 = vmatprep.mubr.msk.f32.mxu1 %vm2609_vm1, %v2608_v1 }
 0x181   : > { %v1695_v17 = vadd.f32 %v3050_v42, %v1694_v16  ;;  %v2450_v18 = vpop.f32.mrb[77].mxu0 }
 0x183   : > { %2490 = vmatmul.mubr.msk.f32.gmra.mrb[24].mxu1 %vm899_vm4, %v1695_v17 }
 0x226   : > { %v1807_v20 = vpop.f32.mrb[0].mxu1 }
 0x227   : > { %v2492_v21 = vadd.f32 %v3108_v19, %v1807_v20  ;;  %v2455_v22 = vpop.f32.mrb[1].mxu1 }
 0x229   : > { %v1884_v1 = vmax.f32 %v2492_v21, 0.0 }
 0x22a   : > { %v1812_v23 = vpop.f32.mrb[2].mxu1 }
 0x22b   : > { %1897 = vst.msk [vmem:[%s3115_s20] sm:$0xff] %vm899_vm4, %v1884_v1  ;;  %v2493_v24 = vadd.f32 %v3108_v19, %v1812_v23  ;;  %v2458_v25 = vpop.f32.mrb[3].mxu1 }
 0x22d   : > { %v1885_v26 = vmax.f32 %v2493_v24, 0.0 }
 0x22e   : > { %v1817_v27 = vpop.f32.mrb[4].mxu1 }
 0x22f   : > { %1898 = vst.msk [vmem:[%s3115_s20 + $0x8] sm:$0xff] %vm899_vm4, %v1885_v26  ;;  %v2494_v28 = vadd.f32 %v3108_v19, %v1817_v27  ;;  %v2461_v29 = vpop.f32.mrb[5].mxu1 }
 0x231   : > { %v1886_v30 = vmax.f32 %v2494_v28, 0.0 }
 0x232   : > { %v1822_v31 = vpop.f32.mrb[6].mxu1 }
 0x233   : > { %1899 = vst.msk [vmem:[%s3115_s20 + $0x10] sm:$0xff] %vm899_vm4, %v1886_v30  ;;  %v2495_v32 = vadd.f32 %v3108_v19, %v1822_v31  ;;  %v2464_v33 = vpop.f32.mrb[7].mxu1 }
 0x235   : > { %v1887_v34 = vmax.f32 %v2495_v32, 0.0 }
 0x236   : > { %v1827_v35 = vpop.f32.mrb[8].mxu1 }
 0x237   : > { %1900 = vst.msk [vmem:[%s3115_s20 + $0x18] sm:$0xff] %vm899_vm4, %v1887_v34  ;;  %v2496_v36 = vadd.f32 %v3108_v19, %v1827_v35  ;;  %v2467_v37 = vpop.f32.mrb[9].mxu1 }
 0x239   : > { %v1888_v38 = vmax.f32 %v2496_v36, 0.0 }
 0x23a   : > { %v1832_v39 = vpop.f32.mrb[10].mxu1 }
 0x23b   : > { %1901 = vst.msk [vmem:[%s3115_s20 + $0x20] sm:$0xff] %vm899_vm4, %v1888_v38  ;;  %v2497_v40 = vadd.f32 %v3108_v19, %v1832_v39  ;;  %v2470_v41 = vpop.f32.mrb[11].mxu1 }
 0x23d   : > { %v1889_v42 = vmax.f32 %v2497_v40, 0.0 }
 0x23e   : > { %v1837_v43 = vpop.f32.mrb[12].mxu1 }
 0x23f   : > { %1902 = vst.msk [vmem:[%s3115_s20 + $0x28] sm:$0xff] %vm899_vm4, %v1889_v42  ;;  %v2498_v44 = vadd.f32 %v3108_v19, %v1837_v43  ;;  %v2473_v45 = vpop.f32.mrb[13].mxu1 }
 0x241   : > { %v1890_v46 = vmax.f32 %v2498_v44, 0.0 }
 0x242   : > { %v1842_v47 = vpop.f32.mrb[14].mxu1 }
 0x243   : > { %1903 = vst.msk [vmem:[%s3115_s20 + $0x30] sm:$0xff] %vm899_vm4, %v1890_v46  ;;  %v2499_v48 = vadd.f32 %v3108_v19, %v1842_v47  ;;  %v2476_v49 = vpop.f32.mrb[15].mxu1 }
 0x245   : > { %v1891_v50 = vmax.f32 %v2499_v48, 0.0 }
 0x246   : > { %v1847_v51 = vpop.f32.mrb[16].mxu1 }
 0x247   : > { %1904 = vst.msk [vmem:[%s3115_s20 + $0x38] sm:$0xff] %vm899_vm4, %v1891_v50  ;;  %v2500_v52 = vadd.f32 %v3108_v19, %v1847_v51  ;;  %v2479_v53 = vpop.f32.mrb[17].mxu1 }
 0x249   : > { %v1892_v54 = vmax.f32 %v2500_v52, 0.0 }
 0x24a   : > { %v1852_v55 = vpop.f32.mrb[18].mxu1 }
 0x24b   : > { %1905 = vst.msk [vmem:[%s3115_s20 + $0x40] sm:$0xff] %vm899_vm4, %v1892_v54  ;;  %v2501_v56 = vadd.f32 %v3108_v19, %v1852_v55  ;;  %v2482_v57 = vpop.f32.mrb[19].mxu1 }
 0x24d   : > { %v1893_v58 = vmax.f32 %v2501_v56, 0.0 }
 0x24e   : > { %v1857_v59 = vpop.f32.mrb[20].mxu1 }
 0x24f   : > { %1906 = vst.msk [vmem:[%s3115_s20 + $0x48] sm:$0xff] %vm899_vm4, %v1893_v58  ;;  %v2502_v60 = vadd.f32 %v3108_v19, %v1857_v59  ;;  %v2485_v61 = vpop.f32.mrb[21].mxu1 }
 0x251   : > { %v1894_v62 = vmax.f32 %v2502_v60, 0.0 }
 0x252   : > { %v1862_v63 = vpop.f32.mrb[22].mxu1 }
 0x253   : > { %1907 = vst.msk [vmem:[%s3115_s20 + $0x50] sm:$0xff] %vm899_vm4, %v1894_v62  ;;  %v2503_v0 = vadd.f32 %v3108_v19, %v1862_v63  ;;  %v2488_v2 = vpop.f32.mrb[23].mxu1 }
 0x255   : > { %v1895_v3 = vmax.f32 %v2503_v0, 0.0 }
 0x256   : > { %v1867_v4 = vpop.f32.mrb[24].mxu1 }
 0x257   : > { %1908 = vst.msk [vmem:[%s3115_s20 + $0x58] sm:$0xff] %vm899_vm4, %v1895_v3  ;;  %v2504_v5 = vadd.f32 %v3108_v19, %v1867_v4  ;;  %v2491_v6 = vpop.f32.mrb[25].mxu1 }
 0x259   : > { %v1896_v7 = vmax.f32 %v2504_v5, 0.0 }
 0x25b   : > { %1909 = vst.msk [vmem:[%s3115_s20 + $0x60] sm:$0xff] %vm899_vm4, %v1896_v7 }
 0x25c PF: > { %s26_s23 = sadd.s32 1, %s2606_s23   ;;  %s3183_s21 = smov %s2602_s22 }
 0x25d   : > { %p23_p5 = scmp.ge.s32.totalorder %s26_s23, 4   ;;  %s3184_s22 = smov %s3186_s24 }
 0x25f   :  { %25 = sbr.rel (!%p23_p5) target bundleno = 2 (0x2), region = 129 }

</bundles_post_ra>
